<compile_context>
chip_gen: v7x
topology: tpu7x:2x2x1
jax: 0.10.0
libtpu: 0.0.40
codegen_flags: <defaults>
</compile_context>

<pallas_src>
import functools

import numpy as np
import jax
import jax.numpy as jnp
from jax.experimental import pallas as pl
from jax.experimental.pallas import tpu as pltpu


# ----------------------------- Pallas kernel ------------------------------ #

def _cnn_kernel(x_ref, w1_ref, b1_ref, w2_ref, b2_ref, w3_ref, b3_ref,
                fcw_ref, fcb_ref, o_ref, *, T):
    """One grid step: Bblk samples flattened to (M = Bblk*T, C) activations."""
    h0 = x_ref[...]                        # (M, N) float32
    M = h0.shape[0]
    Bblk = M // T

    # (row % T) boundary masks: zero the shifted rows at each sample's edges so
    # the rolls never leak across sample boundaries within the batch block.
    t_idx = jax.lax.broadcasted_iota(jnp.int32, (M, 1), 0) % T
    is_first = t_idx == 0
    is_last = t_idx == (T - 1)

    def shifted(h):
        # h[t-1] / h[t+1] via XLU rolls, masked at sample boundaries (f32).
        zero = jnp.zeros((), dtype=h.dtype)
        h_prev = jnp.where(is_first, zero, pltpu.roll(h, 1, axis=0))
        h_next = jnp.where(is_last, zero, pltpu.roll(h, M - 1, axis=0))
        return h_prev, h_next

    def conv_fused(h, w_ref, b_ref):
        # Small Cin: one fused (M, 3*Cin) @ (3*Cin, Cout) MXU dot.
        # Operands are cast to bf16 BEFORE the concat so the hcat buffer is
        # half-size and no post-concat cast pass is needed.
        h_prev, h_next = shifted(h)
        hcat = jnp.concatenate([h_prev.astype(jnp.bfloat16),
                                h.astype(jnp.bfloat16),
                                h_next.astype(jnp.bfloat16)], axis=-1)
        y = jnp.dot(hcat, w_ref[...], preferred_element_type=jnp.float32)
        return jnp.maximum(y + b_ref[...], 0.0)                     # ReLU

    def conv_split(h, w_ref, b_ref):
        # Wide Cin (conv3): three accumulating MXU dots — no hcat buffer, so
        # no extra vst/vld traffic on the narrow vector-store slot.
        h_prev, h_next = shifted(h)
        y = jnp.dot(h.astype(jnp.bfloat16), w_ref[1],               # x[t]   tap
                    preferred_element_type=jnp.float32)
        y += jnp.dot(h_prev.astype(jnp.bfloat16), w_ref[0],         # x[t-1] tap
                     preferred_element_type=jnp.float32)
        y += jnp.dot(h_next.astype(jnp.bfloat16), w_ref[2],         # x[t+1] tap
                     preferred_element_type=jnp.float32)
        return jnp.maximum(y + b_ref[...], 0.0)                     # ReLU

    h1 = conv_fused(h0, w1_ref, b1_ref)       # (M, C0)
    h2 = conv_fused(h1, w2_ref, b2_ref)       # (M, C1)
    h3 = conv_split(h2, w3_ref, b3_ref)       # (M, C2)

    # Epilogue on the MXU: apply the FC BEFORE pooling — (M, C2) @ (C2, O),
    # then a per-sample sum over T and a single /T.  AdaptiveAvgPool1d(1) and
    # the FC commute; dropout == identity in eval mode.
    y = jnp.dot(h3.astype(jnp.bfloat16), fcw_ref[...],
                preferred_element_type=jnp.float32)                 # (M, O)
    out = jnp.sum(y.reshape(Bblk, T, -1), axis=1) * (1.0 / T)       # (Bblk, O)
    o_ref[...] = (out + fcb_ref[...]).astype(o_ref.dtype)


# ------------------------------ host wrapper ------------------------------- #

def _num_tensorcores() -> int:
    """One grid block per TensorCore: 1 on v5e/v6e, 2 on dual-TC parts (v7x)."""
    try:
        info = pltpu.get_tpu_info()
        for name in ("num_cores", "core_count", "num_tensorcores",
                     "tensorcore_count"):
            v = getattr(info, name, None)
            if isinstance(v, int) and v > 0:
                return v
    except Exception:
        pass
    try:
        v = getattr(jax.devices()[0], "num_cores", None)
        if isinstance(v, int) and v > 0:
            return v
    except Exception:
        pass
    return 1


def cnn_forward_pallas(x, kernel_params, output_dim):
    """x: (B, T, N) float32.  Returns (B, output_dim) float32."""
    B, T, N = x.shape
    (w1, b1, w2, b2, w3, b3, fcw, fcb) = kernel_params

    # One block per TensorCore; cap rows/block so intermediates (~3 KB/row
    # peak during layer 3) stay well inside v7x's 32 MiB scoped VMEM default.
    MAX_ROWS_PER_BLOCK = 4096
    n_blocks = max(1, _num_tensorcores(), pl.cdiv(B * T, MAX_ROWS_PER_BLOCK))
    n_blocks = min(n_blocks, B)
    Bblk = pl.cdiv(B, n_blocks)
    if n_blocks > 1 and Bblk % 8 != 0:
        Bblk = ((Bblk + 7) // 8) * 8          # keep blocks sublane-aligned
    n_blocks = pl.cdiv(B, Bblk)
    if n_blocks == 1:
        Bblk = B                              # block == full array, no padding
    B_pad = n_blocks * Bblk
    if B_pad != B:
        x = jnp.concatenate([x, jnp.zeros((B_pad - B, T, N), x.dtype)], axis=0)

    x_flat = x.reshape(B_pad * T, N)          # time on sublanes, N on lanes
    M = Bblk * T

    # Weights use a constant index_map so they are staged once per buffer.
    full = lambda arr: pl.BlockSpec(arr.shape, lambda b: (0,) * arr.ndim)

    # Advisory cost hint so XLA overlaps this µs-scale call with other work.
    C0, C1, C2 = w1.shape[1], w2.shape[1], fcw.shape[0]
    flops = 2 * B_pad * T * (3 * N * C0 + 3 * C0 * C1 + 3 * C1 * C2
                             + C2 * output_dim)
    bytes_accessed = int(
        x_flat.size * 4
        + sum(int(a.size) * a.dtype.itemsize
              for a in (w1, b1, w2, b2, w3, b3, fcw, fcb))
        + B_pad * output_dim * 4)
    cost = pl.CostEstimate(flops=int(flops), transcendentals=0,
                           bytes_accessed=bytes_accessed)

    out = pl.pallas_call(
        functools.partial(_cnn_kernel, T=T),
        out_shape=jax.ShapeDtypeStruct((B_pad, output_dim), jnp.float32),
        grid_spec=pltpu.PrefetchScalarGridSpec(
            num_scalar_prefetch=0,
            grid=(n_blocks,),
            in_specs=[
                pl.BlockSpec((M, N), lambda b: (b, 0)),   # x, one batch block
                full(w1), full(b1),                       # conv1 (BN-folded, taps fused)
                full(w2), full(b2),                       # conv2
                full(w3), full(b3),                       # conv3 (taps split, 3 dots)
                full(fcw), full(fcb),                     # fc
            ],
            out_specs=pl.BlockSpec((Bblk, output_dim), lambda b: (b, 0)),
        ),
        compiler_params=pltpu.CompilerParams(
            dimension_semantics=("parallel",)),
        cost_estimate=cost,
    )(x_flat, w1, b1, w2, b2, w3, b3, fcw, fcb)
    return out[:B]


# ------------------------- parameter construction ------------------------- #

def init_raw_params(key, n_neurons, n_filters, kernel_size, output_dim):
    """Deterministic Kaiming-style init matching the PyTorch module's shapes."""
    k1, k2, k3, k4 = jax.random.split(key, 4)

    def conv_w(k, cout, cin):
        std = np.sqrt(2.0 / (cout * kernel_size))      # kaiming, fan_out, relu
        return std * jax.random.normal(k, (cout, cin, kernel_size), jnp.float32)

    return {
        "w1": conv_w(k1, n_filters[0], n_neurons),
        "b1": jnp.zeros((n_filters[0],), jnp.float32),
        "w2": conv_w(k2, n_filters[1], n_filters[0]),
        "b2": jnp.zeros((n_filters[1],), jnp.float32),
        "w3": conv_w(k3, n_filters[2], n_filters[1]),
        "b3": jnp.zeros((n_filters[2],), jnp.float32),
        "fc_w": np.sqrt(2.0 / output_dim)
                * jax.random.normal(k4, (output_dim, n_filters[2]), jnp.float32),
        "fc_b": jnp.zeros((output_dim,), jnp.float32),
    }


def fold_params_for_kernel(raw, kernel_size=3, eps=1e-5):
    """Fold eval-mode BN into the conv taps.

    NOTE: the scalar bn_scale fold below is ONLY valid for freshly-initialized
    BatchNorm (mean=0, var=1, gamma=1, beta=0).  A trained checkpoint requires
    a per-channel fold of each Cout column and bias.
    conv1/conv2: taps concatenated into one (3*Cin, Cout) bf16 matrix.
    conv3:       taps kept separate as a (3, Cin, Cout) bf16 stack.
    fc:          pre-transposed to (C2, O) bf16 for the MXU epilogue.
    """
    assert kernel_size == 3, "kernel hardcodes K=3 / shift-by-1 'same' padding"
    bn_scale = 1.0 / np.sqrt(1.0 + eps)

    def fold_cat(w, b):
        cout = w.shape[0]
        w_taps = jnp.transpose(w, (2, 1, 0)) * bn_scale             # (K, Cin, Cout)
        w_cat = w_taps.reshape(-1, cout).astype(jnp.bfloat16)       # (K*Cin, Cout)
        b_eff = (b * bn_scale).reshape(1, -1).astype(jnp.float32)   # (1, Cout)
        return w_cat, b_eff

    def fold_split(w, b):
        w_taps = (jnp.transpose(w, (2, 1, 0)) * bn_scale).astype(jnp.bfloat16)
        b_eff = (b * bn_scale).reshape(1, -1).astype(jnp.float32)
        return w_taps, b_eff                                        # (K, Cin, Cout)

    w1, b1 = fold_cat(raw["w1"], raw["b1"])
    w2, b2 = fold_cat(raw["w2"], raw["b2"])
    w3, b3 = fold_split(raw["w3"], raw["b3"])
    fcw = jnp.transpose(raw["fc_w"]).astype(jnp.bfloat16)           # (C2, O)
    fcb = raw["fc_b"].reshape(1, -1).astype(jnp.float32)            # (1, O)
    return (w1, b1, w2, b2, w3, b3, fcw, fcb)


# ------------------------- pure-JAX reference ------------------------------ #

def reference_forward(x, raw, eps=1e-5):
    """Mirrors CNNModel.forward (eval mode) in f32 using lax.conv, NCW layout."""
    bn_scale = 1.0 / np.sqrt(1.0 + eps)
    h = jnp.transpose(x, (0, 2, 1))                      # permute -> (B, C, T)
    for w, b in ((raw["w1"], raw["b1"]),
                 (raw["w2"], raw["b2"]),
                 (raw["w3"], raw["b3"])):
        h = jax.lax.conv_general_dilated(
            h, w, window_strides=(1,), padding=[(1, 1)],
            dimension_numbers=("NCH", "OIH", "NCH"))
        h = (h + b[None, :, None]) * bn_scale
        h = jnp.maximum(h, 0.0)
    pooled = jnp.mean(h, axis=-1)                        # global avg pool
    return pooled @ raw["fc_w"].T + raw["fc_b"]          # dropout == identity


# --------------------------------- main ------------------------------------ #

if __name__ == "__main__":
    B = 32                    # exercises batch-blocking logic
    window_size = 16          # T
    n_neurons = 8             # N
    n_filters = [64, 128, 256]
    kernel_size = 3
    output_dim = 2

    key = jax.random.PRNGKey(0)
    kx, kp = jax.random.split(key)
    x = jax.random.normal(kx, (B, window_size, n_neurons), jnp.float32)

    raw = init_raw_params(kp, n_neurons, n_filters, kernel_size, output_dim)
    kernel_params = fold_params_for_kernel(raw, kernel_size)

    out = jax.block_until_ready(cnn_forward_pallas(x, kernel_params, output_dim))
    ref = jax.block_until_ready(reference_forward(x, raw))

    # bf16 MXU operands (f32 accumulation) vs f32 reference: allow a few
    # percent of the O(1..10) output scale.
    np.testing.assert_allclose(np.asarray(out), np.asarray(ref),
                               rtol=5e-2, atol=1e-1)
    print("KERNEL_OK")
</pallas_src>

<mosaic_0001>
module attributes {stable_mosaic.version = 11 : i64} {
  func.func @_cnn_kernel(%arg0: i32, %arg1: memref<512x8xf32, #tpu.memory_space<vmem>>, %arg2: memref<24x64xbf16, #tpu.memory_space<vmem>>, %arg3: memref<1x64xf32, #tpu.memory_space<vmem>>, %arg4: memref<192x128xbf16, #tpu.memory_space<vmem>>, %arg5: memref<1x128xf32, #tpu.memory_space<vmem>>, %arg6: memref<3x128x256xbf16, #tpu.memory_space<vmem>>, %arg7: memref<1x256xf32, #tpu.memory_space<vmem>>, %arg8: memref<256x2xbf16, #tpu.memory_space<vmem>>, %arg9: memref<1x2xf32, #tpu.memory_space<vmem>>, %arg10: memref<32x2xf32, #tpu.memory_space<vmem>>) attributes {dimension_semantics = [#tpu.dimension_semantics<parallel>], iteration_bounds = array<i64: 1>, scalar_prefetch = 0 : i64, scratch_operands = 0 : i64, tpu.core_type = #tpu.core_type<tc>, window_params = [{transform_indices = @transform_0, window_bounds = array<i64: 512, 8>}, {pipeline_mode = #tpu.pipeline_mode<synchronous>, transform_indices = @transform_1, window_bounds = array<i64: 24, 64>}, {pipeline_mode = #tpu.pipeline_mode<synchronous>, transform_indices = @transform_2, window_bounds = array<i64: 1, 64>}, {pipeline_mode = #tpu.pipeline_mode<synchronous>, transform_indices = @transform_3, window_bounds = array<i64: 192, 128>}, {pipeline_mode = #tpu.pipeline_mode<synchronous>, transform_indices = @transform_4, window_bounds = array<i64: 1, 128>}, {pipeline_mode = #tpu.pipeline_mode<synchronous>, transform_indices = @transform_5, window_bounds = array<i64: 3, 128, 256>}, {pipeline_mode = #tpu.pipeline_mode<synchronous>, transform_indices = @transform_6, window_bounds = array<i64: 1, 256>}, {pipeline_mode = #tpu.pipeline_mode<synchronous>, transform_indices = @transform_7, window_bounds = array<i64: 256, 2>}, {pipeline_mode = #tpu.pipeline_mode<synchronous>, transform_indices = @transform_8, window_bounds = array<i64: 1, 2>}, {transform_indices = @transform_9, window_bounds = array<i64: 32, 2>}]} {
    %c0 = arith.constant 0 : index
    %c0_0 = arith.constant 0 : index
    %0 = vector.load %arg1[%c0, %c0_0] : memref<512x8xf32, #tpu.memory_space<vmem>>, vector<512x8xf32>
    %1 = tpu.iota {dimensions = array<i32: 0>} : vector<512x1xi32>
    %c16_i32 = arith.constant 16 : i32
    %c0_i32 = arith.constant 0 : i32
    %2 = arith.cmpi eq, %c16_i32, %c0_i32 : i32
    %c1_i32 = arith.constant 1 : i32
    %3 = arith.select %2, %c1_i32, %c16_i32 : i32
    %4 = vector.broadcast %3 : i32 to vector<512x1xi32>
    %5 = arith.remsi %1, %4 : vector<512x1xi32>
    %c0_i32_1 = arith.constant 0 : i32
    %6 = vector.broadcast %c0_i32_1 : i32 to vector<512x1xi32>
    %7 = arith.cmpi ne, %5, %6 : vector<512x1xi32>
    %c0_i32_2 = arith.constant 0 : i32
    %8 = vector.broadcast %c0_i32_2 : i32 to vector<512x1xi32>
    %9 = arith.cmpi slt, %5, %8 : vector<512x1xi32>
    %c0_i32_3 = arith.constant 0 : i32
    %10 = arith.cmpi slt, %3, %c0_i32_3 : i32
    %11 = vector.broadcast %10 : i1 to vector<512x1xi1>
    %12 = vector.broadcast %11 : vector<512x1xi1> to vector<512x1xi1>
    %13 = arith.xori %9, %12 : vector<512x1xi1>
    %14 = arith.andi %13, %7 : vector<512x1xi1>
    %15 = vector.broadcast %3 : i32 to vector<512x1xi32>
    %16 = arith.addi %5, %15 : vector<512x1xi32>
    %17 = arith.select %14, %16, %5 : vector<512x1xi1>, vector<512x1xi32>
    %c0_i32_4 = arith.constant 0 : i32
    %18 = vector.broadcast %c0_i32_4 : i32 to vector<512x1xi32>
    %19 = arith.cmpi eq, %17, %18 : vector<512x1xi32>
    %c15_i32 = arith.constant 15 : i32
    %20 = vector.broadcast %c15_i32 : i32 to vector<512x1xi32>
    %21 = arith.cmpi eq, %17, %20 : vector<512x1xi32>
    %c1_i32_5 = arith.constant 1 : i32
    %22 = tpu.dynamic_rotate %0 by %c1_i32_5 dim 0 : vector<512x8xf32>, i32 -> vector<512x8xf32>
    %cst = arith.constant 0.000000e+00 : f32
    %23 = vector.shape_cast %19 : vector<512x1xi1> to vector<512x1xi1>
    %24 = vector.broadcast %23 : vector<512x1xi1> to vector<512x8xi1>
    %25 = vector.broadcast %cst : f32 to vector<512x8xf32>
    %26 = arith.select %24, %25, %22 : vector<512x8xi1>, vector<512x8xf32>
    %c511_i32 = arith.constant 511 : i32
    %27 = tpu.dynamic_rotate %0 by %c511_i32 dim 0 : vector<512x8xf32>, i32 -> vector<512x8xf32>
    %cst_6 = arith.constant 0.000000e+00 : f32
    %28 = vector.shape_cast %21 : vector<512x1xi1> to vector<512x1xi1>
    %29 = vector.broadcast %28 : vector<512x1xi1> to vector<512x8xi1>
    %30 = vector.broadcast %cst_6 : f32 to vector<512x8xf32>
    %31 = arith.select %29, %30, %27 : vector<512x8xi1>, vector<512x8xf32>
    %32 = arith.truncf %26 : vector<512x8xf32> to vector<512x8xbf16>
    %33 = arith.truncf %0 : vector<512x8xf32> to vector<512x8xbf16>
    %34 = arith.truncf %31 : vector<512x8xf32> to vector<512x8xbf16>
    %35 = tpu.concatenate %32, %33, %34 in 1 : vector<512x8xbf16>, vector<512x8xbf16>, vector<512x8xbf16> -> vector<512x24xbf16>
    %c0_7 = arith.constant 0 : index
    %c0_8 = arith.constant 0 : index
    %36 = vector.load %arg2[%c0_7, %c0_8] : memref<24x64xbf16, #tpu.memory_space<vmem>>, vector<24x64xbf16>
    %cst_9 = arith.constant dense<0.000000e+00> : vector<512x64xf32>
    %37 = tpu.matmul %35, %36, %cst_9 {dimension_numbers = #tpu.dot_dimension_numbers<[1], [0], [0], [1], [0, 0, 1, 1], [], []>} : vector<512x24xbf16>, vector<24x64xbf16>, vector<512x64xf32> -> vector<512x64xf32>
    %c0_10 = arith.constant 0 : index
    %c0_11 = arith.constant 0 : index
    %38 = vector.load %arg3[%c0_10, %c0_11] : memref<1x64xf32, #tpu.memory_space<vmem>>, vector<1x64xf32>
    %39 = vector.broadcast %38 : vector<1x64xf32> to vector<512x64xf32>
    %40 = arith.addf %37, %39 : vector<512x64xf32>
    %cst_12 = arith.constant 0.000000e+00 : f32
    %41 = vector.broadcast %cst_12 : f32 to vector<512x64xf32>
    %42 = arith.maximumf %40, %41 : vector<512x64xf32>
    %c1_i32_13 = arith.constant 1 : i32
    %43 = tpu.dynamic_rotate %42 by %c1_i32_13 dim 0 : vector<512x64xf32>, i32 -> vector<512x64xf32>
    %cst_14 = arith.constant 0.000000e+00 : f32
    %44 = vector.shape_cast %19 : vector<512x1xi1> to vector<512x1xi1>
    %45 = vector.broadcast %44 : vector<512x1xi1> to vector<512x64xi1>
    %46 = vector.broadcast %cst_14 : f32 to vector<512x64xf32>
    %47 = arith.select %45, %46, %43 : vector<512x64xi1>, vector<512x64xf32>
    %c511_i32_15 = arith.constant 511 : i32
    %48 = tpu.dynamic_rotate %42 by %c511_i32_15 dim 0 : vector<512x64xf32>, i32 -> vector<512x64xf32>
    %cst_16 = arith.constant 0.000000e+00 : f32
    %49 = vector.shape_cast %21 : vector<512x1xi1> to vector<512x1xi1>
    %50 = vector.broadcast %49 : vector<512x1xi1> to vector<512x64xi1>
    %51 = vector.broadcast %cst_16 : f32 to vector<512x64xf32>
    %52 = arith.select %50, %51, %48 : vector<512x64xi1>, vector<512x64xf32>
    %53 = arith.truncf %47 : vector<512x64xf32> to vector<512x64xbf16>
    %54 = arith.truncf %42 : vector<512x64xf32> to vector<512x64xbf16>
    %55 = arith.truncf %52 : vector<512x64xf32> to vector<512x64xbf16>
    %56 = tpu.concatenate %53, %54, %55 in 1 : vector<512x64xbf16>, vector<512x64xbf16>, vector<512x64xbf16> -> vector<512x192xbf16>
    %c0_17 = arith.constant 0 : index
    %c0_18 = arith.constant 0 : index
    %57 = vector.load %arg4[%c0_17, %c0_18] : memref<192x128xbf16, #tpu.memory_space<vmem>>, vector<192x128xbf16>
    %cst_19 = arith.constant dense<0.000000e+00> : vector<512x128xf32>
    %58 = tpu.matmul %56, %57, %cst_19 {dimension_numbers = #tpu.dot_dimension_numbers<[1], [0], [0], [1], [0, 0, 1, 1], [], []>} : vector<512x192xbf16>, vector<192x128xbf16>, vector<512x128xf32> -> vector<512x128xf32>
    %c0_20 = arith.constant 0 : index
    %c0_21 = arith.constant 0 : index
    %59 = vector.load %arg5[%c0_20, %c0_21] : memref<1x128xf32, #tpu.memory_space<vmem>>, vector<1x128xf32>
    %60 = vector.broadcast %59 : vector<1x128xf32> to vector<512x128xf32>
    %61 = arith.addf %58, %60 : vector<512x128xf32>
    %cst_22 = arith.constant 0.000000e+00 : f32
    %62 = vector.broadcast %cst_22 : f32 to vector<512x128xf32>
    %63 = arith.maximumf %61, %62 : vector<512x128xf32>
    %c1_i32_23 = arith.constant 1 : i32
    %64 = tpu.dynamic_rotate %63 by %c1_i32_23 dim 0 : vector<512x128xf32>, i32 -> vector<512x128xf32>
    %cst_24 = arith.constant 0.000000e+00 : f32
    %65 = vector.shape_cast %19 : vector<512x1xi1> to vector<512x1xi1>
    %66 = vector.broadcast %65 : vector<512x1xi1> to vector<512x128xi1>
    %67 = vector.broadcast %cst_24 : f32 to vector<512x128xf32>
    %68 = arith.select %66, %67, %64 : vector<512x128xi1>, vector<512x128xf32>
    %c511_i32_25 = arith.constant 511 : i32
    %69 = tpu.dynamic_rotate %63 by %c511_i32_25 dim 0 : vector<512x128xf32>, i32 -> vector<512x128xf32>
    %cst_26 = arith.constant 0.000000e+00 : f32
    %70 = vector.shape_cast %21 : vector<512x1xi1> to vector<512x1xi1>
    %71 = vector.broadcast %70 : vector<512x1xi1> to vector<512x128xi1>
    %72 = vector.broadcast %cst_26 : f32 to vector<512x128xf32>
    %73 = arith.select %71, %72, %69 : vector<512x128xi1>, vector<512x128xf32>
    %74 = arith.truncf %63 : vector<512x128xf32> to vector<512x128xbf16>
    %c1 = arith.constant 1 : index
    %c0_27 = arith.constant 0 : index
    %c0_28 = arith.constant 0 : index
    %75 = vector.load %arg6[%c1, %c0_27, %c0_28] : memref<3x128x256xbf16, #tpu.memory_space<vmem>>, vector<1x128x256xbf16>
    %76 = vector.shape_cast %75 : vector<1x128x256xbf16> to vector<128x256xbf16>
    %cst_29 = arith.constant dense<0.000000e+00> : vector<512x256xf32>
    %77 = tpu.matmul %74, %76, %cst_29 {dimension_numbers = #tpu.dot_dimension_numbers<[1], [0], [0], [1], [0, 0, 1, 1], [], []>} : vector<512x128xbf16>, vector<128x256xbf16>, vector<512x256xf32> -> vector<512x256xf32>
    %78 = arith.truncf %68 : vector<512x128xf32> to vector<512x128xbf16>
    %c0_30 = arith.constant 0 : index
    %c0_31 = arith.constant 0 : index
    %c0_32 = arith.constant 0 : index
    %79 = vector.load %arg6[%c0_30, %c0_31, %c0_32] : memref<3x128x256xbf16, #tpu.memory_space<vmem>>, vector<1x128x256xbf16>
    %80 = vector.shape_cast %79 : vector<1x128x256xbf16> to vector<128x256xbf16>
    %cst_33 = arith.constant dense<0.000000e+00> : vector<512x256xf32>
    %81 = tpu.matmul %78, %80, %cst_33 {dimension_numbers = #tpu.dot_dimension_numbers<[1], [0], [0], [1], [0, 0, 1, 1], [], []>} : vector<512x128xbf16>, vector<128x256xbf16>, vector<512x256xf32> -> vector<512x256xf32>
    %82 = arith.addf %77, %81 : vector<512x256xf32>
    %83 = arith.truncf %73 : vector<512x128xf32> to vector<512x128xbf16>
    %c2 = arith.constant 2 : index
    %c0_34 = arith.constant 0 : index
    %c0_35 = arith.constant 0 : index
    %84 = vector.load %arg6[%c2, %c0_34, %c0_35] : memref<3x128x256xbf16, #tpu.memory_space<vmem>>, vector<1x128x256xbf16>
    %85 = vector.shape_cast %84 : vector<1x128x256xbf16> to vector<128x256xbf16>
    %cst_36 = arith.constant dense<0.000000e+00> : vector<512x256xf32>
    %86 = tpu.matmul %83, %85, %cst_36 {dimension_numbers = #tpu.dot_dimension_numbers<[1], [0], [0], [1], [0, 0, 1, 1], [], []>} : vector<512x128xbf16>, vector<128x256xbf16>, vector<512x256xf32> -> vector<512x256xf32>
    %87 = arith.addf %82, %86 : vector<512x256xf32>
    %c0_37 = arith.constant 0 : index
    %c0_38 = arith.constant 0 : index
    %88 = vector.load %arg7[%c0_37, %c0_38] : memref<1x256xf32, #tpu.memory_space<vmem>>, vector<1x256xf32>
    %89 = vector.broadcast %88 : vector<1x256xf32> to vector<512x256xf32>
    %90 = arith.addf %87, %89 : vector<512x256xf32>
    %cst_39 = arith.constant 0.000000e+00 : f32
    %91 = vector.broadcast %cst_39 : f32 to vector<512x256xf32>
    %92 = arith.maximumf %90, %91 : vector<512x256xf32>
    %93 = arith.truncf %92 : vector<512x256xf32> to vector<512x256xbf16>
    %c0_40 = arith.constant 0 : index
    %c0_41 = arith.constant 0 : index
    %94 = vector.load %arg8[%c0_40, %c0_41] : memref<256x2xbf16, #tpu.memory_space<vmem>>, vector<256x2xbf16>
    %cst_42 = arith.constant dense<0.000000e+00> : vector<512x2xf32>
    %95 = tpu.matmul %93, %94, %cst_42 {dimension_numbers = #tpu.dot_dimension_numbers<[1], [0], [0], [1], [0, 0, 1, 1], [], []>} : vector<512x256xbf16>, vector<256x2xbf16>, vector<512x2xf32> -> vector<512x2xf32>
    %96 = vector.shape_cast %95 : vector<512x2xf32> to vector<32x16x2xf32>
    %cst_43 = arith.constant dense<0.000000e+00> : vector<32x2xf32>
    %97 = vector.multi_reduction <add>, %96, %cst_43 [1] : vector<32x16x2xf32> to vector<32x2xf32>
    %cst_44 = arith.constant 6.250000e-02 : f32
    %98 = vector.broadcast %cst_44 : f32 to vector<32x2xf32>
    %99 = arith.mulf %97, %98 : vector<32x2xf32>
    %c0_45 = arith.constant 0 : index
    %c0_46 = arith.constant 0 : index
    %100 = vector.load %arg9[%c0_45, %c0_46] : memref<1x2xf32, #tpu.memory_space<vmem>>, vector<1x2xf32>
    %101 = vector.broadcast %100 : vector<1x2xf32> to vector<32x2xf32>
    %102 = arith.addf %99, %101 : vector<32x2xf32>
    %c0_47 = arith.constant 0 : index
    %c0_48 = arith.constant 0 : index
    %103 = vector.load %arg10[%c0_47, %c0_48] : memref<32x2xf32, #tpu.memory_space<vmem>>, vector<32x2xf32>
    tpu.vector_store %arg10[%c0_47, %c0_48], %102 {strides = array<i32>} : memref<32x2xf32, #tpu.memory_space<vmem>>, vector<32x2xf32>,
    return
  }
  func.func @transform_0(%arg0: i32) -> (i32, i32) {
    %c0_i32 = arith.constant 0 : i32
    %c0_i32_0 = arith.constant 0 : i32
    return %arg0, %c0_i32 : i32, i32
  }
  func.func @transform_1(%arg0: i32) -> (i32, i32) {
    %c0_i32 = arith.constant 0 : i32
    %c0_i32_0 = arith.constant 0 : i32
    %c0_i32_1 = arith.constant 0 : i32
    return %c0_i32, %c0_i32_0 : i32, i32
  }
  func.func @transform_2(%arg0: i32) -> (i32, i32) {
    %c0_i32 = arith.constant 0 : i32
    %c0_i32_0 = arith.constant 0 : i32
    %c0_i32_1 = arith.constant 0 : i32
    return %c0_i32, %c0_i32_0 : i32, i32
  }
  func.func @transform_3(%arg0: i32) -> (i32, i32) {
    %c0_i32 = arith.constant 0 : i32
    %c0_i32_0 = arith.constant 0 : i32
    %c0_i32_1 = arith.constant 0 : i32
    return %c0_i32, %c0_i32_0 : i32, i32
  }
  func.func @transform_4(%arg0: i32) -> (i32, i32) {
    %c0_i32 = arith.constant 0 : i32
    %c0_i32_0 = arith.constant 0 : i32
    %c0_i32_1 = arith.constant 0 : i32
    return %c0_i32, %c0_i32_0 : i32, i32
  }
  func.func @transform_5(%arg0: i32) -> (i32, i32, i32) {
    %c0_i32 = arith.constant 0 : i32
    %c0_i32_0 = arith.constant 0 : i32
    %c0_i32_1 = arith.constant 0 : i32
    %c0_i32_2 = arith.constant 0 : i32
    return %c0_i32, %c0_i32_0, %c0_i32_1 : i32, i32, i32
  }
  func.func @transform_6(%arg0: i32) -> (i32, i32) {
    %c0_i32 = arith.constant 0 : i32
    %c0_i32_0 = arith.constant 0 : i32
    %c0_i32_1 = arith.constant 0 : i32
    return %c0_i32, %c0_i32_0 : i32, i32
  }
  func.func @transform_7(%arg0: i32) -> (i32, i32) {
    %c0_i32 = arith.constant 0 : i32
    %c0_i32_0 = arith.constant 0 : i32
    %c0_i32_1 = arith.constant 0 : i32
    return %c0_i32, %c0_i32_0 : i32, i32
  }
  func.func @transform_8(%arg0: i32) -> (i32, i32) {
    %c0_i32 = arith.constant 0 : i32
    %c0_i32_0 = arith.constant 0 : i32
    %c0_i32_1 = arith.constant 0 : i32
    return %c0_i32, %c0_i32_0 : i32, i32
  }
  func.func @transform_9(%arg0: i32) -> (i32, i32) {
    %c0_i32 = arith.constant 0 : i32
    %c0_i32_0 = arith.constant 0 : i32
    return %arg0, %c0_i32 : i32, i32
  }
}

</mosaic_0001>

<bundles_post_ra>
// kernel: tpu_custom_call.1
= control target key start
LH: loop header
LB: loop body
LE: loop exit
PB: predicated region body
PF: predicated region fallthrough
CT: control target
= control target key end

     0   :  { %v97_v0 = vlaneseq  ;;  %s7939_s21 = smov 8   ;;  %v13617_v40 = vmov 0  ;;  %v13620_v41 = vmov 0  ;;  %v13623_v42 = vmov 0  ;;  %s7940_s13 = smov 16   ;;  %s13220_s0 = inlined_call_operand.vmem [shape: f32[512,8], index: 0, kind: input, shape index: {}]   ;;  %s13221_s1 = inlined_call_operand.vmem [shape: bf16[24,64], index: 1, kind: input, shape index: {}]   ;;  %s13222_s3 = inlined_call_operand.vmem [shape: bf16[192,128], index: 3, kind: input, shape index: {}]   ;;  %s13223_s2 = inlined_call_operand.vmem [shape: f32[1,64], index: 2, kind: input, shape index: {}]   ;;  %s13224_s5 = inlined_call_operand.vmem [shape: bf16[3,128,256], index: 5, kind: input, shape index: {}]   ;;  %s13225_s4 = inlined_call_operand.vmem [shape: f32[1,128], index: 4, kind: input, shape index: {}]   ;;  %s13226_s7 = inlined_call_operand.vmem [shape: bf16[256,2], index: 7, kind: input, shape index: {}]   ;;  %s13227_s6 = inlined_call_operand.vmem [shape: f32[1,256], index: 6, kind: input, shape index: {}]   ;;  %s13228_s8 = inlined_call_operand.vmem [shape: f32[1,2], index: 8, kind: input, shape index: {}]   ;;  %s13229_s9 = inlined_call_operand.vmem [shape: f32[32,2], index: 9, kind: output, shape index: {}]  }
   0x1   :  { %v7997_v1 = vld [vmem:[%s13220_s0] sm:$0xff]  ;;  %v8002_v2 = vld [vmem:[%s13220_s0 + $0x8] sm:$0xff]  ;;  %v8007_v3 = vld [vmem:[%s13220_s0 + $0x10] sm:$0xff]  ;;  %vm13241_vm4 = vcmask 1043456   ;;  %v13644_v63 = vmov 0 }
   0x2   :  { %v1380_v5 = vrot.slane %v8002_v2, 1  ;;  %v1732_v6 = vpack.c.bf16 %v8002_v2, %v7997_v1  ;;  %v8017_v8 = vld [vmem:[%s13220_s0 + $0x18] sm:$0xff]  ;;  %v8022_v9 = vld [vmem:[%s13220_s0 + $0x20] sm:$0xff]  ;;  %v8027_v10 = vld [vmem:[%s13220_s0 + $0x28] sm:$0xff]  ;;  %v13230_v11 = vrot.slane %v7997_v1, 1  ;;  %v8036_v16 = vshrl.u32 %v97_v0, 7 }
   0x3   :  { %v1382_v14 = vrot.slane %v8017_v8, 1  ;;  %v1733_v15 = vpack.c.bf16 %v8017_v8, %v8007_v3  ;;  %v1381_v17 = vrot.slane %v8007_v3, 1  ;;  %v1383_v20 = vrot.slane %v8022_v9, 1  ;;  %v8048_v23 = vld [vmem:[%s13220_s0 + $0x30] sm:$0xff]  ;;  %v8057_v27 = vld [vmem:[%s13220_s0 + $0x38] sm:$0xff]  ;;  %v8094_v44 = vld [vmem:[%s13220_s0 + $0x40] sm:$0xff] }
   0x4   :  { %1828 = vrot.lane.b32.xlu0 %v1732_v6, %s7939_s21  ;;  %v1384_v21 = vrot.slane %v8027_v10, 1  ;;  %v1734_v22 = vpack.c.bf16 %v8027_v10, %v8022_v9  ;;  %v99_v24 = vadd.s32 8, %v8036_v16  ;;  %vm13250_vm0 = vcmp.lt.s32.totalorder %v8036_v16, 7  ;;  %v8099_v45 = vld [vmem:[%s13220_s0 + $0x48] sm:$0xff]  ;;  %v8111_v50 = vld [vmem:[%s13220_s0 + $0x50] sm:$0xff]  ;;  %v8118_v55 = vld [vmem:[%s13220_s0 + $0x58] sm:$0xff] }
   0x5   :  { %v101_v25 = vadd.s32 24, %v8036_v16  ;;  %v103_v26 = vadd.s32 40, %v8036_v16  ;;  %v1505_v28 = vsel %vm13250_vm0, %v1380_v5, %v1381_v17  ;;  %v1506_v29 = vsel %vm13250_vm0, %v13230_v11, %v1380_v5  ;;  %v8134_v0 = vld [vmem:[%s13220_s0 + $0x60] sm:$0xff]  ;;  %v8139_v5 = vld [vmem:[%s13220_s0 + $0x68] sm:$0xff]  ;;  %v8345_v18 = vld [vmem:[%s13220_s0 + $0xd0] sm:$0xff] }
   0x6   :  { %v1503_v30 = vsel %vm13250_vm0, %v1382_v14, %v1383_v20  ;;  %v1504_v31 = vsel %vm13250_vm0, %v1381_v17, %v1382_v14  ;;  %v173_v32 = vand.u32 15, %v99_v24  ;;  %v1385_v35 = vrot.slane %v8048_v23, 1  ;;  %v8293_v24 = vld [vmem:[%s13220_s0 + $0xb0] sm:$0xff]  ;;  %13654 = vst [vmem:[#allocation19_spill] sm:$0xff] %v8345_v18 }
   0x7   :  { %v187_v33 = vand.u32 15, %v101_v25  ;;  %v201_v34 = vand.u32 15, %v103_v26  ;;  %v1502_v36 = vsel %vm13250_vm0, %v1383_v20, %v1384_v21  ;;  %v1386_v38 = vrot.slane %v8057_v27, 1  ;;  %13647 = vst [vmem:[#allocation14_spill] sm:$0xff] %v8293_v24 }
   0x8   :  { %1830 = vrot.lane.b32.xlu0 %v1733_v15, %s7939_s21  ;;  %v1735_v39 = vpack.c.bf16 %v8057_v27, %v8048_v23  ;;  %vm8077_vm1 = vcmp.eq.s32.totalorder %v173_v32, 15  ;;  %v1501_v43 = vsel %vm13250_vm0, %v1384_v21, %v1385_v35  ;;  %v1387_v56 = vrot.slane %v8094_v44, 1 }
   0x9   :  { %v13618_v40 = vsel %vm8077_vm1, 4294967295, %v13617_v40  ;;  %vm8081_vm2 = vcmp.eq.s32.totalorder %v187_v33, 15  ;;  %vm8085_vm3 = vcmp.eq.s32.totalorder %v201_v34, 15  ;;  %v1637_v46 = vsel %vm8077_vm1, 0.0, %v1505_v28 }
   0xa   :  { %13619 = vst [vmem:[#allocation2_spill] sm:$0xff] %v13618_v40  ;;  %v13621_v41 = vsel %vm8081_vm2, 4294967295, %v13620_v41  ;;  %v13624_v42 = vsel %vm8085_vm3, 4294967295, %v13623_v42  ;;  %v1639_v47 = vsel %vm8081_vm2, 0.0, %v1503_v30  ;;  %v1641_v48 = vsel %vm8085_vm3, 0.0, %v1501_v43  ;;  %v8162_v30 = vld [vmem:[%s13220_s0 + $0x70] sm:$0xff] }
   0xb   :  { %13622 = vst [vmem:[#allocation3_spill] sm:$0xff] %v13621_v41  ;;  %13625 = vst [vmem:[#allocation4_spill] sm:$0xff] %v13624_v42  ;;  %v1764_v51 = vpack.c.bf16 %v1637_v46, %v1506_v29  ;;  %v1765_v52 = vpack.c.bf16 %v1639_v47, %v1504_v31  ;;  %v1766_v53 = vpack.c.bf16 %v1641_v48, %v1502_v36  ;;  %v1388_v57 = vrot.slane %v8099_v45, 1  ;;  %v8615_v40 = vld [vmem:[%s13220_s0 + $0x158] sm:$0xff] }
   0xc   :  { %1832 = vrot.lane.b32.xlu0 %v1734_v22, %s7939_s21  ;;  %v1736_v58 = vpack.c.bf16 %v8099_v45, %v8094_v44  ;;  %v105_v59 = vadd.s32 56, %v8036_v16  ;;  %v1500_v60 = vsel %vm13250_vm0, %v1385_v35, %v1386_v38  ;;  %v107_v61 = vadd.s32 72, %v8036_v16  ;;  %v8177_v35 = vld [vmem:[%s13220_s0 + $0x78] sm:$0xff] }
   0xd   :  { %1924 = vrot.lane.b32.xlu1 %v1764_v51, %s7940_s13  ;;  %v1389_v62 = vrot.slane %v8111_v50, 1  ;;  %v1499_v14 = vsel %vm13250_vm0, %v1386_v38, %v1387_v56  ;;  %v1498_v15 = vsel %vm13250_vm0, %v1387_v56, %v1388_v57  ;;  %v1390_v17 = vrot.slane %v8118_v55, 1  ;;  %v8196_v56 = vld [vmem:[%s13220_s0 + $0x88] sm:$0xff] }
   0xe   :  { %v215_v6 = vand.u32 15, %v105_v59  ;;  %v229_v20 = vand.u32 15, %v107_v61  ;;  %v1737_v22 = vpack.c.bf16 %v8118_v55, %v8111_v50  ;;  %v13626_v25 = vmov 0 }
   0xf   :  { %v1497_v21 = vsel %vm13250_vm0, %v1388_v57, %v1389_v62  ;;  %v1391_v28 = vrot.slane %v8134_v0, 1  ;;  %v1392_v29 = vrot.slane %v8139_v5, 1  ;;  %v13629_v32 = vmov 0 }
  0x10   :  { %1928 = vrot.lane.b32.xlu0 %v1766_v53, %s7940_s13  ;;  %vm8152_vm5 = vcmp.eq.s32.totalorder %v215_v6, 15  ;;  %vm8167_vm6 = vcmp.eq.s32.totalorder %v229_v20, 15  ;;  %v1738_v33 = vpack.c.bf16 %v8139_v5, %v8134_v0  ;;  %v109_v34 = vadd.s32 88, %v8036_v16  ;;  %v8191_v53 = vld [vmem:[%s13220_s0 + $0x80] sm:$0xff] }
  0x11   :  { %v13627_v25 = vsel %vm8152_vm5, 4294967295, %v13626_v25  ;;  %1926 = vrot.lane.b32.xlu1 %v1765_v52, %s7940_s13  ;;  %v1643_v31 = vsel %vm8152_vm5, 0.0, %v1499_v14  ;;  %v13630_v32 = vsel %vm8167_vm6, 4294967295, %v13629_v32  ;;  %v1645_v38 = vsel %vm8167_vm6, 0.0, %v1497_v21 }
  0x12   :  { %13628 = vst [vmem:[#allocation5_spill] sm:$0xff] %v13627_v25  ;;  %13631 = vst [vmem:[#allocation6_spill] sm:$0xff] %v13630_v32  ;;  %v1767_v36 = vpack.c.bf16 %v1643_v31, %v1500_v60  ;;  %v1495_v43 = vsel %vm13250_vm0, %v1390_v17, %v1391_v28  ;;  %v1496_v46 = vsel %vm13250_vm0, %v1389_v62, %v1390_v17  ;;  %v243_v48 = vand.u32 15, %v109_v34  ;;  %v8223_v17 = vld [vmem:[%s13220_s0 + $0x98] sm:$0xff] }
  0x13   :  { %v1768_v47 = vpack.c.bf16 %v1645_v38, %v1498_v15  ;;  %v111_v51 = vadd.s32 104, %v8036_v16  ;;  %v1393_v52 = vrot.slane %v8162_v30, 1  ;;  %v1494_v57 = vsel %vm13250_vm0, %v1391_v28, %v1392_v29  ;;  %v8218_v15 = vld [vmem:[%s13220_s0 + $0x90] sm:$0xff]  ;;  %13635 = vst [vmem:[#allocation8_spill] sm:$0xff] %v8223_v17 }
  0x14   :  { %1836 = vrot.lane.b32.xlu0 %v1736_v58, %s7939_s21  ;;  %v1394_v59 = vrot.slane %v8177_v35, 1  ;;  %v1739_v60 = vpack.c.bf16 %v8177_v35, %v8162_v30  ;;  %vm8208_vm7 = vcmp.eq.s32.totalorder %v243_v48, 15  ;;  %v13632_v61 = vmov 0 }
  0x15   :  { %1834 = vrot.lane.b32.xlu1 %v1735_v39, %s7939_s21  ;;  %v13633_v61 = vsel %vm8208_vm7, 4294967295, %v13632_v61  ;;  %v257_v62 = vand.u32 15, %v111_v51  ;;  %v1493_v6 = vsel %vm13250_vm0, %v1392_v29, %v1393_v52  ;;  %v7834_v39 = vld [vmem:[%s13221_s1] sm:$0xff]   ;;  %v1647_v20 = vsel %vm8208_vm7, 0.0, %v1495_v43 }
  0x16   :  { %13634 = vst [vmem:[#allocation7_spill] sm:$0xff] %v13633_v61  ;;  %v1395_v28 = vrot.slane %v8191_v53, 1  ;;  %v1396_v29 = vrot.slane %v8196_v56, 1  ;;  %v1769_v31 = vpack.c.bf16 %v1647_v20, %v1496_v46  ;;  %v13636_v34 = vmov 0  ;;  %7488 = vmatprep.subr.bf16.mxu0 %v7834_v39 }
  0x17   :  { %vm8234_vm8 = vcmp.eq.s32.totalorder %v257_v62, 15  ;;  %v1740_v38 = vpack.c.bf16 %v8196_v56, %v8191_v53  ;;  %v113_v48 = vadd.s32 120, %v8036_v16  ;;  %v115_v46 = vadd.s32 136, %v8036_v16  ;;  %v8251_v62 = vld [vmem:[%s13221_s1 + $0x8] ss:$0 sps:$4 sm:$0xff]   ;;  %7489 = vmatpush3.bf16.msra.mxu0 %v7834_v39 }
  0x18   :  { %1932 = vrot.lane.b32.xlu0 %v1768_v47, %s7940_s13  ;;  %v13637_v34 = vsel %vm8234_vm8, 4294967295, %v13636_v34  ;;  %v1649_v43 = vsel %vm8234_vm8, 0.0, %v1493_v6  ;;  %v1491_v51 = vsel %vm13250_vm0, %v1394_v59, %v1395_v28  ;;  %v1492_v47 = vsel %vm13250_vm0, %v1393_v52, %v1394_v59  ;;  %v8260_v52 = vld [vmem:[%s13220_s0 + $0xa0] sm:$0xff]  ;;  %v8265_v59 = vld [vmem:[%s13220_s0 + $0xa8] sm:$0xff]  ;;  %7828 = vmatprep.subr.msk.bf16.mxu0 %vm13241_vm4, %v8251_v62 }
  0x19   :  { %13638 = vst [vmem:[#allocation9_spill] sm:$0xff] %v13637_v34  ;;  %1930 = vrot.lane.b32.xlu1 %v1767_v36, %s7940_s13  ;;  %v1770_v20 = vpack.c.bf16 %v1649_v43, %v1494_v57  ;;  %v271_v14 = vand.u32 15, %v113_v48  ;;  %v1397_v6 = vrot.slane %v8218_v15, 1  ;;  %v1490_v21 = vsel %vm13250_vm0, %v1395_v28, %v1396_v29  ;;  %13639 = vst [vmem:[#allocation10_spill] sm:$0xff] %v8260_v52  ;;  %v8307_v36 = vld [vmem:[%s13220_s0 + $0xb8] sm:$0xff] }
  0x1a   :  { %13640 = vst [vmem:[#allocation11_spill] sm:$0xff] %v8265_v59  ;;  %v285_v39 = vand.u32 15, %v115_v46  ;;  %v1398_v57 = vrot.slane %v8223_v17, 1  ;;  %v13641_v28 = vmov 0  ;;  %v117_v46 = vadd.s32 152, %v8036_v16  ;;  %13648 = vst [vmem:[#allocation15_spill] sm:$0xff] %v8307_v36 }
  0x1b   :  { %vm8274_vm9 = vcmp.eq.s32.totalorder %v271_v14, 15  ;;  %v1489_v43 = vsel %vm13250_vm0, %v1396_v29, %v1397_v6  ;;  %v1400_v14 = vrot.slane %v8265_v59, 1  ;;  %v1401_v54 = vrot.slane %v8293_v24, 1 }
  0x1c   :  { %1840 = vrot.lane.b32.xlu0 %v1738_v33, %s7939_s21  ;;  %v13642_v28 = vsel %vm8274_vm9, 4294967295, %v13641_v28  ;;  %v1651_v58 = vsel %vm8274_vm9, 0.0, %v1491_v51  ;;  %vm8284_vm10 = vcmp.eq.s32.totalorder %v285_v39, 15  ;;  %v1399_v33 = vrot.slane %v8260_v52, 1 }
  0x1d   :  { %13643 = vst [vmem:[#allocation12_spill] sm:$0xff] %v13642_v28  ;;  %v13645_v63 = vsel %vm8284_vm10, 4294967295, %v13644_v63  ;;  %1838 = vrot.lane.b32.xlu1 %v1737_v22, %s7939_s21  ;;  %v1771_v29 = vpack.c.bf16 %v1651_v58, %v1492_v47  ;;  %v1653_v51 = vsel %vm8284_vm10, 0.0, %v1489_v43  ;;  %v1488_v22 = vsel %vm13250_vm0, %v1397_v6, %v1398_v57  ;;  %v8317_v47 = vld [vmem:[%s13220_s0 + $0xc0] sm:$0xff]  ;;  %v8327_v6 = vld [vmem:[%s13220_s0 + $0xc8] sm:$0xff] }
  0x1e   :  { %13646 = vst [vmem:[#allocation13_spill] sm:$0xff] %v13645_v63  ;;  %v1772_v26 = vpack.c.bf16 %v1653_v51, %v1490_v21  ;;  %v1487_v49 = vsel %vm13250_vm0, %v1398_v57, %v1399_v33  ;;  %v119_v58 = vadd.s32 168, %v8036_v16  ;;  %13649 = vst [vmem:[#allocation16_spill] sm:$0xff] %v8317_v47  ;;  %v299_v43 = vand.u32 15, %v117_v46  ;;  %v8359_v51 = vld [vmem:[%s13220_s0 + $0xd8] sm:$0xff] }
  0x1f   :  { %v1486_v21 = vsel %vm13250_vm0, %v1399_v33, %v1400_v14  ;;  %13650 = vst [vmem:[#allocation17_spill] sm:$0xff] %v8327_v6  ;;  %v1402_v11 = vrot.slane %v8307_v36, 1  ;;  %v13651_v46 = vmov 0  ;;  %v1485_v33 = vsel %vm13250_vm0, %v1400_v14, %v1401_v54  ;;  %13658 = vst [vmem:[#allocation21_spill] sm:$0xff] %v8359_v51 }
  0x20   :  { %1936 = vrot.lane.b32.xlu0 %v1770_v20, %s7940_s13  ;;  %v313_v57 = vand.u32 15, %v119_v58  ;;  %vm8334_vm11 = vcmp.eq.s32.totalorder %v299_v43, 15  ;;  %v1403_v58 = vrot.slane %v8317_v47, 1  ;;  %v1404_v43 = vrot.slane %v8327_v6, 1 }
  0x21   :  { %1934 = vrot.lane.b32.xlu1 %v1769_v31, %s7940_s13  ;;  %v13652_v46 = vsel %vm8334_vm11, 4294967295, %v13651_v46  ;;  %v1655_v20 = vsel %vm8334_vm11, 0.0, %v1487_v49  ;;  %v13655_v31 = vmov 0  ;;  %v1484_v7 = vsel %vm13250_vm0, %v1401_v54, %v1402_v11 }
  0x22   :  { %13653 = vst [vmem:[#allocation18_spill] sm:$0xff] %v13652_v46  ;;  %vm8349_vm12 = vcmp.eq.s32.totalorder %v313_v57, 15  ;;  %v8362_v19 = vpack.c.bf16 %v1655_v20, %v1488_v22  ;;  %v121_v57 = vadd.s32 184, %v8036_v16  ;;  %v1483_v12 = vsel %vm13250_vm0, %v1402_v11, %v1403_v58  ;;  %v8381_v22 = vld [vmem:[%s13220_s0 + $0xe8] sm:$0xff] }
  0x23   :  { %v13656_v31 = vsel %vm8349_vm12, 4294967295, %v13655_v31  ;;  %v1657_v49 = vsel %vm8349_vm12, 0.0, %v1485_v33  ;;  %v123_v4 = vadd.s32 200, %v8036_v16  ;;  %v1405_v37 = vrot.slane %v8345_v18, 1  ;;  %13660 = vst [vmem:[#allocation23_spill] sm:$0xff] %v8381_v22 }
  0x24   :  { %13657 = vst [vmem:[#allocation20_spill] sm:$0xff] %v13656_v31  ;;  %1844 = vrot.lane.b32.xlu0 %v1740_v38, %s7939_s21  ;;  %v1774_v13 = vpack.c.bf16 %v1657_v49, %v1486_v21  ;;  %v8376_v38 = vld [vmem:[%s13220_s0 + $0xe0] sm:$0xff]  ;;  %v327_v11 = vand.u32 15, %v121_v57  ;;  %v1482_v54 = vsel %vm13250_vm0, %v1403_v58, %v1404_v43  ;;  %v1406_v20 = vrot.slane %v8359_v51, 1  ;;  %v8421_v58 = vld [vmem:[%s13220_s0 + $0xf8] sm:$0xff] }
  0x25   :  { %13659 = vst [vmem:[#allocation22_spill] sm:$0xff] %v8376_v38  ;;  %1842 = vrot.lane.b32.xlu1 %v1739_v60, %s7939_s21  ;;  %v341_v33 = vand.u32 15, %v123_v4  ;;  %v1481_v49 = vsel %vm13250_vm0, %v1404_v43, %v1405_v37  ;;  %v13661_v60 = vmov 0  ;;  %v1407_v57 = vrot.slane %v8376_v38, 1  ;;  %v8407_v43 = vld [vmem:[%s13220_s0 + $0xf0] sm:$0xff]  ;;  %13668 = vst [vmem:[#allocation27_spill] sm:$0xff] %v8421_v58 }
  0x26   :  { %vm8397_vm13 = vcmp.eq.s32.totalorder %v327_v11, 15  ;;  %v1408_v4 = vrot.slane %v8381_v22, 1  ;;  %13664 = vst [vmem:[#allocation25_spill] sm:$0xff] %v8407_v43  ;;  %v125_v48 = vadd.s32 216, %v8036_v16  ;;  %v1480_v11 = vsel %vm13250_vm0, %v1405_v37, %v1406_v20 }
  0x27   :  { %v13662_v60 = vsel %vm8397_vm13, 4294967295, %v13661_v60  ;;  %v1659_v21 = vsel %vm8397_vm13, 0.0, %v1483_v12  ;;  %vm8411_vm14 = vcmp.eq.s32.totalorder %v341_v33, 15  ;;  %v1479_v33 = vsel %vm13250_vm0, %v1406_v20, %v1407_v57  ;;  %v8489_v20 = vld [vmem:[%s13220_s0 + $0x118] sm:$0xff] }
  0x28   :  { %1940 = vrot.lane.b32.xlu0 %v1772_v26, %s7940_s13  ;;  %13663 = vst [vmem:[#allocation24_spill] sm:$0xff] %v13662_v60  ;;  %v13665_v26 = vmov 0  ;;  %v8424_v14 = vpack.c.bf16 %v1659_v21, %v1484_v7  ;;  %v1661_v12 = vsel %vm8411_vm14, 0.0, %v1481_v49  ;;  %v355_v60 = vand.u32 15, %v125_v48  ;;  %v8439_v7 = vld [vmem:[%s13220_s0 + $0x100] sm:$0xff]  ;;  %13680 = vst [vmem:[#allocation33_spill] sm:$0xff] %v8489_v20 }
  0x29   :  { %v13666_v26 = vsel %vm8411_vm14, 4294967295, %v13665_v26  ;;  %1938 = vrot.lane.b32.xlu1 %v1771_v29, %s7940_s13  ;;  %v8432_v39 = vpack.c.bf16 %v1661_v12, %v1482_v54  ;;  %v127_v31 = vadd.s32 232, %v8036_v16  ;;  %v1409_v46 = vrot.slane %v8407_v43, 1  ;;  %13669 = vst [vmem:[#allocation28_spill] sm:$0xff] %v8439_v7  ;;  %v8444_v29 = vld [vmem:[%s13220_s0 + $0x108] sm:$0xff] }
  0x2a   :  { %13667 = vst [vmem:[#allocation26_spill] sm:$0xff] %v13666_v26  ;;  %13670 = vst [vmem:[#allocation29_spill] sm:$0xff] %v8444_v29  ;;  %v13671_v37 = vpack.c.bf16 %v8265_v59, %v8260_v52  ;;  %v1478_v48 = vsel %vm13250_vm0, %v1407_v57, %v1408_v4  ;;  %v1410_v21 = vrot.slane %v8421_v58, 1  ;;  %vm8456_vm15 = vcmp.eq.s32.totalorder %v355_v60, 15 }
  0x2b   :  { %v13672_v49 = vmov 0  ;;  %v369_v12 = vand.u32 15, %v127_v31  ;;  %v1477_v26 = vsel %vm13250_vm0, %v1408_v4, %v1409_v46  ;;  %v13675_v57 = vpack.c.bf16 %v8223_v17, %v8218_v15  ;;  %v8475_v31 = vld [vmem:[%s13220_s0 + $0x110] sm:$0xff] }
  0x2c   :  { %1848 = vrot.lane.b32.xlu0 %v13671_v37, %s7939_s21  ;;  %v13673_v49 = vsel %vm8456_vm15, 4294967295, %v13672_v49  ;;  %v1663_v54 = vsel %vm8456_vm15, 0.0, %v1479_v33  ;;  %v1411_v60 = vrot.slane %v8439_v7, 1  ;;  %v1412_v63 = vrot.slane %v8444_v29, 1  ;;  %13676 = vst [vmem:[#allocation31_spill] sm:$0xff] %v8475_v31 }
  0x2d   :  { %13674 = vst [vmem:[#allocation30_spill] sm:$0xff] %v13673_v49  ;;  %1846 = vrot.lane.b32.xlu1 %v13675_v57, %s7939_s21  ;;  %v8477_v4 = vpack.c.bf16 %v1663_v54, %v1480_v11  ;;  %vm8479_vm4 = vcmp.eq.s32.totalorder %v369_v12, 15  ;;  %v13677_v37 = vmov 0  ;;  %v129_v57 = vadd.s32 248, %v8036_v16 }
  0x2e   :  { %v13678_v37 = vsel %vm8479_vm4, 4294967295, %v13677_v37  ;;  %v1665_v11 = vsel %vm8479_vm4, 0.0, %v1477_v26  ;;  %v1475_v54 = vsel %vm13250_vm0, %v1410_v21, %v1411_v60  ;;  %v1476_v12 = vsel %vm13250_vm0, %v1409_v46, %v1410_v21  ;;  %v8512_v26 = vld [vmem:[%s13220_s0 + $0x128] sm:$0xff] }
  0x2f   :  { %13679 = vst [vmem:[#allocation32_spill] sm:$0xff] %v13678_v37  ;;  %v131_v33 = vadd.s32 264, %v8036_v16  ;;  %v8499_v49 = vpack.c.bf16 %v1665_v11, %v1478_v48  ;;  %v383_v28 = vand.u32 15, %v129_v57  ;;  %v1413_v34 = vrot.slane %v8475_v31, 1  ;;  %13682 = vst [vmem:[#allocation35_spill] sm:$0xff] %v8512_v26  ;;  %v8543_v37 = vld [vmem:[%s13220_s0 + $0x130] sm:$0xff] }
  0x30   :  { %1944 = vrot.lane.b32.xlu0 %v1774_v13, %s7940_s13  ;;  %v1474_v61 = vsel %vm13250_vm0, %v1411_v60, %v1412_v63  ;;  %v8507_v13 = vld [vmem:[%s13220_s0 + $0x120] sm:$0xff]  ;;  %v1414_v21 = vrot.slane %v8489_v20, 1  ;;  %v13683_v57 = vmov 0  ;;  %vm13686_vm4 = vcmp.lt.s32.totalorder %v8036_v16, 7  ;;  %v8555_v60 = vld [vmem:[%s13220_s0 + $0x138] sm:$0xff] }
  0x31   :  { %13681 = vst [vmem:[#allocation34_spill] sm:$0xff] %v8507_v13  ;;  %1942 = vrot.lane.b32.xlu1 %v8362_v19, %s7940_s13  ;;  %v397_v46 = vand.u32 15, %v131_v33  ;;  %vm8520_vm0 = vcmp.eq.s32.totalorder %v383_v28, 15  ;;  %v1473_v11 = vsel %vm13686_vm4, %v1412_v63, %v1413_v34  ;;  %v13687_v19 = vpack.c.bf16 %v8327_v6, %v8317_v47  ;;  %13691 = vst [vmem:[#allocation38_spill] sm:$0xff] %v8555_v60 }
  0x32   :  { %v13684_v57 = vsel %vm8520_vm0, 4294967295, %v13683_v57  ;;  %v1667_v33 = vsel %vm8520_vm0, 0.0, %v1475_v54  ;;  %v13688_v28 = vmov 0  ;;  %v1415_v48 = vrot.slane %v8507_v13, 1  ;;  %vm13695_vm0 = vmmov %vm13686_vm4 }
  0x33   :  { %13685 = vst [vmem:[#allocation36_spill] sm:$0xff] %v13684_v57  ;;  %vm8534_vm15 = vcmp.eq.s32.totalorder %v397_v46, 15  ;;  %v1416_v63 = vrot.slane %v8512_v26, 1  ;;  %v8545_v32 = vpack.c.bf16 %v1667_v33, %v1476_v12  ;;  %v133_v46 = vadd.s32 280, %v8036_v16 }
  0x34   :  { %1852 = vrot.lane.b32.xlu0 %v13687_v19, %s7939_s21  ;;  %v13689_v28 = vsel %vm8534_vm15, 4294967295, %v13688_v28  ;;  %v1669_v19 = vsel %vm8534_vm15, 0.0, %v1473_v11  ;;  %v13692_v57 = vpack.c.bf16 %v8307_v36, %v8293_v24  ;;  %v1471_v11 = vsel %vm13686_vm4, %v1414_v21, %v1415_v48  ;;  %vm13693_vm15 = vmmov %vm13686_vm4 }
  0x35   :  { %13690 = vst [vmem:[#allocation37_spill] sm:$0xff] %v13689_v28  ;;  %v8561_v12 = vpack.c.bf16 %v1669_v19, %v1474_v61  ;;  %v1472_v33 = vsel %vm13693_vm15, %v1413_v34, %v1414_v21  ;;  %v135_v54 = vadd.s32 296, %v8036_v16  ;;  %v8571_v28 = vld [vmem:[%s13220_s0 + $0x140] sm:$0xff]  ;;  %v411_v25 = vand.u32 15, %v133_v46  ;;  %v8580_v19 = vld [vmem:[%s13220_s0 + $0x148] sm:$0xff] }
  0x36   :  { %1850 = vrot.lane.b32.xlu1 %v13692_v57, %s7939_s21  ;;  %13694 = vst [vmem:[#allocation39_spill] sm:$0xff] %v8571_v28  ;;  %v1417_v42 = vrot.slane %v8543_v37, 1  ;;  %v1470_v61 = vsel %vm13695_vm0, %v1415_v48, %v1416_v63  ;;  %13696 = vst [vmem:[#allocation40_spill] sm:$0xff] %v8580_v19  ;;  %v1418_v21 = vrot.slane %v8555_v60, 1  ;;  %v13697_v48 = vmov 0 }
  0x37   :  { %v425_v34 = vand.u32 15, %v135_v54  ;;  %vm8588_vm15 = vcmp.eq.s32.totalorder %v411_v25, 15  ;;  %v1419_v36 = vrot.slane %v8571_v28, 1  ;;  %v13700_v54 = vmov 0 }
  0x38   :  { %1948 = vrot.lane.b32.xlu0 %v8432_v39, %s7940_s13  ;;  %v13698_v48 = vsel %vm8588_vm15, 4294967295, %v13697_v48  ;;  %v1469_v57 = vsel %vm13695_vm0, %v1416_v63, %v1417_v42  ;;  %v8599_v39 = vld [vmem:[%s13220_s0 + $0x150] sm:$0xff]  ;;  %v1671_v25 = vsel %vm8588_vm15, 0.0, %v1471_v11  ;;  %v1420_v63 = vrot.slane %v8580_v19, 1  ;;  %vm13704_vm15 = vmmov %vm13695_vm0 }
  0x39   :  { %13699 = vst [vmem:[#allocation41_spill] sm:$0xff] %v13698_v48  ;;  %vm8605_vm4 = vcmp.eq.s32.totalorder %v425_v34, 15  ;;  %v8617_v46 = vpack.c.bf16 %v1671_v25, %v1472_v33  ;;  %v137_v11 = vadd.s32 312, %v8036_v16  ;;  %v1467_v34 = vsel %vm13695_vm0, %v1418_v21, %v1419_v36 }
  0x3a   :  { %1946 = vrot.lane.b32.xlu1 %v8424_v14, %s7940_s13  ;;  %v13701_v54 = vsel %vm8605_vm4, 4294967295, %v13700_v54  ;;  %v1673_v14 = vsel %vm8605_vm4, 0.0, %v1469_v57  ;;  %v13703_v48 = vpack.c.bf16 %v8381_v22, %v8376_v38  ;;  %v1468_v47 = vsel %vm13704_vm15, %v1417_v42, %v1418_v21  ;;  %v8637_v57 = vld [vmem:[%s13220_s0 + $0x160] sm:$0xff]  ;;  %vm13707_vm15 = vmmov %vm13695_vm0  ;;  %v8683_v42 = vld [vmem:[%s13220_s0 + $0x178] sm:$0xff] }
  0x3b   :  { %13702 = vst [vmem:[#allocation42_spill] sm:$0xff] %v13701_v54  ;;  %v8628_v41 = vpack.c.bf16 %v1673_v14, %v1470_v61  ;;  %v139_v33 = vadd.s32 328, %v8036_v16  ;;  %v1421_v25 = vrot.slane %v8599_v39, 1  ;;  %13705 = vst [vmem:[#allocation43_spill] sm:$0xff] %v8637_v57  ;;  %v8642_v54 = vld [vmem:[%s13220_s0 + $0x168] sm:$0xff]  ;;  %v1466_v61 = vsel %vm13695_vm0, %v1419_v36, %v1420_v63 }
  0x3c   :  { %1856 = vrot.lane.b32.xlu0 %v13703_v48, %s7939_s21  ;;  %v439_v48 = vand.u32 15, %v137_v11  ;;  %v1422_v21 = vrot.slane %v8615_v40, 1  ;;  %v13706_v14 = vpack.c.bf16 %v8359_v51, %v8345_v18  ;;  %v13708_v36 = vmov 0 }
  0x3d   :  { %v453_v38 = vand.u32 15, %v139_v33  ;;  %v1465_v22 = vsel %vm13707_vm15, %v1420_v63, %v1421_v25  ;;  %v1423_v24 = vrot.slane %v8637_v57, 1  ;;  %v1424_v51 = vrot.slane %v8642_v54, 1  ;;  %v8667_v33 = vld [vmem:[%s13220_s0 + $0x170] sm:$0xff] }
  0x3e   :  { %1854 = vrot.lane.b32.xlu1 %v13706_v14, %s7939_s21  ;;  %vm8657_vm4 = vcmp.eq.s32.totalorder %v439_v48, 15  ;;  %v13711_v48 = vmov 0  ;;  %v141_v11 = vadd.s32 344, %v8036_v16  ;;  %v143_v18 = vadd.s32 360, %v8036_v16 }
  0x3f   :  { %v13709_v36 = vsel %vm8657_vm4, 4294967295, %v13708_v36  ;;  %v1675_v63 = vsel %vm8657_vm4, 0.0, %v1467_v34  ;;  %vm8673_vm0 = vcmp.eq.s32.totalorder %v453_v38, 15  ;;  %v1463_v38 = vsel %vm13707_vm15, %v1422_v21, %v1423_v24  ;;  %vm13714_vm4 = vmmov %vm13707_vm15 }
  0x40   :  { %13710 = vst [vmem:[#allocation44_spill] sm:$0xff] %v13709_v36  ;;  %1952 = vrot.lane.b32.xlu0 %v8499_v49, %s7940_s13  ;;  %v13712_v48 = vsel %vm8673_vm0, 4294967295, %v13711_v48  ;;  %v8685_v6 = vpack.c.bf16 %v1675_v63, %v1468_v47  ;;  %v1677_v49 = vsel %vm8673_vm0, 0.0, %v1465_v22  ;;  %v1464_v34 = vsel %vm13714_vm4, %v1421_v25, %v1422_v21  ;;  %v8702_v22 = vld [vmem:[%s13220_s0 + $0x180] sm:$0xff]  ;;  %v8707_v63 = vld [vmem:[%s13220_s0 + $0x188] sm:$0xff]  ;;  %vm13719_vm0 = vmmov %vm13714_vm4 }
  0x41   :  { %13713 = vst [vmem:[#allocation45_spill] sm:$0xff] %v13712_v48  ;;  %v8695_v14 = vpack.c.bf16 %v1677_v49, %v1466_v61  ;;  %v467_v36 = vand.u32 15, %v141_v11  ;;  %v1425_v47 = vrot.slane %v8667_v33, 1  ;;  %v1426_v61 = vrot.slane %v8683_v42, 1  ;;  %v8752_v21 = vld [vmem:[%s13220_s0 + $0x198] sm:$0xff]  ;;  %vm13725_vm14 = vmmov %vm13714_vm4 }
  0x42   :  { %1950 = vrot.lane.b32.xlu1 %v8477_v4, %s7940_s13  ;;  %v1462_v4 = vsel %vm13714_vm4, %v1423_v24, %v1424_v51  ;;  %v13715_v11 = vpack.c.bf16 %v8444_v29, %v8439_v7  ;;  %v13716_v49 = vmov 0  ;;  %v481_v48 = vand.u32 15, %v143_v18 }
  0x43   :  { %vm8719_vm15 = vcmp.eq.s32.totalorder %v467_v36, 15  ;;  %v1461_v24 = vsel %vm13719_vm0, %v1424_v51, %v1425_v47  ;;  %v1427_v52 = vrot.slane %v8702_v22, 1  ;;  %v1428_v7 = vrot.slane %v8707_v63, 1  ;;  %v8734_v36 = vld [vmem:[%s13220_s0 + $0x190] sm:$0xff] }
  0x44   :  { %1860 = vrot.lane.b32.xlu0 %v13715_v11, %s7939_s21  ;;  %v13717_v49 = vsel %vm8719_vm15, 4294967295, %v13716_v49  ;;  %v1679_v17 = vsel %vm8719_vm15, 0.0, %v1463_v38  ;;  %v13720_v18 = vpack.c.bf16 %v8421_v58, %v8407_v43  ;;  %vm8742_vm0 = vcmp.eq.s32.totalorder %v481_v48, 15  ;;  %vm13724_vm15 = vmmov %vm13714_vm4 }
  0x45   :  { %13718 = vst [vmem:[#allocation46_spill] sm:$0xff] %v13717_v49  ;;  %v8740_v51 = vpack.c.bf16 %v1679_v17, %v1464_v34  ;;  %v13721_v38 = vmov 0  ;;  %v145_v25 = vadd.s32 376, %v8036_v16  ;;  %v1681_v49 = vsel %vm8742_vm0, 0.0, %v1461_v24  ;;  %v8771_v24 = vld [vmem:[%s13220_s0 + $0x1a0] sm:$0xff] }
  0x46   :  { %1858 = vrot.lane.b32.xlu1 %v13720_v18, %s7939_s21  ;;  %v13722_v38 = vsel %vm8742_vm0, 4294967295, %v13721_v38  ;;  %v1459_v17 = vsel %vm13714_vm4, %v1426_v61, %v1427_v52  ;;  %v1460_v48 = vsel %vm13724_vm15, %v1425_v47, %v1426_v61  ;;  %v147_v34 = vadd.s32 392, %v8036_v16  ;;  %v8776_v47 = vld [vmem:[%s13220_s0 + $0x1a8] sm:$0xff]  ;;  %vm13729_vm15 = vmmov %vm13714_vm4 }
  0x47   :  { %13723 = vst [vmem:[#allocation47_spill] sm:$0xff] %v13722_v38  ;;  %v8763_v18 = vpack.c.bf16 %v1681_v49, %v1462_v4  ;;  %v495_v11 = vand.u32 15, %v145_v25  ;;  %v1429_v29 = vrot.slane %v8734_v36, 1  ;;  %v1458_v38 = vsel %vm13725_vm14, %v1427_v52, %v1428_v7  ;;  %v8803_v25 = vld [vmem:[%s13220_s0 + $0x1b0] sm:$0xff] }
  0x48   :  { %1956 = vrot.lane.b32.xlu0 %v8561_v12, %s7940_s13  ;;  %v509_v61 = vand.u32 15, %v147_v34  ;;  %v1430_v4 = vrot.slane %v8752_v21, 1  ;;  %v13726_v52 = vmov 0  ;;  %v13730_v43 = vmov 0  ;;  %13733 = vst [vmem:[#allocation50_spill] sm:$0xff] %v8803_v25 }
  0x49   :  { %vm8784_vm14 = vcmp.eq.s32.totalorder %v495_v11, 15  ;;  %v1457_v49 = vsel %vm13729_vm15, %v1428_v7, %v1429_v29  ;;  %v1432_v11 = vrot.slane %v8776_v47, 1  ;;  %v13734_v7 = vpack.c.bf16 %v8512_v26, %v8507_v13 }
  0x4a   :  { %1954 = vrot.lane.b32.xlu1 %v8545_v32, %s7940_s13  ;;  %v13727_v52 = vsel %vm8784_vm14, 4294967295, %v13726_v52  ;;  %v1683_v12 = vsel %vm8784_vm14, 0.0, %v1459_v17  ;;  %vm8794_vm4 = vcmp.eq.s32.totalorder %v509_v61, 15  ;;  %v1431_v32 = vrot.slane %v8771_v24, 1  ;;  %vm13736_vm14 = vmmov %vm13729_vm15 }
  0x4b   :  { %13728 = vst [vmem:[#allocation48_spill] sm:$0xff] %v13727_v52  ;;  %v13731_v43 = vsel %vm8794_vm4, 4294967295, %v13730_v43  ;;  %v8809_v58 = vpack.c.bf16 %v1683_v12, %v1460_v48  ;;  %v1685_v17 = vsel %vm8794_vm4, 0.0, %v1457_v49  ;;  %v149_v34 = vadd.s32 408, %v8036_v16  ;;  %v8819_v52 = vld [vmem:[%s13220_s0 + $0x1b8] sm:$0xff]  ;;  %v8831_v49 = vld [vmem:[%s13220_s0 + $0x1c0] sm:$0xff] }
  0x4c   :  { %13732 = vst [vmem:[#allocation49_spill] sm:$0xff] %v13731_v43  ;;  %1864 = vrot.lane.b32.xlu0 %v13734_v7, %s7939_s21  ;;  %13735 = vst [vmem:[#allocation51_spill] sm:$0xff] %v8819_v52  ;;  %v8821_v59 = vpack.c.bf16 %v1685_v17, %v1458_v38  ;;  %v1455_v7 = vsel %vm13729_vm15, %v1430_v4, %v1431_v32  ;;  %v1456_v48 = vsel %vm13736_vm14, %v1429_v29, %v1430_v4  ;;  %v8844_v4 = vld [vmem:[%s13220_s0 + $0x1c8] sm:$0xff]  ;;  %v8877_v29 = vld [vmem:[%s13220_s0 + $0x1d0] sm:$0xff] }
  0x4d   :  { %v151_v12 = vadd.s32 424, %v8036_v16  ;;  %13737 = vst [vmem:[#allocation52_spill] sm:$0xff] %v8831_v49  ;;  %v13738_v61 = vpack.c.bf16 %v8489_v20, %v8475_v31  ;;  %v523_v38 = vand.u32 15, %v149_v34  ;;  %v1433_v17 = vrot.slane %v8803_v25, 1  ;;  %vm13739_vm15 = vmmov %vm13736_vm14  ;;  %v8863_v20 = vld [vmem:[%s13220_s0 + $0x1f8] sm:$0xff] }
  0x4e   :  { %v1454_v43 = vsel %vm13739_vm15, %v1431_v32, %v1432_v11  ;;  %13740 = vst [vmem:[#allocation53_spill] sm:$0xff] %v8844_v4  ;;  %v1434_v26 = vrot.slane %v8819_v52, 1  ;;  %v13741_v32 = vmov 0  ;;  %v166_v52 = vand.u32 15, %v8036_v16  ;;  %vm13759_vm13 = vmmov %vm13739_vm15 }
  0x4f   :  { %1862 = vrot.lane.b32.xlu1 %v13738_v61, %s7939_s21  ;;  %v537_v13 = vand.u32 15, %v151_v12  ;;  %vm8852_vm14 = vcmp.eq.s32.totalorder %v523_v38, 15  ;;  %v1453_v61 = vsel %vm13739_vm15, %v1432_v11, %v1433_v17  ;;  %v1435_v12 = vrot.slane %v8831_v49, 1 }
  0x50   :  { %1960 = vrot.lane.b32.xlu0 %v8628_v41, %s7940_s13  ;;  %v13742_v32 = vsel %vm8852_vm14, 4294967295, %v13741_v32  ;;  %v1687_v34 = vsel %vm8852_vm14, 0.0, %v1455_v7  ;;  %v13744_v41 = vmov 0  ;;  %v1436_v38 = vrot.slane %v8844_v4, 1  ;;  %vm13747_vm14 = vmmov %vm13739_vm15 }
  0x51   :  { %13743 = vst [vmem:[#allocation54_spill] sm:$0xff] %v13742_v32  ;;  %vm8867_vm4 = vcmp.eq.s32.totalorder %v537_v13, 15  ;;  %v8881_v31 = vpack.c.bf16 %v1687_v34, %v1456_v48  ;;  %v153_v7 = vadd.s32 440, %v8036_v16  ;;  %v1451_v32 = vsel %vm13739_vm15, %v1434_v26, %v1435_v12 }
  0x52   :  { %v13745_v41 = vsel %vm8867_vm4, 4294967295, %v13744_v41  ;;  %v1689_v13 = vsel %vm8867_vm4, 0.0, %v1453_v61  ;;  %v1452_v11 = vsel %vm13747_vm14, %v1433_v17, %v1434_v26  ;;  %v13365_v49 = vrot.slane %v8863_v20, 7  ;;  %v8904_v26 = vld [vmem:[%s13220_s0 + $0x1d8] sm:$0xff] }
  0x53   :  { %13746 = vst [vmem:[#allocation55_spill] sm:$0xff] %v13745_v41  ;;  %1958 = vrot.lane.b32.xlu1 %v8617_v46, %s7940_s13  ;;  %v8888_v25 = vpack.c.bf16 %v1689_v13, %v1454_v43  ;;  %v13748_v46 = vpack.c.bf16 %v8580_v19, %v8571_v28  ;;  %v551_v48 = vand.u32 15, %v153_v7  ;;  %vm13374_vm4 = vcmp.lt.s32.totalorder %v8036_v16, 1 }
  0x54   :  { %v155_v34 = vadd.s32 456, %v8036_v16  ;;  %v1437_v43 = vrot.slane %v8877_v29, 1  ;;  %vm8906_vm14 = vcmp.eq.s32.totalorder %v166_v52, 0  ;;  %v13749_v17 = vmov 0 }
  0x55   :  { %1868 = vrot.lane.b32.xlu0 %v13748_v46, %s7939_s21  ;;  %v13750_v17 = vsel %vm8906_vm14, 4294967295, %v13749_v17  ;;  %v13752_v61 = vrot.slane %v8002_v2, 7  ;;  %v13753_v13 = vrot.slane %v7997_v1, 7  ;;  %v1450_v52 = vsel %vm13739_vm15, %v1435_v12, %v1436_v38 }
  0x56   :  { %13751 = vst [vmem:[#allocation56_spill] sm:$0xff] %v13750_v17  ;;  %v13755_v28 = vpack.c.bf16 %v8555_v60, %v8543_v37  ;;  %vm8928_vm0 = vcmp.eq.s32.totalorder %v551_v48, 15  ;;  %v13756_v19 = vmov 0  ;;  %v1449_v4 = vsel %vm13759_vm13, %v1436_v38, %v1437_v43  ;;  %v8945_v48 = vld [vmem:[%s13220_s0 + $0x1e0] sm:$0xff] }
  0x57   :  { %v1185_v7 = vsel %vm13374_vm4, %v13753_v13, %v13752_v61  ;;  %v13754_v46 = vmov %v13753_v13  ;;  %v13757_v19 = vsel %vm8928_vm0, 4294967295, %v13756_v19  ;;  %v565_v13 = vand.u32 15, %v155_v34 }
  0x58   :  { %v1186_v41 = vsel %vm13374_vm4, %v13365_v49, %v13754_v46  ;;  %1866 = vrot.lane.b32.xlu1 %v13755_v28, %s7939_s21  ;;  %13758 = vst [vmem:[#allocation57_spill] sm:$0xff] %v13757_v19  ;;  %v1691_v46 = vsel %vm8928_vm0, 0.0, %v1451_v32  ;;  %v1438_v28 = vrot.slane %v8904_v26, 1  ;;  %v13760_v38 = vmov 0 }
  0x59   :  { %v1315_v61 = vsel %vm8906_vm14, 0.0, %v1186_v41  ;;  %1964 = vrot.lane.b32.xlu0 %v8695_v14, %s7940_s13  ;;  %v8949_v41 = vpack.c.bf16 %v1691_v46, %v1452_v11  ;;  %vm8951_vm13 = vcmp.eq.s32.totalorder %v565_v13, 15  ;;  %v100_v34 = vadd.s32 16, %v8036_v16 }
  0x5a   :  { %v8938_v12 = vpack.c.bf16 %v1185_v7, %v1315_v61  ;;  %v13761_v38 = vsel %vm8951_vm13, 4294967295, %v13760_v38  ;;  %v8961_v7 = vld [vmem:[%s13220_s0 + $0x1e8] sm:$0xff]  ;;  %v1693_v61 = vsel %vm8951_vm13, 0.0, %v1449_v4  ;;  %v13763_v14 = vrot.slane %v8017_v8, 7  ;;  %vm13771_vm13 = vmmov %vm13739_vm15 }
  0x5b   :  { %13762 = vst [vmem:[#allocation58_spill] sm:$0xff] %v13761_v38  ;;  %v13764_v11 = vrot.slane %v8007_v3, 7  ;;  %v13766_v49 = vrot.slane %v8002_v2, 7  ;;  %v8980_v4 = vpack.c.bf16 %v1693_v61, %v1450_v52  ;;  %v180_v38 = vand.u32 15, %v100_v34 }
  0x5c   :  { %1962 = vrot.lane.b32.xlu1 %v8685_v6, %s7940_s13  ;;  %v1439_v60 = vrot.slane %v8945_v48, 1  ;;  %v157_v3 = vadd.s32 472, %v8036_v16  ;;  %v8993_v6 = vld [vmem:[%s13220_s0 + $0x1f0] sm:$0xff]  ;;  %v13767_v52 = vpack.c.bf16 %v8642_v54, %v8637_v57  ;;  %v13768_v34 = vmov 0 }
  0x5d   :  { %v1183_v13 = vsel %vm13374_vm4, %v13764_v11, %v13763_v14  ;;  %v13765_v46 = vmov %v13764_v11  ;;  %v1440_v14 = vrot.slane %v8961_v7, 1  ;;  %vm13772_vm0 = vcmask 1043456  }
  0x5e   :  { %v1184_v32 = vsel %vm13374_vm4, %v13766_v49, %v13765_v46  ;;  %v1448_v49 = vsel %vm13739_vm15, %v1437_v43, %v1438_v28  ;;  %1872 = vrot.lane.b32.xlu0 %v13767_v52, %s7939_s21  ;;  %vm8999_vm4 = vcmp.eq.s32.totalorder %v180_v38, 0  ;;  %v1447_v61 = vsel %vm13771_vm13, %v1438_v28, %v1439_v60 }
  0x5f   :  { %v13769_v34 = vsel %vm8999_vm4, 4294967295, %v13768_v34  ;;  %v2236_v43 = vsel %vm13772_vm0, %v8251_v62, 0  ;;  %v102_v11 = vadd.s32 32, %v8036_v16  ;;  %v1317_v46 = vsel %vm8999_vm4, 0.0, %v1184_v32 }
  0x60   :  { %13770 = vst [vmem:[#allocation59_spill] sm:$0xff] %v13769_v34  ;;  %v579_v19 = vand.u32 15, %v157_v3  ;;  %7491 = vmatpush3.bf16.msra.mxu0 %v2236_v43  ;;  %v13773_v17 = vrot.slane %v8027_v10, 7  ;;  %v13774_v38 = vrot.slane %v8022_v9, 7  ;;  %vm13775_vm15 = vcmp.lt.s32.totalorder %v8036_v16, 1 }
  0x61   :  { %v13777_v28 = vrot.slane %v8017_v8, 7  ;;  %vm13778_vm0 = vmmov %vm13775_vm15  ;;  %v13779_v32 = vpack.c.bf16 %v8615_v40, %v8599_v39  ;;  %v9026_v3 = vpack.c.bf16 %v1183_v13, %v1317_v46  ;;  %v194_v43 = vand.u32 15, %v102_v11 }
  0x62   :  { %v1181_v52 = vsel %vm13775_vm15, %v13774_v38, %v13773_v17  ;;  %v13776_v2 = vmov %v13774_v38  ;;  %v159_v34 = vadd.s32 488, %v8036_v16  ;;  %v1441_v57 = vrot.slane %v8993_v6, 1  ;;  %1968 = vrot.lane.b32.xlu0 %v8763_v18, %s7940_s13 }
  0x63   :  { %v1182_v62 = vsel %vm13778_vm0, %v13777_v28, %v13776_v2  ;;  %1870 = vrot.lane.b32.xlu1 %v13779_v32, %s7939_s21  ;;  %vm9030_vm13 = vcmp.eq.s32.totalorder %v579_v19, 15  ;;  %v13780_v17 = vmov 0  ;;  %vm13783_vm15 = vcmp.lt.s32.totalorder %v8036_v16, 7 }
  0x64   :  { %v13781_v17 = vsel %vm9030_vm13, 4294967295, %v13780_v17  ;;  %v1446_v8 = vsel %vm13783_vm15, %v1439_v60, %v1440_v14  ;;  %v104_v2 = vadd.s32 48, %v8036_v16  ;;  %v1695_v13 = vsel %vm9030_vm13, 0.0, %v1447_v61  ;;  %vm13787_vm14 = vmmov %vm13783_vm15 }
  0x65   :  { %13782 = vst [vmem:[#allocation60_spill] sm:$0xff] %v13781_v17  ;;  %vm9043_vm0 = vcmp.eq.s32.totalorder %v194_v43, 0  ;;  %v13784_v11 = vmov 0  ;;  %v593_v19 = vand.u32 15, %v159_v34  ;;  %v1445_v46 = vsel %vm13787_vm14, %v1440_v14, %v1441_v57  ;;  %v13873_v17 = vld [vmem:[#allocation52_spill] sm:$0xff] }
  0x66   :  { %v13785_v11 = vsel %vm9043_vm0, 4294967295, %v13784_v11  ;;  %v9049_v60 = vpack.c.bf16 %v1695_v13, %v1448_v49  ;;  %v1319_v38 = vsel %vm9043_vm0, 0.0, %v1182_v62  ;;  %v208_v28 = vand.u32 15, %v104_v2 }
  0x67   :  { %13786 = vst [vmem:[#allocation61_spill] sm:$0xff] %v13785_v11  ;;  %v1064_v32 = vrot.slane %v8048_v23, 7  ;;  %1966 = vrot.lane.b32.xlu1 %v8740_v51, %s7940_s13  ;;  %v9056_v18 = vpack.c.bf16 %v1181_v52, %v1319_v38  ;;  %vm9058_vm15 = vcmp.eq.s32.totalorder %v593_v19, 15  ;;  %v13788_v61 = vmov 0 }
  0x68   :  { %v13789_v61 = vsel %vm9058_vm15, 4294967295, %v13788_v61  ;;  %v161_v34 = vadd.s32 504, %v8036_v16  ;;  %v1442_v14 = vrot.slane %v8863_v20, 1  ;;  %v1697_v49 = vsel %vm9058_vm15, 0.0, %v1445_v46 }
  0x69   :  { %13790 = vst [vmem:[#allocation62_spill] sm:$0xff] %v13789_v61  ;;  %vm9066_vm14 = vcmp.eq.s32.totalorder %v208_v28, 0  ;;  %v13791_v62 = vmov 0  ;;  %v13794_v23 = vrot.slane %v8057_v27, 7  ;;  %vm13795_vm13 = vcmp.lt.s32.totalorder %v8036_v16, 1  ;;  %v13872_v61 = vld [vmem:[#allocation53_spill] sm:$0xff] }
  0x6a   :  { %v13792_v62 = vsel %vm9066_vm14, 4294967295, %v13791_v62  ;;  %v13796_v52 = vrot.slane %v8027_v10, 7  ;;  %vm13797_vm12 = vmmov %vm13795_vm13  ;;  %v13798_v2 = vpack.c.bf16 %v8707_v63, %v8702_v22  ;;  %v9082_v13 = vpack.c.bf16 %v1697_v49, %v1446_v8 }
  0x6b   :  { %13793 = vst [vmem:[#allocation63_spill] sm:$0xff] %v13792_v62  ;;  %v1179_v51 = vsel %vm13795_vm13, %v1064_v32, %v13794_v23  ;;  %v607_v46 = vand.u32 15, %v161_v34  ;;  %vm13799_vm15 = vcmp.lt.s32.totalorder %v8036_v16, 7  ;;  %v13800_v10 = vrot.slane %v7997_v1, 1 }
  0x6c   :  { %v1180_v43 = vsel %vm13797_vm12, %v13796_v52, %v1064_v32  ;;  %1876 = vrot.lane.b32.xlu0 %v13798_v2, %s7939_s21  ;;  %v1444_v38 = vsel %vm13799_vm15, %v1441_v57, %v1442_v14  ;;  %vm13801_vm12 = vmmov %vm13799_vm15  ;;  %v106_v23 = vadd.s32 64, %v8036_v16  ;;  %v13802_v52 = vrot.slane %v8099_v45, 7 }
  0x6d   :  { %v1321_v19 = vsel %vm9066_vm14, 0.0, %v1180_v43  ;;  %v1507_v32 = vsel %vm13801_vm12, %v1442_v14, %v13800_v10  ;;  %v13803_v8 = vrot.slane %v8094_v44, 7  ;;  %v13804_v57 = vpack.c.bf16 %v8683_v42, %v8667_v33  ;;  %vm13810_vm12 = vmmov %vm13795_vm13 }
  0x6e   :  { %v9088_v28 = vpack.c.bf16 %v1179_v51, %v1321_v19  ;;  %vm9105_vm15 = vcmp.eq.s32.totalorder %v607_v46, 15  ;;  %v13805_v34 = vmov 0  ;;  %v13809_v14 = vrot.slane %v8057_v27, 7 }
  0x6f   :  { %v1177_v49 = vsel %vm13795_vm13, %v13803_v8, %v13802_v52  ;;  %1874 = vrot.lane.b32.xlu1 %v13804_v57, %s7939_s21  ;;  %v13806_v34 = vsel %vm9105_vm15, 4294967295, %v13805_v34  ;;  %v13808_v1 = vmov %v13803_v8  ;;  %v108_v43 = vadd.s32 80, %v8036_v16  ;;  %vm13813_vm13 = vmmov %vm13810_vm12 }
  0x70   :  { %13807 = vst [vmem:[#allocation64_spill] sm:$0xff] %v13806_v34  ;;  %v1178_v51 = vsel %vm13810_vm12, %v13809_v14, %v13808_v1  ;;  %v1068_v2 = vrot.slane %v8111_v50, 7  ;;  %v1699_v19 = vsel %vm9105_vm15, 0.0, %v1507_v32  ;;  %v222_v10 = vand.u32 15, %v106_v23  ;;  %1972 = vrot.lane.b32.xlu0 %v8821_v59, %s7940_s13  ;;  %vm13816_vm15 = vmmov %vm13810_vm12 }
  0x71   :  { %v110_v46 = vadd.s32 96, %v8036_v16  ;;  %v13811_v52 = vrot.slane %v8139_v5, 7  ;;  %v13812_v8 = vrot.slane %v8134_v0, 7  ;;  %v9128_v44 = vpack.c.bf16 %v1699_v19, %v1444_v38 }
  0x72   :  { %v236_v57 = vand.u32 15, %v108_v43  ;;  %v13814_v50 = vrot.slane %v8118_v55, 7  ;;  %v13815_v23 = vrot.slane %v8099_v45, 7  ;;  %vm9138_vm11 = vcmp.eq.s32.totalorder %v222_v10, 0 }
  0x73   :  { %v1173_v27 = vsel %vm13813_vm13, %v13812_v8, %v13811_v52  ;;  %v13817_v14 = vmov 0  ;;  %v250_v52 = vand.u32 15, %v110_v46  ;;  %v13820_v59 = vmov %v13812_v8  ;;  %vm13822_vm13 = vmmov %vm13810_vm12  ;;  %1970 = vrot.lane.b32.xlu1 %v8809_v58, %s7940_s13 }
  0x74   :  { %v1175_v32 = vsel %vm13810_vm12, %v1068_v2, %v13814_v50  ;;  %v1176_v1 = vsel %vm13816_vm15, %v13815_v23, %v1068_v2  ;;  %v13818_v14 = vsel %vm9138_vm11, 4294967295, %v13817_v14  ;;  %v13821_v38 = vmov %v13814_v50  ;;  %vm13831_vm10 = vmmov %vm13822_vm13 }
  0x75   :  { %13819 = vst [vmem:[#allocation65_spill] sm:$0xff] %v13818_v14  ;;  %v1174_v43 = vsel %vm13822_vm13, %v13821_v38, %v13820_v59  ;;  %v112_v19 = vadd.s32 112, %v8036_v16  ;;  %v1323_v45 = vsel %vm9138_vm11, 0.0, %v1178_v51  ;;  %vm9153_vm15 = vcmp.eq.s32.totalorder %v236_v57, 0  ;;  %vm13833_vm9 = vmmov %vm13831_vm10 }
  0x76   :  { %v13823_v2 = vmov 0  ;;  %v1072_v10 = vrot.slane %v8162_v30, 7  ;;  %v114_v0 = vadd.s32 128, %v8036_v16  ;;  %v9159_v55 = vpack.c.bf16 %v1177_v49, %v1323_v45  ;;  %vm13839_vm13 = vmmov %vm13833_vm9 }
  0x77   :  { %v13824_v2 = vsel %vm9153_vm15, 4294967295, %v13823_v2  ;;  %v1325_v46 = vsel %vm9153_vm15, 0.0, %v1176_v1  ;;  %vm9163_vm12 = vcmp.eq.s32.totalorder %v250_v52, 0  ;;  %v13826_v8 = vmov 0 }
  0x78   :  { %13825 = vst [vmem:[#allocation66_spill] sm:$0xff] %v13824_v2  ;;  %v13827_v8 = vsel %vm9163_vm12, 4294967295, %v13826_v8  ;;  %v264_v58 = vand.u32 15, %v112_v19  ;;  %v13829_v51 = vpack.c.bf16 %v8776_v47, %v8771_v24  ;;  %v9171_v57 = vpack.c.bf16 %v1175_v32, %v1325_v46 }
  0x79   :  { %13828 = vst [vmem:[#allocation67_spill] sm:$0xff] %v13827_v8  ;;  %v1327_v30 = vsel %vm9163_vm12, 0.0, %v1174_v43  ;;  %v13830_v49 = vrot.slane %v8177_v35, 7  ;;  %v13832_v23 = vrot.slane %v8139_v5, 7  ;;  %v13834_v59 = vmov 0  ;;  %v13894_v8 = vld [vmem:[#allocation21_spill] sm:$0xff] }
  0x7a   :  { %1880 = vrot.lane.b32.xlu0 %v13829_v51, %s7939_s21  ;;  %v9183_v52 = vpack.c.bf16 %v1173_v27, %v1327_v30  ;;  %vm9185_vm8 = vcmp.eq.s32.totalorder %v264_v58, 0  ;;  %v278_v32 = vand.u32 15, %v114_v0  ;;  %v13837_v38 = vrot.slane %v8196_v56, 7 }
  0x7b   :  { %v1171_v50 = vsel %vm13831_vm10, %v1072_v10, %v13830_v49  ;;  %v1172_v1 = vsel %vm13833_vm9, %v13832_v23, %v1072_v10  ;;  %v13835_v59 = vsel %vm9185_vm8, 4294967295, %v13834_v59  ;;  %v13838_v43 = vrot.slane %v8191_v53, 7  ;;  %v13846_v23 = vld [vmem:[#allocation11_spill] sm:$0xff]  ;;  %v13848_v53 = vld [vmem:[#allocation10_spill] sm:$0xff] }
  0x7c   :  { %13836 = vst [vmem:[#allocation68_spill] sm:$0xff] %v13835_v59  ;;  %v13840_v5 = vpack.c.bf16 %v8752_v21, %v8734_v36  ;;  %v1329_v27 = vsel %vm9185_vm8, 0.0, %v1172_v1  ;;  %v13842_v10 = vmov %v13830_v49  ;;  %v116_v46 = vadd.s32 144, %v8036_v16  ;;  %vm13854_vm8 = vmmov %vm13833_vm9 }
  0x7d   :  { %v1169_v19 = vsel %vm13839_vm13, %v13838_v43, %v13837_v38  ;;  %v13841_v45 = vmov %v13838_v43  ;;  %v1076_v58 = vrot.slane %v8218_v15, 7  ;;  %v9209_v51 = vpack.c.bf16 %v1171_v50, %v1329_v27  ;;  %vm13850_vm13 = vmmov %vm13833_vm9 }
  0x7e   :  { %1878 = vrot.lane.b32.xlu1 %v13840_v5, %s7939_s21  ;;  %v1170_v0 = vsel %vm13833_vm9, %v13842_v10, %v13841_v45  ;;  %vm9211_vm10 = vcmp.eq.s32.totalorder %v278_v32, 0  ;;  %v13843_v30 = vmov 0  ;;  %v118_v49 = vadd.s32 160, %v8036_v16  ;;  %1976 = vrot.lane.b32.xlu0 %v8888_v25, %s7940_s13  ;;  %v13851_v32 = vld [vmem:[#allocation8_spill] sm:$0xff] }
  0x7f   :  { %v13844_v30 = vsel %vm9211_vm10, 4294967295, %v13843_v30  ;;  %v13847_v1 = vrot.slane %v13846_v23, 7  ;;  %v13849_v38 = vrot.slane %v13848_v53, 7  ;;  %v1331_v15 = vsel %vm9211_vm10, 0.0, %v1170_v0  ;;  %vm13871_vm10 = vmmov %vm13854_vm8 }
  0x80   :  { %13845 = vst [vmem:[#allocation69_spill] sm:$0xff] %v13844_v30  ;;  %v292_v50 = vand.u32 15, %v116_v46  ;;  %v13852_v43 = vrot.slane %v13851_v32, 7  ;;  %v13853_v27 = vrot.slane %v8196_v56, 7  ;;  %v9234_v10 = vpack.c.bf16 %v1169_v19, %v1331_v15  ;;  %v13861_v15 = vld [vmem:[#allocation17_spill] sm:$0xff] }
  0x81   :  { %v1165_v35 = vsel %vm13850_vm13, %v13849_v38, %v13847_v1  ;;  %v306_v1 = vand.u32 15, %v118_v49  ;;  %vm13856_vm13 = vmmov %vm13854_vm8  ;;  %v120_v46 = vadd.s32 176, %v8036_v16  ;;  %v13857_v56 = vmov 0 }
  0x82   :  { %v1167_v5 = vsel %vm13833_vm9, %v1076_v58, %v13852_v43  ;;  %v1168_v45 = vsel %vm13854_vm8, %v13853_v27, %v1076_v58  ;;  %v13855_v25 = vmov %v13852_v43  ;;  %1974 = vrot.lane.b32.xlu1 %v8881_v31, %s7940_s13  ;;  %vm9245_vm9 = vcmp.eq.s32.totalorder %v292_v50, 0  ;;  %v13860_v58 = vld [vmem:[#allocation14_spill] sm:$0xff]  ;;  %v13863_v43 = vld [vmem:[#allocation16_spill] sm:$0xff] }
  0x83   :  { %v1166_v0 = vsel %vm13856_vm13, %v13855_v25, %v13849_v38  ;;  %v13858_v56 = vsel %vm9245_vm9, 4294967295, %v13857_v56  ;;  %v1080_v19 = vrot.slane %v13860_v58, 7  ;;  %v122_v49 = vadd.s32 192, %v8036_v16  ;;  %v13869_v58 = vld [vmem:[#allocation15_spill] sm:$0xff] }
  0x84   :  { %13859 = vst [vmem:[#allocation11_spill] sm:$0xff] %v13858_v56  ;;  %v13862_v53 = vrot.slane %v13861_v15, 7  ;;  %v13864_v32 = vrot.slane %v13863_v43, 7  ;;  %v1333_v38 = vsel %vm9245_vm9, 0.0, %v1168_v45  ;;  %vm9259_vm13 = vcmp.eq.s32.totalorder %v306_v1, 0  ;;  %vm13877_vm9 = vmmov %vm13854_vm8 }
  0x85   :  { %v13865_v31 = vmov 0  ;;  %v320_v50 = vand.u32 15, %v120_v46  ;;  %v13870_v9 = vrot.slane %v13869_v58, 7  ;;  %v13874_v30 = vpack.c.bf16 %v13872_v61, %v13873_v17 }
  0x86   :  { %v1161_v27 = vsel %vm13854_vm8, %v13864_v32, %v13862_v53  ;;  %v13866_v31 = vsel %vm9259_vm13, 4294967295, %v13865_v31  ;;  %v13868_v25 = vmov %v13864_v32  ;;  %v9273_v53 = vpack.c.bf16 %v1167_v5, %v1333_v38  ;;  %v13882_v38 = vld [vmem:[#allocation50_spill] sm:$0xff] }
  0x87   :  { %13867 = vst [vmem:[#allocation10_spill] sm:$0xff] %v13866_v31  ;;  %v1162_v34 = vsel %vm13871_vm10, %v13870_v9, %v13868_v25  ;;  %1884 = vrot.lane.b32.xlu0 %v13874_v30, %s7939_s21  ;;  %v1335_v45 = vsel %vm9259_vm13, 0.0, %v1166_v0  ;;  %v13875_v1 = vmov %v13870_v9  ;;  %v13876_v43 = vrot.slane %v13846_v23, 7  ;;  %v13881_v0 = vld [vmem:[#allocation51_spill] sm:$0xff]  ;;  %v13887_v31 = vld [vmem:[#allocation22_spill] sm:$0xff] }
  0x88   :  { %v1163_v46 = vsel %vm13854_vm8, %v1080_v19, %v13875_v1  ;;  %v9285_v32 = vpack.c.bf16 %v1165_v35, %v1335_v45  ;;  %vm9287_vm10 = vcmp.eq.s32.totalorder %v320_v50, 0  ;;  %v13878_v25 = vmov 0  ;;  %v1829_v1 = vpop.permute.xlu0 %1828  ;;  %v13885_v45 = vld [vmem:[#allocation23_spill] sm:$0xff] }
  0x89   :  { %v1164_v9 = vsel %vm13877_vm9, %v13876_v43, %v1080_v19  ;;  %v13879_v25 = vsel %vm9287_vm10, 4294967295, %v13878_v25  ;;  %v334_v30 = vand.u32 15, %v122_v49  ;;  %v124_v5 = vadd.s32 208, %v8036_v16  ;;  %v13884_v19 = vld [vmem:[#allocation19_spill] sm:$0xff]  ;;  %vm13889_vm9 = vmmov %vm13854_vm8 }
  0x8a   :  { %13880 = vst [vmem:[#allocation8_spill] sm:$0xff] %v13879_v25  ;;  %v13883_v58 = vpack.c.bf16 %v13881_v0, %v13882_v38  ;;  %v1337_v23 = vsel %vm9287_vm10, 0.0, %v1164_v9  ;;  %v1084_v35 = vrot.slane %v13884_v19, 7  ;;  %v126_v50 = vadd.s32 224, %v8036_v16 }
  0x8b   :  { %v13886_v43 = vrot.slane %v13885_v45, 7  ;;  %v13888_v49 = vrot.slane %v13887_v31, 7  ;;  %vm13890_vm13 = vcmask 64512   ;;  %vm9310_vm8 = vcmp.eq.s32.totalorder %v334_v30, 0  ;;  %1980 = vrot.lane.b32.xlu0 %v8980_v4, %s7940_s13 }
  0x8c   :  { %1882 = vrot.lane.b32.xlu1 %v13883_v58, %s7939_s21  ;;  %v1991_v59 = vsel %vm13890_vm13, %v8938_v12, %v1829_v1  ;;  %v9308_v58 = vpack.c.bf16 %v1163_v46, %v1337_v23  ;;  %v13891_v25 = vmov 0  ;;  %v348_v9 = vand.u32 15, %v124_v5  ;;  %vm13897_vm13 = vmmov %vm13889_vm9 }
  0x8d   :  { %v1157_v56 = vsel %vm13889_vm9, %v13888_v49, %v13886_v43  ;;  %v13892_v25 = vsel %vm9310_vm8, 4294967295, %v13891_v25  ;;  %v1339_v19 = vsel %vm9310_vm8, 0.0, %v1162_v34  ;;  %v13895_v2 = vrot.slane %v13894_v8, 7  ;;  %vm13903_vm8 = vmmov %vm13889_vm9 }
  0x8e   :  { %13893 = vst [vmem:[#allocation14_spill] sm:$0xff] %v13892_v25  ;;  %v13896_v12 = vrot.slane %v13861_v15, 7  ;;  %v362_v30 = vand.u32 15, %v126_v50  ;;  %v9326_v1 = vpack.c.bf16 %v1161_v27, %v1339_v19  ;;  %vm9328_vm12 = vcmp.eq.s32.totalorder %v348_v9, 0  ;;  %v1831_v15 = vpop.permute.xlu0 %1830  ;;  %v13907_v50 = vld [vmem:[#allocation25_spill] sm:$0xff]  ;;  %vm13941_vm10 = vmmov %vm13903_vm8 }
  0x8f   :  { %v1159_v43 = vsel %vm13889_vm9, %v1084_v35, %v13895_v2  ;;  %v13898_v5 = vmov 0  ;;  %v13901_v4 = vmov %v13888_v49  ;;  %v13902_v34 = vmov %v13895_v2 }
  0x90   :  { %v1160_v46 = vsel %vm13897_vm13, %v13896_v12, %v1084_v35  ;;  %v13899_v5 = vsel %vm9328_vm12, 4294967295, %v13898_v5  ;;  %v1158_v23 = vsel %vm13903_vm8, %v13902_v34, %v13901_v4  ;;  %v128_v2 = vadd.s32 240, %v8036_v16  ;;  %1978 = vrot.lane.b32.xlu1 %v8949_v41, %s7940_s13 }
  0x91   :  { %13900 = vst [vmem:[#allocation17_spill] sm:$0xff] %v13899_v5  ;;  %v1341_v27 = vsel %vm9328_vm12, 0.0, %v1160_v46  ;;  %vm9343_vm9 = vcmp.eq.s32.totalorder %v362_v30, 0  ;;  %v13904_v35 = vmov 0  ;;  %v1088_v31 = vrot.slane %v13907_v50, 7  ;;  %v13910_v30 = vld [vmem:[#allocation27_spill] sm:$0xff]  ;;  %vm13921_vm12 = vmmov %vm13903_vm8  ;;  %v1925_v5 = vpop.permute.xlu1 %1924 }
  0x92   :  { %v13905_v35 = vsel %vm9343_vm9, 4294967295, %v13904_v35  ;;  %v130_v8 = vadd.s32 256, %v8036_v16  ;;  %vm13908_vm13 = vcmask 64512   ;;  %v9351_v9 = vpack.c.bf16 %v1159_v43, %v1341_v27  ;;  %v13919_v50 = vld [vmem:[#allocation28_spill] sm:$0xff] }
  0x93   :  { %13906 = vst [vmem:[#allocation16_spill] sm:$0xff] %v13905_v35  ;;  %v1994_v49 = vsel %vm13908_vm13, %v9026_v3, %v1831_v15  ;;  %v1343_v41 = vsel %vm9343_vm9, 0.0, %v1158_v23  ;;  %v376_v19 = vand.u32 15, %v128_v2  ;;  %v13909_v12 = vpack.c.bf16 %v8961_v7, %v8945_v48  ;;  %vm13913_vm13 = vmmov %vm13903_vm8  ;;  %v13917_v2 = vld [vmem:[#allocation29_spill] sm:$0xff] }
  0x94   :  { %v9359_v46 = vpack.c.bf16 %v1157_v56, %v1343_v41  ;;  %v13911_v4 = vrot.slane %v13910_v30, 7  ;;  %v13912_v3 = vrot.slane %v13885_v45, 7  ;;  %v390_v15 = vand.u32 15, %v130_v8 }
  0x95   :  { %1888 = vrot.lane.b32.xlu0 %v13909_v12, %s7939_s21  ;;  %vm9369_vm9 = vcmp.eq.s32.totalorder %v376_v19, 0  ;;  %v13914_v23 = vmov 0  ;;  %v13918_v27 = vrot.slane %v13917_v2, 7  ;;  %v13920_v56 = vrot.slane %v13919_v50, 7  ;;  %v1833_v19 = vpop.permute.xlu0 %1832  ;;  %v13927_v50 = vld [vmem:[#allocation31_spill] sm:$0xff] }
  0x96   :  { %v1155_v34 = vsel %vm13903_vm8, %v1088_v31, %v13911_v4  ;;  %v1156_v43 = vsel %vm13913_vm13, %v13912_v3, %v1088_v31  ;;  %v13915_v23 = vsel %vm9369_vm9, 4294967295, %v13914_v23  ;;  %v132_v31 = vadd.s32 272, %v8036_v16 }
  0x97   :  { %13916 = vst [vmem:[#allocation15_spill] sm:$0xff] %v13915_v23  ;;  %v1153_v41 = vsel %vm13921_vm12, %v13920_v56, %v13918_v27  ;;  %v13922_v12 = vmov %v13920_v56  ;;  %v13923_v8 = vpack.c.bf16 %v8904_v26, %v8877_v29  ;;  %v1345_v3 = vsel %vm9369_vm9, 0.0, %v1156_v43 }
  0x98   :  { %v1154_v45 = vsel %vm13903_vm8, %v13911_v4, %v13922_v12  ;;  %vm9392_vm13 = vcmp.eq.s32.totalorder %v390_v15, 0  ;;  %v13924_v27 = vmov 0  ;;  %v1092_v30 = vrot.slane %v13927_v50, 7  ;;  %v13929_v15 = vld [vmem:[#allocation33_spill] sm:$0xff] }
  0x99   :  { %1886 = vrot.lane.b32.xlu1 %v13923_v8, %s7939_s21  ;;  %v13925_v27 = vsel %vm9392_vm13, 4294967295, %v13924_v27  ;;  %v134_v56 = vadd.s32 288, %v8036_v16  ;;  %vm13928_vm12 = vcmask 64512   ;;  %v9400_v4 = vpack.c.bf16 %v1155_v34, %v1345_v3  ;;  %1984 = vrot.lane.b32.xlu0 %v9082_v13, %s7940_s13  ;;  %v13937_v13 = vld [vmem:[#allocation35_spill] sm:$0xff] }
  0x9a   :  { %13926 = vst [vmem:[#allocation53_spill] sm:$0xff] %v13925_v27  ;;  %v1997_v12 = vsel %vm13928_vm12, %v9056_v18, %v1833_v19  ;;  %v1347_v8 = vsel %vm9392_vm13, 0.0, %v1154_v45  ;;  %v404_v35 = vand.u32 15, %v132_v31  ;;  %v13930_v23 = vrot.slane %v13929_v15, 7  ;;  %vm13932_vm12 = vmmov %vm13903_vm8  ;;  %v13939_v19 = vld [vmem:[#allocation34_spill] sm:$0xff] }
  0x9b   :  { %v9406_v43 = vpack.c.bf16 %v1153_v41, %v1347_v8  ;;  %v13931_v25 = vrot.slane %v13917_v2, 7  ;;  %v418_v34 = vand.u32 15, %v134_v56  ;;  %vm13933_vm9 = vcmask 130048  }
  0x9c   :  { %v1151_v50 = vsel %vm13903_vm8, %v1092_v30, %v13930_v23  ;;  %v2087_v45 = vsel %vm13933_vm9, %v1991_v59, %v1925_v5  ;;  %vm9417_vm13 = vcmp.eq.s32.totalorder %v404_v35, 0  ;;  %v13934_v31 = vmov 0  ;;  %v1929_v59 = vpop.permute.xlu0 %1928 }
  0x9d   :  { %v1152_v18 = vsel %vm13932_vm12, %v13931_v25, %v1092_v30  ;;  %v13935_v31 = vsel %vm9417_vm13, 4294967295, %v13934_v31  ;;  %v13938_v41 = vrot.slane %v13937_v13, 7  ;;  %v13940_v3 = vrot.slane %v13939_v19, 7  ;;  %1982 = vrot.lane.b32.xlu1 %v9049_v60, %s7940_s13  ;;  %v1927_v19 = vpop.permute.xlu1 %1926 }
  0x9e   :  { %13936 = vst [vmem:[#allocation52_spill] sm:$0xff] %v13935_v31  ;;  %v13943_v2 = vrot.slane %v13929_v15, 7  ;;  %vm13944_vm9 = vcmask 195584   ;;  %v1349_v5 = vsel %vm9417_vm13, 0.0, %v1152_v18  ;;  %vm9438_vm12 = vcmp.eq.s32.totalorder %v418_v34, 0  ;;  %v13949_v34 = vld [vmem:[#allocation38_spill] sm:$0xff] }
  0x9f   :  { %v1149_v8 = vsel %vm13941_vm10, %v13940_v3, %v13938_v41  ;;  %v13942_v23 = vmov %v13940_v3  ;;  %7492 = vmatprep.mubr.msk.bf16.mxu0 %vm13944_vm9, %v2087_v45  ;;  %v13945_v35 = vmov 0  ;;  %v136_v30 = vadd.s32 304, %v8036_v16  ;;  %vm13952_vm9 = vmmov %vm13903_vm8 }
  0xa0   :  { %v1150_v25 = vsel %vm13903_vm8, %v13943_v2, %v13942_v23  ;;  %v13946_v35 = vsel %vm9438_vm12, 4294967295, %v13945_v35  ;;  %v1096_v56 = vrot.slane %v8543_v37, 7  ;;  %vm13948_vm10 = vcmask 130048  }
  0xa1   :  { %13947 = vst [vmem:[#allocation51_spill] sm:$0xff] %v13946_v35  ;;  %v2091_v15 = vsel %vm13948_vm10, %v1997_v12, %v1929_v59  ;;  %v9445_v41 = vpack.c.bf16 %v1151_v50, %v1349_v5  ;;  %v1351_v60 = vsel %vm9438_vm12, 0.0, %v1150_v25  ;;  %v138_v45 = vadd.s32 320, %v8036_v16  ;;  %v13953_v25 = vld [vmem:[#allocation40_spill] sm:$0xff]  ;;  %v13955_v35 = vld [vmem:[#allocation39_spill] sm:$0xff]  ;;  %vm13957_vm12 = vmmov %vm13903_vm8 }
  0xa2   :  { %v9450_v3 = vpack.c.bf16 %v1149_v8, %v1351_v60  ;;  %v432_v18 = vand.u32 15, %v136_v30  ;;  %v13950_v23 = vrot.slane %v13949_v34, 7  ;;  %v13951_v37 = vrot.slane %v13937_v13, 7 }
  0xa3   :  { %v2089_v50 = vsel %vm13948_vm10, %v1994_v49, %v1927_v19  ;;  %v446_v59 = vand.u32 15, %v138_v45  ;;  %v13954_v5 = vrot.slane %v13953_v25, 7  ;;  %v13956_v31 = vrot.slane %v13955_v35, 7  ;;  %v1837_v49 = vpop.permute.xlu0 %1836 }
  0xa4   :  { %v1147_v2 = vsel %vm13903_vm8, %v1096_v56, %v13950_v23  ;;  %v1148_v12 = vsel %vm13952_vm9, %v13951_v37, %v1096_v56  ;;  %v13959_v60 = vmov %v13950_v23  ;;  %v13960_v56 = vpack.c.bf16 %v8863_v20, %v8993_v6 }
  0xa5   :  { %v1145_v8 = vsel %vm13957_vm12, %v13956_v31, %v13954_v5  ;;  %v13958_v30 = vmov %v13956_v31  ;;  %vm13961_vm9 = vcmask 195584   ;;  %vm9478_vm10 = vcmp.eq.s32.totalorder %v432_v18, 0 }
  0xa6   :  { %v1146_v13 = vsel %vm13903_vm8, %v13959_v60, %v13958_v30  ;;  %1890 = vrot.lane.b32.xlu1 %v13960_v56, %s7939_s21  ;;  %7493 = vmatmul.mubr.msk.bf16.vlgmr.msra.gmra.mrb[0].mxu0 %vm13961_vm9, %v2089_v50  ;;  %v13962_v45 = vmov 0  ;;  %v140_v31 = vadd.s32 336, %v8036_v16  ;;  %v1100_v35 = vrot.slane %v8599_v39, 7  ;;  %vm13965_vm12 = vmmov %vm13961_vm9  ;;  %v13971_v50 = vld [vmem:[#allocation43_spill] sm:$0xff]  ;;  %v1835_v30 = vpop.permute.xlu1 %1834 }
  0xa7   :  { %v13963_v45 = vsel %vm9478_vm10, 4294967295, %v13962_v45  ;;  %v142_v19 = vadd.s32 352, %v8036_v16  ;;  %7496 = vmatprep.mubr.msk.bf16.mxu0 %vm13965_vm12, %v2091_v15  ;;  %vm13966_vm8 = vcmask 64512   ;;  %v1353_v23 = vsel %vm9478_vm10, 0.0, %v1148_v12 }
  0xa8   :  { %13964 = vst [vmem:[#allocation50_spill] sm:$0xff] %v13963_v45  ;;  %v2003_v34 = vsel %vm13966_vm8, %v9159_v55, %v1837_v49  ;;  %vm9490_vm9 = vcmp.eq.s32.totalorder %v446_v59, 0  ;;  %v13967_v37 = vmov 0  ;;  %v13970_v18 = vrot.slane %v8642_v54, 7 }
  0xa9   :  { %v13968_v37 = vsel %vm9490_vm9, 4294967295, %v13967_v37  ;;  %v13972_v5 = vrot.slane %v13971_v50, 7  ;;  %vm13973_vm13 = vcmp.lt.s32.totalorder %v8036_v16, 1  ;;  %v9500_v60 = vpack.c.bf16 %v1147_v2, %v1353_v23 }
  0xaa   :  { %13969 = vst [vmem:[#allocation19_spill] sm:$0xff] %v13968_v37  ;;  %v1355_v55 = vsel %vm9490_vm9, 0.0, %v1146_v13  ;;  %v460_v15 = vand.u32 15, %v140_v31  ;;  %v13974_v12 = vrot.slane %v8615_v40, 7  ;;  %vm13975_vm12 = vmmov %vm13973_vm13  ;;  %v2000_v56 = vsel %vm13966_vm8, %v9088_v28, %v1835_v30  ;;  %1986 = vrot.lane.b32.xlu1 %v9128_v44, %s7940_s13  ;;  %v1933_v13 = vpop.permute.xlu0 %1932 }
  0xab   :  { %v1141_v39 = vsel %vm13973_vm13, %v13972_v5, %v13970_v18  ;;  %v9510_v49 = vpack.c.bf16 %v1145_v8, %v1355_v55  ;;  %v13976_v45 = vrot.slane %v13953_v25, 7  ;;  %vm13977_vm13 = vmmov %vm13975_vm12  ;;  %v474_v23 = vand.u32 15, %v142_v19 }
  0xac   :  { %v1143_v59 = vsel %vm13975_vm12, %v1100_v35, %v13974_v12  ;;  %vm9518_vm9 = vcmp.eq.s32.totalorder %v460_v15, 0  ;;  %v13978_v31 = vmov 0  ;;  %v13981_v18 = vmov %v13972_v5  ;;  %v1931_v5 = vpop.permute.xlu1 %1930 }
  0xad   :  { %v1144_v2 = vsel %vm13977_vm13, %v13976_v45, %v1100_v35  ;;  %v13979_v31 = vsel %vm9518_vm9, 4294967295, %v13978_v31  ;;  %v13982_v28 = vmov %v13974_v12  ;;  %v144_v25 = vadd.s32 368, %v8036_v16 }
  0xae   :  { %13980 = vst [vmem:[#allocation23_spill] sm:$0xff] %v13979_v31  ;;  %v1142_v8 = vsel %vm13975_vm12, %v13982_v28, %v13981_v18  ;;  %v1104_v45 = vrot.slane %v8667_v33, 7  ;;  %vm13983_vm8 = vcmask 130048   ;;  %v1357_v44 = vsel %vm9518_vm9, 0.0, %v1144_v2  ;;  %vm13989_vm9 = vmmov %vm13975_vm12 }
  0xaf   :  { %v2095_v35 = vsel %vm13983_vm8, %v2003_v34, %v1933_v13  ;;  %vm9533_vm13 = vcmp.eq.s32.totalorder %v474_v23, 0  ;;  %v13984_v19 = vmov 0  ;;  %v146_v50 = vadd.s32 384, %v8036_v16  ;;  %v1841_v13 = vpop.permute.xlu0 %1840 }
  0xb0   :  { %v13985_v19 = vsel %vm9533_vm13, 4294967295, %v13984_v19  ;;  %v9538_v40 = vpack.c.bf16 %v1143_v59, %v1357_v44  ;;  %v1359_v30 = vsel %vm9533_vm13, 0.0, %v1142_v8  ;;  %v488_v55 = vand.u32 15, %v144_v25 }
  0xb1   :  { %13986 = vst [vmem:[#allocation22_spill] sm:$0xff] %v13985_v19  ;;  %v13987_v33 = vrot.slane %v8683_v42, 7  ;;  %v2093_v15 = vsel %vm13983_vm8, %v2000_v56, %v1931_v5  ;;  %v9547_v12 = vpack.c.bf16 %v1141_v39, %v1359_v30  ;;  %v13988_v2 = vrot.slane %v8642_v54, 7  ;;  %v1839_v42 = vpop.permute.xlu1 %1838 }
  0xb2   :  { %v502_v59 = vand.u32 15, %v146_v50  ;;  %vm13990_vm10 = vcmask 195584   ;;  %vm9554_vm13 = vcmp.eq.s32.totalorder %v488_v55, 0  ;;  %v13991_v18 = vmov 0 }
  0xb3   :  { %v1139_v34 = vsel %vm13975_vm12, %v1104_v45, %v13987_v33  ;;  %v1140_v23 = vsel %vm13989_vm9, %v13988_v2, %v1104_v45  ;;  %7497 = vmatmul.mubr.msk.bf16.gmra.mrb[4].mxu0 %vm13990_vm10, %v2093_v15  ;;  %v13992_v18 = vsel %vm9554_vm13, 4294967295, %v13991_v18  ;;  %v13994_v28 = vrot.slane %v8707_v63, 7  ;;  %vm13996_vm12 = vmmov %vm13989_vm9 }
  0xb4   :  { %13993 = vst [vmem:[#allocation21_spill] sm:$0xff] %v13992_v18  ;;  %v13995_v8 = vrot.slane %v8702_v22, 7  ;;  %v13998_v56 = vmov %v13987_v33  ;;  %v148_v45 = vadd.s32 400, %v8036_v16  ;;  %7500 = vmatprep.mubr.msk.bf16.mxu0 %vm13990_vm10, %v2095_v35  ;;  %vm13999_vm8 = vcmask 64512   ;;  %vm14006_vm10 = vmmov %vm13989_vm9 }
  0xb5   :  { %v2009_v44 = vsel %vm13999_vm8, %v9183_v52, %v1841_v13  ;;  %v1361_v50 = vsel %vm9554_vm13, 0.0, %v1140_v23  ;;  %vm9576_vm15 = vcmp.eq.s32.totalorder %v502_v59, 0  ;;  %v14000_v5 = vmov 0  ;;  %v1937_v59 = vpop.permute.xlu0 %1936 }
  0xb6   :  { %v1137_v39 = vsel %vm13996_vm12, %v13995_v8, %v13994_v28  ;;  %v13997_v54 = vmov %v13995_v8  ;;  %v14001_v5 = vsel %vm9576_vm15, 4294967295, %v14000_v5  ;;  %v1108_v22 = vrot.slane %v8734_v36, 7  ;;  %vm14003_vm12 = vmmov %vm13999_vm8 }
  0xb7   :  { %v1138_v25 = vsel %vm13989_vm9, %v13998_v56, %v13997_v54  ;;  %14002 = vst [vmem:[#allocation25_spill] sm:$0xff] %v14001_v5  ;;  %v9581_v30 = vpack.c.bf16 %v1139_v34, %v1361_v50  ;;  %v516_v33 = vand.u32 15, %v148_v45  ;;  %v150_v35 = vadd.s32 416, %v8036_v16 }
  0xb8   :  { %v1363_v55 = vsel %vm9576_vm15, 0.0, %v1138_v25  ;;  %v2006_v52 = vsel %vm14003_vm12, %v9171_v57, %v1839_v42  ;;  %v14004_v2 = vrot.slane %v8752_v21, 7  ;;  %v14005_v36 = vmov %v13994_v28  ;;  %vm14012_vm12 = vmmov %vm13989_vm9  ;;  %v1935_v42 = vpop.permute.xlu1 %1934 }
  0xb9   :  { %v9588_v15 = vpack.c.bf16 %v1137_v39, %v1363_v55  ;;  %v1136_v34 = vsel %vm14006_vm10, %v14005_v36, %v1108_v22  ;;  %vm9598_vm8 = vcmp.eq.s32.totalorder %v516_v33, 0  ;;  %v14007_v13 = vmov 0 }
  0xba   :  { %v1135_v23 = vsel %vm13989_vm9, %v1108_v22, %v14004_v2  ;;  %v14008_v13 = vsel %vm9598_vm8, 4294967295, %v14007_v13  ;;  %v530_v28 = vand.u32 15, %v150_v35  ;;  %v14010_v57 = vrot.slane %v8776_v47, 7 }
  0xbb   :  { %14009 = vst [vmem:[#allocation27_spill] sm:$0xff] %v14008_v13  ;;  %v14011_v8 = vrot.slane %v8771_v24, 7  ;;  %v14014_v63 = vmov %v14004_v2  ;;  %vm14015_vm10 = vcmask 130048   ;;  %v1365_v45 = vsel %vm9598_vm8, 0.0, %v1136_v34  ;;  %vm14021_vm8 = vmmov %vm13989_vm9 }
  0xbc   :  { %v2099_v25 = vsel %vm14015_vm10, %v2009_v44, %v1937_v59  ;;  %v152_v50 = vadd.s32 432, %v8036_v16  ;;  %v1112_v22 = vrot.slane %v13882_v38, 7  ;;  %v9619_v55 = vpack.c.bf16 %v1135_v23, %v1365_v45  ;;  %v1845_v59 = vpop.permute.xlu0 %1844 }
  0xbd   :  { %v1133_v39 = vsel %vm14012_vm12, %v14011_v8, %v14010_v57  ;;  %v14013_v54 = vmov %v14011_v8  ;;  %vm9621_vm12 = vcmp.eq.s32.totalorder %v530_v28, 0  ;;  %v14016_v33 = vmov 0 }
  0xbe   :  { %v1134_v56 = vsel %vm13989_vm9, %v14014_v63, %v14013_v54  ;;  %v14017_v33 = vsel %vm9621_vm12, 4294967295, %v14016_v33  ;;  %v154_v21 = vadd.s32 448, %v8036_v16  ;;  %v14018_v24 = vrot.slane %v13872_v61, 7 }
  0xbf   :  { %v14019_v44 = vrot.slane %v13873_v17, 7  ;;  %v2097_v2 = vsel %vm14015_vm10, %v2006_v52, %v1935_v42  ;;  %v1367_v38 = vsel %vm9621_vm12, 0.0, %v1134_v56  ;;  %v544_v23 = vand.u32 15, %v152_v50  ;;  %vm14026_vm10 = vmmov %vm14021_vm8  ;;  %v1843_v50 = vpop.permute.xlu1 %1842 }
  0xc0   :  { %v14020_v36 = vrot.slane %v13881_v0, 7  ;;  %vm14022_vm15 = vcmask 195584   ;;  %v9640_v28 = vpack.c.bf16 %v1133_v39, %v1367_v38  ;;  %v558_v52 = vand.u32 15, %v154_v21  ;;  %v1941_v38 = vpop.permute.xlu0 %1940 }
  0xc1   :  { %v1129_v35 = vsel %vm13989_vm9, %v14019_v44, %v14018_v24  ;;  %7501 = vmatmul.mubr.msk.bf16.gmra.mrb[8].mxu0 %vm14022_vm15, %v2097_v2  ;;  %vm14023_vm9 = vmmov %vm14021_vm8  ;;  %v14024_v54 = vmov %v14019_v44  ;;  %v14028_v45 = vmov 0  ;;  %v156_v39 = vadd.s32 464, %v8036_v16 }
  0xc2   :  { %v1131_v34 = vsel %vm14021_vm8, %v1112_v22, %v14020_v36  ;;  %v1132_v8 = vsel %vm14023_vm9, %v14010_v57, %v1112_v22  ;;  %v14025_v63 = vmov %v14020_v36  ;;  %vm14027_vm12 = vmmov %vm14022_vm15  ;;  %vm9653_vm8 = vcmp.eq.s32.totalorder %v544_v23, 0 }
  0xc3   :  { %v1130_v56 = vsel %vm14026_vm10, %v14025_v63, %v14024_v54  ;;  %7504 = vmatprep.mubr.msk.bf16.mxu0 %vm14027_vm12, %v2099_v25  ;;  %v14029_v45 = vsel %vm9653_vm8, 4294967295, %v14028_v45  ;;  %v1116_v47 = vrot.slane %v8877_v29, 7  ;;  %v1369_v22 = vsel %vm9653_vm8, 0.0, %v1132_v8  ;;  %vm14034_vm12 = vmmov %vm14023_vm9 }
  0xc4   :  { %vm9661_vm15 = vcmp.eq.s32.totalorder %v558_v52, 0  ;;  %v14030_v17 = vmov 0  ;;  %v158_v0 = vadd.s32 480, %v8036_v16  ;;  %v14032_v25 = vrot.slane %v8961_v7, 7 }
  0xc5   :  { %v14031_v17 = vsel %vm9661_vm15, 4294967295, %v14030_v17  ;;  %v14033_v42 = vrot.slane %v8945_v48, 7  ;;  %vm14035_vm9 = vcmask 64512   ;;  %v9674_v24 = vpack.c.bf16 %v1131_v34, %v1369_v22 }
  0xc6   :  { %v2015_v29 = vsel %vm14035_vm9, %v9234_v10, %v1845_v59  ;;  %v1371_v44 = vsel %vm9661_vm15, 0.0, %v1130_v56  ;;  %v572_v2 = vand.u32 15, %v156_v39  ;;  %v14036_v36 = vrot.slane %v8904_v26, 7  ;;  %vm14043_vm15 = vmmov %vm14026_vm10  ;;  %v1939_v56 = vpop.permute.xlu1 %1938 }
  0xc7   :  { %v1125_v21 = vsel %vm14034_vm12, %v14033_v42, %v14032_v25  ;;  %v9678_v23 = vpack.c.bf16 %v1129_v35, %v1371_v44  ;;  %v14037_v8 = vrot.slane %v13872_v61, 7  ;;  %vm14038_vm12 = vmmov %vm14026_vm10  ;;  %v586_v10 = vand.u32 15, %v158_v0  ;;  %v1849_v25 = vpop.permute.xlu0 %1848 }
  0xc8   :  { %v1127_v57 = vsel %vm14026_vm10, %v1116_v47, %v14036_v36  ;;  %v2012_v34 = vsel %vm14035_vm9, %v9209_v51, %v1843_v50  ;;  %vm9690_vm8 = vcmp.eq.s32.totalorder %v572_v2, 0  ;;  %v14039_v59 = vmov 0 }
  0xc9   :  { %v1128_v52 = vsel %vm14038_vm12, %v14037_v8, %v1116_v47  ;;  %v14040_v59 = vsel %vm9690_vm8, 4294967295, %v14039_v59  ;;  %v14041_v35 = vmov %v14033_v42  ;;  %v14042_v54 = vmov %v14036_v36 }
  0xca   :  { %v1126_v63 = vsel %vm14043_vm15, %v14042_v54, %v14041_v35  ;;  %v160_v61 = vadd.s32 496, %v8036_v16  ;;  %vm14044_vm10 = vcmask 130048   ;;  %v1373_v47 = vsel %vm9690_vm8, 0.0, %v1128_v52  ;;  %v1847_v36 = vpop.permute.xlu1 %1846 }
  0xcb   :  { %v2103_v39 = vsel %vm14044_vm10, %v2015_v29, %v1941_v38  ;;  %vm9704_vm12 = vcmp.eq.s32.totalorder %v586_v10, 0  ;;  %v14045_v51 = vmov 0  ;;  %v1120_v50 = vrot.slane %v8993_v6, 7  ;;  %vm14047_vm9 = vmmov %vm14044_vm10  ;;  %v1945_v8 = vpop.permute.xlu0 %1944 }
  0xcc   :  { %v14046_v51 = vsel %vm9704_vm12, 4294967295, %v14045_v51  ;;  %v2101_v48 = vsel %vm14047_vm9, %v2012_v34, %v1939_v56  ;;  %v9710_v26 = vpack.c.bf16 %v1127_v57, %v1373_v47  ;;  %v1375_v22 = vsel %vm9704_vm12, 0.0, %v1126_v63 }
  0xcd   :  { %v600_v0 = vand.u32 15, %v160_v61  ;;  %vm14048_vm15 = vcmask 195584   ;;  %v9715_v42 = vpack.c.bf16 %v1125_v21, %v1375_v22  ;;  %v14049_v29 = vrot.slane %v8863_v20, 7 }
  0xce   :  { %7505 = vmatmul.mubr.msk.bf16.gmra.mrb[12].mxu0 %vm14048_vm15, %v2101_v48  ;;  %vm14050_vm10 = vcmp.lt.s32.totalorder %v8036_v16, 1  ;;  %v14051_v6 = vrot.slane %v8961_v7, 7  ;;  %vm14053_vm8 = vmmov %vm14048_vm15  ;;  %v14054_v38 = vmov 0  ;;  %vm14056_vm15 = vcmask 64512   ;;  %v1943_v52 = vpop.permute.xlu1 %1942 }
  0xcf   :  { %v1123_v44 = vsel %vm14050_vm10, %v1120_v50, %v14049_v29  ;;  %vm14052_vm9 = vmmov %vm14050_vm10  ;;  %7508 = vmatprep.mubr.msk.bf16.mxu0 %vm14053_vm8, %v2103_v39  ;;  %vm9726_vm13 = vcmp.eq.s32.totalorder %v600_v0, 0  ;;  %v2021_v20 = vsel %vm14056_vm15, %v9285_v32, %v1849_v25  ;;  %vm14060_vm12 = vcmask 195584   ;;  %v1853_v35 = vpop.permute.xlu0 %1852 }
  0xd0   :  { %v1124_v2 = vsel %vm14052_vm9, %v14051_v6, %v1120_v50  ;;  %v14055_v38 = vsel %vm9726_vm13, 4294967295, %v14054_v38  ;;  %vm14057_vm10 = vmmov %vm14056_vm15  ;;  %vm14058_vm9 = vcmask 130048  }
  0xd1   :  { %v1377_v21 = vsel %vm9726_vm13, 0.0, %v1124_v2  ;;  %v2018_v7 = vsel %vm14057_vm10, %v9273_v53, %v1847_v36  ;;  %v2107_v10 = vsel %vm14058_vm9, %v2021_v20, %v1945_v8  ;;  %vm14059_vm8 = vmmov %vm14058_vm9 }
  0xd2   :  { %v9734_v57 = vpack.c.bf16 %v1123_v44, %v1377_v21  ;;  %v2105_v34 = vsel %vm14059_vm8, %v2018_v7, %v1943_v52  ;;  %vm14061_vm7 = vmmov %vm14060_vm12  ;;  %v1851_v54 = vpop.permute.xlu1 %1850 }
  0xd3   :  { %vm14062_vm13 = vmmov %vm14057_vm10  ;;  %v1949_v63 = vpop.permute.xlu0 %1948 }
  0xd4   :  { %v2027_v32 = vsel %vm14062_vm13, %v9326_v1, %v1853_v35  ;;  %vm14063_vm15 = vmmov %vm14057_vm10 }
  0xd5   :  { %v2024_v61 = vsel %vm14063_vm15, %v9308_v58, %v1851_v54  ;;  %vm14064_vm10 = vmmov %vm14059_vm8 }
  0xd6   :  { %7509 = vmatmul.mubr.msk.bf16.gmra.mrb[16].mxu0 %vm14060_vm12, %v2105_v34  ;;  %v1947_v56 = vpop.permute.xlu1 %1946  ;;  %v2111_v53 = vsel %vm14064_vm10, %v2027_v32, %v1949_v63  ;;  %vm14065_vm11 = vmmov %vm14059_vm8 }
  0xd7   :  { %7512 = vmatprep.mubr.msk.bf16.mxu0 %vm14061_vm7, %v2107_v10  ;;  %v2109_v39 = vsel %vm14065_vm11, %v2024_v61, %v1947_v56  ;;  %vm14066_vm9 = vmmov %vm14061_vm7  ;;  %v1857_v47 = vpop.permute.xlu0 %1856 }
  0xd8   :  { %vm14067_vm12 = vmmov %vm14061_vm7 }
  0xd9   :  { %vm14068_vm7 = vmmov %vm14062_vm13 }
  0xda   :  { %v1855_v50 = vpop.permute.xlu1 %1854  ;;  %v2033_v48 = vsel %vm14068_vm7, %v9359_v46, %v1857_v47  ;;  %vm14069_vm13 = vmmov %vm14068_vm7 }
  0xdb   :  { %v1953_v22 = vpop.permute.xlu0 %1952  ;;  %v2030_v1 = vsel %vm14069_vm13, %v9351_v9, %v1855_v50  ;;  %vm14070_vm15 = vmmov %vm14059_vm8 }
  0xdc   :  { %v2115_v58 = vsel %vm14059_vm8, %v2033_v48, %v1953_v22  ;;  %vm14071_vm10 = vmmov %vm14066_vm9 }
  0xdd   :  { %vm14072_vm11 = vmmov %vm14066_vm9 }
  0xde   :  { %7513 = vmatmul.mubr.msk.bf16.gmra.mrb[20].mxu0 %vm14066_vm9, %v2109_v39  ;;  %v1951_v0 = vpop.permute.xlu1 %1950  ;;  %vm14073_vm9 = vmmov %vm14068_vm7 }
  0xdf   :  { %7516 = vmatprep.mubr.msk.bf16.mxu0 %vm14067_vm12, %v2111_v53  ;;  %v2113_v25 = vsel %vm14070_vm15, %v2030_v1, %v1951_v0  ;;  %v1861_v29 = vpop.permute.xlu0 %1860  ;;  %vm14074_vm12 = vmmov %vm14068_vm7 }
  0xe0   :  { %v2039_v6 = vsel %vm14073_vm9, %v9406_v43, %v1861_v29  ;;  %vm14075_vm7 = vmmov %vm14059_vm8 }
  0xe1   :  { %vm14076_vm13 = vmmov %vm14075_vm7 }
  0xe2   :  { %v1859_v44 = vpop.permute.xlu1 %1858  ;;  %vm14077_vm8 = vmmov %vm14071_vm10 }
  0xe3   :  { %v1957_v2 = vpop.permute.xlu0 %1956  ;;  %v2036_v46 = vsel %vm14074_vm12, %v9400_v4, %v1859_v44  ;;  %vm14078_vm15 = vmmov %vm14077_vm8 }
  0xe4   :  { %v2119_v9 = vsel %vm14075_vm7, %v2039_v6, %v1957_v2  ;;  %vm14082_vm12 = vmmov %vm14075_vm7 }
  0xe6   :  { %7517 = vmatmul.mubr.msk.bf16.gmra.mrb[24].mxu0 %vm14071_vm10, %v2113_v25  ;;  %v1955_v36 = vpop.permute.xlu1 %1954  ;;  %vm14079_vm10 = vmmov %vm14073_vm9 }
  0xe7   :  { %7520 = vmatprep.mubr.msk.bf16.mxu0 %vm14072_vm11, %v2115_v58  ;;  %v2117_v21 = vsel %vm14076_vm13, %v2036_v46, %v1955_v36  ;;  %v1865_v20 = vpop.permute.xlu0 %1864  ;;  %vm14080_vm11 = vmmov %vm14073_vm9 }
  0xe8   :  { %v2045_v7 = vsel %vm14079_vm10, %v9450_v3, %v1865_v20  ;;  %vm14081_vm9 = vmmov %vm14075_vm7 }
  0xe9   :  { %vm14083_vm7 = vmmov %vm14077_vm8 }
  0xea   :  { %v1863_v8 = vpop.permute.xlu1 %1862  ;;  %vm14084_vm13 = vmmov %vm14083_vm7 }
  0xeb   :  { %v1961_v52 = vpop.permute.xlu0 %1960  ;;  %v2042_v43 = vsel %vm14080_vm11, %v9445_v41, %v1863_v8  ;;  %vm14088_vm11 = vmmov %vm14081_vm9 }
  0xec   :  { %v2123_v4 = vsel %vm14081_vm9, %v2045_v7, %v1961_v52 }
  0xee   :  { %7521 = vmatmul.mubr.msk.bf16.gmra.mrb[28].mxu0 %vm14077_vm8, %v2117_v21  ;;  %v1959_v10 = vpop.permute.xlu1 %1958  ;;  %vm14085_vm8 = vmmov %vm14079_vm10 }
  0xef   :  { %7524 = vmatprep.mubr.msk.bf16.mxu0 %vm14078_vm15, %v2119_v9  ;;  %v2121_v34 = vsel %vm14082_vm12, %v2042_v43, %v1959_v10  ;;  %v1869_v35 = vpop.permute.xlu0 %1868  ;;  %vm14086_vm15 = vmmov %vm14085_vm8 }
  0xf0   :  { %v2051_v32 = vsel %vm14085_vm8, %v9510_v49, %v1869_v35  ;;  %vm14087_vm10 = vmmov %vm14081_vm9 }
  0xf1   :  { %vm14089_vm9 = vmmov %vm14083_vm7 }
  0xf2   :  { %v1867_v54 = vpop.permute.xlu1 %1866  ;;  %vm14090_vm12 = vmmov %vm14083_vm7 }
  0xf3   :  { %v1965_v63 = vpop.permute.xlu0 %1964  ;;  %v2048_v3 = vsel %vm14086_vm15, %v9500_v60, %v1867_v54 }
  0xf4   :  { %v2127_v41 = vsel %vm14087_vm10, %v2051_v32, %v1965_v63 }
  0xf6   :  { %7525 = vmatmul.mubr.msk.bf16.gmra.mrb[32].mxu0 %vm14083_vm7, %v2121_v34  ;;  %v1963_v61 = vpop.permute.xlu1 %1962  ;;  %vm14091_vm7 = vmmov %vm14085_vm8 }
  0xf7   :  { %7528 = vmatprep.mubr.msk.bf16.mxu0 %vm14084_vm13, %v2123_v4  ;;  %v2125_v56 = vsel %vm14088_vm11, %v2048_v3, %v1963_v61  ;;  %v1873_v53 = vpop.permute.xlu0 %1872  ;;  %vm14092_vm13 = vmmov %vm14091_vm7 }
  0xf8   :  { %v2057_v47 = vsel %vm14091_vm7, %v9547_v12, %v1873_v53  ;;  %vm14093_vm8 = vmmov %vm14087_vm10  ;;  %v7838_v53 = vld [vmem:[%s13222_s3 + $0x10] sm:$0xff]  }
  0xf9   :  { %vm14094_vm15 = vmmov %vm14093_vm8 }
  0xfa   :  { %v1871_v39 = vpop.permute.xlu1 %1870  ;;  %vm14095_vm10 = vmmov %vm14089_vm9 }
  0xfb   :  { %v1969_v50 = vpop.permute.xlu0 %1968  ;;  %v2054_v49 = vsel %vm14092_vm13, %v9538_v40, %v1871_v39  ;;  %vm14096_vm11 = vmmov %vm14089_vm9  ;;  %v7839_v39 = vld [vmem:[%s13222_s3 + $0x18] sm:$0xff]  }
  0xfc   :  { %v2131_v60 = vsel %vm14093_vm8, %v2057_v47, %v1969_v50  ;;  %v7840_v47 = vld [vmem:[%s13222_s3 + $0x20] sm:$0xff]   ;;  %v7841_v50 = vld [vmem:[%s13222_s3 + $0x28] sm:$0xff]  }
  0xfe   :  { %7529 = vmatmul.mubr.msk.bf16.gmra.mrb[36].mxu0 %vm14089_vm9, %v2125_v56  ;;  %v1967_v48 = vpop.permute.xlu1 %1966  ;;  %vm14097_vm9 = vmmov %vm14091_vm7  ;;  %v13493_v56 = vmov 0  }
  0xff   :  { %7532 = vmatprep.mubr.msk.bf16.mxu0 %vm14090_vm12, %v2127_v41  ;;  %v2129_v22 = vsel %vm14094_vm15, %v2054_v49, %v1967_v48  ;;  %v1877_v1 = vpop.permute.xlu0 %1876  ;;  %vm14098_vm12 = vmmov %vm14091_vm7  ;;  %3495 = vmatprep.subr.bf16.mxu1 %v13493_v56  ;;  %v7842_v49 = vld [vmem:[%s13222_s3 + $0x30] sm:$0xff]   ;;  %v7843_v48 = vld [vmem:[%s13222_s3 + $0x38] sm:$0xff]  }
 0x100   :  { %v2063_v58 = vsel %vm14097_vm9, %v9588_v15, %v1877_v1  ;;  %vm14099_vm7 = vmmov %vm14093_vm8  ;;  %v7846_v1 = vld [vmem:[%s13222_s3 + $0x50] sm:$0xff]  }
 0x101   :  { %vm14100_vm13 = vmmov %vm14099_vm7 }
 0x102   :  { %v1875_v0 = vpop.permute.xlu1 %1874  ;;  %vm14101_vm8 = vmmov %vm14095_vm10 }
 0x103   :  { %v1973_v25 = vpop.permute.xlu0 %1972  ;;  %v2060_v12 = vsel %vm14098_vm12, %v9581_v30, %v1875_v0  ;;  %vm14102_vm15 = vmmov %vm14101_vm8  ;;  %v9874_v0 = vld [vmem:[%s13223_s2] ss:$0 sm:$0xff] }
 0x104   :  { %v2135_v40 = vsel %vm14099_vm7, %v2063_v58, %v1973_v25  ;;  %vm14106_vm12 = vmmov %vm14099_vm7 }
 0x106   :  { %7533 = vmatmul.mubr.msk.bf16.gmra.mrb[40].mxu0 %vm14095_vm10, %v2129_v22  ;;  %v1971_v29 = vpop.permute.xlu1 %1970  ;;  %vm14103_vm10 = vmmov %vm14097_vm9  ;;  %v7845_v22 = vld [vmem:[%s13222_s3 + $0x48] sm:$0xff]  }
 0x107   :  { %7536 = vmatprep.mubr.msk.bf16.mxu0 %vm14096_vm11, %v2131_v60  ;;  %v2133_v44 = vsel %vm14100_vm13, %v2060_v12, %v1971_v29  ;;  %v1881_v6 = vpop.permute.xlu0 %1880  ;;  %vm14104_vm11 = vmmov %vm14097_vm9  ;;  %v7844_v60 = vld [vmem:[%s13222_s3 + $0x40] sm:$0xff]   ;;  %v7847_v29 = vld [vmem:[%s13222_s3 + $0x58] sm:$0xff]  }
 0x108   :  { %v2069_v46 = vsel %vm14103_vm10, %v9640_v28, %v1881_v6  ;;  %vm14105_vm9 = vmmov %vm14099_vm7 }
 0x109   :  { %vm14107_vm7 = vmmov %vm14101_vm8 }
 0x10a   :  { %v1879_v2 = vpop.permute.xlu1 %1878  ;;  %vm14108_vm13 = vmmov %vm14107_vm7 }
 0x10b   :  { %v1977_v36 = vpop.permute.xlu0 %1976  ;;  %v2066_v15 = vsel %vm14104_vm11, %v9619_v55, %v1879_v2  ;;  %vm14112_vm11 = vmmov %vm14105_vm9 }
 0x10c   :  { %v2139_v30 = vsel %vm14105_vm9, %v2069_v46, %v1977_v36 }
 0x10e   :  { %7537 = vmatmul.mubr.msk.bf16.gmra.mrb[44].mxu0 %vm14101_vm8, %v2133_v44  ;;  %v1975_v9 = vpop.permute.xlu1 %1974  ;;  %vm14109_vm8 = vmmov %vm14103_vm10 }
 0x10f   :  { %7540 = vmatprep.mubr.msk.bf16.mxu0 %vm14102_vm15, %v2135_v40  ;;  %v2137_v21 = vsel %vm14106_vm12, %v2066_v15, %v1975_v9  ;;  %v1885_v20 = vpop.permute.xlu0 %1884  ;;  %vm14110_vm15 = vmmov %vm14109_vm8 }
 0x110   :  { %v2075_v7 = vsel %vm14109_vm8, %v9678_v23, %v1885_v20  ;;  %vm14111_vm10 = vmmov %vm14105_vm9 }
 0x111   :  { %vm14113_vm9 = vmmov %vm14107_vm7 }
 0x112   :  { %v1883_v8 = vpop.permute.xlu1 %1882  ;;  %vm14114_vm12 = vmmov %vm14107_vm7 }
 0x113   :  { %v1981_v52 = vpop.permute.xlu0 %1980  ;;  %v2072_v28 = vsel %vm14110_vm15, %v9674_v24, %v1883_v8 }
 0x114   :  { %v2143_v55 = vsel %vm14111_vm10, %v2075_v7, %v1981_v52 }
 0x116   :  { %7541 = vmatmul.mubr.msk.bf16.gmra.mrb[48].mxu0 %vm14107_vm7, %v2137_v21  ;;  %v1979_v43 = vpop.permute.xlu1 %1978  ;;  %vm14115_vm7 = vmmov %vm14109_vm8 }
 0x117   :  { %7544 = vmatprep.mubr.msk.bf16.mxu0 %vm14108_vm13, %v2139_v30  ;;  %v2141_v10 = vsel %vm14112_vm11, %v2072_v28, %v1979_v43  ;;  %v1889_v4 = vpop.permute.xlu0 %1888  ;;  %vm14116_vm13 = vmmov %vm14115_vm7 }
 0x118   :  { %v2081_v35 = vsel %vm14115_vm7, %v9715_v42, %v1889_v4  ;;  %vm14117_vm8 = vmmov %vm14111_vm10 }
 0x119   :  { %vm14118_vm15 = vmmov %vm14117_vm8 }
 0x11a   :  { %v1887_v34 = vpop.permute.xlu1 %1886  ;;  %vm14119_vm10 = vmmov %vm14113_vm9 }
 0x11b   :  { %v1985_v54 = vpop.permute.xlu0 %1984  ;;  %v2078_v23 = vsel %vm14116_vm13, %v9710_v26, %v1887_v34  ;;  %vm14120_vm11 = vmmov %vm14113_vm9  ;;  %v7836_v26 = vld [vmem:[%s13222_s3] sm:$0xff]   ;;  %vm13497_vm13 = vcmask 523264  }
 0x11c   :  { %v2147_v24 = vsel %vm14117_vm8, %v2081_v35, %v1985_v54  ;;  %3496 = vmatpush1.bf16.msra.mxu1 %v7836_v26 }
 0x11d   :  { %3497 = vmatprep.subr.bf16.mxu1 %v13493_v56 }
 0x11e   :  { %7545 = vmatmul.mubr.msk.bf16.gmra.mrb[52].mxu0 %vm14113_vm9, %v2141_v10  ;;  %v1983_v32 = vpop.permute.xlu1 %1982  ;;  %vm14121_vm9 = vmmov %vm14115_vm7 }
 0x11f   :  { %7548 = vmatprep.mubr.msk.bf16.mxu0 %vm14114_vm12, %v2143_v55  ;;  %v2145_v63 = vsel %vm14118_vm15, %v2078_v23, %v1983_v32  ;;  %vm14122_vm12 = vmmov %vm14117_vm8  ;;  %vm14124_vm8 = vcmp.lt.s32.totalorder %v8036_v16, 7  ;;  %vm14125_vm15 = vcmp.lt.s32.totalorder %v8036_v16, 1 }
 0x120   :  { %vm14123_vm7 = vmmov %vm14119_vm10 }
 0x122   :  { %v1891_v3 = vpop.permute.xlu1 %1890 }
 0x123   :  { %v2084_v61 = vsel %vm14121_vm9, %v9734_v57, %v1891_v3  ;;  %v7837_v57 = vld [vmem:[%s13222_s3 + $0x8] sm:$0xff]   ;;  %s7942_s3 = smov 64   ;;  %vm14128_vm9 = vmmov %vm14125_vm15 }
 0x124   :  { %3498 = vmatpush1.bf16.msra.mxu1 %v7837_v57 }
 0x125   :  { %3499 = vmatprep.subr.bf16.mxu1 %v13493_v56 }
 0x126   :  { %7549 = vmatmul.mubr.msk.bf16.gmra.mrb[56].mxu0 %vm14119_vm10, %v2145_v63  ;;  %v1987_v41 = vpop.permute.xlu1 %1986  ;;  %vm14126_vm10 = vmmov %vm14124_vm8 }
 0x127   :  { %7552 = vmatprep.mubr.msk.bf16.mxu0 %vm14120_vm11, %v2147_v24  ;;  %v2149_v42 = vsel %vm14122_vm12, %v2084_v61, %v1987_v41  ;;  %vm14127_vm11 = vmmov %vm14124_vm8 }
 0x128   :  { %3500 = vmatpush1.bf16.msra.mxu1 %v7838_v53  ;;  %vm14130_vm12 = vmmov %vm14128_vm9 }
 0x129   :  { %3501 = vmatprep.subr.bf16.mxu1 %v13493_v56 }
 0x12c   :  { %3502 = vmatpush1.bf16.msra.mxu1 %v7839_v39 }
 0x12d   :  { %3503 = vmatprep.subr.bf16.mxu1 %v13493_v56 }
 0x12e   :  { %7553 = vmatmul.mubr.msk.bf16.gmra.mrb[60].mxu0 %vm14123_vm7, %v2149_v42  ;;  %vm14132_vm7 = vmmov %vm14124_vm8 }
 0x12f   :  { %4441 = vmatprep.mubr.bf16.mxu0 %v13493_v56 }
 0x130   :  { %3504 = vmatpush1.bf16.msra.mxu1 %v7840_v47 }
 0x131   :  { %3505 = vmatprep.subr.bf16.mxu1 %v13493_v56 }
 0x134   :  { %3506 = vmatpush1.bf16.msra.mxu1 %v7841_v50 }
 0x135   :  { %3507 = vmatprep.subr.bf16.mxu1 %v13493_v56 }
 0x138   :  { %3508 = vmatpush1.bf16.msra.mxu1 %v7842_v49 }
 0x139   :  { %3509 = vmatprep.subr.bf16.mxu1 %v13493_v56 }
 0x13c   :  { %3510 = vmatpush1.bf16.msra.mxu1 %v7843_v48 }
 0x13d   :  { %3511 = vmatprep.subr.bf16.mxu1 %v13493_v56 }
 0x140   :  { %3512 = vmatpush1.bf16.msra.mxu1 %v7844_v60 }
 0x141   :  { %3513 = vmatprep.subr.bf16.mxu1 %v13493_v56 }
 0x144   :  { %3514 = vmatpush1.bf16.msra.mxu1 %v7845_v22 }
 0x145   :  { %3515 = vmatprep.subr.bf16.mxu1 %v13493_v56 }
 0x148   :  { %3516 = vmatpush1.bf16.msra.mxu1 %v7846_v1 }
 0x149   :  { %3517 = vmatprep.subr.bf16.mxu1 %v13493_v56 }
 0x14c   :  { %3518 = vmatpush1.bf16.msra.mxu1 %v7847_v29 }
 0x179   :  { %v7494_v58 = vpop.f32.mrb[0].mxu0 }
 0x17a   :  { %v2281_v25 = vadd.f32 %v7494_v58, %v9874_v0  ;;  %v2272_v12 = vpop.f32.mrb[1].mxu0 }
 0x17b   :  { %v2273_v40 = vadd.f32 %v9874_v0, %v2272_v12  ;;  %v7495_v44 = vpop.f32.mrb[2].mxu0 }
 0x17c   :  { %v2529_v6 = vmax.f32 %v2281_v25, 0.0  ;;  %v2284_v2 = vadd.f32 %v7495_v44, %v9874_v0  ;;  %v2275_v46 = vpop.f32.mrb[3].mxu0 }
 0x17d   :  { %v9883_v36 = vmax.f32 %v2273_v40, 0.0  ;;  %v2276_v15 = vadd.f32 %v9874_v0, %v2275_v46 }
 0x17e   :  { %v2530_v9 = vmax.f32 %v2284_v2, 0.0  ;;  %v2593_v30 = vrot.slane %v2529_v6, 7  ;;  %v2785_v21 = vrot.slane %v2529_v6, 1 }
 0x17f   :  { %v2528_v20 = vmax.f32 %v2276_v15, 0.0  ;;  %v13496_v8 = vrot.slane %v9883_v36, 7  ;;  %v13495_v43 = vrot.slane %v9883_v36, 1 }
 0x180   :  { %v2594_v7 = vrot.slane %v2530_v9, 7  ;;  %v2786_v52 = vrot.slane %v2530_v9, 1  ;;  %v3008_v28 = vpack.c.bf16 %v2530_v9, %v2529_v6 }
 0x181   :  { %v2592_v55 = vrot.slane %v2528_v20, 7  ;;  %v2784_v10 = vrot.slane %v2528_v20, 1  ;;  %v3007_v34 = vpack.c.bf16 %v2528_v20, %v9883_v36 }
 0x182   :  { %3105 = vrot.lane.b32.xlu1 %v3008_v28, %s7942_s3  ;;  %v2907_v23 = vsel %vm14124_vm8, %v2785_v21, %v2786_v52  ;;  %v2715_v32 = vsel %vm14125_vm15, %v2593_v30, %v2594_v7  ;;  %vm14134_vm8 = vmmov %vm14128_vm9 }
 0x183   :  { %3103 = vrot.lane.b32.xlu0 %v3007_v34, %s7942_s3  ;;  %v2908_v3 = vsel %vm14126_vm10, %v2784_v10, %v2785_v21  ;;  %v2909_v61 = vsel %vm14127_vm11, %v13495_v43, %v2784_v10  ;;  %v9907_v41 = vsel %vm14128_vm9, %v13496_v8, %v2592_v55  ;;  %v2716_v47 = vsel %vm14130_vm12, %v2592_v55, %v2593_v30  ;;  %vm14135_vm15 = vmmov %vm14132_vm7  ;;  %v14162_v8 = vld [vmem:[#allocation67_spill] sm:$0xff] }
 0x184   :  { %v2912_v39 = vsel %vm8077_vm1, 0.0, %v2908_v3  ;;  %v2721_v22 = vsel %vm8999_vm4, 0.0, %v2716_v47  ;;  %vm14136_vm10 = vmmov %vm14132_vm7  ;;  %vm14220_vm1 = vcmp.lt.s32.totalorder %v8036_v16, 7  ;;  %vm14382_vm4 = vcmp.lt.s32.totalorder %v8036_v16, 7 }
 0x185   :  { %v3039_v48 = vpack.c.bf16 %v2912_v39, %v2909_v61  ;;  %v9917_v58 = vpack.c.bf16 %v2715_v32, %v2721_v22  ;;  %vm14137_vm11 = vmmov %vm14132_vm7 }
 0x186   :  { %v7498_v4 = vpop.f32.mrb[4].mxu0  ;;  %vm14139_vm9 = vmmov %vm14134_vm8 }
 0x187   :  { %v2297_v35 = vadd.f32 %v7498_v4, %v9874_v0  ;;  %v2288_v54 = vpop.f32.mrb[5].mxu0  ;;  %7069 = vmatprep.mubr.msk.bf16.mxu1 %vm13497_vm13, %v3039_v48  ;;  %vm14140_vm12 = vmmov %vm14134_vm8  ;;  %vm14166_vm13 = vcmp.lt.s32.totalorder %v8036_v16, 1 }
 0x188   :  { %v2289_v24 = vadd.f32 %v9874_v0, %v2288_v54  ;;  %v7499_v63 = vpop.f32.mrb[6].mxu0 }
 0x189   :  { %v2533_v42 = vmax.f32 %v2297_v35, 0.0  ;;  %v2300_v26 = vadd.f32 %v7499_v63, %v9874_v0  ;;  %v2291_v57 = vpop.f32.mrb[7].mxu0 }
 0x18a   :  { %v2531_v50 = vmax.f32 %v2289_v24, 0.0  ;;  %v2292_v49 = vadd.f32 %v9874_v0, %v2291_v57 }
 0x18b   :  { %v2534_v1 = vmax.f32 %v2300_v26, 0.0  ;;  %v2597_v25 = vrot.slane %v2533_v42, 7  ;;  %v2789_v44 = vrot.slane %v2533_v42, 1 }
 0x18c   :  { %v2595_v12 = vrot.slane %v2531_v50, 7  ;;  %v2787_v29 = vrot.slane %v2531_v50, 1  ;;  %v2532_v40 = vmax.f32 %v2292_v49, 0.0 }
 0x18d   :  { %v2598_v6 = vrot.slane %v2534_v1, 7  ;;  %v2790_v2 = vrot.slane %v2534_v1, 1  ;;  %v3010_v46 = vpack.c.bf16 %v2534_v1, %v2533_v42 }
 0x18e   :  { %v2596_v15 = vrot.slane %v2532_v40, 7  ;;  %v2788_v9 = vrot.slane %v2532_v40, 1  ;;  %v3009_v21 = vpack.c.bf16 %v2532_v40, %v2531_v50  ;;  %v2906_v20 = vsel %vm14132_vm7, %v2786_v52, %v2787_v29  ;;  %vm14141_vm7 = vmmov %vm14134_vm8 }
 0x18f   :  { %3109 = vrot.lane.b32.xlu1 %v3010_v46, %s7942_s3  ;;  %v2914_v4 = vsel %vm8081_vm2, 0.0, %v2906_v20  ;;  %v2714_v34 = vsel %vm14134_vm8, %v2594_v7, %v2595_v12  ;;  %v2903_v35 = vsel %vm14135_vm15, %v2789_v44, %v2790_v2  ;;  %v2711_v40 = vsel %vm14140_vm12, %v2597_v25, %v2598_v6  ;;  %vm14142_vm8 = vmmov %vm14136_vm10 }
 0x190   :  { %3107 = vrot.lane.b32.xlu0 %v3009_v21, %s7942_s3  ;;  %v9932_v52 = vpack.c.bf16 %v2914_v4, %v2907_v23  ;;  %v2904_v24 = vsel %vm14136_vm10, %v2788_v9, %v2789_v44  ;;  %v2905_v63 = vsel %vm14137_vm11, %v2787_v29, %v2788_v9  ;;  %v2713_v57 = vsel %vm14139_vm9, %v2595_v12, %v2596_v15  ;;  %vm14144_vm15 = vmmov %vm14141_vm7 }
 0x191   :  { %v2916_v26 = vsel %vm8085_vm3, 0.0, %v2904_v24  ;;  %v2723_v50 = vsel %vm9043_vm0, 0.0, %v2714_v34  ;;  %v2712_v9 = vsel %vm14141_vm7, %v2596_v15, %v2597_v25  ;;  %vm14145_vm10 = vmmov %vm14142_vm8  ;;  %vm14149_vm12 = vnez %v13818_v14 }
 0x192   :  { %v9946_v47 = vpack.c.bf16 %v2916_v26, %v2905_v63  ;;  %v9952_v48 = vpack.c.bf16 %v2713_v57, %v2723_v50  ;;  %v2725_v24 = vsel %vm9066_vm14, 0.0, %v2712_v9  ;;  %vm14146_vm11 = vmmov %vm14142_vm8 }
 0x193   :  { %vm14148_vm9 = vmmov %vm14141_vm7 }
 0x194   :  { %v7502_v30 = vpop.f32.mrb[8].mxu0  ;;  %vm14150_vm7 = vmmov %vm14142_vm8 }
 0x195   :  { %v2313_v28 = vadd.f32 %v7502_v30, %v9874_v0  ;;  %v2304_v55 = vpop.f32.mrb[9].mxu0 }
 0x196   :  { %v2305_v54 = vadd.f32 %v9874_v0, %v2304_v55  ;;  %v7503_v32 = vpop.f32.mrb[10].mxu0 }
 0x197   :  { %v9938_v3 = vmax.f32 %v2313_v28, 0.0  ;;  %v2316_v7 = vadd.f32 %v7503_v32, %v9874_v0  ;;  %v2307_v61 = vpop.f32.mrb[11].mxu0 }
 0x198   :  { %v2535_v39 = vmax.f32 %v2305_v54, 0.0  ;;  %v2308_v23 = vadd.f32 %v9874_v0, %v2307_v61 }
 0x199   :  { %v9950_v49 = vmax.f32 %v2316_v7, 0.0  ;;  %v2793_v12 = vrot.slane %v9938_v3, 1  ;;  %v9976_v7 = vpack.c.bf16 %v2711_v40, %v2725_v24 }
 0x19a   :  { %v2599_v22 = vrot.slane %v2535_v39, 7  ;;  %v2791_v1 = vrot.slane %v2535_v39, 1  ;;  %v2536_v29 = vmax.f32 %v2308_v23, 0.0 }
 0x19b   :  { %v2794_v44 = vrot.slane %v9950_v49, 1  ;;  %v3012_v46 = vpack.c.bf16 %v9950_v49, %v9938_v3  ;;  %v2602_v9 = vrot.slane %v9950_v49, 7 }
 0x19c   :  { %v2600_v30 = vrot.slane %v2536_v29, 7  ;;  %v2792_v21 = vrot.slane %v2536_v29, 1  ;;  %v3011_v28 = vpack.c.bf16 %v2536_v29, %v2535_v39  ;;  %v2902_v55 = vsel %vm14142_vm8, %v2790_v2, %v2791_v1  ;;  %vm14151_vm8 = vmmov %vm14150_vm7 }
 0x19d   :  { %3113 = vrot.lane.b32.xlu1 %v3012_v46, %s7942_s3  ;;  %v2918_v32 = vsel %vm8152_vm5, 0.0, %v2902_v55  ;;  %v2710_v25 = vsel %vm14144_vm15, %v2598_v6, %v2599_v22  ;;  %v2899_v49 = vsel %vm14150_vm7, %v2793_v12, %v2794_v44 }
 0x19e   :  { %3111 = vrot.lane.b32.xlu0 %v3011_v28, %s7942_s3  ;;  %v9974_v2 = vpack.c.bf16 %v2918_v32, %v2903_v35  ;;  %v2900_v61 = vsel %vm14145_vm10, %v2792_v21, %v2793_v12  ;;  %v2901_v6 = vsel %vm14146_vm11, %v2791_v1, %v2792_v21  ;;  %v2709_v40 = vsel %vm14148_vm9, %v2599_v22, %v2600_v30  ;;  %vm14154_vm10 = vmmov %vm14148_vm9 }
 0x19f   :  { %v2920_v50 = vsel %vm8167_vm6, 0.0, %v2900_v61  ;;  %v2727_v28 = vsel %vm14149_vm12, 0.0, %v2710_v25  ;;  %v2601_v1 = vrot.slane %v9938_v3, 7  ;;  %vm14155_vm11 = vmmov %vm14148_vm9  ;;  %vm14331_vm12 = vcmp.lt.s32.totalorder %v8036_v16, 1 }
 0x1a0   :  { %v9988_v46 = vpack.c.bf16 %v2920_v50, %v2901_v6 }
 0x1a1   :  { %v7506_v20 = vpop.f32.mrb[12].mxu0  ;;  %v2707_v50 = vsel %vm14154_vm10, %v2601_v1, %v2602_v9  ;;  %v2708_v12 = vsel %vm14155_vm11, %v2600_v30, %v2601_v1 }
 0x1a2   :  { %v2329_v4 = vadd.f32 %v7506_v20, %v9874_v0  ;;  %v2320_v34 = vpop.f32.mrb[13].mxu0 }
 0x1a3   :  { %v2321_v15 = vadd.f32 %v9874_v0, %v2320_v34  ;;  %v7507_v63 = vpop.f32.mrb[14].mxu0 }
 0x1a4   :  { %v9980_v26 = vmax.f32 %v2329_v4, 0.0  ;;  %v2332_v57 = vadd.f32 %v7507_v63, %v9874_v0  ;;  %v2323_v39 = vpop.f32.mrb[15].mxu0  ;;  %v9998_v4 = vpack.c.bf16 %v2709_v40, %v2727_v28  ;;  %v14156_v40 = vld [vmem:[#allocation66_spill] sm:$0xff] }
 0x1a5   :  { %v2539_v29 = vmax.f32 %v2321_v15, 0.0  ;;  %v2324_v35 = vadd.f32 %v9874_v0, %v2323_v39  ;;  %v14152_v39 = vld [vmem:[#allocation7_spill] sm:$0xff]  ;;  %vm14157_vm9 = vnez %v14156_v40 }
 0x1a6   :  { %v9993_v20 = vmax.f32 %v2332_v57, 0.0  ;;  %v2797_v34 = vrot.slane %v9980_v26, 1  ;;  %vm14153_vm15 = vnez %v14152_v39  ;;  %v2729_v28 = vsel %vm14157_vm9, 0.0, %v2708_v12 }
 0x1a7   :  { %v2795_v21 = vrot.slane %v2539_v29, 1  ;;  %v2540_v55 = vmax.f32 %v2324_v35, 0.0  ;;  %v2603_v32 = vrot.slane %v2539_v29, 7  ;;  %v10026_v56 = vpack.c.bf16 %v2707_v50, %v2729_v28 }
 0x1a8   :  { %v3014_v24 = vpack.c.bf16 %v9993_v20, %v9980_v26  ;;  %v2798_v12 = vrot.slane %v9993_v20, 1  ;;  %v2605_v28 = vrot.slane %v9980_v26, 7 }
 0x1a9   :  { %v2604_v22 = vrot.slane %v2540_v55, 7  ;;  %v2796_v15 = vrot.slane %v2540_v55, 1  ;;  %v7510_v63 = vpop.f32.mrb[16].mxu0  ;;  %v3013_v61 = vpack.c.bf16 %v2540_v55, %v2539_v29  ;;  %v2898_v3 = vsel %vm14151_vm8, %v2794_v44, %v2795_v21  ;;  %vm14158_vm8 = vmmov %vm14150_vm7 }
 0x1aa   :  { %v2345_v25 = vadd.f32 %v7510_v63, %v9874_v0  ;;  %3117 = vrot.lane.b32.xlu1 %v3014_v24, %s7942_s3  ;;  %v2336_v57 = vpop.f32.mrb[17].mxu0  ;;  %v2922_v6 = vsel %vm14153_vm15, 0.0, %v2898_v3  ;;  %vm14169_vm15 = vmmov %vm14166_vm13 }
 0x1ab   :  { %v2337_v35 = vadd.f32 %v9874_v0, %v2336_v57  ;;  %v7511_v29 = vpop.f32.mrb[18].mxu0  ;;  %3115 = vrot.lane.b32.xlu0 %v3013_v61, %s7942_s3  ;;  %v10017_v44 = vpack.c.bf16 %v2922_v6, %v2899_v49  ;;  %v2896_v55 = vsel %vm14150_vm7, %v2796_v15, %v2797_v34  ;;  %v2897_v30 = vsel %vm14158_vm8, %v2795_v21, %v2796_v15  ;;  %v14159_v61 = vld [vmem:[#allocation9_spill] sm:$0xff]  ;;  %vm14161_vm7 = vmmov %vm14155_vm11 }
 0x1ac   :  { %v10023_v24 = vmax.f32 %v2345_v25, 0.0  ;;  %v2348_v63 = vadd.f32 %v7511_v29, %v9874_v0  ;;  %v2339_v3 = vpop.f32.mrb[19].mxu0  ;;  %vm14160_vm10 = vnez %v14159_v61  ;;  %v2705_v6 = vsel %vm14155_vm11, %v2603_v32, %v2604_v22 }
 0x1ad   :  { %v2543_v1 = vmax.f32 %v2337_v35, 0.0  ;;  %v2340_v49 = vadd.f32 %v9874_v0, %v2339_v3  ;;  %v2924_v57 = vsel %vm14160_vm10, 0.0, %v2896_v55  ;;  %v2606_v25 = vrot.slane %v9993_v20, 7 }
 0x1ae   :  { %v10037_v29 = vmax.f32 %v2348_v63, 0.0  ;;  %v10039_v50 = vpack.c.bf16 %v2924_v57, %v2897_v30  ;;  %v2706_v35 = vsel %vm14161_vm7, %v2602_v9, %v2603_v32  ;;  %v2801_v55 = vrot.slane %v10023_v24, 1 }
 0x1af   :  { %v2799_v21 = vrot.slane %v2543_v1, 1  ;;  %v10042_v15 = vmax.f32 %v2340_v49, 0.0  ;;  %v2607_v3 = vrot.slane %v2543_v1, 7  ;;  %vm14163_vm8 = vnez %v14162_v8 }
 0x1b0   :  { %v3016_v43 = vpack.c.bf16 %v10037_v29, %v10023_v24  ;;  %v2731_v20 = vsel %vm14163_vm8, 0.0, %v2706_v35  ;;  %vm14164_vm11 = vcmp.lt.s32.totalorder %v8036_v16, 7  ;;  %v2703_v39 = vsel %vm14166_vm13, %v2605_v28, %v2606_v25 }
 0x1b1   :  { %v2608_v63 = vrot.slane %v10042_v15, 7  ;;  %v2800_v30 = vrot.slane %v10042_v15, 1  ;;  %v7514_v26 = vpop.f32.mrb[20].mxu0  ;;  %v3015_v49 = vpack.c.bf16 %v10042_v15, %v2543_v1  ;;  %v10054_v57 = vpack.c.bf16 %v2705_v6, %v2731_v20  ;;  %vm14165_vm7 = vmmov %vm14164_vm11  ;;  %v14167_v1 = vld [vmem:[#allocation12_spill] sm:$0xff] }
 0x1b2   :  { %v2361_v9 = vadd.f32 %v7514_v26, %v9874_v0  ;;  %3121 = vrot.lane.b32.xlu1 %v3016_v43, %s7942_s3  ;;  %v2352_v32 = vpop.f32.mrb[21].mxu0  ;;  %v2894_v61 = vsel %vm14164_vm11, %v2798_v12, %v2799_v21  ;;  %v2895_v35 = vsel %vm14165_vm7, %v2797_v34, %v2798_v12  ;;  %vm14168_vm10 = vnez %v14167_v1  ;;  %vm14170_vm6 = vmmov %vm14165_vm7 }
 0x1b3   :  { %v2353_v23 = vadd.f32 %v9874_v0, %v2352_v32  ;;  %v7515_v54 = vpop.f32.mrb[22].mxu0  ;;  %3119 = vrot.lane.b32.xlu0 %v3015_v49, %s7942_s3  ;;  %v2926_v6 = vsel %vm14168_vm10, 0.0, %v2894_v61  ;;  %v2704_v43 = vsel %vm14169_vm15, %v2604_v22, %v2605_v28  ;;  %v2892_v15 = vsel %vm14170_vm6, %v2800_v30, %v2801_v55  ;;  %v14171_v32 = vld [vmem:[#allocation68_spill] sm:$0xff]  ;;  %vm14173_vm15 = vmmov %vm14170_vm6 }
 0x1b4   :  { %v10072_v20 = vmax.f32 %v2361_v9, 0.0  ;;  %v2364_v34 = vadd.f32 %v7515_v54, %v9874_v0  ;;  %v2355_v12 = vpop.f32.mrb[23].mxu0  ;;  %v10075_v26 = vpack.c.bf16 %v2926_v6, %v2895_v35  ;;  %vm14172_vm13 = vnez %v14171_v32  ;;  %v14174_v35 = vld [vmem:[#allocation13_spill] sm:$0xff] }
 0x1b5   :  { %v2733_v42 = vsel %vm14172_vm13, 0.0, %v2704_v43  ;;  %v10079_v49 = vmax.f32 %v2353_v23, 0.0  ;;  %v2356_v61 = vadd.f32 %v9874_v0, %v2355_v12  ;;  %v2893_v22 = vsel %vm14173_vm15, %v2799_v21, %v2800_v30 }
 0x1b6   :  { %v10082_v1 = vpack.c.bf16 %v2703_v39, %v2733_v42  ;;  %v2609_v28 = vrot.slane %v10023_v24, 7  ;;  %v2802_v9 = vrot.slane %v10037_v29, 1  ;;  %v10088_v54 = vmax.f32 %v2364_v34, 0.0  ;;  %v14178_v39 = vld [vmem:[#allocation69_spill] sm:$0xff] }
 0x1b7   :  { %vm14175_vm6 = vnez %v14174_v35  ;;  %v2610_v43 = vrot.slane %v10037_v29, 7  ;;  %v2803_v23 = vrot.slane %v10079_v49, 1  ;;  %v10094_v10 = vmax.f32 %v2356_v61, 0.0 }
 0x1b8   :  { %v2928_v6 = vsel %vm14175_vm6, 0.0, %v2892_v15  ;;  %v2805_v21 = vrot.slane %v10072_v20, 1  ;;  %v3018_v24 = vpack.c.bf16 %v10088_v54, %v10072_v20  ;;  %vm14176_vm11 = vcmp.lt.s32.totalorder %v8036_v16, 1 }
 0x1b9   :  { %v10096_v42 = vpack.c.bf16 %v2928_v6, %v2893_v22  ;;  %v2701_v30 = vsel %vm14176_vm11, %v2607_v3, %v2608_v63  ;;  %v2611_v15 = vrot.slane %v10079_v49, 7  ;;  %v2804_v29 = vrot.slane %v10094_v10, 1  ;;  %v7518_v34 = vpop.f32.mrb[24].mxu0  ;;  %vm14177_vm7 = vmmov %vm14176_vm11 }
 0x1ba   :  { %v3017_v12 = vpack.c.bf16 %v10094_v10, %v10079_v49  ;;  %v2702_v61 = vsel %vm14177_vm7, %v2606_v25, %v2607_v3  ;;  %v2377_v22 = vadd.f32 %v7518_v34, %v9874_v0  ;;  %3125 = vrot.lane.b32.xlu1 %v3018_v24, %s7942_s3  ;;  %v2368_v6 = vpop.f32.mrb[25].mxu0  ;;  %vm14179_vm15 = vnez %v14178_v39  ;;  %v14182_v3 = vld [vmem:[#allocation18_spill] sm:$0xff] }
 0x1bb   :  { %v2735_v35 = vsel %vm14179_vm15, 0.0, %v2702_v61  ;;  %vm14180_vm11 = vcmp.lt.s32.totalorder %v8036_v16, 7  ;;  %v2369_v8 = vadd.f32 %v9874_v0, %v2368_v6  ;;  %v7519_v49 = vpop.f32.mrb[26].mxu0  ;;  %vm14183_vm7 = vnez %v14182_v3 }
 0x1bc   :  { %v2890_v53 = vsel %vm14180_vm11, %v2802_v9, %v2803_v23  ;;  %vm14181_vm6 = vmmov %vm14180_vm11  ;;  %3123 = vrot.lane.b32.xlu0 %v3017_v12, %s7942_s3  ;;  %v10120_v25 = vpack.c.bf16 %v2701_v30, %v2735_v35  ;;  %vm14184_vm10 = vcmp.lt.s32.totalorder %v8036_v16, 1  ;;  %v10126_v61 = vmax.f32 %v2377_v22, 0.0  ;;  %v2371_v40 = vpop.f32.mrb[27].mxu0  ;;  %v14186_v30 = vld [vmem:[#allocation11_spill] sm:$0xff] }
 0x1bd   :  { %v2891_v32 = vsel %vm14181_vm6, %v2801_v55, %v2802_v9  ;;  %v2930_v24 = vsel %vm14183_vm7, 0.0, %v2890_v53  ;;  %v2699_v34 = vsel %vm14184_vm10, %v2609_v28, %v2610_v43  ;;  %v2380_v39 = vadd.f32 %v7519_v49, %v9874_v0  ;;  %vm14185_vm6 = vmmov %vm14184_vm10 }
 0x1be   :  { %v10129_v14 = vpack.c.bf16 %v2930_v24, %v2891_v32  ;;  %v2700_v55 = vsel %vm14185_vm6, %v2608_v63, %v2609_v28  ;;  %v10133_v9 = vmax.f32 %v2369_v8, 0.0  ;;  %v2372_v35 = vadd.f32 %v9874_v0, %v2371_v40 }
 0x1bf   :  { %vm14187_vm11 = vnez %v14186_v30  ;;  %vm14188_vm7 = vcmp.lt.s32.totalorder %v8036_v16, 7  ;;  %v2614_v22 = vrot.slane %v10088_v54, 7  ;;  %v2612_v6 = vrot.slane %v10094_v10, 7 }
 0x1c0   :  { %v2737_v53 = vsel %vm14187_vm11, 0.0, %v2700_v55  ;;  %v2888_v12 = vsel %vm14188_vm7, %v2804_v29, %v2805_v21  ;;  %v10142_v49 = vmax.f32 %v2380_v39, 0.0  ;;  %v2806_v63 = vrot.slane %v10088_v54, 1  ;;  %vm14190_vm10 = vmmov %vm14188_vm7  ;;  %v14191_v39 = vld [vmem:[#allocation20_spill] sm:$0xff] }
 0x1c1   :  { %v10144_v32 = vpack.c.bf16 %v2699_v34, %v2737_v53  ;;  %v2807_v8 = vrot.slane %v10133_v9, 1  ;;  %v10148_v28 = vmax.f32 %v2372_v35, 0.0  ;;  %v2889_v40 = vsel %vm14190_vm10, %v2803_v23, %v2804_v29  ;;  %v7522_v3 = vpop.f32.mrb[28].mxu0  ;;  %vm14194_vm10 = vmmov %vm14185_vm6 }
 0x1c2   :  { %v3020_v10 = vpack.c.bf16 %v10142_v49, %v10126_v61  ;;  %vm14192_vm7 = vnez %v14191_v39  ;;  %v2615_v53 = vrot.slane %v10133_v9, 7  ;;  %v2393_v23 = vadd.f32 %v7522_v3, %v9874_v0  ;;  %v2384_v29 = vpop.f32.mrb[29].mxu0 }
 0x1c3   :  { %14189 = vst [vmem:[#allocation29_spill] sm:$0xff] %v10144_v32  ;;  %v2932_v34 = vsel %vm14192_vm7, 0.0, %v2888_v12  ;;  %v2808_v54 = vrot.slane %v10148_v28, 1  ;;  %v3019_v35 = vpack.c.bf16 %v10148_v28, %v10133_v9  ;;  %v2697_v24 = vsel %vm14185_vm6, %v2611_v15, %v2612_v6  ;;  %v7523_v62 = vpop.f32.mrb[30].mxu0  ;;  %v14196_v9 = vld [vmem:[#allocation10_spill] sm:$0xff] }
 0x1c4   :  { %v10162_v30 = vpack.c.bf16 %v2932_v34, %v2889_v40  ;;  %3129 = vrot.lane.b32.xlu1 %v3020_v10, %s7942_s3  ;;  %v2698_v12 = vsel %vm14194_vm10, %v2610_v43, %v2611_v15  ;;  %vm14195_vm7 = vcmp.lt.s32.totalorder %v8036_v16, 7  ;;  %v2385_v39 = vadd.f32 %v9874_v0, %v2384_v29  ;;  %v14199_v10 = vld [vmem:[#allocation24_spill] sm:$0xff]  ;;  %v2387_v15 = vpop.f32.mrb[31].mxu0 }
 0x1c5   :  { %v2886_v55 = vsel %vm14195_vm7, %v2806_v63, %v2807_v8  ;;  %3127 = vrot.lane.b32.xlu0 %v3019_v35, %s7942_s3  ;;  %vm14197_vm5 = vnez %v14196_v9  ;;  %vm14198_vm3 = vmmov %vm14195_vm7  ;;  %vm14200_vm2 = vnez %v14199_v10  ;;  %v10180_v11 = vmax.f32 %v2393_v23, 0.0  ;;  %v14213_v10 = vld [vmem:[#allocation26_spill] sm:$0xff] }
 0x1c6   :  { %14193 = vst [vmem:[#allocation28_spill] sm:$0xff] %v10162_v30  ;;  %v2739_v3 = vsel %vm14197_vm5, 0.0, %v2698_v12  ;;  %v2887_v40 = vsel %vm14198_vm3, %v2805_v21, %v2806_v63  ;;  %v2934_v34 = vsel %vm14200_vm2, 0.0, %v2886_v55  ;;  %v2396_v43 = vadd.f32 %v7523_v62, %v9874_v0  ;;  %vm14204_vm3 = vmmov %vm14185_vm6 }
 0x1c7   :  { %v10183_v60 = vpack.c.bf16 %v2697_v24, %v2739_v3  ;;  %v10185_v29 = vpack.c.bf16 %v2934_v34, %v2887_v40  ;;  %v10187_v30 = vmax.f32 %v2385_v39, 0.0  ;;  %v2388_v35 = vadd.f32 %v9874_v0, %v2387_v15  ;;  %vm14206_vm7 = vmmov %vm14204_vm3  ;;  %v14207_v39 = vld [vmem:[#allocation8_spill] sm:$0xff] }
 0x1c8   :  { %v14203_v12 = vrot.slane %v10072_v20, 7  ;;  %v2616_v24 = vrot.slane %v10148_v28, 7  ;;  %v10200_v23 = vmax.f32 %v2396_v43, 0.0  ;;  %vm14208_vm6 = vnez %v14207_v39 }
 0x1c9   :  { %14201 = vst [vmem:[#allocation31_spill] sm:$0xff] %v10183_v60  ;;  %14202 = vst [vmem:[#allocation33_spill] sm:$0xff] %v10185_v29  ;;  %v2810_v40 = vrot.slane %v10142_v49, 1  ;;  %v2811_v34 = vrot.slane %v10187_v30, 1  ;;  %v10206_v15 = vmax.f32 %v2388_v35, 0.0  ;;  %v14210_v43 = vrot.slane %v10126_v61, 1 }
 0x1ca   :  { %v2695_v21 = vsel %vm14204_vm3, %v14203_v12, %v2614_v22  ;;  %v14205_v63 = vmov %v14203_v12  ;;  %v3022_v28 = vpack.c.bf16 %v10200_v23, %v10180_v11  ;;  %vm14211_vm10 = vcmp.lt.s32.totalorder %v8036_v16, 7  ;;  %v7526_v35 = vpop.f32.mrb[32].mxu0 }
 0x1cb   :  { %v2696_v55 = vsel %vm14206_vm7, %v2612_v6, %v14205_v63  ;;  %v2884_v63 = vsel %vm14211_vm10, %v2808_v54, %v14210_v43  ;;  %vm14212_vm3 = vmmov %vm14211_vm10  ;;  %v2409_v20 = vadd.f32 %v7526_v35, %v9874_v0  ;;  %v2400_v6 = vpop.f32.mrb[33].mxu0  ;;  %vm14214_vm7 = vnez %v14213_v10 }
 0x1cc   :  { %v2741_v3 = vsel %vm14208_vm6, 0.0, %v2696_v55  ;;  %v2619_v55 = vrot.slane %v10187_v30, 7  ;;  %3133 = vrot.lane.b32.xlu1 %v3022_v28, %s7942_s3  ;;  %v2936_v9 = vsel %vm14214_vm7, 0.0, %v2884_v63  ;;  %vm14215_vm10 = vcmp.lt.s32.totalorder %v8036_v16, 1 }
 0x1cd   :  { %v10208_v12 = vpack.c.bf16 %v2695_v21, %v2741_v3  ;;  %v3021_v21 = vpack.c.bf16 %v10206_v15, %v10187_v30  ;;  %v2885_v3 = vsel %vm14212_vm3, %v2807_v8, %v2808_v54  ;;  %v2693_v43 = vsel %vm14215_vm10, %v2615_v53, %v2616_v24  ;;  %vm14216_vm2 = vmmov %vm14215_vm10  ;;  %v7527_v30 = vpop.f32.mrb[34].mxu0  ;;  %v14218_v54 = vld [vmem:[#allocation14_spill] sm:$0xff] }
 0x1ce   :  { %v2694_v62 = vsel %vm14216_vm2, %v2614_v22, %v2615_v53  ;;  %v2401_v39 = vadd.f32 %v9874_v0, %v2400_v6  ;;  %v10234_v8 = vpack.c.bf16 %v2936_v9, %v2885_v3  ;;  %vm14219_vm3 = vnez %v14218_v54  ;;  %vm14223_vm2 = vmmov %vm14220_vm1 }
 0x1cf   :  { %14209 = vst [vmem:[#allocation35_spill] sm:$0xff] %v10208_v12  ;;  %3131 = vrot.lane.b32.xlu0 %v3021_v21, %s7942_s3  ;;  %v2743_v28 = vsel %vm14219_vm3, 0.0, %v2694_v62  ;;  %v2882_v35 = vsel %vm14220_vm1, %v2810_v40, %v2811_v34  ;;  %v10240_v63 = vmax.f32 %v2409_v20, 0.0  ;;  %v2412_v10 = vadd.f32 %v7527_v30, %v9874_v0  ;;  %v2403_v12 = vpop.f32.mrb[35].mxu0  ;;  %v14224_v62 = vld [vmem:[#allocation30_spill] sm:$0xff] }
 0x1d0   :  { %14217 = vst [vmem:[#allocation34_spill] sm:$0xff] %v10234_v8  ;;  %v10243_v29 = vpack.c.bf16 %v2693_v43, %v2743_v28  ;;  %v14222_v22 = vrot.slane %v10126_v61, 1  ;;  %v10249_v9 = vmax.f32 %v2401_v39, 0.0  ;;  %v2404_v6 = vadd.f32 %v9874_v0, %v2403_v12  ;;  %v14244_v8 = vld [vmem:[#allocation16_spill] sm:$0xff] }
 0x1d1   :  { %vm14225_vm10 = vnez %v14224_v62  ;;  %v14226_v20 = vrot.slane %v10142_v49, 7  ;;  %v14227_v3 = vrot.slane %v10126_v61, 7  ;;  %vm14228_vm1 = vcmp.lt.s32.totalorder %v8036_v16, 1 }
 0x1d2   :  { %14221 = vst [vmem:[#allocation38_spill] sm:$0xff] %v10243_v29  ;;  %v2883_v53 = vsel %vm14223_vm2, %v14222_v22, %v2810_v40  ;;  %v2938_v21 = vsel %vm14225_vm10, 0.0, %v2882_v35  ;;  %v2620_v30 = vrot.slane %v10206_v15, 7  ;;  %v2812_v28 = vrot.slane %v10206_v15, 1  ;;  %vm14231_vm2 = vmmov %vm14228_vm1  ;;  %v14232_v15 = vld [vmem:[#allocation17_spill] sm:$0xff] }
 0x1d3   :  { %v2691_v43 = vsel %vm14228_vm1, %v14227_v3, %v14226_v20  ;;  %v10262_v54 = vmax.f32 %v2412_v10, 0.0  ;;  %v10264_v39 = vpack.c.bf16 %v2938_v21, %v2883_v53  ;;  %v2814_v40 = vrot.slane %v10200_v23, 1 }
 0x1d4   :  { %v2815_v12 = vrot.slane %v10249_v9, 1  ;;  %v10268_v35 = vmax.f32 %v2404_v6, 0.0  ;;  %v14230_v22 = vmov %v14227_v3  ;;  %vm14233_vm1 = vnez %v14232_v15 }
 0x1d5   :  { %14229 = vst [vmem:[#allocation40_spill] sm:$0xff] %v10264_v39  ;;  %v2692_v62 = vsel %vm14231_vm2, %v2616_v24, %v14230_v22  ;;  %v3024_v10 = vpack.c.bf16 %v10262_v54, %v10240_v63  ;;  %v2623_v21 = vrot.slane %v10249_v9, 7  ;;  %v7530_v39 = vpop.f32.mrb[36].mxu0  ;;  %v14235_v20 = vrot.slane %v10180_v11, 1 }
 0x1d6   :  { %v2745_v53 = vsel %vm14233_vm1, 0.0, %v2692_v62  ;;  %v3023_v61 = vpack.c.bf16 %v10268_v35, %v10249_v9  ;;  %v2425_v24 = vadd.f32 %v7530_v39, %v9874_v0  ;;  %v2416_v22 = vpop.f32.mrb[37].mxu0  ;;  %vm14236_vm2 = vcmp.lt.s32.totalorder %v8036_v16, 7  ;;  %v14239_v39 = vld [vmem:[#allocation32_spill] sm:$0xff] }
 0x1d7   :  { %v10284_v29 = vpack.c.bf16 %v2691_v43, %v2745_v53  ;;  %3137 = vrot.lane.b32.xlu1 %v3024_v10, %s7942_s3  ;;  %v2880_v62 = vsel %vm14236_vm2, %v2812_v28, %v14235_v20  ;;  %vm14237_vm10 = vmmov %vm14236_vm2  ;;  %vm14238_vm7 = vcmp.lt.s32.totalorder %v8036_v16, 1  ;;  %v2417_v9 = vadd.f32 %v9874_v0, %v2416_v22  ;;  %v7531_v43 = vpop.f32.mrb[38].mxu0 }
 0x1d8   :  { %v2881_v3 = vsel %vm14237_vm10, %v2811_v34, %v2812_v28  ;;  %v2689_v6 = vsel %vm14238_vm7, %v2619_v55, %v2620_v30  ;;  %3135 = vrot.lane.b32.xlu0 %v3023_v61, %s7942_s3  ;;  %vm14240_vm5 = vnez %v14239_v39  ;;  %v14241_v53 = vrot.slane %v10142_v49, 7  ;;  %vm14242_vm11 = vmmov %vm14238_vm7 }
 0x1d9   :  { %14234 = vst [vmem:[#allocation39_spill] sm:$0xff] %v10284_v29  ;;  %v2940_v10 = vsel %vm14240_vm5, 0.0, %v2880_v62  ;;  %v2878_v20 = vsel %vm14236_vm2, %v2814_v40, %v2815_v12  ;;  %v10306_v34 = vmax.f32 %v2425_v24, 0.0  ;;  %v2428_v28 = vadd.f32 %v7531_v43, %v9874_v0  ;;  %v2419_v29 = vpop.f32.mrb[39].mxu0 }
 0x1da   :  { %v2690_v15 = vsel %vm14242_vm11, %v14241_v53, %v2619_v55  ;;  %v10309_v22 = vpack.c.bf16 %v2940_v10, %v2881_v3  ;;  %vm14245_vm7 = vnez %v14244_v8  ;;  %v10313_v39 = vmax.f32 %v2417_v9, 0.0  ;;  %vm14248_vm11 = vmmov %vm14236_vm2  ;;  %v14249_v10 = vld [vmem:[#allocation36_spill] sm:$0xff] }
 0x1db   :  { %v2747_v61 = vsel %vm14245_vm7, 0.0, %v2690_v15  ;;  %v2420_v49 = vadd.f32 %v9874_v0, %v2419_v29  ;;  %v14247_v55 = vrot.slane %v10180_v11, 1  ;;  %v2818_v53 = vrot.slane %v10262_v54, 1 }
 0x1dc   :  { %14243 = vst [vmem:[#allocation43_spill] sm:$0xff] %v10309_v22  ;;  %v10316_v62 = vpack.c.bf16 %v2689_v6, %v2747_v61  ;;  %v2816_v43 = vrot.slane %v10268_v35, 1  ;;  %v10324_v3 = vmax.f32 %v2428_v28, 0.0  ;;  %vm14250_vm10 = vnez %v14249_v10 }
 0x1dd   :  { %v2879_v24 = vsel %vm14248_vm11, %v14247_v55, %v2814_v40  ;;  %v2942_v15 = vsel %vm14250_vm10, 0.0, %v2878_v20  ;;  %v2624_v9 = vrot.slane %v10268_v35, 7  ;;  %v10330_v6 = vmax.f32 %v2420_v49, 0.0 }
 0x1de   :  { %14246 = vst [vmem:[#allocation70_spill] sm:$0xff] %v10316_v62  ;;  %v10332_v61 = vpack.c.bf16 %v2942_v15, %v2879_v24  ;;  %v3026_v55 = vpack.c.bf16 %v10324_v3, %v10306_v34  ;;  %v14252_v28 = vrot.slane %v10200_v23, 7  ;;  %v14253_v10 = vrot.slane %v10180_v11, 7  ;;  %v7534_v24 = vpop.f32.mrb[40].mxu0  ;;  %v14257_v62 = vld [vmem:[#allocation15_spill] sm:$0xff] }
 0x1df   :  { %vm14254_vm2 = vcmp.lt.s32.totalorder %v8036_v16, 1  ;;  %v2819_v20 = vrot.slane %v10313_v39, 1  ;;  %v3025_v15 = vpack.c.bf16 %v10330_v6, %v10313_v39  ;;  %v2441_v8 = vadd.f32 %v7534_v24, %v9874_v0 }
 0x1e0   :  { %14251 = vst [vmem:[#allocation71_spill] sm:$0xff] %v10332_v61  ;;  %v2687_v35 = vsel %vm14254_vm2, %v14253_v10, %v14252_v28  ;;  %v14255_v29 = vmov %v14253_v10  ;;  %vm14256_vm11 = vmmov %vm14254_vm2  ;;  %3141 = vrot.lane.b32.xlu1 %v3026_v55, %s7942_s3  ;;  %v2432_v61 = vpop.f32.mrb[41].mxu0  ;;  %vm14258_vm2 = vnez %v14257_v62  ;;  %v14259_v28 = vrot.slane %v10240_v63, 1 }
 0x1e1   :  { %v2688_v40 = vsel %vm14256_vm11, %v2620_v30, %v14255_v29  ;;  %vm14260_vm10 = vcmp.lt.s32.totalorder %v8036_v16, 7  ;;  %v2433_v11 = vadd.f32 %v9874_v0, %v2432_v61  ;;  %v7535_v60 = vpop.f32.mrb[42].mxu0  ;;  %3139 = vrot.lane.b32.xlu0 %v3025_v15, %s7942_s3  ;;  %v14263_v29 = vld [vmem:[#allocation37_spill] sm:$0xff]  ;;  %vm14265_vm15 = vcmp.lt.s32.totalorder %v8036_v16, 1 }
 0x1e2   :  { %v2749_v10 = vsel %vm14258_vm2, 0.0, %v2688_v40  ;;  %v2876_v49 = vsel %vm14260_vm10, %v2816_v43, %v14259_v28  ;;  %vm14261_vm5 = vmmov %vm14260_vm10  ;;  %vm14264_vm11 = vnez %v14263_v29  ;;  %v2685_v40 = vsel %vm14265_vm15, %v2623_v21, %v2624_v9  ;;  %v2435_v62 = vpop.f32.mrb[43].mxu0 }
 0x1e3   :  { %v2877_v22 = vsel %vm14261_vm5, %v2815_v12, %v2816_v43  ;;  %v10364_v30 = vpack.c.bf16 %v2687_v35, %v2749_v10  ;;  %v2944_v55 = vsel %vm14264_vm11, 0.0, %v2876_v49  ;;  %v10370_v24 = vmax.f32 %v2441_v8, 0.0  ;;  %vm14268_vm5 = vmmov %vm14265_vm15  ;;  %v7538_v10 = vpop.f32.mrb[44].mxu0 }
 0x1e4   :  { %v2444_v28 = vadd.f32 %v7535_v60, %v9874_v0  ;;  %v10373_v32 = vpack.c.bf16 %v2944_v55, %v2877_v22  ;;  %v14267_v12 = vrot.slane %v10200_v23, 7  ;;  %v10379_v61 = vmax.f32 %v2433_v11, 0.0 }
 0x1e5   :  { %14262 = vst [vmem:[#allocation72_spill] sm:$0xff] %v10364_v30  ;;  %v2436_v35 = vadd.f32 %v9874_v0, %v2435_v62  ;;  %vm14269_vm10 = vnez %v13925_v27  ;;  %vm14270_vm15 = vcmp.lt.s32.totalorder %v8036_v16, 7  ;;  %v2822_v60 = vrot.slane %v10324_v3, 1 }
 0x1e6   :  { %14266 = vst [vmem:[#allocation73_spill] sm:$0xff] %v10373_v32  ;;  %v2686_v43 = vsel %vm14268_vm5, %v14267_v12, %v2623_v21  ;;  %v2874_v8 = vsel %vm14270_vm15, %v2818_v53, %v2819_v20  ;;  %v2820_v22 = vrot.slane %v10330_v6, 1  ;;  %v10388_v15 = vmax.f32 %v2444_v28, 0.0  ;;  %vm14273_vm5 = vmmov %vm14270_vm15 }
 0x1e7   :  { %v2751_v49 = vsel %vm14269_vm10, 0.0, %v2686_v43  ;;  %v2628_v21 = vrot.slane %v10330_v6, 7  ;;  %v10394_v11 = vmax.f32 %v2436_v35, 0.0  ;;  %v14272_v62 = vrot.slane %v10240_v63, 1 }
 0x1e8   :  { %v10390_v23 = vpack.c.bf16 %v2685_v40, %v2751_v49  ;;  %v3028_v28 = vpack.c.bf16 %v10388_v15, %v10370_v24  ;;  %v14274_v40 = vld [vmem:[#allocation41_spill] sm:$0xff]  ;;  %v2823_v6 = vrot.slane %v10379_v61, 1  ;;  %v14277_v43 = vrot.slane %v10262_v54, 7 }
 0x1e9   :  { %v2875_v55 = vsel %vm14273_vm5, %v14272_v62, %v2818_v53  ;;  %vm14275_vm15 = vnez %v14274_v40  ;;  %v3027_v29 = vpack.c.bf16 %v10394_v11, %v10379_v61  ;;  %v2457_v53 = vadd.f32 %v7538_v10, %v9874_v0  ;;  %v2448_v62 = vpop.f32.mrb[45].mxu0 }
 0x1ea   :  { %14271 = vst [vmem:[#allocation74_spill] sm:$0xff] %v10390_v23  ;;  %v2946_v49 = vsel %vm14275_vm15, 0.0, %v2874_v8  ;;  %3145 = vrot.lane.b32.xlu1 %v3028_v28, %s7942_s3  ;;  %v14278_v12 = vrot.slane %v10240_v63, 7  ;;  %vm14279_vm5 = vcmp.lt.s32.totalorder %v8036_v16, 1  ;;  %vm14283_vm11 = vcmp.lt.s32.totalorder %v8036_v16, 7  ;;  %v14287_v63 = vld [vmem:[#allocation42_spill] sm:$0xff] }
 0x1eb   :  { %v10410_v27 = vpack.c.bf16 %v2946_v49, %v2875_v55  ;;  %vm14281_vm15 = vmmov %vm14279_vm5  ;;  %v14282_v55 = vrot.slane %v10306_v34, 1  ;;  %v2449_v28 = vadd.f32 %v9874_v0, %v2448_v62  ;;  %v7539_v49 = vpop.f32.mrb[46].mxu0  ;;  %3143 = vrot.lane.b32.xlu0 %v3027_v29, %s7942_s3  ;;  %vm14288_vm8 = vnez %v14287_v63 }
 0x1ec   :  { %v2683_v8 = vsel %vm14279_vm5, %v14278_v12, %v14277_v43  ;;  %v14280_v35 = vmov %v14278_v12  ;;  %vm14286_vm5 = vmmov %vm14283_vm11  ;;  %v2451_v32 = vpop.f32.mrb[47].mxu0 }
 0x1ed   :  { %14276 = vst [vmem:[#allocation75_spill] sm:$0xff] %v10410_v27  ;;  %v2684_v40 = vsel %vm14281_vm15, %v2624_v9, %v14280_v35  ;;  %v2872_v10 = vsel %vm14283_vm11, %v2820_v22, %v14282_v55  ;;  %v14284_v27 = vld [vmem:[#allocation52_spill] sm:$0xff]  ;;  %v2873_v12 = vsel %vm14286_vm5, %v2819_v20, %v2820_v22  ;;  %v10436_v9 = vmax.f32 %v2457_v53, 0.0  ;;  %vm14291_vm11 = vmmov %vm14281_vm15  ;;  %v7542_v63 = vpop.f32.mrb[48].mxu0 }
 0x1ee   :  { %vm14285_vm13 = vnez %v14284_v27  ;;  %v2948_v43 = vsel %vm14288_vm8, 0.0, %v2872_v10  ;;  %v2460_v35 = vadd.f32 %v7539_v49, %v9874_v0  ;;  %v10443_v30 = vmax.f32 %v2449_v28, 0.0  ;;  %vm14294_vm15 = vmmov %vm14291_vm11  ;;  %v14295_v49 = vld [vmem:[#allocation51_spill] sm:$0xff] }
 0x1ef   :  { %v2753_v23 = vsel %vm14285_vm13, 0.0, %v2684_v40  ;;  %v10441_v62 = vpack.c.bf16 %v2948_v43, %v2873_v12  ;;  %v2452_v29 = vadd.f32 %v9874_v0, %v2451_v32  ;;  %v14290_v40 = vrot.slane %v10313_v39, 7 }
 0x1f0   :  { %v10439_v55 = vpack.c.bf16 %v2683_v8, %v2753_v23  ;;  %v14293_v53 = vrot.slane %v10262_v54, 7  ;;  %v2826_v23 = vrot.slane %v10388_v15, 1  ;;  %v10458_v28 = vmax.f32 %v2460_v35, 0.0  ;;  %v14301_v54 = vld [vmem:[#allocation44_spill] sm:$0xff] }
 0x1f1   :  { %14289 = vst [vmem:[#allocation76_spill] sm:$0xff] %v10441_v62  ;;  %v2681_v20 = vsel %vm14291_vm11, %v14290_v40, %v2628_v21  ;;  %v14292_v22 = vmov %v14290_v40  ;;  %vm14296_vm5 = vnez %v14295_v49  ;;  %v2824_v12 = vrot.slane %v10394_v11, 1 }
 0x1f2   :  { %v2682_v10 = vsel %vm14294_vm15, %v14293_v53, %v14292_v22  ;;  %v10464_v40 = vmax.f32 %v2452_v29, 0.0  ;;  %v3030_v53 = vpack.c.bf16 %v10458_v28, %v10436_v9  ;;  %vm14298_vm11 = vcmp.lt.s32.totalorder %v8036_v16, 7  ;;  %v2464_v22 = vpop.f32.mrb[49].mxu0 }
 0x1f3   :  { %v2755_v32 = vsel %vm14296_vm5, 0.0, %v2682_v10  ;;  %v2870_v35 = vsel %vm14298_vm11, %v2822_v60, %v2823_v6  ;;  %vm14300_vm15 = vmmov %vm14298_vm11  ;;  %v2473_v43 = vadd.f32 %v7542_v63, %v9874_v0  ;;  %vm14302_vm11 = vnez %v14301_v54 }
 0x1f4   :  { %v10466_v39 = vpack.c.bf16 %v2681_v20, %v2755_v32  ;;  %v3029_v29 = vpack.c.bf16 %v10464_v40, %v10443_v30  ;;  %v14299_v20 = vrot.slane %v10306_v34, 1  ;;  %3149 = vrot.lane.b32.xlu1 %v3030_v53, %s7942_s3  ;;  %v2950_v49 = vsel %vm14302_vm11, 0.0, %v2870_v35  ;;  %v14308_v35 = vld [vmem:[#allocation50_spill] sm:$0xff] }
 0x1f5   :  { %v14303_v10 = vrot.slane %v10324_v3, 7  ;;  %v14304_v8 = vrot.slane %v10306_v34, 7  ;;  %vm14305_vm8 = vcmp.lt.s32.totalorder %v8036_v16, 1  ;;  %v2465_v63 = vadd.f32 %v9874_v0, %v2464_v22 }
 0x1f6   :  { %14297 = vst [vmem:[#allocation77_spill] sm:$0xff] %v10466_v39  ;;  %v2871_v32 = vsel %vm14300_vm15, %v14299_v20, %v2822_v60  ;;  %vm14307_vm9 = vmmov %vm14305_vm8  ;;  %v7543_v20 = vpop.f32.mrb[50].mxu0  ;;  %3147 = vrot.lane.b32.xlu0 %v3029_v29, %s7942_s3  ;;  %vm14309_vm15 = vnez %v14308_v35  ;;  %v14310_v62 = vrot.slane %v10370_v24, 1  ;;  %vm14311_vm11 = vcmp.lt.s32.totalorder %v8036_v16, 7 }
 0x1f7   :  { %v2679_v27 = vsel %vm14305_vm8, %v14304_v8, %v14303_v10  ;;  %v14306_v39 = vmov %v14304_v8  ;;  %v10498_v53 = vpack.c.bf16 %v2950_v49, %v2871_v32  ;;  %v10506_v10 = vmax.f32 %v2473_v43, 0.0  ;;  %v14314_v32 = vld [vmem:[#allocation45_spill] sm:$0xff] }
 0x1f8   :  { %v2680_v60 = vsel %vm14307_vm9, %v2628_v21, %v14306_v39  ;;  %v2868_v8 = vsel %vm14311_vm11, %v2824_v12, %v14310_v62  ;;  %v2476_v34 = vadd.f32 %v7543_v20, %v9874_v0  ;;  %v2467_v21 = vpop.f32.mrb[51].mxu0  ;;  %vm14313_vm9 = vmmov %vm14311_vm11  ;;  %v10513_v49 = vmax.f32 %v2465_v63, 0.0 }
 0x1f9   :  { %v2757_v54 = vsel %vm14309_vm15, 0.0, %v2680_v60  ;;  %v2869_v22 = vsel %vm14313_vm9, %v2823_v6, %v2824_v12  ;;  %v2468_v29 = vadd.f32 %v9874_v0, %v2467_v21  ;;  %vm14315_vm8 = vnez %v14314_v32 }
 0x1fa   :  { %v10509_v39 = vpack.c.bf16 %v2679_v27, %v2757_v54  ;;  %v2952_v60 = vsel %vm14315_vm8, 0.0, %v2868_v8  ;;  %v14316_v35 = vrot.slane %v10394_v11, 7  ;;  %v14317_v62 = vrot.slane %v10379_v61, 7  ;;  %v7546_v61 = vpop.f32.mrb[52].mxu0 }
 0x1fb   :  { %vm14318_vm11 = vcmp.lt.s32.totalorder %v8036_v16, 1  ;;  %v2830_v27 = vrot.slane %v10458_v28, 1  ;;  %v10526_v20 = vmax.f32 %v2476_v34, 0.0  ;;  %v10528_v6 = vpack.c.bf16 %v2952_v60, %v2869_v22 }
 0x1fc   :  { %14312 = vst [vmem:[#allocation78_spill] sm:$0xff] %v10509_v39  ;;  %v2677_v43 = vsel %vm14318_vm11, %v14317_v62, %v14316_v35  ;;  %v2828_v12 = vrot.slane %v10464_v40, 1  ;;  %v10532_v8 = vmax.f32 %v2468_v29, 0.0  ;;  %v14320_v21 = vmov %v14317_v62  ;;  %vm14322_vm9 = vmmov %vm14318_vm11 }
 0x1fd   :  { %14319 = vst [vmem:[#allocation79_spill] sm:$0xff] %v10528_v6  ;;  %v14321_v32 = vrot.slane %v10324_v3, 7  ;;  %v3032_v22 = vpack.c.bf16 %v10526_v20, %v10506_v10  ;;  %vm14323_vm11 = vnez %v13968_v37  ;;  %v14325_v34 = vrot.slane %v10443_v30, 1  ;;  %v14332_v37 = vld [vmem:[#allocation46_spill] sm:$0xff] }
 0x1fe   :  { %v3031_v3 = vpack.c.bf16 %v10532_v8, %v10513_v49  ;;  %v14327_v62 = vrot.slane %v10370_v24, 1  ;;  %v14329_v29 = vrot.slane %v10388_v15, 7  ;;  %vm14333_vm14 = vnez %v14332_v37 }
 0x1ff   :  { %v2678_v35 = vsel %vm14322_vm9, %v14321_v32, %v14320_v21  ;;  %v2489_v32 = vadd.f32 %v7546_v61, %v9874_v0  ;;  %3153 = vrot.lane.b32.xlu1 %v3032_v22, %s7942_s3  ;;  %v2480_v21 = vpop.f32.mrb[53].mxu0  ;;  %vm14326_vm9 = vcmp.lt.s32.totalorder %v8036_v16, 7  ;;  %v14335_v6 = vrot.slane %v10394_v11, 7 }
 0x200   :  { %v2759_v60 = vsel %vm14323_vm11, 0.0, %v2678_v35  ;;  %v2866_v35 = vsel %vm14326_vm9, %v2826_v23, %v14325_v34  ;;  %vm14328_vm8 = vmmov %vm14326_vm9  ;;  %v2481_v22 = vadd.f32 %v9874_v0, %v2480_v21  ;;  %v7547_v61 = vpop.f32.mrb[54].mxu0  ;;  %3151 = vrot.lane.b32.xlu0 %v3031_v3, %s7942_s3 }
 0x201   :  { %v10550_v54 = vpack.c.bf16 %v2677_v43, %v2759_v60  ;;  %v2867_v63 = vsel %vm14328_vm8, %v14327_v62, %v2826_v23  ;;  %v14330_v43 = vrot.slane %v10370_v24, 7  ;;  %v2954_v34 = vsel %vm14333_vm14, 0.0, %v2866_v35  ;;  %vm14336_vm8 = vmmov %vm14331_vm12  ;;  %v2483_v3 = vpop.f32.mrb[55].mxu0 }
 0x202   :  { %v14337_v62 = vrot.slane %v10436_v9, 1  ;;  %v2492_v21 = vadd.f32 %v7547_v61, %v9874_v0  ;;  %v10585_v39 = vpack.c.bf16 %v2954_v34, %v2867_v63  ;;  %v10589_v35 = vmax.f32 %v2481_v22, 0.0  ;;  %v14342_v34 = vld [vmem:[#allocation47_spill] sm:$0xff] }
 0x203   :  { %14324 = vst [vmem:[#allocation80_spill] sm:$0xff] %v10550_v54  ;;  %v2675_v60 = vsel %vm14331_vm12, %v14330_v43, %v14329_v29  ;;  %v14334_v54 = vmov %v14330_v43  ;;  %v10582_v43 = vmax.f32 %v2489_v32, 0.0  ;;  %vm14338_vm12 = vnez %v13979_v31 }
 0x204   :  { %v2676_v23 = vsel %vm14336_vm8, %v14335_v6, %v14334_v54  ;;  %v2864_v29 = vsel %vm14326_vm9, %v2828_v12, %v14337_v62  ;;  %v2484_v11 = vadd.f32 %v9874_v0, %v2483_v3  ;;  %v14340_v6 = vrot.slane %v10443_v30, 1  ;;  %vm14341_vm8 = vmmov %vm14326_vm9 }
 0x205   :  { %v2761_v24 = vsel %vm14338_vm12, 0.0, %v2676_v23  ;;  %v10600_v63 = vmax.f32 %v2492_v21, 0.0  ;;  %vm14343_vm9 = vnez %v14342_v34  ;;  %v2832_v22 = vrot.slane %v10532_v8, 1  ;;  %v7936_v34 = vld [vmem:[%s13223_s2] ss:$0 sm:$0xff] }
 0x206   :  { %v10592_v54 = vpack.c.bf16 %v2675_v60, %v2761_v24  ;;  %v2865_v32 = vsel %vm14341_vm8, %v14340_v6, %v2828_v12  ;;  %v2956_v23 = vsel %vm14343_vm9, 0.0, %v2864_v29  ;;  %v10606_v60 = vmax.f32 %v2484_v11, 0.0 }
 0x207   :  { %v10608_v3 = vpack.c.bf16 %v2956_v23, %v2865_v32  ;;  %v3034_v6 = vpack.c.bf16 %v10600_v63, %v10582_v43  ;;  %v14345_v21 = vrot.slane %v10464_v40, 7  ;;  %v14346_v62 = vrot.slane %v10443_v30, 7  ;;  %v7550_v32 = vpop.f32.mrb[56].mxu0 }
 0x208   :  { %14339 = vst [vmem:[#allocation81_spill] sm:$0xff] %v10592_v54  ;;  %vm14347_vm8 = vcmp.lt.s32.totalorder %v8036_v16, 1  ;;  %v3033_v23 = vpack.c.bf16 %v10606_v60, %v10589_v35  ;;  %v14349_v24 = vrot.slane %v10388_v15, 7  ;;  %v14352_v0 = vrot.slane %v10513_v49, 1 }
 0x209   :  { %14344 = vst [vmem:[#allocation82_spill] sm:$0xff] %v10608_v3  ;;  %v2673_v29 = vsel %vm14347_vm8, %v14346_v62, %v14345_v21  ;;  %v14348_v12 = vmov %v14346_v62  ;;  %vm14350_vm9 = vmmov %vm14347_vm8  ;;  %v2505_v62 = vadd.f32 %v7936_v34, %v7550_v32  ;;  %3157 = vrot.lane.b32.xlu1 %v3034_v6, %s7942_s3  ;;  %v2496_v21 = vpop.f32.mrb[57].mxu0  ;;  %vm14351_vm8 = vnez %v13985_v19  ;;  %v14356_v6 = vld [vmem:[#allocation48_spill] sm:$0xff] }
 0x20a   :  { %v2674_v61 = vsel %vm14350_vm9, %v14349_v24, %v14348_v12  ;;  %vm14353_vm14 = vcmp.lt.s32.totalorder %v8036_v16, 7  ;;  %v14354_v15 = vrot.slane %v10436_v9, 1  ;;  %v2497_v12 = vadd.f32 %v7936_v34, %v2496_v21  ;;  %v7551_v37 = vpop.f32.mrb[58].mxu0  ;;  %3155 = vrot.lane.b32.xlu0 %v3033_v23, %s7942_s3 }
 0x20b   :  { %v2763_v11 = vsel %vm14351_vm8, 0.0, %v2674_v61  ;;  %v2862_v30 = vsel %vm14353_vm14, %v2830_v27, %v14352_v0  ;;  %vm14355_vm9 = vmmov %vm14353_vm14  ;;  %vm14357_vm0 = vnez %v14356_v6  ;;  %v14358_v61 = vrot.slane %v10458_v28, 7 }
 0x20c   :  { %v2863_v24 = vsel %vm14355_vm9, %v14354_v15, %v2830_v27  ;;  %v10645_v32 = vpack.c.bf16 %v2673_v29, %v2763_v11  ;;  %v2958_v19 = vsel %vm14357_vm0, 0.0, %v2862_v30  ;;  %v14359_v31 = vrot.slane %v10436_v9, 7  ;;  %v2499_v27 = vpop.f32.mrb[59].mxu0 }
 0x20d   :  { %vm14360_vm14 = vcmp.lt.s32.totalorder %v8036_v16, 1  ;;  %v10655_v3 = vmax.f32 %v2505_v62, 0.0  ;;  %v2508_v54 = vadd.f32 %v7936_v34, %v7551_v37  ;;  %v10657_v21 = vpack.c.bf16 %v2958_v19, %v2863_v24 }
 0x20e   :  { %v2671_v0 = vsel %vm14360_vm14, %v14359_v31, %v14358_v61  ;;  %v14362_v23 = vmov %v14359_v31  ;;  %v14363_v29 = vrot.slane %v10464_v40, 7  ;;  %vm14364_vm9 = vmmov %vm14360_vm14  ;;  %v10665_v30 = vmax.f32 %v2497_v12, 0.0  ;;  %v7554_v12 = vpop.f32.mrb[60].mxu0 }
 0x20f   :  { %14361 = vst [vmem:[#allocation83_spill] sm:$0xff] %v10657_v21  ;;  %v2500_v15 = vadd.f32 %v7936_v34, %v2499_v27  ;;  %vm14365_vm0 = vnez %v13992_v18  ;;  %v14366_v31 = vrot.slane %v10506_v10, 1  ;;  %vm14367_vm14 = vcmp.lt.s32.totalorder %v8036_v16, 7 }
 0x210   :  { %v2672_v11 = vsel %vm14364_vm9, %v14363_v29, %v14362_v23  ;;  %v10675_v62 = vmax.f32 %v2508_v54, 0.0  ;;  %v2836_v24 = vrot.slane %v10606_v60, 1  ;;  %v14369_v27 = vrot.slane %v10513_v49, 1  ;;  %vm14370_vm9 = vmmov %vm14367_vm14 }
 0x211   :  { %v2765_v6 = vsel %vm14365_vm0, 0.0, %v2672_v11  ;;  %v2860_v37 = vsel %vm14367_vm14, %v2832_v22, %v14366_v31  ;;  %v10681_v61 = vmax.f32 %v2500_v15, 0.0  ;;  %v14374_v11 = vrot.slane %v10532_v8, 7 }
 0x212   :  { %v10677_v40 = vpack.c.bf16 %v2671_v0, %v2765_v6  ;;  %v2861_v23 = vsel %vm14370_vm9, %v14369_v27, %v2832_v22  ;;  %v3036_v54 = vpack.c.bf16 %v10675_v62, %v10655_v3  ;;  %v14371_v6 = vld [vmem:[#allocation49_spill] sm:$0xff]  ;;  %v2521_v22 = vadd.f32 %v7936_v34, %v7554_v12  ;;  %v2512_v27 = vpop.f32.mrb[61].mxu0 }
 0x213   :  { %vm14372_vm14 = vnez %v14371_v6  ;;  %v3035_v19 = vpack.c.bf16 %v10681_v61, %v10665_v30  ;;  %v14375_v29 = vrot.slane %v10513_v49, 7  ;;  %vm14376_vm9 = vcmp.lt.s32.totalorder %v8036_v16, 1  ;;  %v7555_v18 = vpop.f32.mrb[62].mxu0 }
 0x214   :  { %14368 = vst [vmem:[#allocation84_spill] sm:$0xff] %v10677_v40  ;;  %v2960_v0 = vsel %vm14372_vm14, 0.0, %v2860_v37  ;;  %3161 = vrot.lane.b32.xlu1 %v3036_v54, %s7942_s3  ;;  %v14378_v15 = vrot.slane %v10458_v28, 7  ;;  %vm14379_vm14 = vmmov %vm14376_vm9  ;;  %v14381_v12 = vrot.slane %v10526_v20, 1  ;;  %v14385_v28 = vrot.slane %v10506_v10, 1 }
 0x215   :  { %v10697_v9 = vpack.c.bf16 %v2960_v0, %v2861_v23  ;;  %v2669_v37 = vsel %vm14376_vm9, %v14375_v29, %v14374_v11  ;;  %v14377_v31 = vmov %v14375_v29  ;;  %v14380_v23 = vrot.slane %v10589_v35, 1  ;;  %3159 = vrot.lane.b32.xlu0 %v3035_v19, %s7942_s3 }
 0x216   :  { %v2670_v6 = vsel %vm14379_vm14, %v14378_v15, %v14377_v31  ;;  %v2513_v0 = vadd.f32 %v7936_v34, %v2512_v27  ;;  %vm14383_vm9 = vnez %v14001_v5  ;;  %v14384_v49 = vmov %v14381_v12  ;;  %vm14386_vm14 = vmmov %vm14382_vm4  ;;  %v14387_v31 = vld [vmem:[#allocation54_spill] sm:$0xff]  ;;  %v2515_v27 = vpop.f32.mrb[63].mxu0 }
 0x217   :  { %14373 = vst [vmem:[#allocation85_spill] sm:$0xff] %v10697_v9  ;;  %v2858_v54 = vsel %vm14382_vm4, %v14381_v12, %v14380_v23  ;;  %v2767_v29 = vsel %vm14383_vm9, 0.0, %v2670_v6  ;;  %v2859_v11 = vsel %vm14386_vm14, %v14385_v28, %v14384_v49  ;;  %vm14388_vm0 = vnez %v14387_v31 }
 0x218   :  { %v2962_v15 = vsel %vm14388_vm0, 0.0, %v2858_v54  ;;  %v10729_v9 = vmax.f32 %v2521_v22, 0.0  ;;  %v2524_v23 = vadd.f32 %v7936_v34, %v7555_v18  ;;  %v10731_v12 = vpack.c.bf16 %v2669_v37, %v2767_v29 }
 0x219   :  { %v10733_v19 = vpack.c.bf16 %v2962_v15, %v2859_v11  ;;  %v2842_v6 = vrot.slane %v10675_v62, 1  ;;  %v10736_v5 = vmax.f32 %v2513_v0, 0.0  ;;  %v2516_v40 = vadd.f32 %v7936_v34, %v2515_v27  ;;  %v14404_v0 = vld [vmem:[#allocation55_spill] sm:$0xff] }
 0x21a   :  { %v14390_v21 = vrot.slane %v10526_v20, 7  ;;  %v14391_v49 = vrot.slane %v10506_v10, 7  ;;  %vm14392_vm4 = vcmp.lt.s32.totalorder %v8036_v16, 1  ;;  %v2648_v22 = vrot.slane %v10681_v61, 7 }
 0x21b   :  { %14389 = vst [vmem:[#allocation86_spill] sm:$0xff] %v10733_v19  ;;  %v2840_v18 = vrot.slane %v10681_v61, 1  ;;  %v10746_v37 = vmax.f32 %v2524_v23, 0.0  ;;  %v14394_v28 = vrot.slane %v10532_v8, 7  ;;  %vm14395_vm14 = vmmov %vm14392_vm4  ;;  %v2845_v11 = vrot.slane %v10729_v9, 1 }
 0x21c   :  { %v2667_v54 = vsel %vm14392_vm4, %v14391_v49, %v14390_v21  ;;  %v14393_v29 = vmov %v14391_v49  ;;  %v10756_v15 = vmax.f32 %v2516_v40, 0.0  ;;  %vm14396_vm4 = vnez %v14008_v13 }
 0x21d   :  { %v2668_v34 = vsel %vm14395_vm14, %v14394_v28, %v14393_v29  ;;  %v2651_v61 = vrot.slane %v10736_v5, 7  ;;  %v2654_v23 = vrot.slane %v10746_v37, 7  ;;  %v3038_v10 = vpack.c.bf16 %v10746_v37, %v10729_v9 }
 0x21e   :  { %v2769_v21 = vsel %vm14396_vm4, 0.0, %v2668_v34  ;;  %v2843_v27 = vrot.slane %v10736_v5, 1  ;;  %v2846_v49 = vrot.slane %v10746_v37, 1  ;;  %v3037_v40 = vpack.c.bf16 %v10756_v15, %v10736_v5 }
 0x21f   :  { %v10764_v8 = vpack.c.bf16 %v2667_v54, %v2769_v21  ;;  %v14398_v29 = vrot.slane %v10582_v43, 1  ;;  %vm14399_vm14 = vcmp.lt.s32.totalorder %v8036_v16, 7  ;;  %3165 = vrot.lane.b32.xlu1 %v3038_v10, %s7942_s3  ;;  %v14400_v34 = vrot.slane %v9883_v36, 7 }
 0x220   :  { %vm14401_vm0 = vcmp.lt.s32.totalorder %v8036_v16, 1  ;;  %v14402_v21 = vrot.slane %v10589_v35, 1  ;;  %vm14403_vm4 = vmmov %vm14399_vm14  ;;  %vm14405_vm9 = vnez %v14404_v0  ;;  %v14406_v31 = vrot.slane %v10606_v60, 7  ;;  %3163 = vrot.lane.b32.xlu0 %v3037_v40, %s7942_s3 }
 0x221   :  { %14397 = vst [vmem:[#allocation87_spill] sm:$0xff] %v10764_v8  ;;  %v2856_v28 = vsel %vm14399_vm14, %v2836_v24, %v14398_v29  ;;  %v2718_v54 = vsel %vm14401_vm0, %v2654_v23, %v14400_v34  ;;  %v14407_v13 = vrot.slane %v10589_v35, 7  ;;  %vm14408_vm14 = vmmov %vm14401_vm0  ;;  %v14409_v29 = vld [vmem:[#allocation56_spill] sm:$0xff]  ;;  %v14414_v0 = vrot.slane %v10600_v63, 1 }
 0x222   :  { %v2857_v37 = vsel %vm14403_vm4, %v14402_v21, %v2836_v24  ;;  %v2964_v5 = vsel %vm14405_vm9, 0.0, %v2856_v28  ;;  %vm14410_vm8 = vnez %v14409_v29  ;;  %v14412_v24 = vrot.slane %v10526_v20, 7  ;;  %vm14418_vm9 = vmmov %vm14403_vm4 }
 0x223   :  { %v2665_v10 = vsel %vm14408_vm14, %v14407_v13, %v14406_v31  ;;  %v2719_v34 = vsel %vm14410_vm8, 0.0, %v2718_v54  ;;  %v10794_v8 = vpack.c.bf16 %v2964_v5, %v2857_v37  ;;  %v14411_v19 = vmov %v14407_v13 }
 0x224   :  { %v2666_v28 = vsel %vm14401_vm0, %v14412_v24, %v14411_v19  ;;  %v14413_v21 = vrot.slane %v10665_v30, 1  ;;  %v2975_v31 = vpack.c.bf16 %v9907_v41, %v2719_v34  ;;  %vm14415_vm14 = vnez %v14017_v33  ;;  %v14419_v19 = vld [vmem:[#allocation57_spill] sm:$0xff]  ;;  %v3104_v24 = vpop.permute.xlu0 %3103 }
 0x225   :  { %v2771_v40 = vsel %vm14415_vm14, 0.0, %v2666_v28  ;;  %v14416_v54 = vmov %v14414_v0  ;;  %v14417_v35 = vrot.slane %v10582_v43, 1  ;;  %vm14420_vm0 = vnez %v14419_v19 }
 0x226   :  { %v2854_v13 = vsel %vm14403_vm4, %v14414_v0, %v14413_v21  ;;  %v2652_v5 = vrot.slane %v10756_v15, 7  ;;  %v10820_v29 = vpack.c.bf16 %v2665_v10, %v2771_v40  ;;  %v14421_v41 = vrot.slane %v10600_v63, 7 }
 0x227   :  { %v2855_v20 = vsel %vm14418_vm9, %v14417_v35, %v14416_v54  ;;  %v2966_v37 = vsel %vm14420_vm0, 0.0, %v2854_v13  ;;  %v14422_v34 = vrot.slane %v10582_v43, 7  ;;  %vm14423_vm4 = vcmp.lt.s32.totalorder %v8036_v16, 1  ;;  %v14433_v43 = vld [vmem:[#allocation58_spill] sm:$0xff] }
 0x228   :  { %v10822_v0 = vpack.c.bf16 %v2966_v37, %v2855_v20  ;;  %v2844_v21 = vrot.slane %v10756_v15, 1  ;;  %vm14424_vm9 = vcmask 523264   ;;  %v14426_v35 = vrot.slane %v10606_v60, 7  ;;  %vm14427_vm0 = vmmov %vm14423_vm4 }
 0x229   :  { %v2663_v28 = vsel %vm14423_vm4, %v14422_v34, %v14421_v41  ;;  %v3170_v54 = vsel %vm14424_vm9, %v2975_v31, %v3104_v24  ;;  %v14425_v13 = vmov %v14422_v34  ;;  %v14428_v40 = vrot.slane %v10655_v3, 1 }
 0x22a   :  { %v2664_v10 = vsel %vm14427_vm0, %v14426_v35, %v14425_v13  ;;  %vm14429_vm8 = vcmp.lt.s32.totalorder %v8036_v16, 7  ;;  %3528 = vmatmul.mubr.bf16.vlgmr.msra.gmra.mrb[0].mxu1 %v3170_v54  ;;  %vm14430_vm14 = vnez %v14029_v45  ;;  %v14431_v15 = vrot.slane %v10665_v30, 1 }
 0x22b   :  { %v2852_v20 = vsel %vm14429_vm8, %v2840_v18, %v14428_v40  ;;  %v2773_v37 = vsel %vm14430_vm14, 0.0, %v2664_v10  ;;  %vm14432_vm4 = vmmov %vm14429_vm8  ;;  %vm14434_vm9 = vnez %v14433_v43  ;;  %v14435_v24 = vrot.slane %v10665_v30, 7 }
 0x22c   :  { %v2853_v31 = vsel %vm14432_vm4, %v14431_v15, %v2840_v18  ;;  %v2968_v60 = vsel %vm14434_vm9, 0.0, %v2852_v20  ;;  %vm14436_vm12 = vcmask 523264   ;;  %v10856_v34 = vpack.c.bf16 %v2663_v28, %v2773_v37  ;;  %vm14439_vm8 = vmmov %vm14427_vm0  ;;  %v14443_v28 = vld [vmem:[#allocation60_spill] sm:$0xff] }
 0x22d   :  { %v2661_v41 = vsel %vm14427_vm0, %v14435_v24, %v2648_v22  ;;  %7070 = vmatprep.mubr.msk.bf16.mxu1 %vm14436_vm12, %v9932_v52  ;;  %v10858_v54 = vpack.c.bf16 %v2968_v60, %v2853_v31  ;;  %v14437_v13 = vmov %v14435_v24  ;;  %v14438_v35 = vrot.slane %v10600_v63, 7  ;;  %vm14442_vm12 = vmmov %vm14432_vm4 }
 0x22e   :  { %v2850_v10 = vsel %vm14432_vm4, %v2842_v6, %v2843_v27  ;;  %vm14440_vm9 = vnez %v14031_v17  ;;  %v14441_v20 = vrot.slane %v10655_v3, 1  ;;  %vm14444_vm0 = vnez %v14443_v28  ;;  %vm14448_vm4 = vmmov %vm14439_vm8 }
 0x22f   :  { %v2662_v18 = vsel %vm14439_vm8, %v14438_v35, %v14437_v13  ;;  %v2970_v37 = vsel %vm14444_vm0, 0.0, %v2850_v10  ;;  %v14445_v30 = vrot.slane %v10675_v62, 7  ;;  %v14446_v63 = vrot.slane %v10655_v3, 7  ;;  %v3106_v35 = vpop.permute.xlu1 %3105  ;;  %vm14453_vm14 = vmmov %vm14448_vm4 }
 0x230   :  { %v2775_v40 = vsel %vm14440_vm9, 0.0, %v2662_v18  ;;  %v2851_v52 = vsel %vm14442_vm12, %v14441_v20, %v2842_v6  ;;  %v2848_v6 = vsel %vm14442_vm12, %v2844_v21, %v2845_v11  ;;  %vm14449_vm0 = vnez %v14040_v59  ;;  %vm14450_vm9 = vmmov %vm14442_vm12  ;;  %v14451_v20 = vld [vmem:[#allocation62_spill] sm:$0xff] }
 0x231   :  { %v2659_v15 = vsel %vm14439_vm8, %v14446_v63, %v14445_v30  ;;  %v10882_v31 = vpack.c.bf16 %v2661_v41, %v2775_v40  ;;  %v10884_v60 = vpack.c.bf16 %v2970_v37, %v2851_v52  ;;  %v14447_v24 = vmov %v14446_v63  ;;  %vm14455_vm12 = vmmov %vm14450_vm9 }
 0x232   :  { %v2660_v13 = vsel %vm14448_vm4, %v2648_v22, %v14447_v24  ;;  %v2849_v10 = vsel %vm14450_vm9, %v2843_v27, %v2844_v21  ;;  %vm14452_vm8 = vnez %v14451_v20  ;;  %v2657_v40 = vsel %vm14453_vm14, %v2651_v61, %v2652_v5  ;;  %vm14460_vm14 = vmmov %vm14448_vm4 }
 0x233   :  { %v2777_v18 = vsel %vm14449_vm0, 0.0, %v2660_v13  ;;  %v2972_v41 = vsel %vm14452_vm8, 0.0, %v2848_v6  ;;  %v14454_v22 = vmov %v14445_v30  ;;  %v2847_v30 = vsel %vm14455_vm12, %v2845_v11, %v2846_v49  ;;  %vm14458_vm8 = vmmov %vm14455_vm12  ;;  %v14462_v13 = vld [vmem:[#allocation64_spill] sm:$0xff] }
 0x234   :  { %v10900_v3 = vpack.c.bf16 %v2659_v15, %v2777_v18  ;;  %v10902_v52 = vpack.c.bf16 %v2972_v41, %v2849_v10  ;;  %v2658_v37 = vsel %vm14448_vm4, %v14454_v22, %v2651_v61  ;;  %vm14456_vm9 = vnez %v14046_v51  ;;  %vm14465_vm12 = vmmov %vm14460_vm14  ;;  %v14479_v41 = vld [vmem:[#allocation29_spill] sm:$0xff]  ;;  %v14483_v22 = vld [vmem:[#allocation31_spill] sm:$0xff] }
 0x235   :  { %v2779_v27 = vsel %vm14456_vm9, 0.0, %v2658_v37  ;;  %v14457_v21 = vrot.slane %v9883_v36, 1  ;;  %v14459_v15 = vrot.slane %v10729_v9, 7  ;;  %vm14461_vm0 = vcmask 523264   ;;  %v3110_v9 = vpop.permute.xlu1 %3109  ;;  %v14485_v37 = vld [vmem:[#allocation33_spill] sm:$0xff] }
 0x236   :  { %v3174_v62 = vsel %vm14461_vm0, %v9917_v58, %v3106_v35  ;;  %v10922_v61 = vpack.c.bf16 %v2657_v40, %v2779_v27  ;;  %vm14463_vm4 = vnez %v14462_v13  ;;  %vm14472_vm9 = vmmov %vm14461_vm0  ;;  %v14481_v40 = vld [vmem:[#allocation28_spill] sm:$0xff]  ;;  %v14488_v27 = vld [vmem:[#allocation34_spill] sm:$0xff] }
 0x237   :  { %v2910_v63 = vsel %vm14458_vm8, %v2846_v49, %v14457_v21  ;;  %v2655_v24 = vsel %vm14460_vm14, %v14459_v15, %v2654_v23  ;;  %v14464_v6 = vmov %v14459_v15  ;;  %3536 = vmatmul.mubr.bf16.gmra.mrb[4].mxu1 %v3174_v62  ;;  %vm14466_vm8 = vnez %v14055_v38  ;;  %vm14467_vm14 = vmmov %vm14461_vm0  ;;  %v3108_v23 = vpop.permute.xlu0 %3107 }
 0x238   :  { %v2974_v11 = vsel %vm14463_vm4, 0.0, %v2910_v63  ;;  %v2656_v36 = vsel %vm14465_vm12, %v2652_v5, %v14464_v6  ;;  %7071 = vmatprep.mubr.msk.bf16.mxu1 %vm14467_vm14, %v9946_v47  ;;  %v3178_v35 = vsel %vm14461_vm0, %v9952_v48, %v3108_v23  ;;  %vm14468_vm4 = vmmov %vm14461_vm0  ;;  %v14490_v63 = vld [vmem:[#allocation38_spill] sm:$0xff] }
 0x239   :  { %v10930_v49 = vpack.c.bf16 %v2974_v11, %v2847_v30  ;;  %v2781_v18 = vsel %vm14466_vm8, 0.0, %v2656_v36  ;;  %vm14469_vm12 = vmmov %vm14461_vm0  ;;  %v3114_v48 = vpop.permute.xlu1 %3113  ;;  %v14487_v30 = vld [vmem:[#allocation35_spill] sm:$0xff]  ;;  %v14498_v23 = vld [vmem:[#allocation70_spill] sm:$0xff] }
 0x23a   :  { %v10936_v58 = vpack.c.bf16 %v2655_v24, %v2781_v18  ;;  %v3182_v5 = vsel %vm14469_vm12, %v9976_v7, %v3110_v9  ;;  %vm14470_vm8 = vmmov %vm14461_vm0  ;;  %v14492_v24 = vld [vmem:[#allocation40_spill] sm:$0xff]  ;;  %v14494_v11 = vld [vmem:[#allocation39_spill] sm:$0xff] }
 0x23b   :  { %v3112_v10 = vpop.permute.xlu0 %3111  ;;  %vm14471_vm14 = vmmov %vm14461_vm0  ;;  %v14496_v36 = vld [vmem:[#allocation43_spill] sm:$0xff] }
 0x23c   :  { %v3186_v47 = vsel %vm14471_vm14, %v9998_v4, %v3112_v10  ;;  %vm14474_vm12 = vmmov %vm14461_vm0  ;;  %v14499_v9 = vld [vmem:[#allocation71_spill] sm:$0xff]  ;;  %v14501_v10 = vld [vmem:[#allocation72_spill] sm:$0xff] }
 0x23d   :  { %v3118_v4 = vpop.permute.xlu1 %3117  ;;  %vm14476_vm14 = vmmov %vm14461_vm0 }
 0x23f   :  { %3544 = vmatmul.mubr.bf16.gmra.mrb[8].mxu1 %v3178_v35  ;;  %v3116_v7 = vpop.permute.xlu0 %3115 }
 0x240   :  { %7072 = vmatprep.mubr.msk.bf16.mxu1 %vm14468_vm4, %v9974_v2  ;;  %v3190_v2 = vsel %vm14461_vm0, %v10026_v56, %v3114_v48  ;;  %vm14473_vm4 = vmmov %vm14461_vm0  ;;  %v14503_v48 = vld [vmem:[#allocation73_spill] sm:$0xff] }
 0x243   :  { %v3120_v56 = vpop.permute.xlu0 %3119 }
 0x247   :  { %3552 = vmatmul.mubr.bf16.gmra.mrb[12].mxu1 %v3182_v5 }
 0x248   :  { %7073 = vmatprep.mubr.msk.bf16.mxu1 %vm14470_vm8, %v9988_v46  ;;  %v3194_v46 = vsel %vm14474_vm12, %v10054_v57, %v3116_v7  ;;  %vm14475_vm8 = vmmov %vm14461_vm0  ;;  %v3122_v57 = vpop.permute.xlu1 %3121  ;;  %v14505_v7 = vld [vmem:[#allocation74_spill] sm:$0xff] }
 0x249   :  { %vm14480_vm12 = vmmov %vm14461_vm0 }
 0x24f   :  { %3560 = vmatmul.mubr.bf16.gmra.mrb[16].mxu1 %v3186_v47 }
 0x250   :  { %7074 = vmatprep.mubr.msk.bf16.mxu1 %vm14472_vm9, %v10017_v44  ;;  %v3198_v44 = vsel %vm14476_vm14, %v10082_v1, %v3118_v4  ;;  %vm14477_vm9 = vmmov %vm14461_vm0  ;;  %v3124_v1 = vpop.permute.xlu0 %3123  ;;  %v14507_v4 = vld [vmem:[#allocation75_spill] sm:$0xff] }
 0x251   :  { %vm14484_vm14 = vmmov %vm14461_vm0 }
 0x254   :  { %v3128_v21 = vpop.permute.xlu0 %3127 }
 0x257   :  { %3568 = vmatmul.mubr.bf16.gmra.mrb[20].mxu1 %v3190_v2 }
 0x258   :  { %7075 = vmatprep.mubr.msk.bf16.mxu1 %vm14473_vm4, %v10039_v50  ;;  %v3202_v50 = vsel %vm14461_vm0, %v10120_v25, %v3120_v56  ;;  %vm14478_vm4 = vmmov %vm14461_vm0  ;;  %v3126_v25 = vpop.permute.xlu1 %3125  ;;  %v3132_v18 = vpop.permute.xlu0 %3131 }
 0x259   :  { %v3226_v35 = vsel %vm14461_vm0, %v14498_v23, %v3132_v18  ;;  %v7862_v18 = vld [vmem:[%s13224_s5 + $0x44] ss:$8 sps:$4 sm:$0xff]  }
 0x25c   :  { %v3130_v62 = vpop.permute.xlu1 %3129  ;;  %v3136_v2 = vpop.permute.xlu0 %3135 }
 0x25f   :  { %3576 = vmatmul.mubr.bf16.gmra.mrb[24].mxu1 %v3194_v46 }
 0x260   :  { %7076 = vmatprep.mubr.msk.bf16.mxu1 %vm14475_vm8, %v10075_v26  ;;  %v3206_v26 = vsel %vm14480_vm12, %v14479_v41, %v3122_v57  ;;  %vm14482_vm8 = vmmov %vm14461_vm0  ;;  %v3134_v5 = vpop.permute.xlu1 %3133  ;;  %v3140_v57 = vpop.permute.xlu0 %3139  ;;  %v14511_v41 = vld [vmem:[#allocation77_spill] sm:$0xff] }
 0x261   :  { %vm14491_vm12 = vmmov %vm14461_vm0 }
 0x262   :  { %v3218_v15 = vsel %vm14491_vm12, %v14490_v63, %v3128_v21  ;;  %vm14502_vm12 = vmmov %vm14461_vm0  ;;  %v7854_v21 = vld [vmem:[%s13224_s5 + $0x20] ss:$8 sps:$4 sm:$0xff]   ;;  %v7856_v63 = vld [vmem:[%s13224_s5 + $0x24] ss:$8 sps:$4 sm:$0xff]  }
 0x263   :  { %v3230_v47 = vsel %vm14502_vm12, %v14501_v10, %v3134_v5  ;;  %vm14512_vm12 = vmmov %vm14461_vm0  ;;  %v7863_v5 = vld [vmem:[%s13224_s5 + $0x50] ss:$8 sps:$4 sm:$0xff]   ;;  %v7865_v10 = vld [vmem:[%s13224_s5 + $0x54] ss:$8 sps:$4 sm:$0xff]  }
 0x267   :  { %3584 = vmatmul.mubr.bf16.gmra.mrb[28].mxu1 %v3198_v44  ;;  %v3138_v44 = vpop.permute.xlu1 %3137 }
 0x268   :  { %7077 = vmatprep.mubr.msk.bf16.mxu1 %vm14477_vm9, %v10096_v42  ;;  %v3210_v42 = vsel %vm14484_vm14, %v14483_v22, %v3124_v1  ;;  %vm14486_vm9 = vmmov %vm14461_vm0  ;;  %v3238_v56 = vsel %vm14461_vm0, %v10439_v55, %v3138_v44  ;;  %v14514_v1 = vld [vmem:[#allocation78_spill] sm:$0xff]  ;;  %v7869_v44 = vld [vmem:[%s13224_s5 + $0x70] ss:$8 sps:$4 sm:$0xff]  }
 0x269   :  { %vm14495_vm14 = vmmov %vm14461_vm0  ;;  %v7848_v55 = vld [vmem:[%s13224_s5] ss:$8 sps:$4 sm:$0xff]  }
 0x26a   :  { %v3222_v6 = vsel %vm14495_vm14, %v14494_v11, %v3130_v62  ;;  %vm14506_vm14 = vmmov %vm14461_vm0  ;;  %v7859_v11 = vld [vmem:[%s13224_s5 + $0x34] ss:$8 sps:$4 sm:$0xff]  }
 0x26b   :  { %v3234_v46 = vsel %vm14506_vm14, %v14505_v7, %v3136_v2  ;;  %vm14515_vm14 = vmmov %vm14461_vm0  ;;  %v14527_v2 = vld [vmem:[#allocation84_spill] sm:$0xff] }
 0x26f   :  { %3592 = vmatmul.mubr.bf16.gmra.mrb[32].mxu1 %v3202_v50  ;;  %v14509_v50 = vld [vmem:[#allocation76_spill] sm:$0xff] }
 0x270   :  { %7078 = vmatprep.mubr.msk.bf16.mxu1 %vm14478_vm4, %v10129_v14  ;;  %v3214_v14 = vsel %vm14461_vm0, %v14487_v30, %v3126_v25  ;;  %vm14489_vm4 = vmmov %vm14461_vm0  ;;  %v7850_v25 = vld [vmem:[%s13224_s5 + $0x4] ss:$8 sps:$4 sm:$0xff]  }
 0x271   :  { %7556 = vmatprep.subr.bf16.mxu1 %v7850_v25  ;;  %4409 = vmatprep.subr.bf16.mxu0 %v7850_v25 }
 0x272   :  { %7564 = vmatpush1.bf16.msra.mxu1 %v7848_v55  ;;  %4410 = vmatpush1.bf16.msra.mxu0 %v7848_v55 }
 0x277   :  { %3600 = vmatmul.mubr.bf16.gmra.mrb[36].mxu1 %v3206_v26  ;;  %v3242_v26 = vsel %vm14512_vm12, %v14511_v41, %v3140_v57  ;;  %vm14521_vm12 = vmmov %vm14461_vm0  ;;  %v14532_v41 = vld [vmem:[#allocation86_spill] sm:$0xff] }
 0x278   :  { %7079 = vmatprep.mubr.msk.bf16.mxu1 %vm14482_vm8, %v14481_v40  ;;  %vm14493_vm8 = vmmov %vm14461_vm0  ;;  %v3142_v40 = vpop.permute.xlu1 %3141 }
 0x279   :  { %v3246_v22 = vsel %vm14515_vm14, %v14514_v1, %v3142_v40  ;;  %vm14524_vm14 = vmmov %vm14461_vm0  ;;  %v14534_v40 = vld [vmem:[#allocation87_spill] sm:$0xff] }
 0x27f   :  { %3608 = vmatmul.mubr.bf16.gmra.mrb[40].mxu1 %v3210_v42  ;;  %v14516_v42 = vld [vmem:[#allocation79_spill] sm:$0xff] }
 0x280   :  { %7080 = vmatprep.mubr.msk.bf16.mxu1 %vm14486_vm9, %v14485_v37  ;;  %vm14497_vm9 = vmmov %vm14461_vm0  ;;  %v3144_v37 = vpop.permute.xlu0 %3143 }
 0x284   :  { %v3148_v23 = vpop.permute.xlu0 %3147 }
 0x287   :  { %3616 = vmatmul.mubr.bf16.gmra.mrb[44].mxu1 %v3214_v14  ;;  %v7851_v14 = vld [vmem:[%s13224_s5 + $0x10] ss:$8 sps:$4 sm:$0xff]  }
 0x288   :  { %7081 = vmatprep.mubr.msk.bf16.mxu1 %vm14489_vm4, %v14488_v27  ;;  %vm14500_vm4 = vmmov %vm14461_vm0  ;;  %v7853_v27 = vld [vmem:[%s13224_s5 + $0x14] ss:$8 sps:$4 sm:$0xff]  }
 0x289   :  { %7557 = vmatprep.subr.bf16.mxu1 %v7853_v27  ;;  %4411 = vmatprep.subr.bf16.mxu0 %v7853_v27 }
 0x28a   :  { %7565 = vmatpush1.bf16.msra.mxu1 %v7851_v14  ;;  %4412 = vmatpush1.bf16.msra.mxu0 %v7851_v14 }
 0x28b   :  { %7558 = vmatprep.subr.bf16.mxu1 %v7856_v63  ;;  %4413 = vmatprep.subr.bf16.mxu0 %v7856_v63 }
 0x28e   :  { %7566 = vmatpush1.bf16.msra.mxu1 %v7854_v21  ;;  %4414 = vmatpush1.bf16.msra.mxu0 %v7854_v21 }
 0x28f   :  { %3624 = vmatmul.mubr.bf16.gmra.mrb[48].mxu1 %v3218_v15  ;;  %v3146_v15 = vpop.permute.xlu1 %3145  ;;  %7559 = vmatprep.subr.bf16.mxu1 %v7859_v11 }
 0x290   :  { %7082 = vmatprep.mubr.msk.bf16.mxu1 %vm14493_vm8, %v14492_v24  ;;  %vm14504_vm8 = vmmov %vm14461_vm0  ;;  %v14520_v24 = vld [vmem:[#allocation81_spill] sm:$0xff]  ;;  %4415 = vmatprep.subr.bf16.mxu0 %v7859_v11 }
 0x291   :  { %v3254_v62 = vsel %vm14521_vm12, %v14520_v24, %v3146_v15  ;;  %vm14531_vm12 = vmmov %vm14461_vm0 }
 0x297   :  { %3632 = vmatmul.mubr.bf16.gmra.mrb[52].mxu1 %v3222_v6  ;;  %v14522_v6 = vld [vmem:[#allocation82_spill] sm:$0xff] }
 0x298   :  { %7083 = vmatprep.mubr.msk.bf16.mxu1 %vm14497_vm9, %v14496_v36  ;;  %vm14508_vm9 = vmmov %vm14461_vm0  ;;  %v7860_v36 = vld [vmem:[%s13224_s5 + $0x40] ss:$8 sps:$4 sm:$0xff]  }
 0x29f   :  { %3640 = vmatmul.mubr.bf16.gmra.mrb[56].mxu1 %v3226_v35  ;;  %v3258_v35 = vsel %vm14524_vm14, %v10645_v32, %v3148_v23  ;;  %v7866_v32 = vld [vmem:[%s13224_s5 + $0x60] ss:$8 sps:$4 sm:$0xff]   ;;  %vm14535_vm14 = vmmov %vm14461_vm0 }
 0x2a0   :  { %7084 = vmatprep.mubr.msk.bf16.mxu1 %vm14500_vm4, %v14499_v9  ;;  %vm14510_vm4 = vmmov %vm14461_vm0  ;;  %v14525_v9 = vld [vmem:[#allocation83_spill] sm:$0xff] }
 0x2a7   :  { %3648 = vmatmul.mubr.bf16.gmra.mrb[60].mxu1 %v3230_v47  ;;  %v3150_v47 = vpop.permute.xlu1 %3149 }
 0x2a8   :  { %7085 = vmatprep.mubr.msk.bf16.mxu1 %vm14504_vm8, %v14503_v48  ;;  %vm14513_vm8 = vmmov %vm14461_vm0  ;;  %v7868_v48 = vld [vmem:[%s13224_s5 + $0x64] ss:$8 sps:$4 sm:$0xff]   ;;  %v3262_v7 = vsel %vm14461_vm0, %v14527_v2, %v3150_v47 }
 0x2af   :  { %3656 = vmatmul.mubr.bf16.gmra.mrb[64].mxu1 %v3234_v46  ;;  %v7871_v46 = vld [vmem:[%s13224_s5 + $0x74] ss:$8 sps:$4 sm:$0xff]  }
 0x2b0   :  { %7086 = vmatprep.mubr.msk.bf16.mxu1 %vm14508_vm9, %v14507_v4  ;;  %vm14517_vm9 = vmmov %vm14461_vm0  ;;  %v14528_v4 = vld [vmem:[#allocation85_spill] sm:$0xff] }
 0x2b7   :  { %3664 = vmatmul.mubr.bf16.gmra.mrb[68].mxu1 %v3238_v56  ;;  %v3152_v56 = vpop.permute.xlu0 %3151 }
 0x2b8   :  { %7087 = vmatprep.mubr.msk.bf16.mxu1 %vm14510_vm4, %v14509_v50  ;;  %vm14519_vm4 = vmmov %vm14461_vm0  ;;  %v14530_v50 = vmov 0   ;;  %v3266_v57 = vsel %vm14531_vm12, %v10731_v12, %v3152_v56  ;;  %v11090_v12 = vld [vmem:[%s13225_s4] ss:$0 sm:$0xff] }
 0x2b9   :  { %vm14538_vm12 = vmmov %vm14461_vm0 }
 0x2bf   :  { %3672 = vmatmul.mubr.bf16.gmra.mrb[72].mxu1 %v3242_v26  ;;  %v3154_v26 = vpop.permute.xlu1 %3153 }
 0x2c0   :  { %7088 = vmatprep.mubr.msk.bf16.mxu1 %vm14513_vm8, %v10498_v53  ;;  %v14518_v53 = vld [vmem:[#allocation80_spill] sm:$0xff]  ;;  %vm14523_vm8 = vmmov %vm14461_vm0  ;;  %v3270_v1 = vsel %vm14535_vm14, %v14534_v40, %v3154_v26  ;;  %vm14540_vm14 = vcmp.lt.s32.totalorder %v8036_v16, 1 }
 0x2c1   :  { %v3250_v30 = vsel %vm14461_vm0, %v14518_v53, %v3144_v37 }
 0x2c3   :  { %v3158_v37 = vpop.permute.xlu1 %3157 }
 0x2c4   :  { %v3278_v27 = vsel %vm14538_vm12, %v10856_v34, %v3158_v37 }
 0x2c7   :  { %3680 = vmatmul.mubr.bf16.gmra.mrb[76].mxu1 %v3246_v22  ;;  %v3156_v22 = vpop.permute.xlu0 %3155 }
 0x2c8   :  { %7089 = vmatprep.mubr.msk.bf16.mxu1 %vm14517_vm9, %v14516_v42  ;;  %vm14526_vm9 = vmmov %vm14461_vm0  ;;  %v3274_v42 = vsel %vm14461_vm0, %v10820_v29, %v3156_v22 }
 0x2cf   :  { %3688 = vmatmul.mubr.bf16.gmra.mrb[80].mxu1 %v3250_v30 }
 0x2d0   :  { %7090 = vmatprep.mubr.msk.bf16.mxu1 %vm14519_vm4, %v10585_v39  ;;  %v7857_v39 = vld [vmem:[%s13224_s5 + $0x30] ss:$8 sps:$4 sm:$0xff]   ;;  %vm14529_vm4 = vmmov %vm14461_vm0 }
 0x2d1   :  { %7567 = vmatpush1.bf16.msra.mxu1 %v7857_v39  ;;  %4416 = vmatpush1.bf16.msra.mxu0 %v7857_v39 }
 0x2d2   :  { %7560 = vmatprep.subr.bf16.mxu1 %v7862_v18  ;;  %4417 = vmatprep.subr.bf16.mxu0 %v7862_v18 }
 0x2d5   :  { %7568 = vmatpush1.bf16.msra.mxu1 %v7860_v36  ;;  %4418 = vmatpush1.bf16.msra.mxu0 %v7860_v36 }
 0x2d6   :  { %7561 = vmatprep.subr.bf16.mxu1 %v7865_v10  ;;  %4419 = vmatprep.subr.bf16.mxu0 %v7865_v10 }
 0x2d7   :  { %3696 = vmatmul.mubr.bf16.gmra.mrb[84].mxu1 %v3254_v62  ;;  %v3160_v62 = vpop.permute.xlu0 %3159 }
 0x2d8   :  { %7091 = vmatprep.mubr.msk.bf16.mxu1 %vm14523_vm8, %v14522_v6  ;;  %vm14533_vm8 = vmmov %vm14461_vm0 }
 0x2d9   :  { %7569 = vmatpush1.bf16.msra.mxu1 %v7863_v5  ;;  %4420 = vmatpush1.bf16.msra.mxu0 %v7863_v5 }
 0x2da   :  { %7562 = vmatprep.subr.bf16.mxu1 %v7868_v48  ;;  %4421 = vmatprep.subr.bf16.mxu0 %v7868_v48 }
 0x2dd   :  { %7570 = vmatpush1.bf16.msra.mxu1 %v7866_v32  ;;  %4422 = vmatpush1.bf16.msra.mxu0 %v7866_v32 }
 0x2de   :  { %7563 = vmatprep.subr.bf16.mxu1 %v7871_v46  ;;  %4423 = vmatprep.subr.bf16.mxu0 %v7871_v46 }
 0x2df   :  { %3704 = vmatmul.mubr.bf16.gmra.mrb[88].mxu1 %v3258_v35 }
 0x2e0   :  { %7092 = vmatprep.mubr.msk.bf16.mxu1 %vm14526_vm9, %v14525_v9  ;;  %vm14536_vm9 = vmmov %vm14461_vm0 }
 0x2e1   :  { %7571 = vmatpush1.bf16.msra.mxu1 %v7869_v44  ;;  %4424 = vmatpush1.bf16.msra.mxu0 %v7869_v44 }
 0x2e2   :  { %6265 = vmatprep.subr.bf16.mxu1 %v14530_v50 }
 0x2e7   :  { %3712 = vmatmul.mubr.bf16.gmra.mrb[92].mxu1 %v3262_v7 }
 0x2e8   :  { %7093 = vmatprep.mubr.msk.bf16.mxu1 %vm14529_vm4, %v14528_v4  ;;  %vm14537_vm4 = vmmov %vm14461_vm0 }
 0x2ef   :  { %3720 = vmatmul.mubr.bf16.gmra.mrb[96].mxu1 %v3266_v57 }
 0x2f0   :  { %7094 = vmatprep.mubr.msk.bf16.mxu1 %vm14533_vm8, %v14532_v41  ;;  %vm14539_vm8 = vmmov %vm14461_vm0 }
 0x2f7   :  { %3728 = vmatmul.mubr.bf16.gmra.mrb[100].mxu1 %v3270_v1 }
 0x2f8   :  { %7095 = vmatprep.mubr.msk.bf16.mxu1 %vm14536_vm9, %v10794_v8  ;;  %vm14541_vm9 = vmmov %vm14461_vm0  ;;  %vm14542_vm0 = vcmp.lt.s32.totalorder %v8036_v16, 7 }
 0x2f9   :  { %v3282_v9 = vsel %vm14541_vm9, %v10882_v31, %v3160_v62  ;;  %vm14544_vm12 = vmmov %vm14542_vm0  ;;  %v3164_v62 = vpop.permute.xlu0 %3163 }
 0x2fa   :  { %vm14548_vm9 = vmmov %vm14542_vm0 }
 0x2fd   :  { %v3529_v55 = vpop.f32.mrb[0].mxu1 }
 0x2fe   :  { %v3530_v25 = vadd.f32 %v11090_v12, %v3529_v55  ;;  %v3531_v53 = vpop.f32.mrb[1].mxu1 }
 0x2ff   :  { %3736 = vmatmul.mubr.bf16.gmra.mrb[104].mxu1 %v3274_v42  ;;  %v3532_v30 = vpop.f32.mrb[2].mxu1 }
 0x300   :  { %7096 = vmatprep.mubr.msk.bf16.mxu1 %vm14537_vm4, %v10822_v0  ;;  %v11093_v8 = vmax.f32 %v3530_v25, 0.0  ;;  %v3533_v14 = vadd.f32 %v11090_v12, %v3532_v30  ;;  %v3534_v29 = vpop.f32.mrb[3].mxu1 }
 0x302   :  { %v11098_v0 = vmax.f32 %v3533_v14, 0.0  ;;  %v13517_v21 = vrot.slane %v11093_v8, 7  ;;  %v13516_v35 = vrot.slane %v11093_v8, 1 }
 0x304   :  { %v3849_v63 = vrot.slane %v11098_v0, 7 }
 0x306   :  { %v11111_v34 = vsel %vm14540_vm14, %v13517_v21, %v3849_v63 }
 0x307   :  { %3744 = vmatmul.mubr.bf16.gmra.mrb[108].mxu1 %v3278_v27 }
 0x308   :  { %7097 = vmatprep.mubr.msk.bf16.mxu1 %vm14539_vm8, %v10858_v54  ;;  %v4041_v54 = vrot.slane %v11098_v0, 1  ;;  %vm14546_vm8 = vmmov %vm14540_vm14 }
 0x309   :  { %vm14547_vm14 = vmmov %vm14546_vm8 }
 0x30a   :  { %v3537_v24 = vpop.f32.mrb[4].mxu1  ;;  %v11128_v32 = vsel %vm14542_vm0, %v13516_v35, %v4041_v54  ;;  %vm14550_vm0 = vmmov %vm14537_vm4 }
 0x30b   :  { %v3538_v39 = vadd.f32 %v11090_v12, %v3537_v24  ;;  %v3539_v11 = vpop.f32.mrb[5].mxu1  ;;  %14543 = vst [vmem:[#allocation29_spill] sm:$0xff] %v11128_v32 }
 0x30c   :  { %v3540_v6 = vpop.f32.mrb[6].mxu1 }
 0x30d   :  { %v11114_v36 = vmax.f32 %v3538_v39, 0.0  ;;  %v3541_v18 = vadd.f32 %v11090_v12, %v3540_v6  ;;  %v3542_v23 = vpop.f32.mrb[7].mxu1 }
 0x30f   :  { %v3850_v5 = vrot.slane %v11114_v36, 7  ;;  %v4042_v10 = vrot.slane %v11114_v36, 1  ;;  %v11122_v47 = vmax.f32 %v3541_v18, 0.0  ;;  %3752 = vmatmul.mubr.bf16.gmra.mrb[112].mxu1 %v3282_v9 }
 0x310   :  { %7098 = vmatprep.mubr.msk.bf16.mxu1 %vm14537_vm4, %v10884_v60  ;;  %v3162_v60 = vpop.permute.xlu1 %3161  ;;  %vm14551_vm4 = vmmov %vm14550_vm0 }
 0x311   :  { %v11134_v48 = vsel %vm14544_vm12, %v4041_v54, %v4042_v10  ;;  %v3851_v31 = vrot.slane %v11122_v47, 7  ;;  %v4043_v2 = vrot.slane %v11122_v47, 1  ;;  %v11140_v7 = vsel %vm14546_vm8, %v3849_v63, %v3850_v5  ;;  %vm14552_vm12 = vmmov %vm14546_vm8 }
 0x312   :  { %14545 = vst [vmem:[#allocation28_spill] sm:$0xff] %v11134_v48  ;;  %v3545_v4 = vpop.f32.mrb[8].mxu1  ;;  %v3286_v37 = vsel %vm14550_vm0, %v10900_v3, %v3162_v60  ;;  %vm14553_vm8 = vmmov %vm14548_vm9 }
 0x313   :  { %v3546_v56 = vadd.f32 %v11090_v12, %v3545_v4  ;;  %v3547_v57 = vpop.f32.mrb[9].mxu1  ;;  %v11149_v41 = vsel %vm14547_vm14, %v3850_v5, %v3851_v31  ;;  %v11153_v26 = vsel %vm14548_vm9, %v4042_v10, %v4043_v2  ;;  %vm14555_vm14 = vmmov %vm14552_vm12 }
 0x314   :  { %14549 = vst [vmem:[#allocation31_spill] sm:$0xff] %v11153_v26  ;;  %v3548_v40 = vpop.f32.mrb[10].mxu1  ;;  %vm14556_vm9 = vmmov %vm14553_vm8 }
 0x315   :  { %v11157_v22 = vmax.f32 %v3546_v56, 0.0  ;;  %v3549_v42 = vadd.f32 %v11090_v12, %v3548_v40  ;;  %v3550_v55 = vpop.f32.mrb[11].mxu1 }
 0x317   :  { %v3852_v25 = vrot.slane %v11157_v22, 7  ;;  %v4044_v53 = vrot.slane %v11157_v22, 1  ;;  %v11164_v30 = vmax.f32 %v3549_v42, 0.0  ;;  %3760 = vmatmul.mubr.bf16.gmra.mrb[116].mxu1 %v3286_v37  ;;  %v3166_v37 = vpop.permute.xlu1 %3165 }
 0x318   :  { %7099 = vmatprep.mubr.msk.bf16.mxu1 %vm14551_vm4, %v10902_v52  ;;  %vm14558_vm4 = vmmov %vm14550_vm0 }
 0x319   :  { %v3853_v14 = vrot.slane %v11164_v30, 7  ;;  %v4045_v29 = vrot.slane %v11164_v30, 1  ;;  %v11172_v27 = vsel %vm14552_vm12, %v3851_v31, %v3852_v25  ;;  %v11178_v24 = vsel %vm14553_vm8, %v4043_v2, %v4044_v53 }
 0x31a   :  { %v3553_v63 = vpop.f32.mrb[12].mxu1  ;;  %14554 = vst [vmem:[#allocation33_spill] sm:$0xff] %v11178_v24  ;;  %v3290_v31 = vsel %vm14550_vm0, %v10922_v61, %v3164_v62 }
 0x31b   :  { %v3554_v39 = vadd.f32 %v11090_v12, %v3553_v63  ;;  %v3555_v52 = vpop.f32.mrb[13].mxu1  ;;  %v11183_v11 = vsel %vm14555_vm14, %v3852_v25, %v3853_v14  ;;  %v11189_v6 = vsel %vm14556_vm9, %v4044_v53, %v4045_v29  ;;  %vm14560_vm14 = vmmov %vm14552_vm12 }
 0x31c   :  { %14557 = vst [vmem:[#allocation35_spill] sm:$0xff] %v11189_v6  ;;  %v3556_v18 = vpop.f32.mrb[14].mxu1  ;;  %vm14561_vm9 = vmmov %vm14553_vm8 }
 0x31d   :  { %v11193_v9 = vmax.f32 %v3554_v39, 0.0  ;;  %v3557_v5 = vadd.f32 %v11090_v12, %v3556_v18  ;;  %v3558_v10 = vpop.f32.mrb[15].mxu1 }
 0x31f   :  { %v3854_v2 = vrot.slane %v11193_v9, 7  ;;  %v4046_v4 = vrot.slane %v11193_v9, 1  ;;  %v11200_v60 = vmax.f32 %v3557_v5, 0.0  ;;  %3768 = vmatmul.mubr.bf16.gmra.mrb[120].mxu1 %v3290_v31  ;;  %v3294_v5 = vsel %vm14550_vm0, %v10936_v58, %v3166_v37 }
 0x320   :  { %7100 = vmatprep.mubr.msk.bf16.mxu1 %vm14558_vm4, %v10930_v49  ;;  %vm14563_vm4 = vmmov %vm14552_vm12 }
 0x321   :  { %v3855_v56 = vrot.slane %v11200_v60, 7  ;;  %v4047_v57 = vrot.slane %v11200_v60, 1  ;;  %v11208_v40 = vsel %vm14552_vm12, %v3853_v14, %v3854_v2  ;;  %v11214_v55 = vsel %vm14553_vm8, %v4045_v29, %v4046_v4  ;;  %vm14564_vm12 = vmmov %vm14553_vm8 }
 0x322   :  { %v3561_v42 = vpop.f32.mrb[16].mxu1  ;;  %14559 = vst [vmem:[#allocation34_spill] sm:$0xff] %v11214_v55  ;;  %vm14566_vm8 = vmmov %vm14563_vm4 }
 0x323   :  { %v3562_v25 = vadd.f32 %v11090_v12, %v3561_v42  ;;  %v3563_v49 = vpop.f32.mrb[17].mxu1  ;;  %v11219_v53 = vsel %vm14560_vm14, %v3854_v2, %v3855_v56  ;;  %v11225_v63 = vsel %vm14561_vm9, %v4046_v4, %v4047_v57  ;;  %vm14567_vm14 = vmmov %vm14561_vm9 }
 0x324   :  { %14562 = vst [vmem:[#allocation38_spill] sm:$0xff] %v11225_v63  ;;  %v3564_v62 = vpop.f32.mrb[18].mxu1  ;;  %vm14569_vm9 = vmmov %vm14563_vm4 }
 0x325   :  { %v11229_v39 = vmax.f32 %v3562_v25, 0.0  ;;  %v3565_v52 = vadd.f32 %v11090_v12, %v3564_v62  ;;  %v3566_v18 = vpop.f32.mrb[19].mxu1  ;;  %vm14570_vm0 = vmmov %vm14564_vm12 }
 0x327   :  { %v3856_v10 = vrot.slane %v11229_v39, 7  ;;  %v4048_v31 = vrot.slane %v11229_v39, 1  ;;  %v11236_v2 = vmax.f32 %v3565_v52, 0.0  ;;  %3776 = vmatmul.mubr.bf16.gmra.mrb[124].mxu1 %v3294_v5 }
 0x328   :  { %4551 = vmatprep.mubr.bf16.mxu1 %v14530_v50 }
 0x329   :  { %v3857_v4 = vrot.slane %v11236_v2, 7  ;;  %v4049_v42 = vrot.slane %v11236_v2, 1  ;;  %v11243_v25 = vsel %vm14563_vm4, %v3855_v56, %v3856_v10  ;;  %v11249_v49 = vsel %vm14564_vm12, %v4047_v57, %v4048_v31  ;;  %vm14572_vm12 = vmmov %vm14570_vm0 }
 0x32a   :  { %v3569_v37 = vpop.f32.mrb[20].mxu1  ;;  %14565 = vst [vmem:[#allocation40_spill] sm:$0xff] %v11249_v49 }
 0x32b   :  { %v3570_v62 = vadd.f32 %v11090_v12, %v3569_v37  ;;  %v3571_v52 = vpop.f32.mrb[21].mxu1  ;;  %v11254_v18 = vsel %vm14566_vm8, %v3856_v10, %v3857_v4  ;;  %v11260_v56 = vsel %vm14567_vm14, %v4048_v31, %v4049_v42  ;;  %vm14574_vm8 = vmmov %vm14563_vm4 }
 0x32c   :  { %14568 = vst [vmem:[#allocation39_spill] sm:$0xff] %v11260_v56  ;;  %v3572_v14 = vpop.f32.mrb[22].mxu1  ;;  %vm14575_vm14 = vmmov %vm14570_vm0 }
 0x32d   :  { %v11264_v57 = vmax.f32 %v3570_v62, 0.0  ;;  %v3573_v37 = vadd.f32 %v11090_v12, %v3572_v14  ;;  %v3574_v52 = vpop.f32.mrb[23].mxu1 }
 0x32f   :  { %v3858_v46 = vrot.slane %v11264_v57, 7  ;;  %v4050_v10 = vrot.slane %v11264_v57, 1  ;;  %v11269_v58 = vmax.f32 %v3573_v37, 0.0 }
 0x331   :  { %v3859_v5 = vrot.slane %v11269_v58, 7  ;;  %v4051_v31 = vrot.slane %v11269_v58, 1  ;;  %v11275_v61 = vsel %vm14569_vm9, %v3857_v4, %v3858_v46  ;;  %v11281_v14 = vsel %vm14570_vm0, %v4049_v42, %v4050_v10  ;;  %vm14577_vm9 = vmmov %vm14563_vm4 }
 0x332   :  { %v3577_v3 = vpop.f32.mrb[24].mxu1  ;;  %14571 = vst [vmem:[#allocation43_spill] sm:$0xff] %v11281_v14 }
 0x333   :  { %v3578_v52 = vadd.f32 %v11090_v12, %v3577_v3  ;;  %v3579_v37 = vpop.f32.mrb[25].mxu1  ;;  %v11286_v44 = vsel %vm14563_vm4, %v3858_v46, %v3859_v5  ;;  %v11292_v4 = vsel %vm14572_vm12, %v4050_v10, %v4051_v31  ;;  %vm14579_vm12 = vmmov %vm14570_vm0 }
 0x334   :  { %14573 = vst [vmem:[#allocation70_spill] sm:$0xff] %v11292_v4  ;;  %v3580_v62 = vpop.f32.mrb[26].mxu1 }
 0x335   :  { %v11296_v42 = vmax.f32 %v3578_v52, 0.0  ;;  %v3581_v3 = vadd.f32 %v11090_v12, %v3580_v62  ;;  %v3582_v37 = vpop.f32.mrb[27].mxu1 }
 0x337   :  { %v3860_v29 = vrot.slane %v11296_v42, 7  ;;  %v4052_v46 = vrot.slane %v11296_v42, 1  ;;  %v11301_v23 = vmax.f32 %v3581_v3, 0.0 }
 0x339   :  { %v3861_v15 = vrot.slane %v11301_v23, 7  ;;  %v4053_v10 = vrot.slane %v11301_v23, 1  ;;  %v11307_v1 = vsel %vm14574_vm8, %v3859_v5, %v3860_v29  ;;  %v11313_v62 = vsel %vm14575_vm14, %v4051_v31, %v4052_v46  ;;  %vm14581_vm8 = vmmov %vm14563_vm4 }
 0x33a   :  { %v3585_v54 = vpop.f32.mrb[28].mxu1  ;;  %14576 = vst [vmem:[#allocation71_spill] sm:$0xff] %v11313_v62  ;;  %vm14582_vm14 = vmmov %vm14570_vm0 }
 0x33b   :  { %v3586_v37 = vadd.f32 %v11090_v12, %v3585_v54  ;;  %v3587_v3 = vpop.f32.mrb[29].mxu1  ;;  %v11318_v35 = vsel %vm14577_vm9, %v3860_v29, %v3861_v15  ;;  %v11324_v5 = vsel %vm14570_vm0, %v4052_v46, %v4053_v10  ;;  %vm14586_vm9 = vmmov %vm14563_vm4 }
 0x33c   :  { %14578 = vst [vmem:[#allocation72_spill] sm:$0xff] %v11324_v5  ;;  %v3588_v52 = vpop.f32.mrb[30].mxu1 }
 0x33d   :  { %v11328_v31 = vmax.f32 %v3586_v37, 0.0  ;;  %v3589_v54 = vadd.f32 %v11090_v12, %v3588_v52  ;;  %v3590_v3 = vpop.f32.mrb[31].mxu1 }
 0x33f   :  { %v3862_v20 = vrot.slane %v11328_v31, 7  ;;  %v4054_v29 = vrot.slane %v11328_v31, 1  ;;  %v11333_v28 = vmax.f32 %v3589_v54, 0.0 }
 0x341   :  { %v3863_v21 = vrot.slane %v11333_v28, 7  ;;  %v4055_v46 = vrot.slane %v11333_v28, 1  ;;  %v11339_v43 = vsel %vm14563_vm4, %v3861_v15, %v3862_v20  ;;  %v11345_v52 = vsel %vm14579_vm12, %v4053_v10, %v4054_v29  ;;  %vm14588_vm12 = vmmov %vm14570_vm0 }
 0x342   :  { %v3593_v13 = vpop.f32.mrb[32].mxu1  ;;  %14580 = vst [vmem:[#allocation73_spill] sm:$0xff] %v11345_v52 }
 0x343   :  { %v3594_v3 = vadd.f32 %v11090_v12, %v3593_v13  ;;  %v3595_v54 = vpop.f32.mrb[33].mxu1  ;;  %v11350_v19 = vsel %vm14581_vm8, %v3862_v20, %v3863_v21  ;;  %v11356_v15 = vsel %vm14582_vm14, %v4054_v29, %v4055_v46  ;;  %vm14592_vm8 = vmmov %vm14563_vm4 }
 0x344   :  { %14583 = vst [vmem:[#allocation74_spill] sm:$0xff] %v11356_v15  ;;  %v3596_v37 = vpop.f32.mrb[34].mxu1  ;;  %vm14593_vm14 = vmmov %vm14570_vm0 }
 0x345   :  { %v11360_v10 = vmax.f32 %v3594_v3, 0.0  ;;  %v3597_v13 = vadd.f32 %v11090_v12, %v3596_v37  ;;  %v3598_v54 = vpop.f32.mrb[35].mxu1 }
 0x347   :  { %14584 = vst [vmem:[#allocation75_spill] sm:$0xff] %v11360_v10  ;;  %v3864_v56 = vrot.slane %v11360_v10, 7  ;;  %v4056_v20 = vrot.slane %v11360_v10, 1  ;;  %v11365_v14 = vmax.f32 %v3597_v13, 0.0 }
 0x349   :  { %14585 = vst [vmem:[#allocation76_spill] sm:$0xff] %v11365_v14  ;;  %v3865_v4 = vrot.slane %v11365_v14, 7  ;;  %v4057_v29 = vrot.slane %v11365_v14, 1  ;;  %v11371_v5 = vsel %vm14586_vm9, %v3863_v21, %v3864_v56  ;;  %v11377_v37 = vsel %vm14570_vm0, %v4055_v46, %v4056_v20  ;;  %vm14595_vm9 = vmmov %vm14563_vm4 }
 0x34a   :  { %v3601_v62 = vpop.f32.mrb[36].mxu1  ;;  %14587 = vst [vmem:[#allocation77_spill] sm:$0xff] %v11377_v37 }
 0x34b   :  { %v3602_v54 = vadd.f32 %v11090_v12, %v3601_v62  ;;  %v3603_v13 = vpop.f32.mrb[37].mxu1  ;;  %v11382_v52 = vsel %vm14563_vm4, %v3864_v56, %v3865_v4  ;;  %v11388_v21 = vsel %vm14588_vm12, %v4056_v20, %v4057_v29  ;;  %vm14599_vm12 = vmmov %vm14570_vm0 }
 0x34c   :  { %14589 = vst [vmem:[#allocation78_spill] sm:$0xff] %v11388_v21  ;;  %v3604_v3 = vpop.f32.mrb[38].mxu1 }
 0x34d   :  { %v11392_v46 = vmax.f32 %v3602_v54, 0.0  ;;  %v3605_v62 = vadd.f32 %v11090_v12, %v3604_v3  ;;  %v3606_v13 = vpop.f32.mrb[39].mxu1 }
 0x34f   :  { %14590 = vst [vmem:[#allocation79_spill] sm:$0xff] %v11392_v46  ;;  %v3866_v6 = vrot.slane %v11392_v46, 7  ;;  %v4058_v56 = vrot.slane %v11392_v46, 1  ;;  %v11397_v55 = vmax.f32 %v3605_v62, 0.0 }
 0x351   :  { %14591 = vst [vmem:[#allocation80_spill] sm:$0xff] %v11397_v55  ;;  %v3867_v63 = vrot.slane %v11397_v55, 7  ;;  %v4059_v20 = vrot.slane %v11397_v55, 1  ;;  %v11403_v15 = vsel %vm14592_vm8, %v3865_v4, %v3866_v6  ;;  %v11409_v3 = vsel %vm14593_vm14, %v4057_v29, %v4058_v56  ;;  %vm14601_vm8 = vmmov %vm14563_vm4 }
 0x352   :  { %v3609_v49 = vpop.f32.mrb[40].mxu1  ;;  %14594 = vst [vmem:[#allocation81_spill] sm:$0xff] %v11409_v3  ;;  %vm14602_vm14 = vmmov %vm14570_vm0 }
 0x353   :  { %v3610_v13 = vadd.f32 %v11090_v12, %v3609_v49  ;;  %v3611_v62 = vpop.f32.mrb[41].mxu1  ;;  %v11414_v37 = vsel %vm14595_vm9, %v3866_v6, %v3867_v63  ;;  %v11420_v4 = vsel %vm14570_vm0, %v4058_v56, %v4059_v20  ;;  %vm7177_vm9 = vmneg %vm14208_vm6  ;;  %vm7943_vm6 = vmmov 1  }
 0x354   :  { %14596 = vst [vmem:[#allocation82_spill] sm:$0xff] %v11420_v4  ;;  %v3612_v54 = vpop.f32.mrb[42].mxu1  ;;  %vm14607_vm0 = vmmov %vm14563_vm4 }
 0x355   :  { %v11424_v29 = vmax.f32 %v3610_v13, 0.0  ;;  %v3613_v49 = vadd.f32 %v11090_v12, %v3612_v54  ;;  %v3614_v62 = vpop.f32.mrb[43].mxu1 }
 0x357   :  { %14597 = vst [vmem:[#allocation83_spill] sm:$0xff] %v11424_v29  ;;  %v3868_v32 = vrot.slane %v11424_v29, 7  ;;  %v4060_v6 = vrot.slane %v11424_v29, 1  ;;  %v11429_v48 = vmax.f32 %v3613_v49, 0.0 }
 0x359   :  { %14598 = vst [vmem:[#allocation84_spill] sm:$0xff] %v11429_v48  ;;  %v3869_v26 = vrot.slane %v11429_v48, 7  ;;  %v4061_v56 = vrot.slane %v11429_v48, 1  ;;  %v11435_v21 = vsel %vm14563_vm4, %v3867_v63, %v3868_v32  ;;  %v11441_v54 = vsel %vm14599_vm12, %v4059_v20, %v4060_v6  ;;  %vm14608_vm4 = vmmov %vm14599_vm12 }
 0x35a   :  { %v3617_v24 = vpop.f32.mrb[44].mxu1  ;;  %14600 = vst [vmem:[#allocation85_spill] sm:$0xff] %v11441_v54  ;;  %vm14610_vm12 = vmmov %vm14607_vm0 }
 0x35b   :  { %v3618_v62 = vadd.f32 %v11090_v12, %v3617_v24  ;;  %v3619_v49 = vpop.f32.mrb[45].mxu1  ;;  %v11446_v3 = vsel %vm14601_vm8, %v3868_v32, %v3869_v26  ;;  %v11452_v63 = vsel %vm14602_vm14, %v4060_v6, %v4061_v56  ;;  %vm7178_vm8 = vmpackc.low %vm7943_vm6, %vm7177_vm9 }
 0x35c   :  { %14603 = vst [vmem:[#allocation86_spill] sm:$0xff] %v11452_v63  ;;  %v3620_v13 = vpop.f32.mrb[46].mxu1  ;;  %vm14611_vm14 = vmmov %vm14608_vm4 }
 0x35d   :  { %v11456_v20 = vmax.f32 %v3618_v62, 0.0  ;;  %v3621_v24 = vadd.f32 %v11090_v12, %v3620_v13  ;;  %v3622_v49 = vpop.f32.mrb[47].mxu1  ;;  %vm7181_vm9 = vmneg %vm14219_vm3 }
 0x35e   :  { %vm14617_vm3 = vmmov %vm14607_vm0 }
 0x35f   :  { %14604 = vst [vmem:[#allocation87_spill] sm:$0xff] %v11456_v20  ;;  %v3870_v48 = vrot.slane %v11456_v20, 7  ;;  %v4062_v32 = vrot.slane %v11456_v20, 1  ;;  %v11461_v55 = vmax.f32 %v3621_v24, 0.0 }
 0x361   :  { %14605 = vst [vmem:[#allocation88_spill] sm:$0xff] %v11461_v55  ;;  %v3953_v6 = vsel %vm14607_vm0, %v3869_v26, %v3870_v48  ;;  %v3871_v4 = vrot.slane %v11461_v55, 7  ;;  %v4063_v62 = vrot.slane %v11461_v55, 1  ;;  %v11473_v29 = vsel %vm14608_vm4, %v4061_v56, %v4062_v32 }
 0x362   :  { %v3625_v49 = vpop.f32.mrb[48].mxu1  ;;  %14609 = vst [vmem:[#allocation8_spill] sm:$0xff] %v11473_v29 }
 0x363   :  { %v3952_v24 = vsel %vm14610_vm12, %v3870_v48, %v3871_v4  ;;  %v3626_v46 = vadd.f32 %v11090_v12, %v3625_v49  ;;  %v3627_v54 = vpop.f32.mrb[49].mxu1  ;;  %v11483_v13 = vsel %vm14611_vm14, %v4062_v32, %v4063_v62  ;;  %vm7182_vm12 = vmpackc.low %vm7943_vm6, %vm7181_vm9 }
 0x364   :  { %14612 = vst [vmem:[#allocation89_spill] sm:$0xff] %v11483_v13  ;;  %v7179_v20 = vpack.c.bf16 %v3952_v24, %v3953_v6  ;;  %v3628_v55 = vpop.f32.mrb[50].mxu1  ;;  %vm7185_vm14 = vmneg %vm14233_vm1 }
 0x365   :  { %v11485_v56 = vmax.f32 %v3626_v46, 0.0  ;;  %v3629_v10 = vadd.f32 %v11090_v12, %v3628_v55  ;;  %v3630_v48 = vpop.f32.mrb[51].mxu1  ;;  %vm14623_vm9 = vmmov %vm14607_vm0 }
 0x366   :  { %7180 = vmatmul.mubr.msk.bf16.vlgmr.msra.gmra.mrb[128].mxu1 %vm7178_vm8, %v7179_v20  ;;  %vm14618_vm8 = vmmov %vm14608_vm4 }
 0x367   :  { %14613 = vst [vmem:[#allocation90_spill] sm:$0xff] %v11485_v56  ;;  %v3872_v54 = vrot.slane %v11485_v56, 7  ;;  %v4064_v49 = vrot.slane %v11485_v56, 1  ;;  %v11490_v14 = vmax.f32 %v3629_v10, 0.0  ;;  %4561 = vmatprep.mubr.bf16.mxu1 %v14530_v50  ;;  %vm14626_vm1 = vmmov %vm14617_vm3 }
 0x369   :  { %14614 = vst [vmem:[#allocation91_spill] sm:$0xff] %v11490_v14  ;;  %v3873_v32 = vrot.slane %v11490_v14, 7  ;;  %v4065_v6 = vrot.slane %v11490_v14, 1  ;;  %v3951_v55 = vsel %vm14607_vm0, %v3871_v4, %v3872_v54  ;;  %v11503_v10 = vsel %vm14608_vm4, %v4063_v62, %v4064_v49  ;;  %vm14624_vm0 = vmmov %vm14608_vm4 }
 0x36a   :  { %v3633_v24 = vpop.f32.mrb[52].mxu1  ;;  %14616 = vst [vmem:[#allocation14_spill] sm:$0xff] %v11503_v10  ;;  %vm7186_vm4 = vmpackc.low %vm7943_vm6, %vm7185_vm14 }
 0x36b   :  { %v3634_v46 = vadd.f32 %v11090_v12, %v3633_v24  ;;  %v3635_v48 = vpop.f32.mrb[53].mxu1  ;;  %v3950_v26 = vsel %vm14617_vm3, %v3872_v54, %v3873_v32  ;;  %v11513_v4 = vsel %vm14618_vm8, %v4064_v49, %v4065_v6  ;;  %vm14627_vm3 = vmmov %vm14624_vm0 }
 0x36c   :  { %14619 = vst [vmem:[#allocation92_spill] sm:$0xff] %v11513_v4  ;;  %v3636_v20 = vpop.f32.mrb[54].mxu1  ;;  %v7183_v29 = vpack.c.bf16 %v3950_v26, %v3951_v55  ;;  %vm14632_vm8 = vmmov %vm14626_vm1 }
 0x36d   :  { %v11515_v56 = vmax.f32 %v3634_v46, 0.0  ;;  %v3637_v62 = vadd.f32 %v11090_v12, %v3636_v20  ;;  %v3638_v24 = vpop.f32.mrb[55].mxu1  ;;  %vm14633_vm14 = vmmov %vm14624_vm0 }
 0x36e   :  { %7184 = vmatmul.mubr.msk.bf16.gmra.mrb[132].mxu1 %vm7182_vm12, %v7183_v29  ;;  %vm7189_vm12 = vmneg %vm14245_vm7 }
 0x36f   :  { %14620 = vst [vmem:[#allocation93_spill] sm:$0xff] %v11515_v56  ;;  %v3874_v48 = vrot.slane %v11515_v56, 7  ;;  %v4066_v54 = vrot.slane %v11515_v56, 1  ;;  %v11520_v14 = vmax.f32 %v3637_v62, 0.0  ;;  %4571 = vmatprep.mubr.bf16.mxu1 %v14530_v50  ;;  %vm14635_vm7 = vmmov %vm14626_vm1 }
 0x371   :  { %14621 = vst [vmem:[#allocation94_spill] sm:$0xff] %v11520_v14  ;;  %v3875_v49 = vrot.slane %v11520_v14, 7  ;;  %v4067_v55 = vrot.slane %v11520_v14, 1  ;;  %v3949_v20 = vsel %vm14623_vm9, %v3873_v32, %v3874_v48  ;;  %v11533_v26 = vsel %vm14624_vm0, %v4065_v6, %v4066_v54  ;;  %vm7190_vm9 = vmpackc.low %vm7943_vm6, %vm7189_vm12 }
 0x372   :  { %v3641_v46 = vpop.f32.mrb[56].mxu1  ;;  %14625 = vst [vmem:[#allocation17_spill] sm:$0xff] %v11533_v26 }
 0x373   :  { %v3642_v62 = vadd.f32 %v11090_v12, %v3641_v46  ;;  %v3643_v24 = vpop.f32.mrb[57].mxu1  ;;  %v3948_v63 = vsel %vm14626_vm1, %v3874_v48, %v3875_v49  ;;  %v11543_v32 = vsel %vm14627_vm3, %v4066_v54, %v4067_v55  ;;  %vm7193_vm1 = vmneg %vm14258_vm2 }
 0x374   :  { %14628 = vst [vmem:[#allocation95_spill] sm:$0xff] %v11543_v32  ;;  %v3644_v29 = vpop.f32.mrb[58].mxu1  ;;  %v7187_v10 = vpack.c.bf16 %v3948_v63, %v3949_v20  ;;  %vm14641_vm3 = vmmov %vm14624_vm0 }
 0x375   :  { %v11545_v56 = vmax.f32 %v3642_v62, 0.0  ;;  %v3645_v6 = vadd.f32 %v11090_v12, %v3644_v29  ;;  %v3646_v46 = vpop.f32.mrb[59].mxu1  ;;  %vm7194_vm12 = vmpackc.low %vm7943_vm6, %vm7193_vm1 }
 0x376   :  { %7188 = vmatmul.mubr.msk.bf16.gmra.mrb[136].mxu1 %vm7186_vm4, %v7187_v10  ;;  %vm14640_vm4 = vmmov %vm14635_vm7 }
 0x377   :  { %14629 = vst [vmem:[#allocation96_spill] sm:$0xff] %v11545_v56  ;;  %v3876_v24 = vrot.slane %v11545_v56, 7  ;;  %v4068_v48 = vrot.slane %v11545_v56, 1  ;;  %v11550_v14 = vmax.f32 %v3645_v6, 0.0  ;;  %4581 = vmatprep.mubr.bf16.mxu1 %v14530_v50  ;;  %vm14643_vm2 = vmmov %vm14640_vm4 }
 0x378   :  { %vm14653_vm1 = vmmov %vm14641_vm3 }
 0x379   :  { %14630 = vst [vmem:[#allocation97_spill] sm:$0xff] %v11550_v14  ;;  %v3877_v54 = vrot.slane %v11550_v14, 7  ;;  %v4069_v20 = vrot.slane %v11550_v14, 1  ;;  %v3947_v29 = vsel %vm14632_vm8, %v3875_v49, %v3876_v24  ;;  %v11563_v63 = vsel %vm14633_vm14, %v4067_v55, %v4068_v48  ;;  %vm14644_vm8 = vmmov %vm14624_vm0 }
 0x37a   :  { %v3649_v62 = vpop.f32.mrb[60].mxu1  ;;  %14634 = vst [vmem:[#allocation16_spill] sm:$0xff] %v11563_v63  ;;  %vm7197_vm14 = vmneg %vm14269_vm10 }
 0x37b   :  { %v3650_v6 = vadd.f32 %v11090_v12, %v3649_v62  ;;  %v3651_v46 = vpop.f32.mrb[61].mxu1  ;;  %v3946_v13 = vsel %vm14635_vm7, %v3876_v24, %v3877_v54  ;;  %v11573_v49 = vsel %vm14624_vm0, %v4068_v48, %v4069_v20  ;;  %vm14649_vm7 = vmmov %vm14643_vm2 }
 0x37c   :  { %14636 = vst [vmem:[#allocation98_spill] sm:$0xff] %v11573_v49  ;;  %v3652_v10 = vpop.f32.mrb[62].mxu1  ;;  %v7191_v26 = vpack.c.bf16 %v3946_v13, %v3947_v29  ;;  %vm14652_vm10 = vmmov %vm14643_vm2 }
 0x37d   :  { %v11575_v56 = vmax.f32 %v3650_v6, 0.0  ;;  %v3653_v55 = vadd.f32 %v11090_v12, %v3652_v10  ;;  %v3654_v62 = vpop.f32.mrb[63].mxu1 }
 0x37e   :  { %7192 = vmatmul.mubr.msk.bf16.gmra.mrb[140].mxu1 %vm7190_vm9, %v7191_v26  ;;  %vm14650_vm9 = vmmov %vm14624_vm0 }
 0x37f   :  { %14637 = vst [vmem:[#allocation99_spill] sm:$0xff] %v11575_v56  ;;  %v3878_v46 = vrot.slane %v11575_v56, 7  ;;  %v4070_v24 = vrot.slane %v11575_v56, 1  ;;  %v11580_v14 = vmax.f32 %v3653_v55, 0.0  ;;  %4591 = vmatprep.mubr.bf16.mxu1 %v14530_v50  ;;  %vm7198_vm0 = vmpackc.low %vm7943_vm6, %vm7197_vm14 }
 0x380   :  { %vm7205_vm14 = vmneg %vm14296_vm5 }
 0x381   :  { %14638 = vst [vmem:[#allocation100_spill] sm:$0xff] %v11580_v14  ;;  %v3879_v48 = vrot.slane %v11580_v14, 7  ;;  %v4071_v29 = vrot.slane %v11580_v14, 1  ;;  %v3945_v10 = vsel %vm14640_vm4, %v3877_v54, %v3878_v46  ;;  %v11593_v13 = vsel %vm14641_vm3, %v4069_v20, %v4070_v24  ;;  %v7874_v20 = vld [vmem:[%s13224_s5 + $0x84] ss:$8 sps:$4 sm:$0xff]   ;;  %vm7201_vm4 = vmneg %vm14285_vm13 }
 0x382   :  { %v3657_v6 = vpop.f32.mrb[64].mxu1  ;;  %14642 = vst [vmem:[#allocation15_spill] sm:$0xff] %v11593_v13  ;;  %4842 = vmatprep.subr.bf16.mxu0 %v7874_v20  ;;  %vm14658_vm3 = vmmov %vm14643_vm2 }
 0x383   :  { %v3658_v55 = vadd.f32 %v11090_v12, %v3657_v6  ;;  %v3659_v62 = vpop.f32.mrb[65].mxu1  ;;  %v3944_v4 = vsel %vm14643_vm2, %v3878_v46, %v3879_v48  ;;  %v11603_v54 = vsel %vm14644_vm8, %v4070_v24, %v4071_v29  ;;  %vm14659_vm2 = vmmov %vm14653_vm1 }
 0x384   :  { %14645 = vst [vmem:[#allocation101_spill] sm:$0xff] %v11603_v54  ;;  %v3660_v26 = vpop.f32.mrb[66].mxu1  ;;  %v7195_v63 = vpack.c.bf16 %v3944_v4, %v3945_v10  ;;  %vm14661_vm13 = vmmov %vm14658_vm3 }
 0x385   :  { %v11608_v6 = vmax.f32 %v3658_v55, 0.0  ;;  %v3661_v62 = vadd.f32 %v11090_v12, %v3660_v26  ;;  %v3662_v46 = vpop.f32.mrb[67].mxu1  ;;  %vm14662_vm8 = vmmov %vm14653_vm1 }
 0x386   :  { %7196 = vmatmul.mubr.msk.bf16.gmra.mrb[144].mxu1 %vm7194_vm12, %v7195_v63  ;;  %vm7202_vm12 = vmpackc.low %vm7943_vm6, %vm7201_vm4 }
 0x387   :  { %14646 = vst [vmem:[#allocation102_spill] sm:$0xff] %v11608_v6  ;;  %v3880_v56 = vrot.slane %v11608_v6, 7  ;;  %v4072_v32 = vrot.slane %v11608_v6, 1  ;;  %v11613_v49 = vmax.f32 %v3661_v62, 0.0  ;;  %4601 = vmatprep.mubr.bf16.mxu1 %v14530_v50  ;;  %vm14670_vm5 = vmmov %vm14658_vm3 }
 0x388   :  { %vm14676_vm4 = vmmov %vm14658_vm3 }
 0x389   :  { %14647 = vst [vmem:[#allocation103_spill] sm:$0xff] %v11613_v49  ;;  %v3881_v10 = vrot.slane %v11613_v49, 7  ;;  %v4073_v55 = vrot.slane %v11613_v49, 1  ;;  %v3943_v26 = vsel %vm14649_vm7, %v3879_v48, %v3880_v56  ;;  %v11626_v20 = vsel %vm14650_vm9, %v4071_v29, %v4072_v32  ;;  %vm14667_vm7 = vmmov %vm14658_vm3 }
 0x38a   :  { %v3665_v4 = vpop.f32.mrb[68].mxu1  ;;  %14651 = vst [vmem:[#allocation53_spill] sm:$0xff] %v11626_v20  ;;  %vm14668_vm9 = vmmov %vm14653_vm1 }
 0x38b   :  { %v3666_v62 = vadd.f32 %v11090_v12, %v3665_v4  ;;  %v3667_v46 = vpop.f32.mrb[69].mxu1  ;;  %v3942_v24 = vsel %vm14652_vm10, %v3880_v56, %v3881_v10  ;;  %v11636_v48 = vsel %vm14653_vm1, %v4072_v32, %v4073_v55  ;;  %vm7206_vm10 = vmpackc.low %vm7943_vm6, %vm7205_vm14 }
 0x38c   :  { %14654 = vst [vmem:[#allocation104_spill] sm:$0xff] %v11636_v48  ;;  %v3668_v63 = vpop.f32.mrb[70].mxu1  ;;  %v7199_v6 = vpack.c.bf16 %v3942_v24, %v3943_v26 }
 0x38d   :  { %v11638_v49 = vmax.f32 %v3666_v62, 0.0  ;;  %v3669_v29 = vadd.f32 %v11090_v12, %v3668_v63  ;;  %v3670_v4 = vpop.f32.mrb[71].mxu1 }
 0x38e   :  { %7200 = vmatmul.mubr.msk.bf16.gmra.mrb[148].mxu1 %vm7198_vm0, %v7199_v6  ;;  %vm14671_vm0 = vmmov %vm14653_vm1 }
 0x38f   :  { %14655 = vst [vmem:[#allocation105_spill] sm:$0xff] %v11638_v49  ;;  %v3882_v46 = vrot.slane %v11638_v49, 7  ;;  %v4074_v56 = vrot.slane %v11638_v49, 1  ;;  %v11643_v14 = vmax.f32 %v3669_v29, 0.0  ;;  %4611 = vmatprep.mubr.bf16.mxu1 %v14530_v50  ;;  %vm7209_vm1 = vmneg %vm14309_vm15 }
 0x390   :  { %vm14679_vm15 = vmmov %vm14676_vm4 }
 0x391   :  { %14656 = vst [vmem:[#allocation106_spill] sm:$0xff] %v11643_v14  ;;  %v3883_v32 = vrot.slane %v11643_v14, 7  ;;  %v4075_v26 = vrot.slane %v11643_v14, 1  ;;  %v3941_v63 = vsel %vm14658_vm3, %v3881_v10, %v3882_v46  ;;  %v11656_v24 = vsel %vm14659_vm2, %v4073_v55, %v4074_v56  ;;  %vm14677_vm3 = vmmov %vm14671_vm0 }
 0x392   :  { %v3673_v62 = vpop.f32.mrb[72].mxu1  ;;  %14660 = vst [vmem:[#allocation52_spill] sm:$0xff] %v11656_v24  ;;  %vm7210_vm2 = vmpackc.low %vm7943_vm6, %vm7209_vm1 }
 0x393   :  { %v3674_v29 = vadd.f32 %v11090_v12, %v3673_v62  ;;  %v3675_v4 = vpop.f32.mrb[73].mxu1  ;;  %v3940_v13 = vsel %vm14661_vm13, %v3882_v46, %v3883_v32  ;;  %v11666_v10 = vsel %vm14662_vm8, %v4074_v56, %v4075_v26  ;;  %vm14680_vm13 = vmmov %vm14671_vm0 }
 0x394   :  { %14663 = vst [vmem:[#allocation107_spill] sm:$0xff] %v11666_v10  ;;  %v3676_v6 = vpop.f32.mrb[74].mxu1  ;;  %v7203_v20 = vpack.c.bf16 %v3940_v13, %v3941_v63  ;;  %vm14685_vm8 = vmmov %vm14676_vm4 }
 0x395   :  { %v11668_v49 = vmax.f32 %v3674_v29, 0.0  ;;  %v3677_v55 = vadd.f32 %v11090_v12, %v3676_v6  ;;  %v3678_v62 = vpop.f32.mrb[75].mxu1  ;;  %vm14686_vm14 = vmmov %vm14671_vm0 }
 0x396   :  { %7204 = vmatmul.mubr.msk.bf16.gmra.mrb[152].mxu1 %vm7202_vm12, %v7203_v20  ;;  %vm7213_vm12 = vmneg %vm14323_vm11 }
 0x397   :  { %14664 = vst [vmem:[#allocation108_spill] sm:$0xff] %v11668_v49  ;;  %v3884_v4 = vrot.slane %v11668_v49, 7  ;;  %v4076_v46 = vrot.slane %v11668_v49, 1  ;;  %v11673_v14 = vmax.f32 %v3677_v55, 0.0  ;;  %4621 = vmatprep.mubr.bf16.mxu1 %v14530_v50  ;;  %vm14688_vm11 = vmmov %vm14676_vm4 }
 0x398   :  { %vm14696_vm1 = vmmov %vm14677_vm3 }
 0x399   :  { %14665 = vst [vmem:[#allocation109_spill] sm:$0xff] %v11673_v14  ;;  %v3885_v56 = vrot.slane %v11673_v14, 7  ;;  %v4077_v63 = vrot.slane %v11673_v14, 1  ;;  %v3939_v6 = vsel %vm14667_vm7, %v3883_v32, %v3884_v4  ;;  %v11686_v13 = vsel %vm14668_vm9, %v4075_v26, %v4076_v46  ;;  %vm7214_vm7 = vmpackc.low %vm7943_vm6, %vm7213_vm12 }
 0x39a   :  { %v3681_v29 = vpop.f32.mrb[76].mxu1  ;;  %14669 = vst [vmem:[#allocation51_spill] sm:$0xff] %v11686_v13  ;;  %vm14689_vm9 = vmmov %vm14671_vm0 }
 0x39b   :  { %v3682_v55 = vadd.f32 %v11090_v12, %v3681_v29  ;;  %v3683_v62 = vpop.f32.mrb[77].mxu1  ;;  %v3938_v54 = vsel %vm14670_vm5, %v3884_v4, %v3885_v56  ;;  %v11696_v32 = vsel %vm14671_vm0, %v4076_v46, %v4077_v63  ;;  %vm14695_vm0 = vmmov %vm14676_vm4 }
 0x39c   :  { %14672 = vst [vmem:[#allocation110_spill] sm:$0xff] %v11696_v32  ;;  %v3684_v20 = vpop.f32.mrb[78].mxu1  ;;  %v7207_v24 = vpack.c.bf16 %v3938_v54, %v3939_v6  ;;  %v14693_v32 = vld [vmem:[#allocation23_spill] sm:$0xff]  ;;  %vm14705_vm12 = vmmov %vm14695_vm0 }
 0x39d   :  { %v11698_v49 = vmax.f32 %v3682_v55, 0.0  ;;  %v3685_v26 = vadd.f32 %v11090_v12, %v3684_v20  ;;  %v3686_v29 = vpop.f32.mrb[79].mxu1  ;;  %vm14694_vm5 = vnez %v14693_v32 }
 0x39e   :  { %7208 = vmatmul.mubr.msk.bf16.gmra.mrb[156].mxu1 %vm7206_vm10, %v7207_v24  ;;  %vm7217_vm10 = vmneg %vm14694_vm5 }
 0x39f   :  { %14673 = vst [vmem:[#allocation111_spill] sm:$0xff] %v11698_v49  ;;  %v3886_v62 = vrot.slane %v11698_v49, 7  ;;  %v4078_v4 = vrot.slane %v11698_v49, 1  ;;  %v11703_v14 = vmax.f32 %v3685_v26, 0.0  ;;  %4631 = vmatprep.mubr.bf16.mxu1 %v14530_v50 }
 0x3a1   :  { %14674 = vst [vmem:[#allocation112_spill] sm:$0xff] %v11703_v14  ;;  %v3887_v46 = vrot.slane %v11703_v14, 7  ;;  %v4079_v6 = vrot.slane %v11703_v14, 1  ;;  %v3937_v20 = vsel %vm14676_vm4, %v3885_v56, %v3886_v62  ;;  %v11716_v54 = vsel %vm14677_vm3, %v4077_v63, %v4078_v4  ;;  %vm14698_vm4 = vmmov %vm14695_vm0 }
 0x3a2   :  { %v3689_v55 = vpop.f32.mrb[80].mxu1  ;;  %14678 = vst [vmem:[#allocation50_spill] sm:$0xff] %v11716_v54  ;;  %vm7218_vm3 = vmpackc.low %vm7943_vm6, %vm7217_vm10 }
 0x3a3   :  { %v3690_v26 = vadd.f32 %v11090_v12, %v3689_v55  ;;  %v3691_v29 = vpop.f32.mrb[81].mxu1  ;;  %v3936_v48 = vsel %vm14679_vm15, %v3886_v62, %v3887_v46  ;;  %v11726_v56 = vsel %vm14680_vm13, %v4078_v4, %v4079_v6  ;;  %vm14699_vm15 = vmmov %vm14696_vm1 }
 0x3a4   :  { %14681 = vst [vmem:[#allocation113_spill] sm:$0xff] %v11726_v56  ;;  %v3692_v24 = vpop.f32.mrb[82].mxu1  ;;  %v7211_v13 = vpack.c.bf16 %v3936_v48, %v3937_v20  ;;  %v14703_v56 = vld [vmem:[#allocation22_spill] sm:$0xff]  ;;  %vm14715_vm10 = vmmov %vm14695_vm0 }
 0x3a5   :  { %v11728_v49 = vmax.f32 %v3690_v26, 0.0  ;;  %v3693_v63 = vadd.f32 %v11090_v12, %v3692_v24  ;;  %v3694_v55 = vpop.f32.mrb[83].mxu1 }
 0x3a6   :  { %7212 = vmatmul.mubr.msk.bf16.gmra.mrb[160].mxu1 %vm7210_vm2, %v7211_v13  ;;  %vm14704_vm2 = vnez %v14703_v56 }
 0x3a7   :  { %14682 = vst [vmem:[#allocation114_spill] sm:$0xff] %v11728_v49  ;;  %v3888_v29 = vrot.slane %v11728_v49, 7  ;;  %v4080_v62 = vrot.slane %v11728_v49, 1  ;;  %v11733_v14 = vmax.f32 %v3693_v63, 0.0  ;;  %4641 = vmatprep.mubr.bf16.mxu1 %v14530_v50  ;;  %vm7221_vm13 = vmneg %vm14704_vm2 }
 0x3a9   :  { %14683 = vst [vmem:[#allocation115_spill] sm:$0xff] %v11733_v14  ;;  %v3889_v4 = vrot.slane %v11733_v14, 7  ;;  %v4081_v20 = vrot.slane %v11733_v14, 1  ;;  %v3935_v24 = vsel %vm14685_vm8, %v3887_v46, %v3888_v29  ;;  %v11746_v48 = vsel %vm14686_vm14, %v4079_v6, %v4080_v62  ;;  %vm14706_vm8 = vmmov %vm14696_vm1 }
 0x3aa   :  { %v3697_v26 = vpop.f32.mrb[84].mxu1  ;;  %14687 = vst [vmem:[#allocation19_spill] sm:$0xff] %v11746_v48  ;;  %vm14708_vm14 = vmmov %vm14695_vm0 }
 0x3ab   :  { %v3698_v63 = vadd.f32 %v11090_v12, %v3697_v26  ;;  %v3699_v55 = vpop.f32.mrb[85].mxu1  ;;  %v3934_v10 = vsel %vm14688_vm11, %v3888_v29, %v3889_v4  ;;  %v11756_v46 = vsel %vm14689_vm9, %v4080_v62, %v4081_v20  ;;  %vm7222_vm11 = vmpackc.low %vm7943_vm6, %vm7221_vm13 }
 0x3ac   :  { %14690 = vst [vmem:[#allocation116_spill] sm:$0xff] %v11756_v46  ;;  %v3700_v13 = vpop.f32.mrb[86].mxu1  ;;  %v7215_v54 = vpack.c.bf16 %v3934_v10, %v3935_v24  ;;  %v14713_v46 = vld [vmem:[#allocation21_spill] sm:$0xff] }
 0x3ad   :  { %v11758_v49 = vmax.f32 %v3698_v63, 0.0  ;;  %v3701_v6 = vadd.f32 %v11090_v12, %v3700_v13  ;;  %v3702_v26 = vpop.f32.mrb[87].mxu1  ;;  %vm14714_vm9 = vnez %v14713_v46  ;;  %v11841_v46 = vld [vmem:[%s13225_s4] ss:$0 sm:$0xff] }
 0x3ae   :  { %7216 = vmatmul.mubr.msk.bf16.gmra.mrb[164].mxu1 %vm7214_vm7, %v7215_v54  ;;  %vm14709_vm7 = vmmov %vm14696_vm1 }
 0x3af   :  { %14691 = vst [vmem:[#allocation117_spill] sm:$0xff] %v11758_v49  ;;  %v3890_v55 = vrot.slane %v11758_v49, 7  ;;  %v4082_v29 = vrot.slane %v11758_v49, 1  ;;  %v11763_v14 = vmax.f32 %v3701_v6, 0.0  ;;  %4651 = vmatprep.mubr.bf16.mxu1 %v14530_v50  ;;  %vm7225_vm5 = vmneg %vm14714_vm9 }
 0x3b1   :  { %14692 = vst [vmem:[#allocation118_spill] sm:$0xff] %v11763_v14  ;;  %v3891_v62 = vrot.slane %v11763_v14, 7  ;;  %v4083_v24 = vrot.slane %v11763_v14, 1  ;;  %v3933_v13 = vsel %vm14695_vm0, %v3889_v4, %v3890_v55  ;;  %v11776_v10 = vsel %vm14696_vm1, %v4081_v20, %v4082_v29  ;;  %vm14716_vm0 = vmmov %vm14696_vm1 }
 0x3b2   :  { %v3705_v63 = vpop.f32.mrb[88].mxu1  ;;  %14697 = vst [vmem:[#allocation23_spill] sm:$0xff] %v11776_v10  ;;  %vm14718_vm1 = vmmov %vm14698_vm4 }
 0x3b3   :  { %v3706_v6 = vadd.f32 %v11090_v12, %v3705_v63  ;;  %v3707_v26 = vpop.f32.mrb[89].mxu1  ;;  %v3932_v32 = vsel %vm14698_vm4, %v3890_v55, %v3891_v62  ;;  %v11786_v4 = vsel %vm14699_vm15, %v4082_v29, %v4083_v24  ;;  %vm7226_vm4 = vmpackc.low %vm7943_vm6, %vm7225_vm5 }
 0x3b4   :  { %14700 = vst [vmem:[#allocation119_spill] sm:$0xff] %v11786_v4  ;;  %v3708_v54 = vpop.f32.mrb[90].mxu1  ;;  %v7219_v48 = vpack.c.bf16 %v3932_v32, %v3933_v13  ;;  %vm14725_vm13 = vmmov %vm14718_vm1 }
 0x3b5   :  { %v11788_v49 = vmax.f32 %v3706_v6, 0.0  ;;  %v3709_v20 = vadd.f32 %v11090_v12, %v3708_v54  ;;  %v3710_v63 = vpop.f32.mrb[91].mxu1  ;;  %vm14735_vm5 = vmmov %vm14718_vm1 }
 0x3b6   :  { %7220 = vmatmul.mubr.msk.bf16.gmra.mrb[168].mxu1 %vm7218_vm3, %v7219_v48  ;;  %vm14719_vm3 = vmmov %vm14716_vm0 }
 0x3b7   :  { %14701 = vst [vmem:[#allocation120_spill] sm:$0xff] %v11788_v49  ;;  %v3892_v26 = vrot.slane %v11788_v49, 7  ;;  %v4084_v55 = vrot.slane %v11788_v49, 1  ;;  %v11793_v14 = vmax.f32 %v3709_v20, 0.0  ;;  %4661 = vmatprep.mubr.bf16.mxu1 %v14530_v50 }
 0x3b9   :  { %14702 = vst [vmem:[#allocation121_spill] sm:$0xff] %v11793_v14  ;;  %v3893_v29 = vrot.slane %v11793_v14, 7  ;;  %v4085_v13 = vrot.slane %v11793_v14, 1  ;;  %v3931_v54 = vsel %vm14705_vm12, %v3891_v62, %v3892_v26  ;;  %v11806_v32 = vsel %vm14706_vm8, %v4083_v24, %v4084_v55  ;;  %vm14726_vm12 = vmmov %vm14716_vm0 }
 0x3ba   :  { %v3713_v6 = vpop.f32.mrb[92].mxu1  ;;  %14707 = vst [vmem:[#allocation22_spill] sm:$0xff] %v11806_v32  ;;  %vm14728_vm8 = vmmov %vm14718_vm1 }
 0x3bb   :  { %v3714_v20 = vadd.f32 %v11090_v12, %v3713_v6  ;;  %v3715_v63 = vpop.f32.mrb[93].mxu1  ;;  %v3930_v56 = vsel %vm14708_vm14, %v3892_v26, %v3893_v29  ;;  %v11816_v62 = vsel %vm14709_vm7, %v4084_v55, %v4085_v13 }
 0x3bc   :  { %14710 = vst [vmem:[#allocation122_spill] sm:$0xff] %v11816_v62  ;;  %v3716_v48 = vpop.f32.mrb[94].mxu1  ;;  %v7223_v10 = vpack.c.bf16 %v3930_v56, %v3931_v54  ;;  %v14733_v62 = vld [vmem:[#allocation27_spill] sm:$0xff] }
 0x3bd   :  { %v11818_v49 = vmax.f32 %v3714_v20, 0.0  ;;  %v3717_v24 = vadd.f32 %v11090_v12, %v3716_v48  ;;  %v3718_v6 = vpop.f32.mrb[95].mxu1  ;;  %vm14734_vm7 = vnez %v14733_v62 }
 0x3be   :  { %7224 = vmatmul.mubr.msk.bf16.gmra.mrb[172].mxu1 %vm7222_vm11, %v7223_v10  ;;  %vm14729_vm11 = vmmov %vm14716_vm0 }
 0x3bf   :  { %14711 = vst [vmem:[#allocation123_spill] sm:$0xff] %v11818_v49  ;;  %v3894_v63 = vrot.slane %v11818_v49, 7  ;;  %v4086_v26 = vrot.slane %v11818_v49, 1  ;;  %v11823_v14 = vmax.f32 %v3717_v24, 0.0  ;;  %4671 = vmatprep.mubr.bf16.mxu1 %v14530_v50  ;;  %vm7233_vm9 = vmneg %vm14734_vm7 }
 0x3c1   :  { %14712 = vst [vmem:[#allocation124_spill] sm:$0xff] %v11823_v14  ;;  %v3895_v55 = vrot.slane %v11823_v14, 7  ;;  %v4087_v54 = vrot.slane %v11823_v14, 1  ;;  %v3929_v12 = vsel %vm14715_vm10, %v3893_v29, %v3894_v63  ;;  %v11836_v20 = vsel %vm14716_vm0, %v4085_v13, %v4086_v26  ;;  %v14723_v29 = vld [vmem:[#allocation25_spill] sm:$0xff]  ;;  %vm14736_vm10 = vmmov %vm14716_vm0 }
 0x3c2   :  { %v3721_v48 = vpop.f32.mrb[96].mxu1  ;;  %14717 = vst [vmem:[#allocation21_spill] sm:$0xff] %v11836_v20  ;;  %vm14724_vm15 = vnez %v14723_v29  ;;  %vm14738_vm0 = vmmov %vm14718_vm1 }
 0x3c3   :  { %v3722_v56 = vadd.f32 %v11841_v46, %v3721_v48  ;;  %v3723_v24 = vpop.f32.mrb[97].mxu1  ;;  %v3928_v6 = vsel %vm14718_vm1, %v3894_v63, %v3895_v55  ;;  %v11851_v13 = vsel %vm14719_vm3, %v4086_v26, %v4087_v54  ;;  %vm7229_vm2 = vmneg %vm14724_vm15 }
 0x3c4   :  { %14720 = vst [vmem:[#allocation125_spill] sm:$0xff] %v11851_v13  ;;  %v3724_v10 = vpop.f32.mrb[98].mxu1  ;;  %v7227_v4 = vpack.c.bf16 %v3928_v6, %v3929_v12  ;;  %vm7230_vm14 = vmpackc.low %vm7943_vm6, %vm7229_vm2  ;;  %v14778_v13 = vld [vmem:[#allocation56_spill] sm:$0xff] }
 0x3c5   :  { %v11853_v32 = vmax.f32 %v3722_v56, 0.0  ;;  %v3725_v49 = vadd.f32 %v11841_v46, %v3724_v10  ;;  %v3726_v48 = vpop.f32.mrb[99].mxu1  ;;  %vm7234_vm1 = vmpackc.low %vm7943_vm6, %vm7233_vm9 }
 0x3c6   :  { %7228 = vmatmul.mubr.msk.bf16.gmra.mrb[176].mxu1 %vm7226_vm4, %v7227_v4  ;;  %vm14739_vm4 = vmmov %vm14719_vm3  ;;  %vm14742_vm3 = vnez %v14017_v33 }
 0x3c7   :  { %14721 = vst [vmem:[#allocation126_spill] sm:$0xff] %v11853_v32  ;;  %v3896_v24 = vrot.slane %v11853_v32, 7  ;;  %v4088_v63 = vrot.slane %v11853_v32, 1  ;;  %v11858_v14 = vmax.f32 %v3725_v49, 0.0  ;;  %4681 = vmatprep.mubr.bf16.mxu1 %v14530_v50  ;;  %vm7237_vm15 = vmneg %vm14742_vm3 }
 0x3c8   :  { %vm14743_vm2 = vmmov %vm14738_vm0 }
 0x3c9   :  { %14722 = vst [vmem:[#allocation127_spill] sm:$0xff] %v11858_v14  ;;  %v3897_v26 = vrot.slane %v11858_v14, 7  ;;  %v4089_v12 = vrot.slane %v11858_v14, 1  ;;  %v3927_v10 = vsel %vm14725_vm13, %v3895_v55, %v3896_v24  ;;  %v11871_v49 = vsel %vm14726_vm12, %v4087_v54, %v4088_v63  ;;  %vm14744_vm13 = vmmov %vm14739_vm4 }
 0x3ca   :  { %v3729_v56 = vpop.f32.mrb[100].mxu1  ;;  %14727 = vst [vmem:[#allocation25_spill] sm:$0xff] %v11871_v49  ;;  %vm14746_vm12 = vmmov %vm14738_vm0 }
 0x3cb   :  { %v3730_v6 = vadd.f32 %v11841_v46, %v3729_v56  ;;  %v3731_v48 = vpop.f32.mrb[101].mxu1  ;;  %v3926_v29 = vsel %vm14728_vm8, %v3896_v24, %v3897_v26  ;;  %v11881_v55 = vsel %vm14729_vm11, %v4088_v63, %v4089_v12  ;;  %vm7238_vm8 = vmpackc.low %vm7943_vm6, %vm7237_vm15  ;;  %vm14750_vm11 = vnez %v14029_v45 }
 0x3cc   :  { %14730 = vst [vmem:[#allocation128_spill] sm:$0xff] %v11881_v55  ;;  %v3732_v4 = vpop.f32.mrb[102].mxu1  ;;  %v7231_v20 = vpack.c.bf16 %v3926_v29, %v3927_v10  ;;  %vm7241_vm7 = vmneg %vm14750_vm11 }
 0x3cd   :  { %v11883_v32 = vmax.f32 %v3730_v6, 0.0  ;;  %v3733_v54 = vadd.f32 %v11841_v46, %v3732_v4  ;;  %v3734_v56 = vpop.f32.mrb[103].mxu1  ;;  %vm14751_vm9 = vmmov %vm14738_vm0 }
 0x3ce   :  { %7232 = vmatmul.mubr.msk.bf16.gmra.mrb[180].mxu1 %vm7230_vm14, %v7231_v20  ;;  %vm14747_vm14 = vmmov %vm14739_vm4 }
 0x3cf   :  { %14731 = vst [vmem:[#allocation129_spill] sm:$0xff] %v11883_v32  ;;  %v3898_v48 = vrot.slane %v11883_v32, 7  ;;  %v4090_v24 = vrot.slane %v11883_v32, 1  ;;  %v11888_v14 = vmax.f32 %v3733_v54, 0.0  ;;  %4691 = vmatprep.mubr.bf16.mxu1 %v14530_v50  ;;  %vm14759_vm15 = vmmov %vm14743_vm2 }
 0x3d1   :  { %14732 = vst [vmem:[#allocation130_spill] sm:$0xff] %v11888_v14  ;;  %v3899_v63 = vrot.slane %v11888_v14, 7  ;;  %v4091_v10 = vrot.slane %v11888_v14, 1  ;;  %v3925_v4 = vsel %vm14735_vm5, %v3897_v26, %v3898_v48  ;;  %v11901_v29 = vsel %vm14736_vm10, %v4089_v12, %v4090_v24  ;;  %vm14752_vm5 = vmmov %vm14739_vm4 }
 0x3d2   :  { %v3737_v6 = vpop.f32.mrb[104].mxu1  ;;  %14737 = vst [vmem:[#allocation27_spill] sm:$0xff] %v11901_v29  ;;  %vm14754_vm10 = vmmov %vm14738_vm0 }
 0x3d3   :  { %v3738_v54 = vadd.f32 %v11841_v46, %v3737_v6  ;;  %v3739_v56 = vpop.f32.mrb[105].mxu1  ;;  %v3924_v62 = vsel %vm14738_vm0, %v3898_v48, %v3899_v63  ;;  %v11911_v26 = vsel %vm14739_vm4, %v4090_v24, %v4091_v10  ;;  %vm7242_vm0 = vmpackc.low %vm7943_vm6, %vm7241_vm7 }
 0x3d4   :  { %14740 = vst [vmem:[#allocation131_spill] sm:$0xff] %v11911_v26  ;;  %v3740_v20 = vpop.f32.mrb[106].mxu1  ;;  %v7235_v49 = vpack.c.bf16 %v3924_v62, %v3925_v4  ;;  %vm14767_vm7 = vmmov %vm14751_vm9 }
 0x3d5   :  { %v11913_v32 = vmax.f32 %v3738_v54, 0.0  ;;  %v3741_v12 = vadd.f32 %v11841_v46, %v3740_v20  ;;  %v3742_v6 = vpop.f32.mrb[107].mxu1 }
 0x3d6   :  { %7236 = vmatmul.mubr.msk.bf16.gmra.mrb[184].mxu1 %vm7234_vm1, %v7235_v49  ;;  %vm14755_vm1 = vmmov %vm14739_vm4  ;;  %vm14758_vm4 = vnez %v14031_v17 }
 0x3d7   :  { %14741 = vst [vmem:[#allocation132_spill] sm:$0xff] %v11913_v32  ;;  %v3900_v56 = vrot.slane %v11913_v32, 7  ;;  %v4092_v48 = vrot.slane %v11913_v32, 1  ;;  %v11918_v14 = vmax.f32 %v3741_v12, 0.0  ;;  %4701 = vmatprep.mubr.bf16.mxu1 %v14530_v50  ;;  %vm7245_vm3 = vmneg %vm14758_vm4 }
 0x3d9   :  { %v3901_v24 = vrot.slane %v11918_v14, 7  ;;  %v4093_v4 = vrot.slane %v11918_v14, 1  ;;  %v3923_v20 = vsel %vm14743_vm2, %v3899_v63, %v3900_v56  ;;  %v11931_v62 = vsel %vm14744_vm13, %v4091_v10, %v4092_v48  ;;  %vm14760_vm2 = vmmov %vm14755_vm1 }
 0x3da   :  { %v3745_v54 = vpop.f32.mrb[108].mxu1  ;;  %14745 = vst [vmem:[#allocation133_spill] sm:$0xff] %v11931_v62  ;;  %vm14762_vm13 = vmmov %vm14751_vm9 }
 0x3db   :  { %v3746_v12 = vadd.f32 %v11841_v46, %v3745_v54  ;;  %v3747_v6 = vpop.f32.mrb[109].mxu1  ;;  %v3922_v33 = vsel %vm14746_vm12, %v3900_v56, %v3901_v24  ;;  %v11941_v63 = vsel %vm14747_vm14, %v4092_v48, %v4093_v4  ;;  %vm7246_vm12 = vmpackc.low %vm7943_vm6, %vm7245_vm3  ;;  %vm14766_vm14 = vnez %v14040_v59 }
 0x3dc   :  { %14748 = vst [vmem:[#allocation134_spill] sm:$0xff] %v11941_v63  ;;  %v3748_v49 = vpop.f32.mrb[110].mxu1  ;;  %v7239_v55 = vpack.c.bf16 %v3922_v33, %v3923_v20  ;;  %vm7249_vm11 = vmneg %vm14766_vm14 }
 0x3dd   :  { %v11943_v29 = vmax.f32 %v3746_v12, 0.0  ;;  %v3749_v10 = vadd.f32 %v11841_v46, %v3748_v49  ;;  %v3750_v54 = vpop.f32.mrb[111].mxu1 }
 0x3de   :  { %7240 = vmatmul.mubr.msk.bf16.gmra.mrb[188].mxu1 %vm7238_vm8, %v7239_v55  ;;  %vm14763_vm8 = vmmov %vm14755_vm1 }
 0x3df   :  { %14749 = vst [vmem:[#allocation135_spill] sm:$0xff] %v11943_v29  ;;  %v3902_v6 = vrot.slane %v11943_v29, 7  ;;  %v4094_v56 = vrot.slane %v11943_v29, 1  ;;  %v11948_v32 = vmax.f32 %v3749_v10, 0.0  ;;  %4711 = vmatprep.mubr.bf16.mxu1 %v14530_v50 }
 0x3e1   :  { %v3903_v48 = vrot.slane %v11948_v32, 7  ;;  %v4095_v20 = vrot.slane %v11948_v32, 1  ;;  %v3921_v49 = vsel %vm14751_vm9, %v3901_v24, %v3902_v6  ;;  %v11961_v33 = vsel %vm14752_vm5, %v4093_v4, %v4094_v56  ;;  %vm14768_vm9 = vmmov %vm14755_vm1 }
 0x3e2   :  { %v3753_v12 = vpop.f32.mrb[112].mxu1  ;;  %14753 = vst [vmem:[#allocation136_spill] sm:$0xff] %v11961_v33  ;;  %vm14770_vm5 = vmmov %vm14767_vm7 }
 0x3e3   :  { %v3754_v10 = vadd.f32 %v11841_v46, %v3753_v12  ;;  %v3755_v54 = vpop.f32.mrb[113].mxu1  ;;  %v3920_v45 = vsel %vm14754_vm10, %v3902_v6, %v3903_v48  ;;  %v11971_v24 = vsel %vm14755_vm1, %v4094_v56, %v4095_v20  ;;  %vm7250_vm10 = vmpackc.low %vm7943_vm6, %vm7249_vm11  ;;  %vm14780_vm11 = vnez %v14055_v38 }
 0x3e4   :  { %14756 = vst [vmem:[#allocation137_spill] sm:$0xff] %v11971_v24  ;;  %v3756_v55 = vpop.f32.mrb[114].mxu1  ;;  %v7243_v26 = vpack.c.bf16 %v3920_v45, %v3921_v49  ;;  %vm14774_vm3 = vmmov %vm14770_vm5 }
 0x3e5   :  { %v11973_v62 = vmax.f32 %v3754_v10, 0.0  ;;  %v3757_v4 = vadd.f32 %v11841_v46, %v3756_v55  ;;  %v3758_v12 = vpop.f32.mrb[115].mxu1 }
 0x3e6   :  { %7244 = vmatmul.mubr.msk.bf16.gmra.mrb[192].mxu1 %vm7242_vm0, %v7243_v26  ;;  %vm14771_vm0 = vmmov %vm14755_vm1  ;;  %vm14773_vm1 = vnez %v14046_v51 }
 0x3e7   :  { %14757 = vst [vmem:[#allocation138_spill] sm:$0xff] %v11973_v62  ;;  %v3904_v54 = vrot.slane %v11973_v62, 7  ;;  %v4096_v6 = vrot.slane %v11973_v62, 1  ;;  %v11978_v29 = vmax.f32 %v3757_v4, 0.0  ;;  %4721 = vmatprep.mubr.bf16.mxu1 %v14530_v50  ;;  %vm7253_vm4 = vmneg %vm14773_vm1 }
 0x3e9   :  { %v3905_v56 = vrot.slane %v11978_v29, 7  ;;  %v4097_v49 = vrot.slane %v11978_v29, 1  ;;  %v3919_v55 = vsel %vm14759_vm15, %v3903_v48, %v3904_v54  ;;  %v11991_v45 = vsel %vm14760_vm2, %v4095_v20, %v4096_v6  ;;  %vm14775_vm15 = vmmov %vm14771_vm0 }
 0x3ea   :  { %v3761_v10 = vpop.f32.mrb[116].mxu1  ;;  %14761 = vst [vmem:[#allocation139_spill] sm:$0xff] %v11991_v45  ;;  %vm14776_vm2 = vmmov %vm14774_vm3 }
 0x3eb   :  { %v3762_v4 = vadd.f32 %v11841_v46, %v3761_v10  ;;  %v3763_v12 = vpop.f32.mrb[117].mxu1  ;;  %v3918_v17 = vsel %vm14762_vm13, %v3904_v54, %v3905_v56  ;;  %v12001_v48 = vsel %vm14763_vm8, %v4096_v6, %v4097_v49  ;;  %vm7254_vm13 = vmpackc.low %vm7943_vm6, %vm7253_vm4  ;;  %vm14779_vm8 = vnez %v14778_v13 }
 0x3ec   :  { %14764 = vst [vmem:[#allocation140_spill] sm:$0xff] %v12001_v48  ;;  %v3764_v26 = vpop.f32.mrb[118].mxu1  ;;  %v7247_v63 = vpack.c.bf16 %v3918_v17, %v3919_v55  ;;  %vm7133_vm14 = vmneg %vm14779_vm8  ;;  %v14783_v13 = vrot.slane %v11093_v8, 7 }
 0x3ed   :  { %v12003_v33 = vmax.f32 %v3762_v4, 0.0  ;;  %v3765_v20 = vadd.f32 %v11841_v46, %v3764_v26  ;;  %v3766_v10 = vpop.f32.mrb[119].mxu1 }
 0x3ee   :  { %7248 = vmatmul.mubr.msk.bf16.gmra.mrb[196].mxu1 %vm7246_vm12, %v7247_v63  ;;  %vm14777_vm12 = vmmov %vm14771_vm0 }
 0x3ef   :  { %14765 = vst [vmem:[#allocation141_spill] sm:$0xff] %v12003_v33  ;;  %v3906_v12 = vrot.slane %v12003_v33, 7  ;;  %v4098_v54 = vrot.slane %v12003_v33, 1  ;;  %v12008_v62 = vmax.f32 %v3765_v20, 0.0  ;;  %4731 = vmatprep.mubr.bf16.mxu1 %v14530_v50 }
 0x3f1   :  { %v3907_v6 = vrot.slane %v12008_v62, 7  ;;  %v4099_v55 = vrot.slane %v12008_v62, 1  ;;  %v3917_v26 = vsel %vm14767_vm7, %v3905_v56, %v3906_v12  ;;  %v12021_v17 = vsel %vm14768_vm9, %v4097_v49, %v4098_v54  ;;  %vm7257_vm7 = vmneg %vm14780_vm11 }
 0x3f2   :  { %v3769_v4 = vpop.f32.mrb[120].mxu1  ;;  %14769 = vst [vmem:[#allocation142_spill] sm:$0xff] %v12021_v17  ;;  %vm14781_vm9 = vmmov %vm14776_vm2 }
 0x3f3   :  { %v3770_v20 = vadd.f32 %v11841_v46, %v3769_v4  ;;  %v3771_v10 = vpop.f32.mrb[121].mxu1  ;;  %v3916_v59 = vsel %vm14770_vm5, %v3906_v12, %v3907_v6  ;;  %v12031_v56 = vsel %vm14771_vm0, %v4098_v54, %v4099_v55  ;;  %vm7134_vm5 = vmpackc.low %vm7943_vm6, %vm7133_vm14 }
 0x3f4   :  { %v3772_v63 = vpop.f32.mrb[122].mxu1  ;;  %v7251_v24 = vpack.c.bf16 %v3916_v59, %v3917_v26  ;;  %vm7258_vm4 = vmpackc.low %vm7943_vm6, %vm7257_vm7 }
 0x3f5   :  { %v12033_v45 = vmax.f32 %v3770_v20, 0.0  ;;  %v3773_v49 = vadd.f32 %v11841_v46, %v3772_v63  ;;  %v3774_v4 = vpop.f32.mrb[123].mxu1 }
 0x3f6   :  { %7252 = vmatmul.mubr.msk.bf16.gmra.mrb[200].mxu1 %vm7250_vm10, %v7251_v24  ;;  %vm14782_vm10 = vmmov %vm14771_vm0 }
 0x3f7   :  { %14772 = vst [vmem:[#allocation143_spill] sm:$0xff] %v12033_v45  ;;  %v3908_v10 = vrot.slane %v12033_v45, 7  ;;  %v4100_v12 = vrot.slane %v12033_v45, 1  ;;  %v12038_v33 = vmax.f32 %v3773_v49, 0.0  ;;  %4741 = vmatprep.mubr.bf16.mxu1 %v14530_v50  ;;  %vm14784_vm0 = vmmov %vm14776_vm2 }
 0x3f8   :  { %vm14785_vm1 = vmmov %vm14784_vm0 }
 0x3f9   :  { %v3909_v54 = vrot.slane %v12038_v33, 7  ;;  %v4101_v26 = vrot.slane %v12038_v33, 1  ;;  %v3915_v63 = vsel %vm14774_vm3, %v3907_v6, %v3908_v10  ;;  %v12051_v59 = vsel %vm14775_vm15, %v4099_v55, %v4100_v12  ;;  %vm14786_vm3 = vmmov %vm14782_vm10 }
 0x3fa   :  { %v3777_v20 = vpop.f32.mrb[124].mxu1  ;;  %vm14788_vm15 = vmmov %vm14786_vm3 }
 0x3fb   :  { %v3778_v49 = vadd.f32 %v11841_v46, %v3777_v20  ;;  %v3779_v4 = vpop.f32.mrb[125].mxu1  ;;  %v3914_v51 = vsel %vm14776_vm2, %v3908_v10, %v3909_v54  ;;  %v12061_v6 = vsel %vm14777_vm12, %v4100_v12, %v4101_v26 }
 0x3fc   :  { %v3780_v24 = vpop.f32.mrb[126].mxu1  ;;  %v7255_v48 = vpack.c.bf16 %v3914_v51, %v3915_v63  ;;  %v14787_v63 = vrot.slane %v11093_v8, 1 }
 0x3fd   :  { %v12063_v17 = vmax.f32 %v3778_v49, 0.0  ;;  %v3781_v55 = vadd.f32 %v11841_v46, %v3780_v24  ;;  %v3782_v20 = vpop.f32.mrb[127].mxu1  ;;  %v7872_v49 = vld [vmem:[%s13224_s5 + $0x80] ss:$8 sps:$4 sm:$0xff]  }
 0x3fe   :  { %7256 = vmatmul.mubr.msk.bf16.gmra.mrb[204].mxu1 %vm7254_vm13, %v7255_v48 }
 0x3ff   :  { %v3910_v4 = vrot.slane %v12063_v17, 7  ;;  %v4102_v10 = vrot.slane %v12063_v17, 1  ;;  %v12068_v45 = vmax.f32 %v3781_v55, 0.0  ;;  %4751 = vmatprep.mubr.bf16.mxu1 %v14530_v50 }
 0x401   :  { %v3911_v12 = vrot.slane %v12068_v45, 7  ;;  %v4103_v46 = vrot.slane %v12068_v45, 1  ;;  %v3913_v48 = vsel %vm14781_vm9, %v3909_v54, %v3910_v4  ;;  %v12084_v24 = vsel %vm14782_vm10, %v4101_v26, %v4102_v10 }
 0x403   :  { %v3975_v38 = vsel %vm14784_vm0, %v3911_v12, %v14783_v13  ;;  %v3912_v54 = vsel %vm14785_vm1, %v3910_v4, %v3911_v12  ;;  %v12100_v26 = vsel %vm14786_vm3, %v4102_v10, %v4103_v46  ;;  %v7877_v13 = vld [vmem:[%s13224_s5 + $0x94] ss:$8 sps:$4 sm:$0xff]   ;;  %v12110_v4 = vsel %vm14788_vm15, %v4103_v46, %v14787_v63  ;;  %v14789_v10 = vld [vmem:[#allocation59_spill] sm:$0xff] }
 0x404   :  { %v7135_v55 = vpack.c.bf16 %v11111_v34, %v3975_v38  ;;  %v7259_v20 = vpack.c.bf16 %v3912_v54, %v3913_v48  ;;  %v7875_v34 = vld [vmem:[%s13224_s5 + $0x90] ss:$8 sps:$4 sm:$0xff]   ;;  %vm14790_vm2 = vnez %v14789_v10  ;;  %v7880_v46 = vld [vmem:[%s13224_s5 + $0xa4] ss:$8 sps:$4 sm:$0xff]   ;;  %v7878_v48 = vld [vmem:[%s13224_s5 + $0xa0] ss:$8 sps:$4 sm:$0xff]   ;;  %v14791_v38 = vpack.c.bf16 %v11149_v41, %v11140_v7 }
 0x405   :  { %vm7137_vm13 = vmneg %vm14790_vm2  ;;  %v7883_v63 = vld [vmem:[%s13224_s5 + $0xb4] ss:$8 sps:$4 sm:$0xff]   ;;  %v7884_v7 = vld [vmem:[%s13224_s5 + $0xc0] ss:$8 sps:$4 sm:$0xff]   ;;  %v14823_v12 = vpack.c.bf16 %v11200_v60, %v11193_v9  ;;  %v14825_v60 = vpack.c.bf16 %v11236_v2, %v11229_v39 }
 0x406   :  { %7136 = vmatmul.mubr.msk.bf16.vlgmr.msra.gmra.mrb[64].mxu0 %vm7134_vm5, %v7135_v55  ;;  %7260 = vmatmul.mubr.msk.bf16.gmra.mrb[208].mxu1 %vm7258_vm4, %v7259_v20  ;;  %vm7138_vm12 = vmpackc.low %vm7943_vm6, %vm7137_vm13  ;;  %v14792_v54 = vld [vmem:[#allocation61_spill] sm:$0xff]  ;;  %v7886_v55 = vld [vmem:[%s13224_s5 + $0xc4] ss:$8 sps:$4 sm:$0xff]   ;;  %v14794_v20 = vpack.c.bf16 %v11183_v11, %v11172_v27 }
 0x407   :  { %4843 = vmatpush1.bf16.msra.mxu0 %v7872_v49  ;;  %4451 = vmatprep.mubr.bf16.mxu0 %v14530_v50  ;;  %v7881_v49 = vld [vmem:[%s13224_s5 + $0xb0] ss:$8 sps:$4 sm:$0xff]   ;;  %vm14793_vm8 = vnez %v14792_v54  ;;  %v7889_v41 = vld [vmem:[%s13224_s5 + $0xd4] ss:$8 sps:$4 sm:$0xff]   ;;  %v7892_v10 = vld [vmem:[%s13224_s5 + $0xe4] ss:$8 sps:$4 sm:$0xff]  }
 0x408   :  { %4844 = vmatprep.subr.bf16.mxu0 %v7877_v13  ;;  %vm7141_vm14 = vmneg %vm14793_vm8  ;;  %v7887_v13 = vld [vmem:[%s13224_s5 + $0xd0] ss:$8 sps:$4 sm:$0xff]   ;;  %v7890_v27 = vld [vmem:[%s13224_s5 + $0xe0] ss:$8 sps:$4 sm:$0xff]  }
 0x409   :  { %vm7142_vm11 = vmpackc.low %vm7943_vm6, %vm7141_vm14  ;;  %v7895_v11 = vld [vmem:[%s13224_s5 + $0xf4] ss:$8 sps:$4 sm:$0xff]   ;;  %v14804_v54 = vld [vmem:[#allocation67_spill] sm:$0xff] }
 0x40a   :  { %vm14805_vm2 = vnez %v14804_v54  ;;  %v7896_v54 = vld [vmem:[%s13224_s5 + $0x100] ss:$8 sps:$4 sm:$0xff]  }
 0x40b   :  { %4845 = vmatpush1.bf16.msra.mxu0 %v7875_v34  ;;  %v14795_v34 = vld [vmem:[#allocation63_spill] sm:$0xff]  ;;  %vm7157_vm13 = vmneg %vm14805_vm2 }
 0x40c   :  { %4846 = vmatprep.subr.bf16.mxu0 %v7880_v46  ;;  %vm14796_vm7 = vnez %v14795_v34  ;;  %v14797_v46 = vpack.c.bf16 %v11219_v53, %v11208_v40  ;;  %v14800_v40 = vpack.c.bf16 %v11254_v18, %v11243_v25  ;;  %v14801_v53 = vld [vmem:[#allocation66_spill] sm:$0xff]  ;;  %v14806_v25 = vpack.c.bf16 %v11318_v35, %v11307_v1  ;;  %v14807_v18 = vld [vmem:[#allocation68_spill] sm:$0xff]  ;;  %v14810_v35 = vld [vmem:[#allocation69_spill] sm:$0xff] }
 0x40d   :  { %vm7145_vm9 = vmneg %vm14796_vm7  ;;  %vm14802_vm4 = vnez %v14801_v53  ;;  %vm14808_vm8 = vnez %v14807_v18  ;;  %vm14811_vm7 = vnez %v14810_v35  ;;  %v14818_v53 = vpack.c.bf16 %v11446_v3, %v11435_v21  ;;  %v7901_v18 = vld [vmem:[%s13224_s5 + $0x114] ss:$8 sps:$4 sm:$0xff]   ;;  %v7899_v3 = vld [vmem:[%s13224_s5 + $0x110] ss:$8 sps:$4 sm:$0xff]  }
 0x40e   :  { %7140 = vmatmul.mubr.msk.bf16.gmra.mrb[68].mxu0 %vm7138_vm12, %v14791_v38  ;;  %vm7146_vm5 = vmpackc.low %vm7943_vm6, %vm7145_vm9  ;;  %v7898_v38 = vld [vmem:[%s13224_s5 + $0x104] ss:$8 sps:$4 sm:$0xff]   ;;  %v14819_v21 = vpack.c.bf16 %v11098_v0, %v11093_v8  ;;  %v7902_v8 = vld [vmem:[%s13224_s5 + $0x120] ss:$8 sps:$4 sm:$0xff]  }
 0x40f   :  { %4461 = vmatprep.mubr.bf16.mxu0 %v14530_v50  ;;  %4847 = vmatpush1.bf16.msra.mxu0 %v7878_v48  ;;  %v7893_v48 = vld [vmem:[%s13224_s5 + $0xf0] ss:$8 sps:$4 sm:$0xff]   ;;  %vm7153_vm3 = vmneg %vm14802_vm4 }
 0x410   :  { %4848 = vmatprep.subr.bf16.mxu0 %v7883_v63  ;;  %v14798_v63 = vld [vmem:[#allocation65_spill] sm:$0xff]  ;;  %vm7154_vm15 = vmpackc.low %vm7943_vm6, %vm7153_vm3 }
 0x411   :  { %vm14799_vm10 = vnez %v14798_v63  ;;  %vm7158_vm12 = vmpackc.low %vm7943_vm6, %vm7157_vm13 }
 0x412   :  { %vm7149_vm0 = vmneg %vm14799_vm10 }
 0x413   :  { %4849 = vmatpush1.bf16.msra.mxu0 %v7881_v49  ;;  %vm7150_vm1 = vmpackc.low %vm7943_vm6, %vm7149_vm0  ;;  %v14803_v49 = vpack.c.bf16 %v11286_v44, %v11275_v61 }
 0x414   :  { %4850 = vmatprep.subr.bf16.mxu0 %v7886_v55  ;;  %vm7161_vm14 = vmneg %vm14808_vm8 }
 0x415   :  { %vm7165_vm9 = vmneg %vm14811_vm7 }
 0x416   :  { %7144 = vmatmul.mubr.msk.bf16.gmra.mrb[72].mxu0 %vm7142_vm11, %v14794_v20  ;;  %vm7162_vm11 = vmpackc.low %vm7943_vm6, %vm7161_vm14 }
 0x417   :  { %4471 = vmatprep.mubr.bf16.mxu0 %v14530_v50  ;;  %4851 = vmatpush1.bf16.msra.mxu0 %v7884_v7 }
 0x418   :  { %4852 = vmatprep.subr.bf16.mxu0 %v7889_v41  ;;  %v14809_v41 = vpack.c.bf16 %v11350_v19, %v11339_v43  ;;  %v14813_v19 = vld [vmem:[#allocation11_spill] sm:$0xff] }
 0x419   :  { %vm14814_vm10 = vnez %v14813_v19 }
 0x41a   :  { %vm7169_vm0 = vmneg %vm14814_vm10 }
 0x41b   :  { %4853 = vmatpush1.bf16.msra.mxu0 %v7887_v13 }
 0x41c   :  { %4854 = vmatprep.subr.bf16.mxu0 %v7892_v10  ;;  %v14812_v10 = vpack.c.bf16 %v11382_v52, %v11371_v5  ;;  %v14816_v5 = vld [vmem:[#allocation10_spill] sm:$0xff] }
 0x41d   :  { %vm14817_vm4 = vnez %v14816_v5  ;;  %v14820_v5 = vpack.c.bf16 %v11122_v47, %v11114_v36  ;;  %v7908_v36 = vld [vmem:[%s13224_s5 + $0x140] ss:$8 sps:$4 sm:$0xff]  }
 0x41e   :  { %7148 = vmatmul.mubr.msk.bf16.gmra.mrb[76].mxu0 %vm7146_vm5, %v14797_v46  ;;  %vm7166_vm5 = vmpackc.low %vm7943_vm6, %vm7165_vm9 }
 0x41f   :  { %4481 = vmatprep.mubr.bf16.mxu0 %v14530_v50  ;;  %4855 = vmatpush1.bf16.msra.mxu0 %v7890_v27  ;;  %vm7173_vm3 = vmneg %vm14817_vm4 }
 0x420   :  { %4856 = vmatprep.subr.bf16.mxu0 %v7895_v11 }
 0x423   :  { %4857 = vmatpush1.bf16.msra.mxu0 %v7893_v48  ;;  %v14815_v48 = vpack.c.bf16 %v11414_v37, %v11403_v15 }
 0x424   :  { %5324 = vmatprep.subr.bf16.mxu0 %v7898_v38 }
 0x426   :  { %7152 = vmatmul.mubr.msk.bf16.gmra.mrb[80].mxu0 %vm7150_vm1, %v14800_v40  ;;  %vm7170_vm1 = vmpackc.low %vm7943_vm6, %vm7169_vm0 }
 0x427   :  { %4491 = vmatprep.mubr.bf16.mxu0 %v14530_v50 }
 0x42e   :  { %7156 = vmatmul.mubr.msk.bf16.gmra.mrb[84].mxu0 %vm7154_vm15, %v14803_v49  ;;  %vm7174_vm15 = vmpackc.low %vm7943_vm6, %vm7173_vm3 }
 0x42f   :  { %4501 = vmatprep.mubr.bf16.mxu0 %v14530_v50 }
 0x436   :  { %7160 = vmatmul.mubr.msk.bf16.gmra.mrb[88].mxu0 %vm7158_vm12, %v14806_v25 }
 0x437   :  { %4511 = vmatprep.mubr.bf16.mxu0 %v14530_v50 }
 0x439   :  { %v12201_v55 = vpop.f32.mrb[128].mxu1 }
 0x43a   :  { %v12203_v44 = vpop.f32.mrb[129].mxu1 }
 0x43b   :  { %v12205_v61 = vpop.f32.mrb[130].mxu1 }
 0x43c   :  { %v12208_v7 = vpop.f32.mrb[131].mxu1 }
 0x43e   :  { %7164 = vmatmul.mubr.msk.bf16.gmra.mrb[92].mxu0 %vm7162_vm11, %v14809_v41  ;;  %v7904_v41 = vld [vmem:[%s13224_s5 + $0x124] ss:$8 sps:$4 sm:$0xff]  }
 0x43f   :  { %4521 = vmatprep.mubr.bf16.mxu0 %v14530_v50 }
 0x441   :  { %v12216_v1 = vpop.f32.mrb[132].mxu1 }
 0x442   :  { %v12218_v20 = vpop.f32.mrb[133].mxu1 }
 0x443   :  { %v12220_v13 = vpop.f32.mrb[134].mxu1 }
 0x444   :  { %v12223_v34 = vpop.f32.mrb[135].mxu1 }
 0x446   :  { %7168 = vmatmul.mubr.msk.bf16.gmra.mrb[96].mxu0 %vm7166_vm5, %v14812_v10 }
 0x447   :  { %4531 = vmatprep.mubr.bf16.mxu0 %v14530_v50 }
 0x449   :  { %v12231_v43 = vpop.f32.mrb[136].mxu1 }
 0x44a   :  { %v12233_v27 = vpop.f32.mrb[137].mxu1 }
 0x44b   :  { %v12235_v11 = vpop.f32.mrb[138].mxu1 }
 0x44c   :  { %v12238_v46 = vpop.f32.mrb[139].mxu1 }
 0x44e   :  { %7172 = vmatmul.mubr.msk.bf16.gmra.mrb[100].mxu0 %vm7170_vm1, %v14815_v48  ;;  %v7907_v48 = vld [vmem:[%s13224_s5 + $0x134] ss:$8 sps:$4 sm:$0xff]  }
 0x44f   :  { %4541 = vmatprep.mubr.bf16.mxu0 %v14530_v50 }
 0x451   :  { %v12246_v52 = vpop.f32.mrb[140].mxu1 }
 0x452   :  { %v12248_v63 = vpop.f32.mrb[141].mxu1 }
 0x453   :  { %v12250_v38 = vpop.f32.mrb[142].mxu1 }
 0x454   :  { %v12253_v40 = vpop.f32.mrb[143].mxu1 }
 0x456   :  { %7176 = vmatmul.mubr.msk.bf16.gmra.mrb[104].mxu0 %vm7174_vm15, %v14818_v53  ;;  %v7905_v53 = vld [vmem:[%s13224_s5 + $0x130] ss:$8 sps:$4 sm:$0xff]  }
 0x457   :  { %4874 = vmatprep.mubr.bf16.mxu0 %v14530_v50 }
 0x459   :  { %v12259_v15 = vpop.f32.mrb[144].mxu1 }
 0x45a   :  { %v12261_v37 = vpop.f32.mrb[145].mxu1 }
 0x45b   :  { %v12263_v49 = vpop.f32.mrb[146].mxu1 }
 0x45c   :  { %v12268_v25 = vpop.f32.mrb[147].mxu1 }
 0x45e   :  { %4875 = vmatmul.mubr.bf16.vlgmr.msra.gmra.mrb[64].mxu0 %v14819_v21 }
 0x45f   :  { %5325 = vmatpush1.bf16.msra.mxu0 %v7896_v54  ;;  %4884 = vmatprep.mubr.bf16.mxu0 %v14530_v50  ;;  %v7910_v54 = vld [vmem:[%s13224_s5 + $0x144] ss:$8 sps:$4 sm:$0xff]  }
 0x460   :  { %5326 = vmatprep.subr.bf16.mxu0 %v7901_v18 }
 0x461   :  { %v12283_v35 = vpop.f32.mrb[148].mxu1 }
 0x462   :  { %v12285_v10 = vpop.f32.mrb[149].mxu1 }
 0x463   :  { %v12287_v19 = vpop.f32.mrb[150].mxu1  ;;  %5327 = vmatpush1.bf16.msra.mxu0 %v7899_v3 }
 0x464   :  { %v12292_v0 = vpop.f32.mrb[151].mxu1  ;;  %5328 = vmatprep.subr.bf16.mxu0 %v7904_v41  ;;  %v14821_v41 = vpack.c.bf16 %v11164_v30, %v11157_v22  ;;  %v7911_v22 = vld [vmem:[%s13224_s5 + $0x150] ss:$8 sps:$4 sm:$0xff]   ;;  %v7913_v30 = vld [vmem:[%s13224_s5 + $0x154] ss:$8 sps:$4 sm:$0xff]  }
 0x466   :  { %4885 = vmatmul.mubr.bf16.gmra.mrb[68].mxu0 %v14820_v5 }
 0x467   :  { %4894 = vmatprep.mubr.bf16.mxu0 %v14530_v50  ;;  %5329 = vmatpush1.bf16.msra.mxu0 %v7902_v8 }
 0x468   :  { %5330 = vmatprep.subr.bf16.mxu0 %v7907_v48 }
 0x469   :  { %v12307_v18 = vpop.f32.mrb[152].mxu1 }
 0x46a   :  { %v12309_v21 = vpop.f32.mrb[153].mxu1 }
 0x46b   :  { %v12311_v3 = vpop.f32.mrb[154].mxu1  ;;  %5331 = vmatpush1.bf16.msra.mxu0 %v7905_v53 }
 0x46c   :  { %v12316_v47 = vpop.f32.mrb[155].mxu1  ;;  %5332 = vmatprep.subr.bf16.mxu0 %v7910_v54 }
 0x46e   :  { %4895 = vmatmul.mubr.bf16.gmra.mrb[72].mxu0 %v14821_v41 }
 0x46f   :  { %4904 = vmatprep.mubr.bf16.mxu0 %v14530_v50  ;;  %5333 = vmatpush1.bf16.msra.mxu0 %v7908_v36 }
 0x470   :  { %5334 = vmatprep.subr.bf16.mxu0 %v7913_v30 }
 0x471   :  { %v12322_v8 = vpop.f32.mrb[156].mxu1 }
 0x472   :  { %v12324_v48 = vpop.f32.mrb[157].mxu1 }
 0x473   :  { %v12326_v5 = vpop.f32.mrb[158].mxu1  ;;  %5335 = vmatpush1.bf16.msra.mxu0 %v7911_v22  ;;  %v14828_v22 = vpack.c.bf16 %v11269_v58, %v11264_v57 }
 0x474   :  { %v12328_v53 = vpop.f32.mrb[159].mxu1 }
 0x475   :  { %14822 = vst [vmem:[#allocation56_spill] sm:$0xff] %v12328_v53 }
 0x476   :  { %4905 = vmatmul.mubr.bf16.gmra.mrb[76].mxu0 %v14823_v12 }
 0x477   :  { %4914 = vmatprep.mubr.bf16.mxu0 %v14530_v50 }
 0x479   :  { %v12340_v54 = vpop.f32.mrb[160].mxu1 }
 0x47a   :  { %v12342_v36 = vpop.f32.mrb[161].mxu1 }
 0x47b   :  { %v12344_v41 = vpop.f32.mrb[162].mxu1 }
 0x47c   :  { %v12346_v9 = vpop.f32.mrb[163].mxu1 }
 0x47d   :  { %14824 = vst [vmem:[#allocation59_spill] sm:$0xff] %v12346_v9 }
 0x47e   :  { %4915 = vmatmul.mubr.bf16.gmra.mrb[80].mxu0 %v14825_v60 }
 0x47f   :  { %4924 = vmatprep.mubr.bf16.mxu0 %v14530_v50 }
 0x481   :  { %v12352_v12 = vpop.f32.mrb[164].mxu1 }
 0x482   :  { %v12354_v51 = vpop.f32.mrb[165].mxu1 }
 0x483   :  { %14826 = vst [vmem:[#allocation61_spill] sm:$0xff] %v12354_v51  ;;  %v12356_v53 = vpop.f32.mrb[166].mxu1  ;;  %v14832_v51 = vpack.c.bf16 %v11301_v23, %v11296_v42  ;;  %v7914_v23 = vld [vmem:[%s13224_s5 + $0x160] ss:$8 sps:$4 sm:$0xff]   ;;  %v7916_v42 = vld [vmem:[%s13224_s5 + $0x164] ss:$8 sps:$4 sm:$0xff]  }
 0x484   :  { %v12358_v30 = vpop.f32.mrb[167].mxu1  ;;  %5336 = vmatprep.subr.bf16.mxu0 %v7916_v42 }
 0x485   :  { %14827 = vst [vmem:[#allocation63_spill] sm:$0xff] %v12358_v30  ;;  %5337 = vmatpush1.bf16.msra.mxu0 %v7914_v23  ;;  %v14850_v23 = vld [vmem:[#allocation79_spill] sm:$0xff] }
 0x486   :  { %4925 = vmatmul.mubr.bf16.gmra.mrb[84].mxu0 %v14828_v22 }
 0x487   :  { %4934 = vmatprep.mubr.bf16.mxu0 %v14530_v50 }
 0x489   :  { %v12364_v9 = vpop.f32.mrb[168].mxu1 }
 0x48a   :  { %v12366_v39 = vpop.f32.mrb[169].mxu1 }
 0x48b   :  { %14829 = vst [vmem:[#allocation65_spill] sm:$0xff] %v12366_v39  ;;  %v12368_v2 = vpop.f32.mrb[170].mxu1  ;;  %v14837_v39 = vpack.c.bf16 %v11333_v28, %v11328_v31  ;;  %v14842_v31 = vld [vmem:[#allocation76_spill] sm:$0xff] }
 0x48c   :  { %14830 = vst [vmem:[#allocation66_spill] sm:$0xff] %v12368_v2  ;;  %v12370_v60 = vpop.f32.mrb[171].mxu1 }
 0x48d   :  { %14831 = vst [vmem:[#allocation67_spill] sm:$0xff] %v12370_v60 }
 0x48e   :  { %4935 = vmatmul.mubr.bf16.gmra.mrb[88].mxu0 %v14832_v51 }
 0x48f   :  { %4944 = vmatprep.mubr.bf16.mxu0 %v14530_v50 }
 0x491   :  { %v12376_v30 = vpop.f32.mrb[172].mxu1 }
 0x492   :  { %14833 = vst [vmem:[#allocation68_spill] sm:$0xff] %v12376_v30  ;;  %v12378_v58 = vpop.f32.mrb[173].mxu1 }
 0x493   :  { %14834 = vst [vmem:[#allocation69_spill] sm:$0xff] %v12378_v58  ;;  %v12380_v57 = vpop.f32.mrb[174].mxu1 }
 0x494   :  { %14835 = vst [vmem:[#allocation11_spill] sm:$0xff] %v12380_v57  ;;  %v12382_v22 = vpop.f32.mrb[175].mxu1 }
 0x495   :  { %14836 = vst [vmem:[#allocation10_spill] sm:$0xff] %v12382_v22 }
 0x496   :  { %4945 = vmatmul.mubr.bf16.gmra.mrb[92].mxu0 %v14837_v39  ;;  %v14843_v39 = vld [vmem:[#allocation75_spill] sm:$0xff] }
 0x497   :  { %4954 = vmatprep.mubr.bf16.mxu0 %v14530_v50  ;;  %v14844_v58 = vpack.c.bf16 %v14842_v31, %v14843_v39 }
 0x499   :  { %v12394_v51 = vpop.f32.mrb[176].mxu1 }
 0x49a   :  { %14838 = vst [vmem:[#allocation144_spill] sm:$0xff] %v12394_v51  ;;  %v12396_v57 = vpop.f32.mrb[177].mxu1 }
 0x49b   :  { %14839 = vst [vmem:[#allocation145_spill] sm:$0xff] %v12396_v57  ;;  %v12398_v22 = vpop.f32.mrb[178].mxu1  ;;  %v14849_v57 = vld [vmem:[#allocation80_spill] sm:$0xff] }
 0x49c   :  { %14840 = vst [vmem:[#allocation146_spill] sm:$0xff] %v12398_v22  ;;  %v12400_v28 = vpop.f32.mrb[179].mxu1  ;;  %v14851_v51 = vpack.c.bf16 %v14849_v57, %v14850_v23 }
 0x49d   :  { %14841 = vst [vmem:[#allocation147_spill] sm:$0xff] %v12400_v28 }
 0x49e   :  { %4955 = vmatmul.mubr.bf16.gmra.mrb[96].mxu0 %v14844_v58 }
 0x49f   :  { %4964 = vmatprep.mubr.bf16.mxu0 %v14530_v50 }
 0x4a1   :  { %v12406_v30 = vpop.f32.mrb[180].mxu1 }
 0x4a2   :  { %14845 = vst [vmem:[#allocation76_spill] sm:$0xff] %v12406_v30  ;;  %v12408_v60 = vpop.f32.mrb[181].mxu1  ;;  %v14856_v30 = vld [vmem:[#allocation84_spill] sm:$0xff] }
 0x4a3   :  { %14846 = vst [vmem:[#allocation75_spill] sm:$0xff] %v12408_v60  ;;  %v12410_v2 = vpop.f32.mrb[182].mxu1  ;;  %v14857_v60 = vld [vmem:[#allocation83_spill] sm:$0xff] }
 0x4a4   :  { %14847 = vst [vmem:[#allocation148_spill] sm:$0xff] %v12410_v2  ;;  %v12412_v42 = vpop.f32.mrb[183].mxu1  ;;  %v14858_v22 = vpack.c.bf16 %v14856_v30, %v14857_v60  ;;  %v7917_v30 = vld [vmem:[%s13224_s5 + $0x170] ss:$8 sps:$4 sm:$0xff]   ;;  %v7919_v60 = vld [vmem:[%s13224_s5 + $0x174] ss:$8 sps:$4 sm:$0xff]  }
 0x4a5   :  { %14848 = vst [vmem:[#allocation149_spill] sm:$0xff] %v12412_v42  ;;  %5338 = vmatprep.subr.bf16.mxu0 %v7919_v60 }
 0x4a6   :  { %4965 = vmatmul.mubr.bf16.gmra.mrb[100].mxu0 %v14851_v51 }
 0x4a7   :  { %4974 = vmatprep.mubr.bf16.mxu0 %v14530_v50  ;;  %5339 = vmatpush1.bf16.msra.mxu0 %v7917_v30  ;;  %v14878_v30 = vld [vmem:[#allocation93_spill] sm:$0xff] }
 0x4a9   :  { %v12418_v28 = vpop.f32.mrb[184].mxu1 }
 0x4aa   :  { %14852 = vst [vmem:[#allocation80_spill] sm:$0xff] %v12418_v28  ;;  %v12420_v31 = vpop.f32.mrb[185].mxu1  ;;  %v14863_v28 = vld [vmem:[#allocation88_spill] sm:$0xff] }
 0x4ab   :  { %14853 = vst [vmem:[#allocation79_spill] sm:$0xff] %v12420_v31  ;;  %v12422_v58 = vpop.f32.mrb[186].mxu1  ;;  %v14864_v31 = vld [vmem:[#allocation87_spill] sm:$0xff] }
 0x4ac   :  { %14854 = vst [vmem:[#allocation150_spill] sm:$0xff] %v12422_v58  ;;  %v12424_v39 = vpop.f32.mrb[187].mxu1  ;;  %v14865_v2 = vpack.c.bf16 %v14863_v28, %v14864_v31  ;;  %v14871_v31 = vld [vmem:[#allocation90_spill] sm:$0xff] }
 0x4ad   :  { %14855 = vst [vmem:[#allocation151_spill] sm:$0xff] %v12424_v39 }
 0x4ae   :  { %4975 = vmatmul.mubr.bf16.gmra.mrb[104].mxu0 %v14858_v22 }
 0x4af   :  { %4984 = vmatprep.mubr.bf16.mxu0 %v14530_v50 }
 0x4b1   :  { %v12430_v42 = vpop.f32.mrb[188].mxu1 }
 0x4b2   :  { %14859 = vst [vmem:[#allocation84_spill] sm:$0xff] %v12430_v42  ;;  %v12432_v57 = vpop.f32.mrb[189].mxu1 }
 0x4b3   :  { %14860 = vst [vmem:[#allocation83_spill] sm:$0xff] %v12432_v57  ;;  %v12434_v51 = vpop.f32.mrb[190].mxu1 }
 0x4b4   :  { %14861 = vst [vmem:[#allocation152_spill] sm:$0xff] %v12434_v51  ;;  %v12436_v23 = vpop.f32.mrb[191].mxu1 }
 0x4b5   :  { %14862 = vst [vmem:[#allocation153_spill] sm:$0xff] %v12436_v23 }
 0x4b6   :  { %4985 = vmatmul.mubr.bf16.gmra.mrb[108].mxu0 %v14865_v2  ;;  %v14870_v2 = vld [vmem:[#allocation91_spill] sm:$0xff] }
 0x4b7   :  { %4994 = vmatprep.mubr.bf16.mxu0 %v14530_v50  ;;  %v14872_v57 = vpack.c.bf16 %v14870_v2, %v14871_v31 }
 0x4b9   :  { %v12448_v22 = vpop.f32.mrb[192].mxu1 }
 0x4ba   :  { %14866 = vst [vmem:[#allocation88_spill] sm:$0xff] %v12448_v22  ;;  %v12450_v51 = vpop.f32.mrb[193].mxu1 }
 0x4bb   :  { %14867 = vst [vmem:[#allocation87_spill] sm:$0xff] %v12450_v51  ;;  %v12452_v23 = vpop.f32.mrb[194].mxu1  ;;  %v14877_v51 = vld [vmem:[#allocation94_spill] sm:$0xff] }
 0x4bc   :  { %14868 = vst [vmem:[#allocation154_spill] sm:$0xff] %v12452_v23  ;;  %v12454_v28 = vpop.f32.mrb[195].mxu1  ;;  %v14879_v22 = vpack.c.bf16 %v14877_v51, %v14878_v30 }
 0x4bd   :  { %14869 = vst [vmem:[#allocation155_spill] sm:$0xff] %v12454_v28 }
 0x4be   :  { %4995 = vmatmul.mubr.bf16.gmra.mrb[112].mxu0 %v14872_v57 }
 0x4bf   :  { %5004 = vmatprep.mubr.bf16.mxu0 %v14530_v50 }
 0x4c1   :  { %v12460_v42 = vpop.f32.mrb[196].mxu1 }
 0x4c2   :  { %14873 = vst [vmem:[#allocation91_spill] sm:$0xff] %v12460_v42  ;;  %v12462_v39 = vpop.f32.mrb[197].mxu1  ;;  %v14884_v42 = vld [vmem:[#allocation97_spill] sm:$0xff] }
 0x4c3   :  { %14874 = vst [vmem:[#allocation90_spill] sm:$0xff] %v12462_v39  ;;  %v12464_v58 = vpop.f32.mrb[198].mxu1  ;;  %v14885_v39 = vld [vmem:[#allocation96_spill] sm:$0xff] }
 0x4c4   :  { %14875 = vst [vmem:[#allocation156_spill] sm:$0xff] %v12464_v58  ;;  %v12466_v60 = vpop.f32.mrb[199].mxu1  ;;  %v14886_v23 = vpack.c.bf16 %v14884_v42, %v14885_v39 }
 0x4c5   :  { %14876 = vst [vmem:[#allocation157_spill] sm:$0xff] %v12466_v60 }
 0x4c6   :  { %5005 = vmatmul.mubr.bf16.gmra.mrb[116].mxu0 %v14879_v22 }
 0x4c7   :  { %5014 = vmatprep.mubr.bf16.mxu0 %v14530_v50 }
 0x4c9   :  { %v12472_v28 = vpop.f32.mrb[200].mxu1 }
 0x4ca   :  { %14880 = vst [vmem:[#allocation94_spill] sm:$0xff] %v12472_v28  ;;  %v12474_v2 = vpop.f32.mrb[201].mxu1  ;;  %v14891_v28 = vld [vmem:[#allocation100_spill] sm:$0xff] }
 0x4cb   :  { %14881 = vst [vmem:[#allocation93_spill] sm:$0xff] %v12474_v2  ;;  %v12476_v57 = vpop.f32.mrb[202].mxu1  ;;  %v14892_v2 = vld [vmem:[#allocation99_spill] sm:$0xff] }
 0x4cc   :  { %14882 = vst [vmem:[#allocation158_spill] sm:$0xff] %v12476_v57  ;;  %v12478_v31 = vpop.f32.mrb[203].mxu1  ;;  %v14893_v58 = vpack.c.bf16 %v14891_v28, %v14892_v2  ;;  %v14905_v2 = vld [vmem:[#allocation108_spill] sm:$0xff] }
 0x4cd   :  { %14883 = vst [vmem:[#allocation159_spill] sm:$0xff] %v12478_v31 }
 0x4ce   :  { %5015 = vmatmul.mubr.bf16.gmra.mrb[120].mxu0 %v14886_v23 }
 0x4cf   :  { %5024 = vmatprep.mubr.bf16.mxu0 %v14530_v50 }
 0x4d1   :  { %v12484_v60 = vpop.f32.mrb[204].mxu1 }
 0x4d2   :  { %14887 = vst [vmem:[#allocation97_spill] sm:$0xff] %v12484_v60  ;;  %v12486_v51 = vpop.f32.mrb[205].mxu1  ;;  %v14898_v60 = vld [vmem:[#allocation103_spill] sm:$0xff] }
 0x4d3   :  { %14888 = vst [vmem:[#allocation96_spill] sm:$0xff] %v12486_v51  ;;  %v12488_v22 = vpop.f32.mrb[206].mxu1  ;;  %v14899_v51 = vld [vmem:[#allocation102_spill] sm:$0xff] }
 0x4d4   :  { %14889 = vst [vmem:[#allocation160_spill] sm:$0xff] %v12488_v22  ;;  %v12490_v30 = vpop.f32.mrb[207].mxu1  ;;  %v14900_v57 = vpack.c.bf16 %v14898_v60, %v14899_v51  ;;  %v14902_v22 = vld [vmem:[#allocation105_spill] sm:$0xff]  ;;  %v14910_v60 = vld [vmem:[#allocation115_spill] sm:$0xff] }
 0x4d5   :  { %14890 = vst [vmem:[#allocation161_spill] sm:$0xff] %v12490_v30  ;;  %v14901_v30 = vld [vmem:[#allocation106_spill] sm:$0xff] }
 0x4d6   :  { %5025 = vmatmul.mubr.bf16.gmra.mrb[124].mxu0 %v14893_v58  ;;  %v14903_v28 = vpack.c.bf16 %v14901_v30, %v14902_v22  ;;  %v14904_v58 = vld [vmem:[#allocation109_spill] sm:$0xff]  ;;  %v14913_v22 = vld [vmem:[#allocation118_spill] sm:$0xff] }
 0x4d7   :  { %5034 = vmatprep.mubr.bf16.mxu0 %v14530_v50  ;;  %v14914_v30 = vld [vmem:[#allocation117_spill] sm:$0xff] }
 0x4d9   :  { %v12496_v31 = vpop.f32.mrb[208].mxu1 }
 0x4da   :  { %14894 = vst [vmem:[#allocation100_spill] sm:$0xff] %v12496_v31  ;;  %v12498_v42 = vpop.f32.mrb[209].mxu1  ;;  %v14906_v31 = vpack.c.bf16 %v14904_v58, %v14905_v2  ;;  %v14917_v58 = vld [vmem:[#allocation120_spill] sm:$0xff] }
 0x4db   :  { %14895 = vst [vmem:[#allocation99_spill] sm:$0xff] %v12498_v42  ;;  %v12500_v39 = vpop.f32.mrb[210].mxu1 }
 0x4dc   :  { %14896 = vst [vmem:[#allocation162_spill] sm:$0xff] %v12500_v39  ;;  %v12502_v23 = vpop.f32.mrb[211].mxu1  ;;  %v14907_v39 = vld [vmem:[#allocation112_spill] sm:$0xff] }
 0x4dd   :  { %14897 = vst [vmem:[#allocation163_spill] sm:$0xff] %v12502_v23  ;;  %v14908_v23 = vld [vmem:[#allocation111_spill] sm:$0xff] }
 0x4de   :  { %5035 = vmatmul.mubr.bf16.gmra.mrb[128].mxu0 %v14900_v57  ;;  %v14909_v42 = vpack.c.bf16 %v14907_v39, %v14908_v23  ;;  %v14911_v57 = vld [vmem:[#allocation114_spill] sm:$0xff]  ;;  %v14920_v39 = vld [vmem:[#allocation123_spill] sm:$0xff] }
 0x4df   :  { %5044 = vmatprep.mubr.bf16.mxu0 %v14530_v50  ;;  %v14912_v51 = vpack.c.bf16 %v14910_v60, %v14911_v57  ;;  %v7920_v60 = vld [vmem:[%s13226_s7] sm:$0xff]   ;;  %v14922_v57 = vld [vmem:[#allocation127_spill] sm:$0xff] }
 0x4e0   :  { %6266 = vmatpush1.bf16.msra.mxu1 %v7920_v60 }
 0x4e1   :  { %6267 = vmatprep.subr.bf16.mxu1 %v14530_v50 }
 0x4e6   :  { %5045 = vmatmul.mubr.bf16.gmra.mrb[132].mxu0 %v14903_v28  ;;  %v14915_v28 = vpack.c.bf16 %v14913_v22, %v14914_v30  ;;  %v7921_v30 = vld [vmem:[%s13226_s7 + $0x8] sm:$0xff]  }
 0x4e7   :  { %5054 = vmatprep.mubr.bf16.mxu0 %v14530_v50  ;;  %6268 = vmatpush1.bf16.msra.mxu1 %v7921_v30 }
 0x4e8   :  { %6269 = vmatprep.subr.bf16.mxu1 %v14530_v50 }
 0x4ee   :  { %5055 = vmatmul.mubr.bf16.gmra.mrb[136].mxu0 %v14906_v31  ;;  %v14916_v31 = vld [vmem:[#allocation121_spill] sm:$0xff] }
 0x4ef   :  { %5064 = vmatprep.mubr.bf16.mxu0 %v14530_v50  ;;  %v14918_v2 = vpack.c.bf16 %v14916_v31, %v14917_v58  ;;  %v14926_v31 = vld [vmem:[#allocation129_spill] sm:$0xff] }
 0x4f6   :  { %5065 = vmatmul.mubr.bf16.gmra.mrb[140].mxu0 %v14909_v42  ;;  %v14919_v42 = vld [vmem:[#allocation124_spill] sm:$0xff] }
 0x4f7   :  { %5074 = vmatprep.mubr.bf16.mxu0 %v14530_v50  ;;  %v14921_v23 = vpack.c.bf16 %v14919_v42, %v14920_v39  ;;  %v14928_v42 = vld [vmem:[#allocation132_spill] sm:$0xff] }
 0x4f8   :  { %v14929_v39 = vpack.c.bf16 %v11918_v14, %v14928_v42  ;;  %v7924_v14 = vld [vmem:[%s13226_s7 + $0x20] sm:$0xff]   ;;  %v14942_v42 = vld [vmem:[#allocation29_spill] sm:$0xff] }
 0x4fe   :  { %5075 = vmatmul.mubr.bf16.gmra.mrb[144].mxu0 %v14912_v51  ;;  %v14923_v51 = vld [vmem:[#allocation126_spill] sm:$0xff] }
 0x4ff   :  { %5084 = vmatprep.mubr.bf16.mxu0 %v14530_v50  ;;  %v14924_v22 = vpack.c.bf16 %v14922_v57, %v14923_v51  ;;  %v7923_v57 = vld [vmem:[%s13226_s7 + $0x18] sm:$0xff]   ;;  %v14932_v51 = vld [vmem:[#allocation138_spill] sm:$0xff] }
 0x506   :  { %5085 = vmatmul.mubr.bf16.gmra.mrb[148].mxu0 %v14915_v28  ;;  %v14925_v28 = vld [vmem:[#allocation130_spill] sm:$0xff] }
 0x507   :  { %5094 = vmatprep.mubr.bf16.mxu0 %v14530_v50  ;;  %v14927_v58 = vpack.c.bf16 %v14925_v28, %v14926_v31  ;;  %v7925_v28 = vld [vmem:[%s13226_s7 + $0x28] sm:$0xff]  }
 0x50e   :  { %5095 = vmatmul.mubr.bf16.gmra.mrb[152].mxu0 %v14918_v2  ;;  %v7922_v2 = vld [vmem:[%s13226_s7 + $0x10] sm:$0xff]  }
 0x50f   :  { %5104 = vmatprep.mubr.bf16.mxu0 %v14530_v50  ;;  %6270 = vmatpush1.bf16.msra.mxu1 %v7922_v2  ;;  %v14939_v2 = vld [vmem:[#allocation2_spill] sm:$0xff] }
 0x510   :  { %6271 = vmatprep.subr.bf16.mxu1 %v14530_v50  ;;  %vm14940_vm2 = vnez %v14939_v2  ;;  %v14959_v2 = vld [vmem:[#allocation6_spill] sm:$0xff] }
 0x511   :  { %vm7309_vm13 = vmneg %vm14940_vm2  ;;  %vm14960_vm4 = vnez %v14959_v2  ;;  %v14979_v2 = vld [vmem:[#allocation13_spill] sm:$0xff] }
 0x512   :  { %vm7310_vm12 = vmpackc.low %vm7309_vm13, %vm7943_vm6 }
 0x513   :  { %6272 = vmatpush1.bf16.msra.mxu1 %v7923_v57  ;;  %vm7325_vm3 = vmneg %vm14960_vm4 }
 0x514   :  { %6273 = vmatprep.subr.bf16.mxu1 %v14530_v50  ;;  %vm7326_vm15 = vmpackc.low %vm7325_vm3, %vm7943_vm6 }
 0x516   :  { %5105 = vmatmul.mubr.bf16.gmra.mrb[156].mxu0 %v14921_v23  ;;  %v14930_v23 = vld [vmem:[#allocation135_spill] sm:$0xff] }
 0x517   :  { %5114 = vmatprep.mubr.bf16.mxu0 %v14530_v50  ;;  %v14931_v60 = vpack.c.bf16 %v11948_v32, %v14930_v23  ;;  %6274 = vmatpush1.bf16.msra.mxu1 %v7924_v14  ;;  %v14934_v32 = vld [vmem:[#allocation141_spill] sm:$0xff]  ;;  %v14951_v14 = vld [vmem:[#allocation34_spill] sm:$0xff] }
 0x518   :  { %6275 = vmatprep.subr.bf16.mxu1 %v14530_v50  ;;  %v14935_v30 = vpack.c.bf16 %v12008_v62, %v14934_v32  ;;  %v7926_v62 = vld [vmem:[%s13226_s7 + $0x30] sm:$0xff]   ;;  %v7927_v23 = vld [vmem:[%s13226_s7 + $0x38] sm:$0xff]   ;;  %v14952_v32 = vld [vmem:[#allocation35_spill] sm:$0xff] }
 0x51b   :  { %6276 = vmatpush1.bf16.msra.mxu1 %v7925_v28  ;;  %v7929_v28 = vld [vmem:[%s13226_s7 + $0x48] sm:$0xff]  }
 0x51c   :  { %6277 = vmatprep.subr.bf16.mxu1 %v14530_v50 }
 0x51e   :  { %5115 = vmatmul.mubr.bf16.gmra.mrb[160].mxu0 %v14924_v22  ;;  %v14933_v22 = vpack.c.bf16 %v11978_v29, %v14932_v51  ;;  %v14936_v29 = vld [vmem:[#allocation143_spill] sm:$0xff]  ;;  %v7928_v51 = vld [vmem:[%s13226_s7 + $0x40] sm:$0xff]  }
 0x51f   :  { %5124 = vmatprep.mubr.bf16.mxu0 %v14530_v50  ;;  %v14937_v31 = vpack.c.bf16 %v12038_v33, %v14936_v29  ;;  %6278 = vmatpush1.bf16.msra.mxu1 %v7926_v62  ;;  %v14941_v33 = vld [vmem:[#allocation28_spill] sm:$0xff]  ;;  %v14954_v29 = vld [vmem:[#allocation5_spill] sm:$0xff]  ;;  %v14957_v62 = vld [vmem:[#allocation38_spill] sm:$0xff] }
 0x520   :  { %6279 = vmatprep.subr.bf16.mxu1 %v14530_v50  ;;  %vm14955_vm10 = vnez %v14954_v29  ;;  %v14974_v29 = vld [vmem:[#allocation12_spill] sm:$0xff] }
 0x521   :  { %vm7321_vm0 = vmneg %vm14955_vm10  ;;  %vm14980_vm10 = vnez %v14979_v2  ;;  %v7935_v2 = vld [vmem:[%s13226_s7 + $0x78] sm:$0xff]  }
 0x522   :  { %vm7322_vm1 = vmpackc.low %vm7321_vm0, %vm7943_vm6 }
 0x523   :  { %6280 = vmatpush1.bf16.msra.mxu1 %v7927_v23  ;;  %v7930_v23 = vld [vmem:[%s13226_s7 + $0x50] sm:$0xff]   ;;  %vm7341_vm0 = vmneg %vm14980_vm10 }
 0x524   :  { %6281 = vmatprep.subr.bf16.mxu1 %v14530_v50 }
 0x526   :  { %5125 = vmatmul.mubr.bf16.gmra.mrb[164].mxu0 %v14927_v58  ;;  %v14938_v58 = vpack.c.bf16 %v12068_v45, %v12063_v17  ;;  %v14946_v45 = vld [vmem:[#allocation33_spill] sm:$0xff]  ;;  %v14947_v17 = vld [vmem:[#allocation31_spill] sm:$0xff] }
 0x527   :  { %5134 = vmatprep.mubr.bf16.mxu0 %v14530_v50  ;;  %v14948_v57 = vpack.c.bf16 %v14946_v45, %v14947_v17  ;;  %6282 = vmatpush1.bf16.msra.mxu1 %v7928_v51  ;;  %v14966_v45 = vld [vmem:[#allocation71_spill] sm:$0xff]  ;;  %v14967_v17 = vld [vmem:[#allocation70_spill] sm:$0xff]  ;;  %v7931_v51 = vld [vmem:[%s13226_s7 + $0x58] sm:$0xff]  }
 0x528   :  { %6283 = vmatprep.subr.bf16.mxu1 %v14530_v50 }
 0x52b   :  { %6284 = vmatpush1.bf16.msra.mxu1 %v7929_v28  ;;  %v7932_v28 = vld [vmem:[%s13226_s7 + $0x60] sm:$0xff]  }
 0x52c   :  { %6285 = vmatprep.subr.bf16.mxu1 %v14530_v50 }
 0x52e   :  { %5135 = vmatmul.mubr.bf16.gmra.mrb[168].mxu0 %v14929_v39  ;;  %v14943_v39 = vpack.c.bf16 %v14941_v33, %v14942_v42  ;;  %v14961_v33 = vld [vmem:[#allocation43_spill] sm:$0xff] }
 0x52f   :  { %5144 = vmatprep.mubr.bf16.mxu0 %v14530_v50  ;;  %v14962_v42 = vld [vmem:[#allocation39_spill] sm:$0xff]  ;;  %6286 = vmatpush1.bf16.msra.mxu1 %v7930_v23 }
 0x530   :  { %6287 = vmatprep.subr.bf16.mxu1 %v14530_v50  ;;  %v7933_v23 = vld [vmem:[%s13226_s7 + $0x68] sm:$0xff]  }
 0x533   :  { %6288 = vmatpush1.bf16.msra.mxu1 %v7931_v51  ;;  %v7934_v51 = vld [vmem:[%s13226_s7 + $0x70] sm:$0xff]  }
 0x534   :  { %6289 = vmatprep.subr.bf16.mxu1 %v14530_v50 }
 0x536   :  { %5145 = vmatmul.mubr.bf16.gmra.mrb[172].mxu0 %v14931_v60  ;;  %v14944_v60 = vld [vmem:[#allocation3_spill] sm:$0xff] }
 0x537   :  { %5154 = vmatprep.mubr.bf16.mxu0 %v14530_v50  ;;  %vm14945_vm8 = vnez %v14944_v60  ;;  %v14964_v60 = vld [vmem:[#allocation7_spill] sm:$0xff]  ;;  %6290 = vmatpush1.bf16.msra.mxu1 %v7932_v28  ;;  %v14994_v28 = vld [vmem:[#allocation24_spill] sm:$0xff] }
 0x538   :  { %vm7313_vm14 = vmneg %vm14945_vm8  ;;  %vm14965_vm2 = vnez %v14964_v60  ;;  %6291 = vmatprep.subr.bf16.mxu1 %v14530_v50  ;;  %v14984_v60 = vld [vmem:[#allocation18_spill] sm:$0xff] }
 0x539   :  { %vm7314_vm11 = vmpackc.low %vm7313_vm14, %vm7943_vm6  ;;  %vm14985_vm4 = vnez %v14984_v60  ;;  %v15006_v60 = vld [vmem:[#allocation16_spill] sm:$0xff] }
 0x53a   :  { %vm7329_vm13 = vmneg %vm14965_vm2 }
 0x53b   :  { %vm7345_vm3 = vmneg %vm14985_vm4  ;;  %6292 = vmatpush1.bf16.msra.mxu1 %v7933_v23  ;;  %v15004_v23 = vld [vmem:[#allocation30_spill] sm:$0xff] }
 0x53c   :  { %6293 = vmatprep.subr.bf16.mxu1 %v14530_v50  ;;  %vm15005_vm10 = vnez %v15004_v23 }
 0x53e   :  { %5155 = vmatmul.mubr.bf16.gmra.mrb[176].mxu0 %v14933_v22  ;;  %v14949_v22 = vld [vmem:[#allocation4_spill] sm:$0xff] }
 0x53f   :  { %5164 = vmatprep.mubr.bf16.mxu0 %v14530_v50  ;;  %vm14950_vm7 = vnez %v14949_v22  ;;  %v14969_v22 = vld [vmem:[#allocation9_spill] sm:$0xff]  ;;  %6294 = vmatpush1.bf16.msra.mxu1 %v7934_v51  ;;  %v15011_v51 = vld [vmem:[#allocation15_spill] sm:$0xff] }
 0x540   :  { %vm7317_vm9 = vmneg %vm14950_vm7  ;;  %vm14970_vm8 = vnez %v14969_v22  ;;  %vm14975_vm7 = vnez %v14974_v29  ;;  %v14989_v22 = vld [vmem:[#allocation20_spill] sm:$0xff]  ;;  %6295 = vmatprep.subr.bf16.mxu1 %v14530_v50  ;;  %v14996_v29 = vld [vmem:[#allocation14_spill] sm:$0xff] }
 0x541   :  { %vm7318_vm5 = vmpackc.low %vm7317_vm9, %vm7943_vm6  ;;  %vm14990_vm2 = vnez %v14989_v22  ;;  %v15012_v22 = vld [vmem:[#allocation98_spill] sm:$0xff] }
 0x542   :  { %vm7333_vm14 = vmneg %vm14970_vm8  ;;  %vm14995_vm8 = vnez %v14994_v28  ;;  %v15017_v28 = vld [vmem:[#allocation101_spill] sm:$0xff] }
 0x543   :  { %vm7337_vm9 = vmneg %vm14975_vm7  ;;  %6296 = vmatpush1.bf16.msra.mxu1 %v7935_v2 }
 0x546   :  { %5165 = vmatmul.mubr.bf16.gmra.mrb[180].mxu0 %v14935_v30  ;;  %v14953_v30 = vpack.c.bf16 %v14951_v14, %v14952_v32  ;;  %v14971_v14 = vld [vmem:[#allocation73_spill] sm:$0xff]  ;;  %v14972_v32 = vld [vmem:[#allocation72_spill] sm:$0xff] }
 0x547   :  { %5174 = vmatprep.mubr.bf16.mxu0 %v14530_v50 }
 0x54e   :  { %5175 = vmatmul.mubr.bf16.gmra.mrb[184].mxu0 %v14937_v31  ;;  %v14956_v31 = vld [vmem:[#allocation40_spill] sm:$0xff] }
 0x54f   :  { %5184 = vmatprep.mubr.bf16.mxu0 %v14530_v50 }
 0x556   :  { %5185 = vmatmul.mubr.bf16.gmra.mrb[188].mxu0 %v14938_v58  ;;  %v14958_v58 = vpack.c.bf16 %v14956_v31, %v14957_v62  ;;  %v14976_v31 = vld [vmem:[#allocation77_spill] sm:$0xff]  ;;  %v14977_v62 = vld [vmem:[#allocation74_spill] sm:$0xff] }
 0x557   :  { %5356 = vmatprep.mubr.bf16.mxu0 %v14530_v50 }
 0x55e   :  { %7312 = vmatmul.mubr.msk.bf16.vlgmr.msra.gmra.mrb[64].mxu0 %vm7310_vm12, %v14943_v39  ;;  %v14963_v39 = vpack.c.bf16 %v14961_v33, %v14962_v42  ;;  %vm7330_vm12 = vmpackc.low %vm7329_vm13, %vm7943_vm6  ;;  %v14981_v33 = vld [vmem:[#allocation81_spill] sm:$0xff]  ;;  %v14982_v42 = vld [vmem:[#allocation78_spill] sm:$0xff] }
 0x55f   :  { %5366 = vmatprep.mubr.bf16.mxu0 %v14530_v50  ;;  %vm7349_vm13 = vmneg %vm14990_vm2 }
 0x566   :  { %7316 = vmatmul.mubr.msk.bf16.gmra.mrb[68].mxu0 %vm7314_vm11, %v14948_v57  ;;  %v14968_v57 = vpack.c.bf16 %v14966_v45, %v14967_v17  ;;  %vm7334_vm11 = vmpackc.low %vm7333_vm14, %vm7943_vm6  ;;  %v14986_v45 = vld [vmem:[#allocation85_spill] sm:$0xff]  ;;  %v14987_v17 = vld [vmem:[#allocation82_spill] sm:$0xff] }
 0x567   :  { %5376 = vmatprep.mubr.bf16.mxu0 %v14530_v50  ;;  %vm7353_vm14 = vmneg %vm14995_vm8 }
 0x56e   :  { %7320 = vmatmul.mubr.msk.bf16.gmra.mrb[72].mxu0 %vm7318_vm5, %v14953_v30  ;;  %v14973_v30 = vpack.c.bf16 %v14971_v14, %v14972_v32  ;;  %vm7338_vm5 = vmpackc.low %vm7337_vm9, %vm7943_vm6  ;;  %v14991_v14 = vld [vmem:[#allocation8_spill] sm:$0xff]  ;;  %v14992_v32 = vld [vmem:[#allocation86_spill] sm:$0xff] }
 0x56f   :  { %5386 = vmatprep.mubr.bf16.mxu0 %v14530_v50 }
 0x576   :  { %7324 = vmatmul.mubr.msk.bf16.gmra.mrb[76].mxu0 %vm7322_vm1, %v14958_v58  ;;  %v14978_v58 = vpack.c.bf16 %v14976_v31, %v14977_v62  ;;  %vm7342_vm1 = vmpackc.low %vm7341_vm0, %vm7943_vm6  ;;  %v14997_v31 = vld [vmem:[#allocation89_spill] sm:$0xff] }
 0x577   :  { %5396 = vmatprep.mubr.bf16.mxu0 %v14530_v50  ;;  %v14998_v62 = vpack.c.bf16 %v14996_v29, %v14997_v31  ;;  %vm7361_vm0 = vmneg %vm15005_vm10  ;;  %v15019_v31 = vld [vmem:[#allocation37_spill] sm:$0xff] }
 0x578   :  { %vm15020_vm8 = vnez %v15019_v31 }
 0x57e   :  { %7328 = vmatmul.mubr.msk.bf16.gmra.mrb[80].mxu0 %vm7326_vm15, %v14963_v39  ;;  %v14983_v39 = vpack.c.bf16 %v14981_v33, %v14982_v42  ;;  %vm7346_vm15 = vmpackc.low %vm7345_vm3, %vm7943_vm6  ;;  %v15001_v33 = vld [vmem:[#allocation17_spill] sm:$0xff]  ;;  %v15002_v42 = vld [vmem:[#allocation92_spill] sm:$0xff] }
 0x57f   :  { %5406 = vmatprep.mubr.bf16.mxu0 %v14530_v50 }
 0x586   :  { %7332 = vmatmul.mubr.msk.bf16.gmra.mrb[84].mxu0 %vm7330_vm12, %v14968_v57  ;;  %v14988_v57 = vpack.c.bf16 %v14986_v45, %v14987_v17  ;;  %vm7350_vm12 = vmpackc.low %vm7349_vm13, %vm7943_vm6  ;;  %v15007_v45 = vld [vmem:[#allocation95_spill] sm:$0xff] }
 0x587   :  { %5416 = vmatprep.mubr.bf16.mxu0 %v14530_v50  ;;  %v15008_v17 = vpack.c.bf16 %v15006_v60, %v15007_v45  ;;  %v15029_v60 = vld [vmem:[#allocation42_spill] sm:$0xff] }
 0x588   :  { %vm15030_vm10 = vnez %v15029_v60  ;;  %v15031_v45 = vld [vmem:[#allocation50_spill] sm:$0xff] }
 0x58e   :  { %7336 = vmatmul.mubr.msk.bf16.gmra.mrb[88].mxu0 %vm7334_vm11, %v14973_v30  ;;  %v14993_v30 = vpack.c.bf16 %v14991_v14, %v14992_v32  ;;  %vm7354_vm11 = vmpackc.low %vm7353_vm14, %vm7943_vm6  ;;  %v15013_v14 = vpack.c.bf16 %v15011_v51, %v15012_v22  ;;  %v15014_v32 = vld [vmem:[#allocation36_spill] sm:$0xff]  ;;  %v15036_v22 = vld [vmem:[#allocation19_spill] sm:$0xff] }
 0x58f   :  { %5426 = vmatprep.mubr.bf16.mxu0 %v14530_v50  ;;  %vm15015_vm2 = vnez %v15014_v32  ;;  %vm7373_vm14 = vmneg %vm15020_vm8  ;;  %v15034_v51 = vld [vmem:[#allocation44_spill] sm:$0xff] }
 0x590   :  { %vm7369_vm13 = vmneg %vm15015_vm2 }
 0x596   :  { %7340 = vmatmul.mubr.msk.bf16.gmra.mrb[92].mxu0 %vm7338_vm5, %v14978_v58  ;;  %v14999_v58 = vld [vmem:[#allocation26_spill] sm:$0xff] }
 0x597   :  { %5436 = vmatprep.mubr.bf16.mxu0 %v14530_v50  ;;  %vm15000_vm7 = vnez %v14999_v58  ;;  %v15022_v58 = vld [vmem:[#allocation104_spill] sm:$0xff] }
 0x598   :  { %vm7357_vm9 = vmneg %vm15000_vm7 }
 0x599   :  { %vm7358_vm5 = vmpackc.low %vm7357_vm9, %vm7943_vm6 }
 0x59e   :  { %7344 = vmatmul.mubr.msk.bf16.gmra.mrb[96].mxu0 %vm7342_vm1, %v14983_v39  ;;  %v15003_v39 = vpack.c.bf16 %v15001_v33, %v15002_v42  ;;  %vm7362_vm1 = vmpackc.low %vm7361_vm0, %vm7943_vm6  ;;  %v15024_v33 = vld [vmem:[#allocation41_spill] sm:$0xff]  ;;  %v15026_v42 = vld [vmem:[#allocation51_spill] sm:$0xff] }
 0x59f   :  { %5446 = vmatprep.mubr.bf16.mxu0 %v14530_v50  ;;  %vm15025_vm7 = vnez %v15024_v33  ;;  %vm7381_vm0 = vmneg %vm15030_vm10 }
 0x5a0   :  { %vm7377_vm9 = vmneg %vm15025_vm7 }
 0x5a6   :  { %7348 = vmatmul.mubr.msk.bf16.gmra.mrb[100].mxu0 %vm7346_vm15, %v14988_v57  ;;  %v15009_v57 = vld [vmem:[#allocation32_spill] sm:$0xff] }
 0x5a7   :  { %5456 = vmatprep.mubr.bf16.mxu0 %v14530_v50  ;;  %vm15010_vm4 = vnez %v15009_v57 }
 0x5a8   :  { %vm7365_vm3 = vmneg %vm15010_vm4  ;;  %vm15035_vm4 = vnez %v15034_v51 }
 0x5a9   :  { %vm7366_vm15 = vmpackc.low %vm7365_vm3, %vm7943_vm6 }
 0x5aa   :  { %vm7385_vm3 = vmneg %vm15035_vm4 }
 0x5ae   :  { %7352 = vmatmul.mubr.msk.bf16.gmra.mrb[104].mxu0 %vm7350_vm12, %v14993_v30  ;;  %vm7370_vm12 = vmpackc.low %vm7369_vm13, %vm7943_vm6  ;;  %v15016_v30 = vld [vmem:[#allocation53_spill] sm:$0xff] }
 0x5af   :  { %5466 = vmatprep.mubr.bf16.mxu0 %v14530_v50  ;;  %v15018_v29 = vpack.c.bf16 %v15016_v30, %v15017_v28  ;;  %v15039_v30 = vld [vmem:[#allocation45_spill] sm:$0xff]  ;;  %v15041_v28 = vld [vmem:[#allocation23_spill] sm:$0xff] }
 0x5b0   :  { %vm15040_vm2 = vnez %v15039_v30 }
 0x5b1   :  { %vm7389_vm13 = vmneg %vm15040_vm2 }
 0x5b6   :  { %7356 = vmatmul.mubr.msk.bf16.gmra.mrb[108].mxu0 %vm7354_vm11, %v14998_v62  ;;  %vm7374_vm11 = vmpackc.low %vm7373_vm14, %vm7943_vm6  ;;  %v15021_v62 = vld [vmem:[#allocation52_spill] sm:$0xff] }
 0x5b7   :  { %5476 = vmatprep.mubr.bf16.mxu0 %v14530_v50  ;;  %v15023_v2 = vpack.c.bf16 %v15021_v62, %v15022_v58  ;;  %v15044_v62 = vld [vmem:[#allocation46_spill] sm:$0xff] }
 0x5b8   :  { %vm15045_vm8 = vnez %v15044_v62  ;;  %v15046_v58 = vld [vmem:[#allocation22_spill] sm:$0xff] }
 0x5b9   :  { %vm7393_vm14 = vmneg %vm15045_vm8 }
 0x5be   :  { %7360 = vmatmul.mubr.msk.bf16.gmra.mrb[112].mxu0 %vm7358_vm5, %v15003_v39  ;;  %vm7378_vm5 = vmpackc.low %vm7377_vm9, %vm7943_vm6  ;;  %v15027_v39 = vld [vmem:[#allocation107_spill] sm:$0xff] }
 0x5bf   :  { %5486 = vmatprep.mubr.bf16.mxu0 %v14530_v50  ;;  %v15028_v23 = vpack.c.bf16 %v15026_v42, %v15027_v39  ;;  %v15049_v42 = vld [vmem:[#allocation47_spill] sm:$0xff]  ;;  %v15051_v39 = vld [vmem:[#allocation21_spill] sm:$0xff] }
 0x5c0   :  { %vm15050_vm7 = vnez %v15049_v42  ;;  %v5813_v42 = vsub.s32 1, %v8036_v16 }
 0x5c1   :  { %vm7397_vm9 = vmneg %vm15050_vm7 }
 0x5c6   :  { %7364 = vmatmul.mubr.msk.bf16.gmra.mrb[116].mxu0 %vm7362_vm1, %v15008_v17  ;;  %vm7382_vm1 = vmpackc.low %vm7381_vm0, %vm7943_vm6  ;;  %v15032_v17 = vld [vmem:[#allocation110_spill] sm:$0xff] }
 0x5c7   :  { %5496 = vmatprep.mubr.bf16.mxu0 %v14530_v50  ;;  %v15033_v57 = vpack.c.bf16 %v15031_v45, %v15032_v17  ;;  %v15054_v45 = vld [vmem:[#allocation48_spill] sm:$0xff]  ;;  %v15056_v17 = vld [vmem:[#allocation25_spill] sm:$0xff] }
 0x5c8   :  { %vm15055_vm10 = vnez %v15054_v45 }
 0x5c9   :  { %vm7401_vm0 = vmneg %vm15055_vm10 }
 0x5ce   :  { %7368 = vmatmul.mubr.msk.bf16.gmra.mrb[120].mxu0 %vm7366_vm15, %v15013_v14  ;;  %vm7386_vm15 = vmpackc.low %vm7385_vm3, %vm7943_vm6  ;;  %v15037_v14 = vld [vmem:[#allocation113_spill] sm:$0xff] }
 0x5cf   :  { %5506 = vmatprep.mubr.bf16.mxu0 %v14530_v50  ;;  %v15038_v32 = vpack.c.bf16 %v15036_v22, %v15037_v14  ;;  %v15059_v22 = vld [vmem:[#allocation49_spill] sm:$0xff]  ;;  %v15061_v14 = vld [vmem:[#allocation27_spill] sm:$0xff] }
 0x5d0   :  { %vm15060_vm4 = vnez %v15059_v22 }
 0x5d1   :  { %vm7405_vm3 = vmneg %vm15060_vm4 }
 0x5d6   :  { %7372 = vmatmul.mubr.msk.bf16.gmra.mrb[124].mxu0 %vm7370_vm12, %v15018_v29  ;;  %vm7390_vm12 = vmpackc.low %vm7389_vm13, %vm7943_vm6  ;;  %v15042_v29 = vld [vmem:[#allocation116_spill] sm:$0xff] }
 0x5d7   :  { %5516 = vmatprep.mubr.bf16.mxu0 %v14530_v50  ;;  %v15043_v31 = vpack.c.bf16 %v15041_v28, %v15042_v29  ;;  %v15064_v28 = vld [vmem:[#allocation54_spill] sm:$0xff]  ;;  %v15066_v29 = vld [vmem:[#allocation133_spill] sm:$0xff] }
 0x5d8   :  { %vm15065_vm2 = vnez %v15064_v28 }
 0x5d9   :  { %vm7409_vm13 = vmneg %vm15065_vm2 }
 0x5de   :  { %7376 = vmatmul.mubr.msk.bf16.gmra.mrb[128].mxu0 %vm7374_vm11, %v15023_v2  ;;  %vm7394_vm11 = vmpackc.low %vm7393_vm14, %vm7943_vm6  ;;  %v15047_v2 = vld [vmem:[#allocation119_spill] sm:$0xff] }
 0x5df   :  { %5526 = vmatprep.mubr.bf16.mxu0 %v14530_v50  ;;  %v15048_v33 = vpack.c.bf16 %v15046_v58, %v15047_v2  ;;  %v15069_v58 = vld [vmem:[#allocation55_spill] sm:$0xff]  ;;  %v5809_v2 = vsub.s32 0, %v8036_v16 }
 0x5e0   :  { %vm15070_vm8 = vnez %v15069_v58  ;;  %v15076_v58 = vld [vmem:[#allocation139_spill] sm:$0xff] }
 0x5e1   :  { %vm7413_vm14 = vmneg %vm15070_vm8 }
 0x5e6   :  { %7380 = vmatmul.mubr.msk.bf16.gmra.mrb[132].mxu0 %vm7378_vm5, %v15028_v23  ;;  %vm7398_vm5 = vmpackc.low %vm7397_vm9, %vm7943_vm6  ;;  %v15052_v23 = vld [vmem:[#allocation122_spill] sm:$0xff] }
 0x5e7   :  { %5536 = vmatprep.mubr.bf16.mxu0 %v14530_v50  ;;  %v15053_v60 = vpack.c.bf16 %v15051_v39, %v15052_v23  ;;  %v15071_v39 = vld [vmem:[#allocation136_spill] sm:$0xff]  ;;  %v15072_v23 = vld [vmem:[#allocation134_spill] sm:$0xff] }
 0x5ee   :  { %7384 = vmatmul.mubr.msk.bf16.gmra.mrb[136].mxu0 %vm7382_vm1, %v15033_v57  ;;  %vm7402_vm1 = vmpackc.low %vm7401_vm0, %vm7943_vm6  ;;  %v15057_v57 = vld [vmem:[#allocation125_spill] sm:$0xff] }
 0x5ef   :  { %5546 = vmatprep.mubr.bf16.mxu0 %v14530_v50  ;;  %v15058_v51 = vpack.c.bf16 %v15056_v17, %v15057_v57  ;;  %v15074_v57 = vld [vmem:[#allocation57_spill] sm:$0xff] }
 0x5f0   :  { %vm15075_vm7 = vnez %v15074_v57 }
 0x5f1   :  { %vm7417_vm9 = vmneg %vm15075_vm7  ;;  %vm6947_vm7 = vcmask 1041409  }
 0x5f6   :  { %7388 = vmatmul.mubr.msk.bf16.gmra.mrb[140].mxu0 %vm7386_vm15, %v15038_v32  ;;  %vm7406_vm15 = vmpackc.low %vm7405_vm3, %vm7943_vm6  ;;  %v15062_v32 = vld [vmem:[#allocation128_spill] sm:$0xff] }
 0x5f7   :  { %5556 = vmatprep.mubr.bf16.mxu0 %v14530_v50  ;;  %v15063_v30 = vpack.c.bf16 %v15061_v14, %v15062_v32 }
 0x5fe   :  { %7392 = vmatmul.mubr.msk.bf16.gmra.mrb[144].mxu0 %vm7390_vm12, %v15043_v31  ;;  %vm7410_vm12 = vmpackc.low %vm7409_vm13, %vm7943_vm6  ;;  %v15067_v31 = vld [vmem:[#allocation131_spill] sm:$0xff] }
 0x5ff   :  { %5566 = vmatprep.mubr.bf16.mxu0 %v14530_v50  ;;  %v15068_v62 = vpack.c.bf16 %v15066_v29, %v15067_v31 }
 0x606   :  { %7396 = vmatmul.mubr.msk.bf16.gmra.mrb[148].mxu0 %vm7394_vm11, %v15048_v33  ;;  %vm7414_vm11 = vmpackc.low %vm7413_vm14, %vm7943_vm6  ;;  %v5805_v33 = vld [vmem:[%s13227_s6] sm:$0x3] }
 0x607   :  { %5576 = vmatprep.mubr.bf16.mxu0 %v14530_v50  ;;  %v12824_v45 = vrot.slane %v5805_v33, %v5809_v2  ;;  %v12826_v17 = vrot.slane %v5805_v33, %v5813_v42  ;;  %v15077_v2 = vld [vmem:[#allocation137_spill] sm:$0xff] }
 0x608   :  { %v15078_v33 = vpack.c.bf16 %v15076_v58, %v15077_v2  ;;  %v15081_v58 = vld [vmem:[#allocation142_spill] sm:$0xff]  ;;  %v15082_v2 = vld [vmem:[#allocation140_spill] sm:$0xff] }
 0x60e   :  { %7400 = vmatmul.mubr.msk.bf16.gmra.mrb[152].mxu0 %vm7398_vm5, %v15053_v60  ;;  %v15073_v60 = vpack.c.bf16 %v15071_v39, %v15072_v23  ;;  %vm7418_vm5 = vmpackc.low %vm7417_vm9, %vm7943_vm6  ;;  %vm6950_vm9 = vcmask 1042434  }
 0x60f   :  { %5586 = vmatprep.mubr.bf16.mxu0 %v14530_v50 }
 0x616   :  { %7404 = vmatmul.mubr.msk.bf16.gmra.mrb[156].mxu0 %vm7402_vm1, %v15058_v51 }
 0x617   :  { %5596 = vmatprep.mubr.bf16.mxu0 %v14530_v50 }
 0x61e   :  { %7408 = vmatmul.mubr.msk.bf16.gmra.mrb[160].mxu0 %vm7406_vm15, %v15063_v30 }
 0x61f   :  { %5606 = vmatprep.mubr.bf16.mxu0 %v14530_v50 }
 0x626   :  { %7412 = vmatmul.mubr.msk.bf16.gmra.mrb[164].mxu0 %vm7410_vm12, %v15068_v62 }
 0x627   :  { %5616 = vmatprep.mubr.bf16.mxu0 %v14530_v50 }
 0x62e   :  { %7416 = vmatmul.mubr.msk.bf16.gmra.mrb[168].mxu0 %vm7414_vm11, %v15073_v60  ;;  %v15079_v60 = vld [vmem:[#allocation58_spill] sm:$0xff] }
 0x62f   :  { %5626 = vmatprep.mubr.bf16.mxu0 %v14530_v50  ;;  %vm15080_vm10 = vnez %v15079_v60 }
 0x630   :  { %vm7421_vm0 = vmneg %vm15080_vm10  ;;  %vm6956_vm10 = vcmask 1044484  }
 0x631   :  { %v5358_v51 = vpop.f32.mrb[64].mxu0  ;;  %vm7422_vm1 = vmpackc.low %vm7421_vm0, %vm7943_vm6  ;;  %vm6959_vm0 = vcmask 1045509  }
 0x632   :  { %v5817_v22 = vadd.f32 %v12824_v45, %v5358_v51  ;;  %v5360_v14 = vpop.f32.mrb[65].mxu0 }
 0x633   :  { %v5818_v32 = vadd.f32 %v12826_v17, %v5360_v14  ;;  %v5362_v16 = vpop.f32.mrb[66].mxu0 }
 0x634   :  { %v5819_v30 = vadd.f32 %v12824_v45, %v5362_v16  ;;  %v5364_v28 = vpop.f32.mrb[67].mxu0  ;;  %v5945_v31 = vmax.f32 %v5817_v22, 0.0 }
 0x635   :  { %v5820_v29 = vadd.f32 %v12826_v17, %v5364_v28  ;;  %v5946_v42 = vmax.f32 %v5818_v32, 0.0 }
 0x636   :  { %v5947_v62 = vmax.f32 %v5819_v30, 0.0  ;;  %7420 = vmatmul.mubr.msk.bf16.gmra.mrb[172].mxu0 %vm7418_vm5, %v15078_v33  ;;  %v15083_v33 = vpack.c.bf16 %v15081_v58, %v15082_v2  ;;  %v15086_v58 = vpack.c.bf16 %v12051_v59, %v12031_v56  ;;  %vm6953_vm5 = vcmask 1043459  }
 0x637   :  { %v5948_v39 = vmax.f32 %v5820_v29, 0.0  ;;  %5636 = vmatprep.mubr.bf16.mxu0 %v14530_v50 }
 0x638   :  { %v6073_v23 = vpack.c.bf16 %v5947_v62, %v5945_v31 }
 0x639   :  { %v6074_v57 = vpack.c.bf16 %v5948_v39, %v5946_v42  ;;  %v5368_v51 = vpop.f32.mrb[68].mxu0 }
 0x63a   :  { %v5821_v14 = vadd.f32 %v12824_v45, %v5368_v51  ;;  %v5370_v16 = vpop.f32.mrb[69].mxu0 }
 0x63b   :  { %v5822_v22 = vadd.f32 %v12826_v17, %v5370_v16  ;;  %v5372_v30 = vpop.f32.mrb[70].mxu0  ;;  %6297 = vmatprep.mubr.bf16.mxu1 %v6074_v57  ;;  %v15084_v57 = vld [vmem:[#allocation60_spill] sm:$0xff] }
 0x63c   :  { %v5823_v32 = vadd.f32 %v12824_v45, %v5372_v30  ;;  %v5374_v28 = vpop.f32.mrb[71].mxu0  ;;  %6298 = vmatmul.mubr.bf16.vlgmr.msra.gmra.mrb[212].mxu1 %v6073_v23  ;;  %v5949_v31 = vmax.f32 %v5821_v14, 0.0  ;;  %vm15085_vm4 = vnez %v15084_v57 }
 0x63d   :  { %v5824_v29 = vadd.f32 %v12826_v17, %v5374_v28  ;;  %v5950_v42 = vmax.f32 %v5822_v22, 0.0  ;;  %vm7425_vm3 = vmneg %vm15085_vm4  ;;  %vm6965_vm4 = vcmask 1047559  }
 0x63e   :  { %v5951_v62 = vmax.f32 %v5823_v32, 0.0  ;;  %7424 = vmatmul.mubr.msk.bf16.gmra.mrb[176].mxu0 %vm7422_vm1, %v15083_v33  ;;  %vm7426_vm15 = vmpackc.low %vm7425_vm3, %vm7943_vm6  ;;  %vm6962_vm1 = vcmask 1046534  }
 0x63f   :  { %v5952_v39 = vmax.f32 %v5824_v29, 0.0  ;;  %5646 = vmatprep.mubr.bf16.mxu0 %v14530_v50 }
 0x640   :  { %v6075_v60 = vpack.c.bf16 %v5951_v62, %v5949_v31 }
 0x641   :  { %v6076_v51 = vpack.c.bf16 %v5952_v39, %v5950_v42  ;;  %v5378_v16 = vpop.f32.mrb[72].mxu0  ;;  %v15087_v39 = vld [vmem:[#allocation62_spill] sm:$0xff] }
 0x642   :  { %v5825_v23 = vadd.f32 %v12824_v45, %v5378_v16  ;;  %v5380_v30 = vpop.f32.mrb[73].mxu0  ;;  %vm15088_vm2 = vnez %v15087_v39 }
 0x643   :  { %v5826_v14 = vadd.f32 %v12826_v17, %v5380_v30  ;;  %v5382_v32 = vpop.f32.mrb[74].mxu0  ;;  %6305 = vmatprep.mubr.bf16.mxu1 %v6076_v51  ;;  %vm7429_vm13 = vmneg %vm15088_vm2 }
 0x644   :  { %v5827_v22 = vadd.f32 %v12824_v45, %v5382_v32  ;;  %v5384_v28 = vpop.f32.mrb[75].mxu0  ;;  %6306 = vmatmul.mubr.bf16.gmra.mrb[216].mxu1 %v6075_v60  ;;  %v5953_v31 = vmax.f32 %v5825_v23, 0.0  ;;  %vm7430_vm12 = vmpackc.low %vm7429_vm13, %vm7943_vm6 }
 0x645   :  { %v5828_v29 = vadd.f32 %v12826_v17, %v5384_v28  ;;  %v5954_v2 = vmax.f32 %v5826_v14, 0.0  ;;  %v15089_v28 = vpack.c.bf16 %v12084_v24, %v12061_v6 }
 0x646   :  { %v5955_v62 = vmax.f32 %v5827_v22, 0.0  ;;  %7428 = vmatmul.mubr.msk.bf16.gmra.mrb[180].mxu0 %vm7426_vm15, %v15086_v58  ;;  %v15090_v58 = vld [vmem:[#allocation64_spill] sm:$0xff] }
 0x647   :  { %v5956_v33 = vmax.f32 %v5828_v29, 0.0  ;;  %5656 = vmatprep.mubr.bf16.mxu0 %v14530_v50  ;;  %vm15091_vm8 = vnez %v15090_v58 }
 0x648   :  { %v6077_v42 = vpack.c.bf16 %v5955_v62, %v5953_v31  ;;  %vm7433_vm14 = vmneg %vm15091_vm8 }
 0x649   :  { %v6078_v57 = vpack.c.bf16 %v5956_v33, %v5954_v2  ;;  %v5388_v51 = vpop.f32.mrb[76].mxu0  ;;  %vm7434_vm11 = vmpackc.low %vm7433_vm14, %vm7943_vm6  ;;  %vm6554_vm6 = vcmask 15360  }
 0x64a   :  { %v5829_v60 = vadd.f32 %v12824_v45, %v5388_v51  ;;  %v5390_v16 = vpop.f32.mrb[77].mxu0 }
 0x64b   :  { %v5830_v23 = vadd.f32 %v12826_v17, %v5390_v16  ;;  %v5392_v30 = vpop.f32.mrb[78].mxu0  ;;  %6313 = vmatprep.mubr.bf16.mxu1 %v6078_v57 }
 0x64c   :  { %v5831_v56 = vadd.f32 %v12824_v45, %v5392_v30  ;;  %v5394_v59 = vpop.f32.mrb[79].mxu0  ;;  %6314 = vmatmul.mubr.bf16.gmra.mrb[220].mxu1 %v6077_v42  ;;  %v5957_v32 = vmax.f32 %v5829_v60, 0.0 }
 0x64d   :  { %v5832_v14 = vadd.f32 %v12826_v17, %v5394_v59  ;;  %v5958_v29 = vmax.f32 %v5830_v23, 0.0  ;;  %v15092_v23 = vpack.c.bf16 %v12110_v4, %v12100_v26 }
 0x64e   :  { %v5959_v22 = vmax.f32 %v5831_v56, 0.0  ;;  %7432 = vmatmul.mubr.msk.bf16.gmra.mrb[184].mxu0 %vm7430_vm12, %v15089_v28 }
 0x64f   :  { %v5960_v31 = vmax.f32 %v5832_v14, 0.0  ;;  %5666 = vmatprep.mubr.bf16.mxu0 %v14530_v50 }
 0x650   :  { %v6079_v62 = vpack.c.bf16 %v5959_v22, %v5957_v32 }
 0x651   :  { %v6080_v2 = vpack.c.bf16 %v5960_v31, %v5958_v29  ;;  %v5398_v33 = vpop.f32.mrb[80].mxu0 }
 0x652   :  { %v5833_v42 = vadd.f32 %v12824_v45, %v5398_v33  ;;  %v5400_v39 = vpop.f32.mrb[81].mxu0 }
 0x653   :  { %v5834_v57 = vadd.f32 %v12826_v17, %v5400_v39  ;;  %v5402_v51 = vpop.f32.mrb[82].mxu0  ;;  %6321 = vmatprep.mubr.bf16.mxu1 %v6080_v2 }
 0x654   :  { %v5835_v6 = vadd.f32 %v12824_v45, %v5402_v51  ;;  %v5404_v24 = vpop.f32.mrb[83].mxu0  ;;  %6322 = vmatmul.mubr.bf16.gmra.mrb[224].mxu1 %v6079_v62  ;;  %v5961_v60 = vmax.f32 %v5833_v42, 0.0 }
 0x655   :  { %v5836_v50 = vadd.f32 %v12826_v17, %v5404_v24  ;;  %v5962_v30 = vmax.f32 %v5834_v57, 0.0 }
 0x656   :  { %v5963_v16 = vmax.f32 %v5835_v6, 0.0  ;;  %7436 = vmatmul.mubr.msk.bf16.gmra.mrb[188].mxu0 %vm7434_vm11, %v15092_v23 }
 0x657   :  { %v5964_v56 = vmax.f32 %v5836_v50, 0.0 }
 0x658   :  { %v6081_v59 = vpack.c.bf16 %v5963_v16, %v5961_v60 }
 0x659   :  { %v6082_v14 = vpack.c.bf16 %v5964_v56, %v5962_v30  ;;  %v5408_v32 = vpop.f32.mrb[84].mxu0 }
 0x65a   :  { %v5837_v22 = vadd.f32 %v12824_v45, %v5408_v32  ;;  %v5410_v28 = vpop.f32.mrb[85].mxu0 }
 0x65b   :  { %v5838_v29 = vadd.f32 %v12826_v17, %v5410_v28  ;;  %v5412_v31 = vpop.f32.mrb[86].mxu0  ;;  %6329 = vmatprep.mubr.bf16.mxu1 %v6082_v14 }
 0x65c   :  { %v5839_v62 = vadd.f32 %v12824_v45, %v5412_v31  ;;  %v5414_v58 = vpop.f32.mrb[87].mxu0  ;;  %6330 = vmatmul.mubr.bf16.gmra.mrb[228].mxu1 %v6081_v59  ;;  %v5965_v26 = vmax.f32 %v5837_v22, 0.0 }
 0x65d   :  { %v5840_v2 = vadd.f32 %v12826_v17, %v5414_v58  ;;  %v5966_v33 = vmax.f32 %v5838_v29, 0.0 }
 0x65e   :  { %v5967_v4 = vmax.f32 %v5839_v62, 0.0 }
 0x65f   :  { %v5968_v42 = vmax.f32 %v5840_v2, 0.0 }
 0x660   :  { %v6083_v39 = vpack.c.bf16 %v5967_v4, %v5965_v26 }
 0x661   :  { %v6084_v57 = vpack.c.bf16 %v5968_v42, %v5966_v33  ;;  %v5418_v51 = vpop.f32.mrb[88].mxu0 }
 0x662   :  { %v5841_v6 = vadd.f32 %v12824_v45, %v5418_v51  ;;  %v5420_v24 = vpop.f32.mrb[89].mxu0 }
 0x663   :  { %v5842_v50 = vadd.f32 %v12826_v17, %v5420_v24  ;;  %v5422_v60 = vpop.f32.mrb[90].mxu0  ;;  %6337 = vmatprep.mubr.bf16.mxu1 %v6084_v57 }
 0x664   :  { %v5843_v16 = vadd.f32 %v12824_v45, %v5422_v60  ;;  %v5424_v23 = vpop.f32.mrb[91].mxu0  ;;  %6338 = vmatmul.mubr.bf16.gmra.mrb[232].mxu1 %v6083_v39  ;;  %v5969_v56 = vmax.f32 %v5841_v6, 0.0 }
 0x665   :  { %v5844_v30 = vadd.f32 %v12826_v17, %v5424_v23  ;;  %v5970_v14 = vmax.f32 %v5842_v50, 0.0 }
 0x666   :  { %v5971_v59 = vmax.f32 %v5843_v16, 0.0 }
 0x667   :  { %v5972_v32 = vmax.f32 %v5844_v30, 0.0 }
 0x668   :  { %v6085_v22 = vpack.c.bf16 %v5971_v59, %v5969_v56 }
 0x669   :  { %v6086_v28 = vpack.c.bf16 %v5972_v32, %v5970_v14  ;;  %v5428_v29 = vpop.f32.mrb[92].mxu0 }
 0x66a   :  { %v5845_v31 = vadd.f32 %v12824_v45, %v5428_v29  ;;  %v5430_v62 = vpop.f32.mrb[93].mxu0 }
 0x66b   :  { %v5846_v58 = vadd.f32 %v12826_v17, %v5430_v62  ;;  %v5432_v2 = vpop.f32.mrb[94].mxu0  ;;  %6345 = vmatprep.mubr.bf16.mxu1 %v6086_v28 }
 0x66c   :  { %v5847_v26 = vadd.f32 %v12824_v45, %v5432_v2  ;;  %v5434_v4 = vpop.f32.mrb[95].mxu0  ;;  %6346 = vmatmul.mubr.bf16.gmra.mrb[236].mxu1 %v6085_v22  ;;  %v5973_v42 = vmax.f32 %v5845_v31, 0.0 }
 0x66d   :  { %v5848_v33 = vadd.f32 %v12826_v17, %v5434_v4  ;;  %v5974_v57 = vmax.f32 %v5846_v58, 0.0 }
 0x66e   :  { %v5975_v39 = vmax.f32 %v5847_v26, 0.0 }
 0x66f   :  { %v5976_v51 = vmax.f32 %v5848_v33, 0.0 }
 0x670   :  { %v6087_v6 = vpack.c.bf16 %v5975_v39, %v5973_v42 }
 0x671   :  { %v6088_v24 = vpack.c.bf16 %v5976_v51, %v5974_v57  ;;  %v5438_v50 = vpop.f32.mrb[96].mxu0 }
 0x672   :  { %v5849_v60 = vadd.f32 %v12824_v45, %v5438_v50  ;;  %v5440_v16 = vpop.f32.mrb[97].mxu0 }
 0x673   :  { %v5850_v23 = vadd.f32 %v12826_v17, %v5440_v16  ;;  %v5442_v30 = vpop.f32.mrb[98].mxu0  ;;  %6353 = vmatprep.mubr.bf16.mxu1 %v6088_v24 }
 0x674   :  { %v5851_v56 = vadd.f32 %v12824_v45, %v5442_v30  ;;  %v5444_v59 = vpop.f32.mrb[99].mxu0  ;;  %6354 = vmatmul.mubr.bf16.gmra.mrb[240].mxu1 %v6087_v6  ;;  %v5977_v32 = vmax.f32 %v5849_v60, 0.0 }
 0x675   :  { %v5852_v14 = vadd.f32 %v12826_v17, %v5444_v59  ;;  %v5978_v28 = vmax.f32 %v5850_v23, 0.0 }
 0x676   :  { %v5979_v22 = vmax.f32 %v5851_v56, 0.0 }
 0x677   :  { %v5980_v29 = vmax.f32 %v5852_v14, 0.0 }
 0x678   :  { %v6089_v31 = vpack.c.bf16 %v5979_v22, %v5977_v32 }
 0x679   :  { %v6090_v62 = vpack.c.bf16 %v5980_v29, %v5978_v28  ;;  %v5448_v58 = vpop.f32.mrb[100].mxu0 }
 0x67a   :  { %v5853_v2 = vadd.f32 %v12824_v45, %v5448_v58  ;;  %v5450_v26 = vpop.f32.mrb[101].mxu0 }
 0x67b   :  { %v5854_v4 = vadd.f32 %v12826_v17, %v5450_v26  ;;  %v5452_v33 = vpop.f32.mrb[102].mxu0  ;;  %6361 = vmatprep.mubr.bf16.mxu1 %v6090_v62 }
 0x67c   :  { %v5855_v42 = vadd.f32 %v12824_v45, %v5452_v33  ;;  %v5454_v39 = vpop.f32.mrb[103].mxu0  ;;  %6362 = vmatmul.mubr.bf16.gmra.mrb[244].mxu1 %v6089_v31  ;;  %v5981_v51 = vmax.f32 %v5853_v2, 0.0 }
 0x67d   :  { %v5856_v57 = vadd.f32 %v12826_v17, %v5454_v39  ;;  %v5982_v24 = vmax.f32 %v5854_v4, 0.0 }
 0x67e   :  { %v5983_v6 = vmax.f32 %v5855_v42, 0.0 }
 0x67f   :  { %v5984_v50 = vmax.f32 %v5856_v57, 0.0 }
 0x680   :  { %v6091_v60 = vpack.c.bf16 %v5983_v6, %v5981_v51 }
 0x681   :  { %v6092_v16 = vpack.c.bf16 %v5984_v50, %v5982_v24  ;;  %v5458_v23 = vpop.f32.mrb[104].mxu0 }
 0x682   :  { %v5857_v30 = vadd.f32 %v12824_v45, %v5458_v23  ;;  %v5460_v56 = vpop.f32.mrb[105].mxu0 }
 0x683   :  { %v5858_v59 = vadd.f32 %v12826_v17, %v5460_v56  ;;  %v5462_v14 = vpop.f32.mrb[106].mxu0  ;;  %6369 = vmatprep.mubr.bf16.mxu1 %v6092_v16 }
 0x684   :  { %v5859_v32 = vadd.f32 %v12824_v45, %v5462_v14  ;;  %v5464_v22 = vpop.f32.mrb[107].mxu0  ;;  %6370 = vmatmul.mubr.bf16.gmra.mrb[248].mxu1 %v6091_v60  ;;  %v5985_v29 = vmax.f32 %v5857_v30, 0.0 }
 0x685   :  { %v5860_v28 = vadd.f32 %v12826_v17, %v5464_v22  ;;  %v5986_v62 = vmax.f32 %v5858_v59, 0.0 }
 0x686   :  { %v5987_v31 = vmax.f32 %v5859_v32, 0.0 }
 0x687   :  { %v5988_v58 = vmax.f32 %v5860_v28, 0.0 }
 0x688   :  { %v6093_v2 = vpack.c.bf16 %v5987_v31, %v5985_v29 }
 0x689   :  { %v6094_v26 = vpack.c.bf16 %v5988_v58, %v5986_v62  ;;  %v5468_v4 = vpop.f32.mrb[108].mxu0 }
 0x68a   :  { %v7572_v33 = vadd.f32 %v5468_v4, %v12201_v55  ;;  %v5470_v42 = vpop.f32.mrb[109].mxu0 }
 0x68b   :  { %v7573_v39 = vadd.f32 %v5470_v42, %v12203_v44  ;;  %v5472_v57 = vpop.f32.mrb[110].mxu0  ;;  %6377 = vmatprep.mubr.bf16.mxu1 %v6094_v26 }
 0x68c   :  { %v5861_v51 = vadd.f32 %v7572_v33, %v12824_v45  ;;  %v7574_v6 = vadd.f32 %v5472_v57, %v12205_v61  ;;  %v5474_v24 = vpop.f32.mrb[111].mxu0  ;;  %6378 = vmatmul.mubr.bf16.gmra.mrb[252].mxu1 %v6093_v2 }
 0x68d   :  { %v5862_v50 = vadd.f32 %v7573_v39, %v12826_v17  ;;  %v7575_v60 = vadd.f32 %v5474_v24, %v12208_v7 }
 0x68e   :  { %v5863_v16 = vadd.f32 %v7574_v6, %v12824_v45  ;;  %v5989_v55 = vmax.f32 %v5861_v51, 0.0 }
 0x68f   :  { %v5864_v23 = vadd.f32 %v7575_v60, %v12826_v17  ;;  %v5990_v56 = vmax.f32 %v5862_v50, 0.0 }
 0x690   :  { %v5991_v30 = vmax.f32 %v5863_v16, 0.0 }
 0x691   :  { %v5992_v44 = vmax.f32 %v5864_v23, 0.0  ;;  %v5478_v59 = vpop.f32.mrb[112].mxu0 }
 0x692   :  { %v6095_v14 = vpack.c.bf16 %v5991_v30, %v5989_v55  ;;  %v7576_v32 = vadd.f32 %v5478_v59, %v12216_v1  ;;  %v5480_v22 = vpop.f32.mrb[113].mxu0 }
 0x693   :  { %v7577_v61 = vadd.f32 %v5480_v22, %v12218_v20  ;;  %v5482_v28 = vpop.f32.mrb[114].mxu0  ;;  %v6096_v29 = vpack.c.bf16 %v5992_v44, %v5990_v56 }
 0x694   :  { %v5865_v31 = vadd.f32 %v7576_v32, %v12824_v45  ;;  %v7578_v7 = vadd.f32 %v5482_v28, %v12220_v13  ;;  %v5484_v62 = vpop.f32.mrb[115].mxu0 }
 0x695   :  { %v5866_v58 = vadd.f32 %v7577_v61, %v12826_v17  ;;  %v7579_v2 = vadd.f32 %v5484_v62, %v12223_v34  ;;  %6385 = vmatprep.mubr.bf16.mxu1 %v6096_v29 }
 0x696   :  { %v5867_v26 = vadd.f32 %v7578_v7, %v12824_v45  ;;  %6386 = vmatmul.mubr.bf16.gmra.mrb[0].mxu1 %v6095_v14  ;;  %v5993_v4 = vmax.f32 %v5865_v31, 0.0 }
 0x697   :  { %v5868_v1 = vadd.f32 %v7579_v2, %v12826_v17  ;;  %v5994_v20 = vmax.f32 %v5866_v58, 0.0 }
 0x698   :  { %v5995_v33 = vmax.f32 %v5867_v26, 0.0 }
 0x699   :  { %v5996_v42 = vmax.f32 %v5868_v1, 0.0  ;;  %v5488_v39 = vpop.f32.mrb[116].mxu0 }
 0x69a   :  { %v6097_v57 = vpack.c.bf16 %v5995_v33, %v5993_v4  ;;  %v7580_v51 = vadd.f32 %v5488_v39, %v12231_v43  ;;  %v5490_v13 = vpop.f32.mrb[117].mxu0 }
 0x69b   :  { %v7581_v6 = vadd.f32 %v5490_v13, %v12233_v27  ;;  %v5492_v24 = vpop.f32.mrb[118].mxu0  ;;  %v6098_v50 = vpack.c.bf16 %v5996_v42, %v5994_v20 }
 0x69c   :  { %v5869_v34 = vadd.f32 %v7580_v51, %v12824_v45  ;;  %v7582_v60 = vadd.f32 %v5492_v24, %v12235_v11  ;;  %v5494_v16 = vpop.f32.mrb[119].mxu0 }
 0x69d   :  { %v5870_v23 = vadd.f32 %v7581_v6, %v12826_v17  ;;  %v7583_v55 = vadd.f32 %v5494_v16, %v12238_v46  ;;  %6393 = vmatprep.mubr.bf16.mxu1 %v6098_v50 }
 0x69e   :  { %v5871_v30 = vadd.f32 %v7582_v60, %v12824_v45  ;;  %6394 = vmatmul.mubr.bf16.gmra.mrb[4].mxu1 %v6097_v57  ;;  %v5997_v56 = vmax.f32 %v5869_v34, 0.0 }
 0x69f   :  { %v5872_v43 = vadd.f32 %v7583_v55, %v12826_v17  ;;  %v5998_v27 = vmax.f32 %v5870_v23, 0.0 }
 0x6a0   :  { %v5999_v44 = vmax.f32 %v5871_v30, 0.0 }
 0x6a1   :  { %v6000_v59 = vmax.f32 %v5872_v43, 0.0  ;;  %v5498_v14 = vpop.f32.mrb[120].mxu0 }
 0x6a2   :  { %v6099_v32 = vpack.c.bf16 %v5999_v44, %v5997_v56  ;;  %v7584_v22 = vadd.f32 %v5498_v14, %v12246_v52  ;;  %v5500_v11 = vpop.f32.mrb[121].mxu0 }
 0x6a3   :  { %v7585_v61 = vadd.f32 %v5500_v11, %v12248_v63  ;;  %v5502_v28 = vpop.f32.mrb[122].mxu0  ;;  %v6100_v29 = vpack.c.bf16 %v6000_v59, %v5998_v27 }
 0x6a4   :  { %v5873_v46 = vadd.f32 %v7584_v22, %v12824_v45  ;;  %v7586_v31 = vadd.f32 %v5502_v28, %v12250_v38  ;;  %v5504_v7 = vpop.f32.mrb[123].mxu0 }
 0x6a5   :  { %v5874_v62 = vadd.f32 %v7585_v61, %v12826_v17  ;;  %v7587_v58 = vadd.f32 %v5504_v7, %v12253_v40  ;;  %6401 = vmatprep.mubr.bf16.mxu1 %v6100_v29 }
 0x6a6   :  { %v5875_v2 = vadd.f32 %v7586_v31, %v12824_v45  ;;  %6402 = vmatmul.mubr.bf16.gmra.mrb[8].mxu1 %v6099_v32  ;;  %v6001_v26 = vmax.f32 %v5873_v46, 0.0 }
 0x6a7   :  { %v5876_v52 = vadd.f32 %v7587_v58, %v12826_v17  ;;  %v6002_v63 = vmax.f32 %v5874_v62, 0.0 }
 0x6a8   :  { %v6003_v1 = vmax.f32 %v5875_v2, 0.0 }
 0x6a9   :  { %v6004_v4 = vmax.f32 %v5876_v52, 0.0  ;;  %v5508_v33 = vpop.f32.mrb[124].mxu0 }
 0x6aa   :  { %v6101_v20 = vpack.c.bf16 %v6003_v1, %v6001_v26  ;;  %v7588_v42 = vadd.f32 %v5508_v33, %v12259_v15  ;;  %v5510_v38 = vpop.f32.mrb[125].mxu0 }
 0x6ab   :  { %v7589_v39 = vadd.f32 %v5510_v38, %v12261_v37  ;;  %v5512_v57 = vpop.f32.mrb[126].mxu0  ;;  %v6102_v51 = vpack.c.bf16 %v6004_v4, %v6002_v63 }
 0x6ac   :  { %v5877_v40 = vadd.f32 %v7588_v42, %v12824_v45  ;;  %v7590_v13 = vadd.f32 %v5512_v57, %v12263_v49  ;;  %v5514_v6 = vpop.f32.mrb[127].mxu0 }
 0x6ad   :  { %v5878_v24 = vadd.f32 %v7589_v39, %v12826_v17  ;;  %v7591_v50 = vadd.f32 %v5514_v6, %v12268_v25  ;;  %6409 = vmatprep.mubr.bf16.mxu1 %v6102_v51 }
 0x6ae   :  { %v5879_v34 = vadd.f32 %v7590_v13, %v12824_v45  ;;  %6410 = vmatmul.mubr.bf16.gmra.mrb[12].mxu1 %v6101_v20  ;;  %v6005_v60 = vmax.f32 %v5877_v40, 0.0 }
 0x6af   :  { %v5880_v15 = vadd.f32 %v7591_v50, %v12826_v17  ;;  %v6006_v37 = vmax.f32 %v5878_v24, 0.0 }
 0x6b0   :  { %v6007_v16 = vmax.f32 %v5879_v34, 0.0  ;;  %v15093_v34 = vld [vmem:[#allocation56_spill] sm:$0xff] }
 0x6b1   :  { %v6008_v23 = vmax.f32 %v5880_v15, 0.0  ;;  %v5518_v55 = vpop.f32.mrb[128].mxu0 }
 0x6b2   :  { %v6103_v30 = vpack.c.bf16 %v6007_v16, %v6005_v60  ;;  %v7592_v43 = vadd.f32 %v5518_v55, %v12283_v35  ;;  %v5520_v49 = vpop.f32.mrb[129].mxu0 }
 0x6b3   :  { %v7593_v56 = vadd.f32 %v5520_v49, %v12285_v10  ;;  %v5522_v44 = vpop.f32.mrb[130].mxu0  ;;  %v6104_v27 = vpack.c.bf16 %v6008_v23, %v6006_v37 }
 0x6b4   :  { %v5881_v25 = vadd.f32 %v7592_v43, %v12824_v45  ;;  %v7594_v59 = vadd.f32 %v5522_v44, %v12287_v19  ;;  %v5524_v14 = vpop.f32.mrb[131].mxu0 }
 0x6b5   :  { %v5882_v32 = vadd.f32 %v7593_v56, %v12826_v17  ;;  %v7595_v22 = vadd.f32 %v5524_v14, %v12292_v0  ;;  %6417 = vmatprep.mubr.bf16.mxu1 %v6104_v27 }
 0x6b6   :  { %v5883_v11 = vadd.f32 %v7594_v59, %v12824_v45  ;;  %6418 = vmatmul.mubr.bf16.gmra.mrb[16].mxu1 %v6103_v30  ;;  %v6009_v61 = vmax.f32 %v5881_v25, 0.0 }
 0x6b7   :  { %v5884_v35 = vadd.f32 %v7595_v22, %v12826_v17  ;;  %v6010_v10 = vmax.f32 %v5882_v32, 0.0  ;;  %v15094_v32 = vld [vmem:[#allocation59_spill] sm:$0xff] }
 0x6b8   :  { %v6011_v28 = vmax.f32 %v5883_v11, 0.0 }
 0x6b9   :  { %v6012_v29 = vmax.f32 %v5884_v35, 0.0  ;;  %v5528_v46 = vpop.f32.mrb[132].mxu0 }
 0x6ba   :  { %v6105_v31 = vpack.c.bf16 %v6011_v28, %v6009_v61  ;;  %v7596_v7 = vadd.f32 %v5528_v46, %v12307_v18  ;;  %v5530_v19 = vpop.f32.mrb[133].mxu0 }
 0x6bb   :  { %v7597_v62 = vadd.f32 %v5530_v19, %v12309_v21  ;;  %v5532_v58 = vpop.f32.mrb[134].mxu0  ;;  %v6106_v2 = vpack.c.bf16 %v6012_v29, %v6010_v10 }
 0x6bc   :  { %v5885_v0 = vadd.f32 %v7596_v7, %v12824_v45  ;;  %v7598_v52 = vadd.f32 %v5532_v58, %v12311_v3  ;;  %v5534_v26 = vpop.f32.mrb[135].mxu0 }
 0x6bd   :  { %v5886_v1 = vadd.f32 %v7597_v62, %v12826_v17  ;;  %v7599_v63 = vadd.f32 %v5534_v26, %v12316_v47  ;;  %6425 = vmatprep.mubr.bf16.mxu1 %v6106_v2  ;;  %v15096_v26 = vld [vmem:[#allocation63_spill] sm:$0xff] }
 0x6be   :  { %v5887_v4 = vadd.f32 %v7598_v52, %v12824_v45  ;;  %6426 = vmatmul.mubr.bf16.gmra.mrb[20].mxu1 %v6105_v31  ;;  %v6013_v33 = vmax.f32 %v5885_v0, 0.0  ;;  %v15095_v31 = vld [vmem:[#allocation61_spill] sm:$0xff] }
 0x6bf   :  { %v5888_v18 = vadd.f32 %v7599_v63, %v12826_v17  ;;  %v6014_v21 = vmax.f32 %v5886_v1, 0.0 }
 0x6c0   :  { %v6015_v20 = vmax.f32 %v5887_v4, 0.0 }
 0x6c1   :  { %v6016_v42 = vmax.f32 %v5888_v18, 0.0  ;;  %v5538_v38 = vpop.f32.mrb[136].mxu0 }
 0x6c2   :  { %v6107_v39 = vpack.c.bf16 %v6015_v20, %v6013_v33  ;;  %v7600_v57 = vadd.f32 %v5538_v38, %v12322_v8  ;;  %v5540_v3 = vpop.f32.mrb[137].mxu0 }
 0x6c3   :  { %v7601_v51 = vadd.f32 %v5540_v3, %v12324_v48  ;;  %v5542_v40 = vpop.f32.mrb[138].mxu0  ;;  %v6108_v13 = vpack.c.bf16 %v6016_v42, %v6014_v21 }
 0x6c4   :  { %v5889_v47 = vadd.f32 %v7600_v57, %v12824_v45  ;;  %v7602_v6 = vadd.f32 %v5542_v40, %v12326_v5  ;;  %v5544_v24 = vpop.f32.mrb[139].mxu0 }
 0x6c5   :  { %v5890_v50 = vadd.f32 %v7601_v51, %v12826_v17  ;;  %v7603_v15 = vadd.f32 %v5544_v24, %v15093_v34  ;;  %6433 = vmatprep.mubr.bf16.mxu1 %v6108_v13  ;;  %v15098_v13 = vld [vmem:[#allocation66_spill] sm:$0xff] }
 0x6c6   :  { %v5891_v60 = vadd.f32 %v7602_v6, %v12824_v45  ;;  %6434 = vmatmul.mubr.bf16.gmra.mrb[24].mxu1 %v6107_v39  ;;  %v6017_v16 = vmax.f32 %v5889_v47, 0.0  ;;  %v15097_v39 = vld [vmem:[#allocation65_spill] sm:$0xff] }
 0x6c7   :  { %v5892_v8 = vadd.f32 %v7603_v15, %v12826_v17  ;;  %v6018_v48 = vmax.f32 %v5890_v50, 0.0  ;;  %v15099_v50 = vld [vmem:[#allocation67_spill] sm:$0xff] }
 0x6c8   :  { %v6019_v37 = vmax.f32 %v5891_v60, 0.0 }
 0x6c9   :  { %v6020_v23 = vmax.f32 %v5892_v8, 0.0  ;;  %v5548_v55 = vpop.f32.mrb[140].mxu0 }
 0x6ca   :  { %v6109_v30 = vpack.c.bf16 %v6019_v37, %v6017_v16  ;;  %v7604_v43 = vadd.f32 %v5548_v55, %v12340_v54  ;;  %v5550_v5 = vpop.f32.mrb[141].mxu0  ;;  %v15100_v55 = vld [vmem:[#allocation68_spill] sm:$0xff] }
 0x6cb   :  { %v7605_v49 = vadd.f32 %v5550_v5, %v12342_v36  ;;  %v5552_v56 = vpop.f32.mrb[142].mxu0  ;;  %v6110_v44 = vpack.c.bf16 %v6020_v23, %v6018_v48  ;;  %v15101_v5 = vld [vmem:[#allocation69_spill] sm:$0xff] }
 0x6cc   :  { %v5893_v27 = vadd.f32 %v7604_v43, %v12824_v45  ;;  %v7606_v25 = vadd.f32 %v5552_v56, %v12344_v41  ;;  %v5554_v59 = vpop.f32.mrb[143].mxu0 }
 0x6cd   :  { %v5894_v14 = vadd.f32 %v7605_v49, %v12826_v17  ;;  %v7607_v22 = vadd.f32 %v5554_v59, %v15094_v32  ;;  %6441 = vmatprep.mubr.bf16.mxu1 %v6110_v44 }
 0x6ce   :  { %v5895_v11 = vadd.f32 %v7606_v25, %v12824_v45  ;;  %6442 = vmatmul.mubr.bf16.gmra.mrb[28].mxu1 %v6109_v30  ;;  %v6021_v35 = vmax.f32 %v5893_v27, 0.0  ;;  %v15102_v25 = vld [vmem:[#allocation11_spill] sm:$0xff] }
 0x6cf   :  { %v5896_v54 = vadd.f32 %v7607_v22, %v12826_v17  ;;  %v6022_v36 = vmax.f32 %v5894_v14, 0.0  ;;  %v15103_v22 = vld [vmem:[#allocation10_spill] sm:$0xff] }
 0x6d0   :  { %v6023_v61 = vmax.f32 %v5895_v11, 0.0 }
 0x6d1   :  { %v6024_v28 = vmax.f32 %v5896_v54, 0.0  ;;  %v5558_v10 = vpop.f32.mrb[144].mxu0 }
 0x6d2   :  { %v6111_v29 = vpack.c.bf16 %v6023_v61, %v6021_v35  ;;  %v7608_v46 = vadd.f32 %v5558_v10, %v12352_v12  ;;  %v5560_v41 = vpop.f32.mrb[145].mxu0 }
 0x6d3   :  { %v7609_v7 = vadd.f32 %v5560_v41, %v15095_v31  ;;  %v5562_v19 = vpop.f32.mrb[146].mxu0  ;;  %v6112_v62 = vpack.c.bf16 %v6024_v28, %v6022_v36  ;;  %v15104_v41 = vld [vmem:[#allocation144_spill] sm:$0xff] }
 0x6d4   :  { %v5897_v58 = vadd.f32 %v7608_v46, %v12824_v45  ;;  %v7610_v2 = vadd.f32 %v5562_v19, %v12356_v53  ;;  %v5564_v0 = vpop.f32.mrb[147].mxu0  ;;  %v15105_v19 = vld [vmem:[#allocation145_spill] sm:$0xff] }
 0x6d5   :  { %v5898_v52 = vadd.f32 %v7609_v7, %v12826_v17  ;;  %v7611_v1 = vadd.f32 %v5564_v0, %v15096_v26  ;;  %6449 = vmatprep.mubr.bf16.mxu1 %v6112_v62 }
 0x6d6   :  { %v5899_v63 = vadd.f32 %v7610_v2, %v12824_v45  ;;  %6450 = vmatmul.mubr.bf16.gmra.mrb[32].mxu1 %v6111_v29  ;;  %v6025_v4 = vmax.f32 %v5897_v58, 0.0 }
 0x6d7   :  { %v5900_v12 = vadd.f32 %v7611_v1, %v12826_v17  ;;  %v6026_v33 = vmax.f32 %v5898_v52, 0.0  ;;  %v15106_v52 = vld [vmem:[#allocation146_spill] sm:$0xff] }
 0x6d8   :  { %v6027_v18 = vmax.f32 %v5899_v63, 0.0 }
 0x6d9   :  { %v6028_v20 = vmax.f32 %v5900_v12, 0.0  ;;  %v5568_v21 = vpop.f32.mrb[148].mxu0  ;;  %v15107_v12 = vld [vmem:[#allocation147_spill] sm:$0xff] }
 0x6da   :  { %v6113_v42 = vpack.c.bf16 %v6027_v18, %v6025_v4  ;;  %v7612_v38 = vadd.f32 %v5568_v21, %v12364_v9  ;;  %v5570_v53 = vpop.f32.mrb[149].mxu0 }
 0x6db   :  { %v7613_v57 = vadd.f32 %v5570_v53, %v15097_v39  ;;  %v5572_v3 = vpop.f32.mrb[150].mxu0  ;;  %v6114_v51 = vpack.c.bf16 %v6028_v20, %v6026_v33 }
 0x6dc   :  { %v5901_v40 = vadd.f32 %v7612_v38, %v12824_v45  ;;  %v7614_v47 = vadd.f32 %v5572_v3, %v15098_v13  ;;  %v5574_v6 = vpop.f32.mrb[151].mxu0 }
 0x6dd   :  { %v5902_v24 = vadd.f32 %v7613_v57, %v12826_v17  ;;  %v7615_v34 = vadd.f32 %v5574_v6, %v15099_v50  ;;  %6457 = vmatprep.mubr.bf16.mxu1 %v6114_v51  ;;  %v15108_v57 = vld [vmem:[#allocation76_spill] sm:$0xff] }
 0x6de   :  { %v5903_v15 = vadd.f32 %v7614_v47, %v12824_v45  ;;  %6458 = vmatmul.mubr.bf16.gmra.mrb[36].mxu1 %v6113_v42  ;;  %v6029_v60 = vmax.f32 %v5901_v40, 0.0  ;;  %v15109_v40 = vld [vmem:[#allocation75_spill] sm:$0xff]  ;;  %v15110_v50 = vld [vmem:[#allocation148_spill] sm:$0xff] }
 0x6df   :  { %v5904_v9 = vadd.f32 %v7615_v34, %v12826_v17  ;;  %v6030_v16 = vmax.f32 %v5902_v24, 0.0 }
 0x6e0   :  { %v6031_v8 = vmax.f32 %v5903_v15, 0.0 }
 0x6e1   :  { %v6032_v37 = vmax.f32 %v5904_v9, 0.0  ;;  %v5578_v48 = vpop.f32.mrb[152].mxu0 }
 0x6e2   :  { %v6115_v23 = vpack.c.bf16 %v6031_v8, %v6029_v60  ;;  %v7616_v30 = vadd.f32 %v5578_v48, %v15100_v55  ;;  %v5580_v43 = vpop.f32.mrb[153].mxu0  ;;  %v15111_v60 = vld [vmem:[#allocation149_spill] sm:$0xff] }
 0x6e3   :  { %v7617_v49 = vadd.f32 %v5580_v43, %v15101_v5  ;;  %v5582_v56 = vpop.f32.mrb[154].mxu0  ;;  %v6116_v44 = vpack.c.bf16 %v6032_v37, %v6030_v16 }
 0x6e4   :  { %v5905_v27 = vadd.f32 %v7616_v30, %v12824_v45  ;;  %v7618_v59 = vadd.f32 %v5582_v56, %v15102_v25  ;;  %v5584_v14 = vpop.f32.mrb[155].mxu0 }
 0x6e5   :  { %v5906_v32 = vadd.f32 %v7617_v49, %v12826_v17  ;;  %v7619_v11 = vadd.f32 %v5584_v14, %v15103_v22  ;;  %6465 = vmatprep.mubr.bf16.mxu1 %v6116_v44  ;;  %v15112_v49 = vld [vmem:[#allocation80_spill] sm:$0xff]  ;;  %v15114_v22 = vld [vmem:[#allocation150_spill] sm:$0xff] }
 0x6e6   :  { %v5907_v54 = vadd.f32 %v7618_v59, %v12824_v45  ;;  %6466 = vmatmul.mubr.bf16.gmra.mrb[40].mxu1 %v6115_v23  ;;  %v6033_v61 = vmax.f32 %v5905_v27, 0.0  ;;  %v15113_v27 = vld [vmem:[#allocation79_spill] sm:$0xff] }
 0x6e7   :  { %v5908_v35 = vadd.f32 %v7619_v11, %v12826_v17  ;;  %v6034_v28 = vmax.f32 %v5906_v32, 0.0 }
 0x6e8   :  { %v6035_v36 = vmax.f32 %v5907_v54, 0.0 }
 0x6e9   :  { %v6036_v10 = vmax.f32 %v5908_v35, 0.0  ;;  %v5588_v29 = vpop.f32.mrb[156].mxu0 }
 0x6ea   :  { %v6117_v46 = vpack.c.bf16 %v6035_v36, %v6033_v61  ;;  %v7620_v31 = vadd.f32 %v5588_v29, %v15104_v41  ;;  %v5590_v7 = vpop.f32.mrb[157].mxu0  ;;  %v15115_v61 = vld [vmem:[#allocation151_spill] sm:$0xff] }
 0x6eb   :  { %v7621_v62 = vadd.f32 %v5590_v7, %v15105_v19  ;;  %v5592_v58 = vpop.f32.mrb[158].mxu0  ;;  %v6118_v2 = vpack.c.bf16 %v6036_v10, %v6034_v28 }
 0x6ec   :  { %v5909_v0 = vadd.f32 %v7620_v31, %v12824_v45  ;;  %v7622_v26 = vadd.f32 %v5592_v58, %v15106_v52  ;;  %v5594_v1 = vpop.f32.mrb[159].mxu0 }
 0x6ed   :  { %v5910_v63 = vadd.f32 %v7621_v62, %v12826_v17  ;;  %v7623_v4 = vadd.f32 %v5594_v1, %v15107_v12  ;;  %6473 = vmatprep.mubr.bf16.mxu1 %v6118_v2  ;;  %v15116_v62 = vld [vmem:[#allocation84_spill] sm:$0xff] }
 0x6ee   :  { %v5911_v18 = vadd.f32 %v7622_v26, %v12824_v45  ;;  %6474 = vmatmul.mubr.bf16.gmra.mrb[44].mxu1 %v6117_v46  ;;  %v6037_v20 = vmax.f32 %v5909_v0, 0.0  ;;  %v15117_v0 = vld [vmem:[#allocation83_spill] sm:$0xff]  ;;  %v15118_v12 = vld [vmem:[#allocation152_spill] sm:$0xff] }
 0x6ef   :  { %v5912_v33 = vadd.f32 %v7623_v4, %v12826_v17  ;;  %v6038_v42 = vmax.f32 %v5910_v63, 0.0 }
 0x6f0   :  { %v6039_v21 = vmax.f32 %v5911_v18, 0.0 }
 0x6f1   :  { %v6040_v38 = vmax.f32 %v5912_v33, 0.0  ;;  %v5598_v53 = vpop.f32.mrb[160].mxu0 }
 0x6f2   :  { %v6119_v39 = vpack.c.bf16 %v6039_v21, %v6037_v20  ;;  %v7624_v3 = vadd.f32 %v5598_v53, %v15108_v57  ;;  %v5600_v51 = vpop.f32.mrb[161].mxu0  ;;  %v15119_v20 = vld [vmem:[#allocation153_spill] sm:$0xff] }
 0x6f3   :  { %v7625_v13 = vadd.f32 %v5600_v51, %v15109_v40  ;;  %v5602_v47 = vpop.f32.mrb[162].mxu0  ;;  %v6120_v6 = vpack.c.bf16 %v6040_v38, %v6038_v42 }
 0x6f4   :  { %v5913_v24 = vadd.f32 %v7624_v3, %v12824_v45  ;;  %v7626_v34 = vadd.f32 %v5602_v47, %v15110_v50  ;;  %v5604_v15 = vpop.f32.mrb[163].mxu0 }
 0x6f5   :  { %v5914_v9 = vadd.f32 %v7625_v13, %v12826_v17  ;;  %v7627_v8 = vadd.f32 %v5604_v15, %v15111_v60  ;;  %6481 = vmatprep.mubr.bf16.mxu1 %v6120_v6  ;;  %v15120_v13 = vld [vmem:[#allocation88_spill] sm:$0xff]  ;;  %v15122_v60 = vld [vmem:[#allocation154_spill] sm:$0xff] }
 0x6f6   :  { %v5915_v16 = vadd.f32 %v7626_v34, %v12824_v45  ;;  %6482 = vmatmul.mubr.bf16.gmra.mrb[48].mxu1 %v6119_v39  ;;  %v6041_v48 = vmax.f32 %v5913_v24, 0.0  ;;  %v15121_v24 = vld [vmem:[#allocation87_spill] sm:$0xff] }
 0x6f7   :  { %v5916_v37 = vadd.f32 %v7627_v8, %v12826_v17  ;;  %v6042_v55 = vmax.f32 %v5914_v9, 0.0 }
 0x6f8   :  { %v6043_v23 = vmax.f32 %v5915_v16, 0.0 }
 0x6f9   :  { %v6044_v30 = vmax.f32 %v5916_v37, 0.0  ;;  %v5608_v43 = vpop.f32.mrb[164].mxu0 }
 0x6fa   :  { %v6121_v5 = vpack.c.bf16 %v6043_v23, %v6041_v48  ;;  %v7628_v56 = vadd.f32 %v5608_v43, %v15112_v49  ;;  %v5610_v44 = vpop.f32.mrb[165].mxu0  ;;  %v15123_v48 = vld [vmem:[#allocation155_spill] sm:$0xff] }
 0x6fb   :  { %v7629_v25 = vadd.f32 %v5610_v44, %v15113_v27  ;;  %v5612_v59 = vpop.f32.mrb[166].mxu0  ;;  %v6122_v14 = vpack.c.bf16 %v6044_v30, %v6042_v55 }
 0x6fc   :  { %v5917_v32 = vadd.f32 %v7628_v56, %v12824_v45  ;;  %v7630_v11 = vadd.f32 %v5612_v59, %v15114_v22  ;;  %v5614_v54 = vpop.f32.mrb[167].mxu0  ;;  %v15124_v22 = vld [vmem:[#allocation91_spill] sm:$0xff] }
 0x6fd   :  { %v5918_v35 = vadd.f32 %v7629_v25, %v12826_v17  ;;  %v7631_v36 = vadd.f32 %v5614_v54, %v15115_v61  ;;  %6489 = vmatprep.mubr.bf16.mxu1 %v6122_v14 }
 0x6fe   :  { %v5919_v28 = vadd.f32 %v7630_v11, %v12824_v45  ;;  %6490 = vmatmul.mubr.bf16.gmra.mrb[52].mxu1 %v6121_v5  ;;  %v6045_v29 = vmax.f32 %v5917_v32, 0.0 }
 0x6ff   :  { %v5920_v10 = vadd.f32 %v7631_v36, %v12826_v17  ;;  %v6046_v41 = vmax.f32 %v5918_v35, 0.0 }
 0x700   :  { %v6047_v46 = vmax.f32 %v5919_v28, 0.0  ;;  %v15125_v28 = vld [vmem:[#allocation90_spill] sm:$0xff] }
 0x701   :  { %v6048_v31 = vmax.f32 %v5920_v10, 0.0  ;;  %v5618_v7 = vpop.f32.mrb[168].mxu0 }
 0x702   :  { %v6123_v19 = vpack.c.bf16 %v6047_v46, %v6045_v29  ;;  %v7632_v58 = vadd.f32 %v5618_v7, %v15116_v62  ;;  %v5620_v2 = vpop.f32.mrb[169].mxu0 }
 0x703   :  { %v7633_v52 = vadd.f32 %v5620_v2, %v15117_v0  ;;  %v5622_v26 = vpop.f32.mrb[170].mxu0  ;;  %v6124_v1 = vpack.c.bf16 %v6048_v31, %v6046_v41  ;;  %v15126_v31 = vld [vmem:[#allocation156_spill] sm:$0xff]  ;;  %v15127_v2 = vld [vmem:[#allocation157_spill] sm:$0xff] }
 0x704   :  { %v5921_v63 = vadd.f32 %v7632_v58, %v12824_v45  ;;  %v7634_v4 = vadd.f32 %v5622_v26, %v15118_v12  ;;  %v5624_v18 = vpop.f32.mrb[171].mxu0 }
 0x705   :  { %v5922_v33 = vadd.f32 %v7633_v52, %v12826_v17  ;;  %v7635_v21 = vadd.f32 %v5624_v18, %v15119_v20  ;;  %6497 = vmatprep.mubr.bf16.mxu1 %v6124_v1 }
 0x706   :  { %v5923_v42 = vadd.f32 %v7634_v4, %v12824_v45  ;;  %6498 = vmatmul.mubr.bf16.gmra.mrb[56].mxu1 %v6123_v19  ;;  %v6049_v53 = vmax.f32 %v5921_v63, 0.0 }
 0x707   :  { %v5924_v38 = vadd.f32 %v7635_v21, %v12826_v17  ;;  %v6050_v57 = vmax.f32 %v5922_v33, 0.0 }
 0x708   :  { %v6051_v39 = vmax.f32 %v5923_v42, 0.0 }
 0x709   :  { %v6052_v3 = vmax.f32 %v5924_v38, 0.0  ;;  %v5628_v51 = vpop.f32.mrb[172].mxu0 }
 0x70a   :  { %v6125_v40 = vpack.c.bf16 %v6051_v39, %v6049_v53  ;;  %v7636_v47 = vadd.f32 %v5628_v51, %v15120_v13  ;;  %v5630_v6 = vpop.f32.mrb[173].mxu0 }
 0x70b   :  { %v7637_v50 = vadd.f32 %v5630_v6, %v15121_v24  ;;  %v5632_v34 = vpop.f32.mrb[174].mxu0  ;;  %v6126_v15 = vpack.c.bf16 %v6052_v3, %v6050_v57  ;;  %v15128_v57 = vld [vmem:[#allocation94_spill] sm:$0xff]  ;;  %v15129_v6 = vld [vmem:[#allocation93_spill] sm:$0xff] }
 0x70c   :  { %v5925_v9 = vadd.f32 %v7636_v47, %v12824_v45  ;;  %v7638_v8 = vadd.f32 %v5632_v34, %v15122_v60  ;;  %v5634_v16 = vpop.f32.mrb[175].mxu0  ;;  %v15130_v60 = vld [vmem:[#allocation158_spill] sm:$0xff] }
 0x70d   :  { %v5926_v37 = vadd.f32 %v7637_v50, %v12826_v17  ;;  %v7639_v23 = vadd.f32 %v5634_v16, %v15123_v48  ;;  %6505 = vmatprep.mubr.bf16.mxu1 %v6126_v15 }
 0x70e   :  { %v5927_v55 = vadd.f32 %v7638_v8, %v12824_v45  ;;  %6506 = vmatmul.mubr.bf16.gmra.mrb[60].mxu1 %v6125_v40  ;;  %v6053_v5 = vmax.f32 %v5925_v9, 0.0 }
 0x70f   :  { %v5928_v30 = vadd.f32 %v7639_v23, %v12826_v17  ;;  %v6299_v43 = vpop.f32.mrb[212].mxu1  ;;  %v6054_v44 = vmax.f32 %v5926_v37, 0.0  ;;  %v15131_v23 = vld [vmem:[#allocation159_spill] sm:$0xff] }
 0x710   :  { %v6055_v49 = vmax.f32 %v5927_v55, 0.0  ;;  %v6301_v56 = vpop.f32.mrb[213].mxu1  ;;  %v6555_v32 = vsel %vm6554_vm6, %v6299_v43, 0.0 }
 0x711   :  { %v6056_v27 = vmax.f32 %v5928_v30, 0.0  ;;  %v5638_v25 = vpop.f32.mrb[176].mxu0  ;;  %v6302_v59 = vpop.f32.mrb[214].mxu1 }
 0x712   :  { %v6127_v14 = vpack.c.bf16 %v6055_v49, %v6053_v5  ;;  %v7640_v11 = vadd.f32 %v5638_v25, %v15124_v22  ;;  %v6556_v54 = vsel %vm6554_vm6, %v6302_v59, 0.0  ;;  %v5640_v35 = vpop.f32.mrb[177].mxu0  ;;  %v6304_v61 = vpop.f32.mrb[215].mxu1 }
 0x713   :  { %v6557_v36 = vadd.f32 %v6556_v54, %v6555_v32  ;;  %v7641_v10 = vadd.f32 %v5640_v35, %v15125_v28  ;;  %v5642_v29 = vpop.f32.mrb[178].mxu0  ;;  %v6128_v46 = vpack.c.bf16 %v6056_v27, %v6054_v44  ;;  %v15132_v61 = vld [vmem:[#allocation97_spill] sm:$0xff] }
 0x714   :  { %v5929_v41 = vadd.f32 %v7640_v11, %v12824_v45  ;;  %v7642_v7 = vadd.f32 %v5642_v29, %v15126_v31  ;;  %v5644_v19 = vpop.f32.mrb[179].mxu0  ;;  %v15133_v31 = vld [vmem:[#allocation96_spill] sm:$0xff] }
 0x715   :  { %v6558_v62 = vrot.slane %v6557_v36, 4  ;;  %v5930_v58 = vadd.f32 %v7641_v10, %v12826_v17  ;;  %v7643_v0 = vadd.f32 %v5644_v19, %v15127_v2  ;;  %6513 = vmatprep.mubr.bf16.mxu1 %v6128_v46  ;;  %v15134_v2 = vld [vmem:[#allocation160_spill] sm:$0xff] }
 0x716   :  { %v5931_v52 = vadd.f32 %v7642_v7, %v12824_v45  ;;  %6514 = vmatmul.mubr.bf16.gmra.mrb[64].mxu1 %v6127_v14  ;;  %v6057_v12 = vmax.f32 %v5929_v41, 0.0 }
 0x717   :  { %v6559_v26 = vadd.f32 %v6558_v62, %v6557_v36  ;;  %v5932_v1 = vadd.f32 %v7643_v0, %v12826_v17  ;;  %v6307_v63 = vpop.f32.mrb[216].mxu1  ;;  %v6058_v20 = vmax.f32 %v5930_v58, 0.0 }
 0x718   :  { %v6059_v4 = vmax.f32 %v5931_v52, 0.0  ;;  %v6309_v18 = vpop.f32.mrb[217].mxu1  ;;  %v6564_v39 = vsel %vm6554_vm6, %v6307_v63, 0.0 }
 0x719   :  { %v6560_v33 = vrot.slane %v6559_v26, 2  ;;  %v6060_v21 = vmax.f32 %v5932_v1, 0.0  ;;  %v5648_v42 = vpop.f32.mrb[180].mxu0  ;;  %v6310_v38 = vpop.f32.mrb[218].mxu1 }
 0x71a   :  { %v6129_v53 = vpack.c.bf16 %v6059_v4, %v6057_v12  ;;  %v7644_v3 = vadd.f32 %v5648_v42, %v15128_v57  ;;  %v6565_v51 = vsel %vm6554_vm6, %v6310_v38, 0.0  ;;  %v5650_v40 = vpop.f32.mrb[181].mxu0  ;;  %v6312_v13 = vpop.f32.mrb[219].mxu1  ;;  %v15135_v4 = vld [vmem:[#allocation161_spill] sm:$0xff] }
 0x71b   :  { %v6566_v47 = vadd.f32 %v6565_v51, %v6564_v39  ;;  %v7645_v24 = vadd.f32 %v5650_v40, %v15129_v6  ;;  %v5652_v50 = vpop.f32.mrb[182].mxu0  ;;  %v6130_v34 = vpack.c.bf16 %v6060_v21, %v6058_v20  ;;  %v6561_v15 = vadd.f32 %v6560_v33, %v6559_v26  ;;  %v13075_v20 = vld [vmem:[%s13228_s8] ss:$0 sm:$0xff] }
 0x71c   :  { %v5933_v9 = vadd.f32 %v7644_v3, %v12824_v45  ;;  %v7646_v8 = vadd.f32 %v5652_v50, %v15130_v60  ;;  %v5654_v16 = vpop.f32.mrb[183].mxu0 }
 0x71d   :  { %v6567_v37 = vrot.slane %v6566_v47, 4  ;;  %v5934_v48 = vadd.f32 %v7645_v24, %v12826_v17  ;;  %v7647_v55 = vadd.f32 %v5654_v16, %v15131_v23  ;;  %6521 = vmatprep.mubr.bf16.mxu1 %v6130_v34  ;;  %v6562_v56 = vrot.slane %v6561_v15, 1 }
 0x71e   :  { %v5935_v30 = vadd.f32 %v7646_v8, %v12824_v45  ;;  %6522 = vmatmul.mubr.bf16.gmra.mrb[68].mxu1 %v6129_v53  ;;  %v6061_v44 = vmax.f32 %v5933_v9, 0.0  ;;  %v15136_v9 = vld [vmem:[#allocation100_spill] sm:$0xff] }
 0x71f   :  { %v6568_v43 = vadd.f32 %v6567_v37, %v6566_v47  ;;  %v5936_v5 = vadd.f32 %v7647_v55, %v12826_v17  ;;  %v6315_v49 = vpop.f32.mrb[220].mxu1  ;;  %v6062_v14 = vmax.f32 %v5934_v48, 0.0  ;;  %v6563_v62 = vadd.f32 %v6562_v56, %v6561_v15 }
 0x720   :  { %v6063_v27 = vmax.f32 %v5935_v30, 0.0  ;;  %v6317_v25 = vpop.f32.mrb[221].mxu1  ;;  %v6573_v35 = vsel %vm6554_vm6, %v6315_v49, 0.0  ;;  %v15137_v30 = vld [vmem:[#allocation99_spill] sm:$0xff] }
 0x721   :  { %v6569_v59 = vrot.slane %v6568_v43, 2  ;;  %v6064_v32 = vmax.f32 %v5936_v5, 0.0  ;;  %v5658_v22 = vpop.f32.mrb[184].mxu0  ;;  %v6318_v11 = vpop.f32.mrb[222].mxu1  ;;  %v6843_v39 = vmul.f32 0.0625, %v6563_v62 }
 0x722   :  { %v6131_v54 = vpack.c.bf16 %v6063_v27, %v6061_v44  ;;  %v7648_v36 = vadd.f32 %v5658_v22, %v15132_v61  ;;  %v6574_v28 = vsel %vm6554_vm6, %v6318_v11, 0.0  ;;  %v5660_v10 = vpop.f32.mrb[185].mxu0  ;;  %v6320_v29 = vpop.f32.mrb[223].mxu1  ;;  %v15138_v44 = vld [vmem:[#allocation162_spill] sm:$0xff] }
 0x723   :  { %v6570_v46 = vadd.f32 %v6569_v59, %v6568_v43  ;;  %v6575_v41 = vadd.f32 %v6574_v28, %v6573_v35  ;;  %v7649_v7 = vadd.f32 %v5660_v10, %v15133_v31  ;;  %v5662_v19 = vpop.f32.mrb[186].mxu0  ;;  %v6132_v26 = vpack.c.bf16 %v6064_v32, %v6062_v14  ;;  %v15139_v35 = vld [vmem:[#allocation163_spill] sm:$0xff] }
 0x724   :  { %v5937_v58 = vadd.f32 %v7648_v36, %v12824_v45  ;;  %v7650_v0 = vadd.f32 %v5662_v19, %v15134_v2  ;;  %v5664_v52 = vpop.f32.mrb[187].mxu0  ;;  %v6882_v49 = vadd.f32 %v13075_v20, %v6843_v39 }
 0x725   :  { %v6571_v1 = vrot.slane %v6570_v46, 1  ;;  %v6576_v63 = vrot.slane %v6575_v41, 4  ;;  %v5938_v12 = vadd.f32 %v7649_v7, %v12826_v17  ;;  %v7651_v18 = vadd.f32 %v5664_v52, %v15135_v4  ;;  %6529 = vmatprep.mubr.bf16.mxu1 %v6132_v26 }
 0x726   :  { %v5939_v33 = vadd.f32 %v7650_v0, %v12824_v45  ;;  %6530 = vmatmul.mubr.bf16.gmra.mrb[72].mxu1 %v6131_v54  ;;  %v6065_v57 = vmax.f32 %v5937_v58, 0.0 }
 0x727   :  { %v6572_v21 = vadd.f32 %v6571_v1, %v6570_v46  ;;  %v6577_v42 = vadd.f32 %v6576_v63, %v6575_v41  ;;  %v5940_v38 = vadd.f32 %v7651_v18, %v12826_v17  ;;  %v6323_v53 = vpop.f32.mrb[224].mxu1  ;;  %v6066_v47 = vmax.f32 %v5938_v12, 0.0 }
 0x728   :  { %v6067_v3 = vmax.f32 %v5939_v33, 0.0  ;;  %v6325_v51 = vpop.f32.mrb[225].mxu1  ;;  %v6582_v15 = vsel %vm6554_vm6, %v6323_v53, 0.0 }
 0x729   :  { %v6844_v40 = vmul.f32 0.0625, %v6572_v21  ;;  %v6578_v13 = vrot.slane %v6577_v42, 2  ;;  %v6068_v6 = vmax.f32 %v5940_v38, 0.0  ;;  %v5668_v24 = vpop.f32.mrb[188].mxu0  ;;  %v6326_v50 = vpop.f32.mrb[226].mxu1 }
 0x72a   :  { %v6133_v34 = vpack.c.bf16 %v6067_v3, %v6065_v57  ;;  %v7652_v60 = vadd.f32 %v5668_v24, %v15136_v9  ;;  %v6583_v8 = vsel %vm6554_vm6, %v6326_v50, 0.0  ;;  %v5670_v16 = vpop.f32.mrb[189].mxu0  ;;  %v6328_v37 = vpop.f32.mrb[227].mxu1 }
 0x72b   :  { %v6883_v48 = vadd.f32 %v13075_v20, %v6844_v40  ;;  %v6579_v23 = vadd.f32 %v6578_v13, %v6577_v42  ;;  %v6584_v55 = vadd.f32 %v6583_v8, %v6582_v15  ;;  %v7653_v43 = vadd.f32 %v5670_v16, %v15137_v30  ;;  %v5672_v5 = vpop.f32.mrb[190].mxu0 }
 0x72c   :  { %v5941_v56 = vadd.f32 %v7652_v60, %v12824_v45  ;;  %v7654_v27 = vadd.f32 %v5672_v5, %v15138_v44  ;;  %v5674_v25 = vpop.f32.mrb[191].mxu0  ;;  %v6134_v59 = vpack.c.bf16 %v6068_v6, %v6066_v47 }
 0x72d   :  { %v6946_v14 = vrot.slane %v6883_v48, 7  ;;  %v6580_v32 = vrot.slane %v6579_v23, 1  ;;  %v6585_v22 = vrot.slane %v6584_v55, 4  ;;  %v5942_v11 = vadd.f32 %v7653_v43, %v12826_v17 }
 0x72e   :  { %v5943_v54 = vadd.f32 %v7654_v27, %v12824_v45  ;;  %v7655_v61 = vadd.f32 %v5674_v25, %v15139_v35  ;;  %6537 = vmatprep.mubr.bf16.mxu1 %v6134_v59  ;;  %v6069_v46 = vmax.f32 %v5941_v56, 0.0 }
 0x72f   :  { %v6948_v36 = vsel %vm6947_vm7, %v6946_v14, %v6882_v49  ;;  %v6581_v28 = vadd.f32 %v6580_v32, %v6579_v23  ;;  %v6586_v10 = vadd.f32 %v6585_v22, %v6584_v55  ;;  %6538 = vmatmul.mubr.bf16.gmra.mrb[76].mxu1 %v6133_v34  ;;  %v6331_v29 = vpop.f32.mrb[228].mxu1  ;;  %v6070_v58 = vmax.f32 %v5942_v11, 0.0 }
 0x730   :  { %v6071_v41 = vmax.f32 %v5943_v54, 0.0  ;;  %v5944_v31 = vadd.f32 %v7655_v61, %v12826_v17  ;;  %v6333_v7 = vpop.f32.mrb[229].mxu1  ;;  %v6591_v52 = vsel %vm6554_vm6, %v6331_v29, 0.0 }
 0x731   :  { %v6845_v19 = vmul.f32 0.0625, %v6581_v28  ;;  %v6587_v62 = vrot.slane %v6586_v10, 2  ;;  %v6334_v2 = vpop.f32.mrb[230].mxu1 }
 0x732   :  { %v6135_v0 = vpack.c.bf16 %v6071_v41, %v6069_v46  ;;  %v6072_v45 = vmax.f32 %v5944_v31, 0.0  ;;  %v6592_v26 = vsel %vm6554_vm6, %v6334_v2, 0.0  ;;  %v6336_v1 = vpop.f32.mrb[231].mxu1 }
 0x733   :  { %v6884_v63 = vadd.f32 %v13075_v20, %v6845_v19  ;;  %v6588_v12 = vadd.f32 %v6587_v62, %v6586_v10  ;;  %v6593_v4 = vadd.f32 %v6592_v26, %v6591_v52 }
 0x734   :  { %v6136_v18 = vpack.c.bf16 %v6072_v45, %v6070_v58 }
 0x735   :  { %v6949_v33 = vrot.slane %v6884_v63, 6  ;;  %v6589_v17 = vrot.slane %v6588_v12, 1  ;;  %v6594_v21 = vrot.slane %v6593_v4, 4 }
 0x736   :  { %6545 = vmatprep.mubr.bf16.mxu1 %v6136_v18 }
 0x737   :  { %v6951_v42 = vsel %vm6950_vm9, %v6949_v33, %v6948_v36  ;;  %v6590_v38 = vadd.f32 %v6589_v17, %v6588_v12  ;;  %v6595_v53 = vadd.f32 %v6594_v21, %v6593_v4  ;;  %6546 = vmatmul.mubr.bf16.gmra.mrb[80].mxu1 %v6135_v0  ;;  %v6339_v39 = vpop.f32.mrb[232].mxu1 }
 0x738   :  { %v6341_v57 = vpop.f32.mrb[233].mxu1  ;;  %v6600_v13 = vsel %vm6554_vm6, %v6339_v39, 0.0 }
 0x739   :  { %v6846_v3 = vmul.f32 0.0625, %v6590_v38  ;;  %v6596_v51 = vrot.slane %v6595_v53, 2  ;;  %v6342_v40 = vpop.f32.mrb[234].mxu1 }
 0x73a   :  { %v6601_v47 = vsel %vm6554_vm6, %v6342_v40, 0.0  ;;  %v6344_v6 = vpop.f32.mrb[235].mxu1 }
 0x73b   :  { %v6885_v24 = vadd.f32 %v13075_v20, %v6846_v3  ;;  %v6597_v50 = vadd.f32 %v6596_v51, %v6595_v53  ;;  %v6602_v34 = vadd.f32 %v6601_v47, %v6600_v13 }
 0x73d   :  { %v6952_v15 = vrot.slane %v6885_v24, 5  ;;  %v6598_v9 = vrot.slane %v6597_v50, 1  ;;  %v6603_v60 = vrot.slane %v6602_v34, 4 }
 0x73f   :  { %v6954_v8 = vsel %vm6953_vm5, %v6952_v15, %v6951_v42  ;;  %v6599_v16 = vadd.f32 %v6598_v9, %v6597_v50  ;;  %v6604_v37 = vadd.f32 %v6603_v60, %v6602_v34  ;;  %v6347_v48 = vpop.f32.mrb[236].mxu1 }
 0x740   :  { %v6349_v23 = vpop.f32.mrb[237].mxu1  ;;  %v6609_v5 = vsel %vm6554_vm6, %v6347_v48, 0.0 }
 0x741   :  { %v6847_v55 = vmul.f32 0.0625, %v6599_v16  ;;  %v6605_v30 = vrot.slane %v6604_v37, 2  ;;  %v6350_v43 = vpop.f32.mrb[238].mxu1 }
 0x742   :  { %v6610_v49 = vsel %vm6554_vm6, %v6350_v43, 0.0  ;;  %v6352_v56 = vpop.f32.mrb[239].mxu1 }
 0x743   :  { %v6886_v44 = vadd.f32 %v13075_v20, %v6847_v55  ;;  %v6606_v27 = vadd.f32 %v6605_v30, %v6604_v37  ;;  %v6611_v25 = vadd.f32 %v6610_v49, %v6609_v5 }
 0x745   :  { %v6955_v59 = vrot.slane %v6886_v44, 4  ;;  %v6607_v14 = vrot.slane %v6606_v27, 1  ;;  %v6612_v32 = vrot.slane %v6611_v25, 4 }
 0x747   :  { %v6957_v22 = vsel %vm6956_vm10, %v6955_v59, %v6954_v8  ;;  %v6608_v11 = vadd.f32 %v6607_v14, %v6606_v27  ;;  %v6613_v54 = vadd.f32 %v6612_v32, %v6611_v25  ;;  %v6355_v35 = vpop.f32.mrb[240].mxu1 }
 0x748   :  { %v6357_v61 = vpop.f32.mrb[241].mxu1  ;;  %v6618_v29 = vsel %vm6554_vm6, %v6355_v35, 0.0 }
 0x749   :  { %v6848_v36 = vmul.f32 0.0625, %v6608_v11  ;;  %v6614_v28 = vrot.slane %v6613_v54, 2  ;;  %v6358_v10 = vpop.f32.mrb[242].mxu1 }
 0x74a   :  { %v6619_v46 = vsel %vm6554_vm6, %v6358_v10, 0.0  ;;  %v6360_v41 = vpop.f32.mrb[243].mxu1 }
 0x74b   :  { %v6887_v31 = vadd.f32 %v13075_v20, %v6848_v36  ;;  %v6615_v7 = vadd.f32 %v6614_v28, %v6613_v54  ;;  %v6620_v19 = vadd.f32 %v6619_v46, %v6618_v29 }
 0x74d   :  { %v6958_v62 = vrot.slane %v6887_v31, 3  ;;  %v6616_v58 = vrot.slane %v6615_v7, 1  ;;  %v6621_v2 = vrot.slane %v6620_v19, 4 }
 0x74f   :  { %v6960_v0 = vsel %vm6959_vm0, %v6958_v62, %v6957_v22  ;;  %v6617_v45 = vadd.f32 %v6616_v58, %v6615_v7  ;;  %v6622_v52 = vadd.f32 %v6621_v2, %v6620_v19  ;;  %v6363_v26 = vpop.f32.mrb[244].mxu1 }
 0x750   :  { %v6365_v1 = vpop.f32.mrb[245].mxu1  ;;  %v6627_v18 = vsel %vm6554_vm6, %v6363_v26, 0.0 }
 0x751   :  { %v6849_v63 = vmul.f32 0.0625, %v6617_v45  ;;  %v6623_v12 = vrot.slane %v6622_v52, 2  ;;  %v6366_v4 = vpop.f32.mrb[246].mxu1 }
 0x752   :  { %v6628_v33 = vsel %vm6554_vm6, %v6366_v4, 0.0  ;;  %v6368_v17 = vpop.f32.mrb[247].mxu1 }
 0x753   :  { %v6888_v21 = vadd.f32 %v13075_v20, %v6849_v63  ;;  %v6624_v42 = vadd.f32 %v6623_v12, %v6622_v52  ;;  %v6629_v38 = vadd.f32 %v6628_v33, %v6627_v18 }
 0x755   :  { %v6961_v53 = vrot.slane %v6888_v21, 2  ;;  %v6625_v39 = vrot.slane %v6624_v42, 1  ;;  %v6630_v57 = vrot.slane %v6629_v38, 4 }
 0x757   :  { %v6963_v3 = vsel %vm6962_vm1, %v6961_v53, %v6960_v0  ;;  %v6626_v51 = vadd.f32 %v6625_v39, %v6624_v42  ;;  %v6631_v40 = vadd.f32 %v6630_v57, %v6629_v38  ;;  %v6371_v13 = vpop.f32.mrb[248].mxu1 }
 0x758   :  { %v6373_v47 = vpop.f32.mrb[249].mxu1  ;;  %v6636_v34 = vsel %vm6554_vm6, %v6371_v13, 0.0 }
 0x759   :  { %v6850_v6 = vmul.f32 0.0625, %v6626_v51  ;;  %v6632_v24 = vrot.slane %v6631_v40, 2  ;;  %v6374_v50 = vpop.f32.mrb[250].mxu1 }
 0x75a   :  { %v6637_v15 = vsel %vm6554_vm6, %v6374_v50, 0.0  ;;  %v6376_v9 = vpop.f32.mrb[251].mxu1 }
 0x75b   :  { %v6889_v60 = vadd.f32 %v13075_v20, %v6850_v6  ;;  %v6638_v8 = vadd.f32 %v6637_v15, %v6636_v34  ;;  %v6633_v37 = vadd.f32 %v6632_v24, %v6631_v40 }
 0x75d   :  { %v6964_v16 = vrot.slane %v6889_v60, 1  ;;  %v6639_v48 = vrot.slane %v6638_v8, 4  ;;  %v6634_v5 = vrot.slane %v6633_v37, 1 }
 0x75f   :  { %v6966_v23 = vsel %vm6965_vm4, %v6964_v16, %v6963_v3  ;;  %v6640_v55 = vadd.f32 %v6639_v48, %v6638_v8  ;;  %v6379_v30 = vpop.f32.mrb[252].mxu1  ;;  %v6635_v32 = vadd.f32 %v6634_v5, %v6633_v37 }
 0x760   :  { %7013 = vst.msk [vmem:[%s13229_s9] sm:$0xff] %vm6554_vm6, %v6966_v23  ;;  %v6381_v43 = vpop.f32.mrb[253].mxu1  ;;  %v6645_v44 = vsel %vm6554_vm6, %v6379_v30, 0.0 }
 0x761   :  { %v6641_v49 = vrot.slane %v6640_v55, 2  ;;  %v6382_v56 = vpop.f32.mrb[254].mxu1  ;;  %v6851_v61 = vmul.f32 0.0625, %v6635_v32 }
 0x762   :  { %v6646_v27 = vsel %vm6554_vm6, %v6382_v56, 0.0  ;;  %v6384_v25 = vpop.f32.mrb[255].mxu1 }
 0x763   :  { %v6642_v59 = vadd.f32 %v6641_v49, %v6640_v55  ;;  %v6647_v14 = vadd.f32 %v6646_v27, %v6645_v44  ;;  %v6890_v58 = vadd.f32 %v13075_v20, %v6851_v61 }
 0x765   :  { %v6643_v22 = vrot.slane %v6642_v59, 1  ;;  %v6648_v11 = vrot.slane %v6647_v14, 4 }
 0x767   :  { %v6644_v54 = vadd.f32 %v6643_v22, %v6642_v59  ;;  %v6649_v35 = vadd.f32 %v6648_v11, %v6647_v14 }
 0x769   :  { %v6852_v36 = vmul.f32 0.0625, %v6644_v54  ;;  %v6650_v28 = vrot.slane %v6649_v35, 2  ;;  %v6387_v10 = vpop.f32.mrb[0].mxu1 }
 0x76a   :  { %v6389_v29 = vpop.f32.mrb[1].mxu1  ;;  %v6654_v7 = vsel %vm6554_vm6, %v6387_v10, 0.0 }
 0x76b   :  { %v6891_v46 = vadd.f32 %v13075_v20, %v6852_v36  ;;  %v6651_v41 = vadd.f32 %v6650_v28, %v6649_v35  ;;  %v6390_v31 = vpop.f32.mrb[2].mxu1 }
 0x76c   :  { %v6655_v19 = vsel %vm6554_vm6, %v6390_v31, 0.0  ;;  %v6392_v62 = vpop.f32.mrb[3].mxu1 }
 0x76d   :  { %v6967_v2 = vrot.slane %v6891_v46, 7  ;;  %v6652_v0 = vrot.slane %v6651_v41, 1  ;;  %v6656_v45 = vadd.f32 %v6655_v19, %v6654_v7 }
 0x76f   :  { %v6968_v52 = vsel %vm6947_vm7, %v6967_v2, %v6890_v58  ;;  %v6653_v26 = vadd.f32 %v6652_v0, %v6651_v41  ;;  %v6657_v1 = vrot.slane %v6656_v45, 4 }
 0x771   :  { %v6853_v63 = vmul.f32 0.0625, %v6653_v26  ;;  %v6658_v12 = vadd.f32 %v6657_v1, %v6656_v45  ;;  %v6395_v4 = vpop.f32.mrb[4].mxu1 }
 0x772   :  { %v6397_v18 = vpop.f32.mrb[5].mxu1  ;;  %v6663_v42 = vsel %vm6554_vm6, %v6395_v4, 0.0 }
 0x773   :  { %v6892_v33 = vadd.f32 %v13075_v20, %v6853_v63  ;;  %v6659_v17 = vrot.slane %v6658_v12, 2  ;;  %v6398_v21 = vpop.f32.mrb[6].mxu1 }
 0x774   :  { %v6664_v38 = vsel %vm6554_vm6, %v6398_v21, 0.0  ;;  %v6400_v53 = vpop.f32.mrb[7].mxu1 }
 0x775   :  { %v6969_v39 = vrot.slane %v6892_v33, 6  ;;  %v6660_v57 = vadd.f32 %v6659_v17, %v6658_v12  ;;  %v6665_v3 = vadd.f32 %v6664_v38, %v6663_v42 }
 0x777   :  { %v6970_v51 = vsel %vm6950_vm9, %v6969_v39, %v6968_v52  ;;  %v6661_v40 = vrot.slane %v6660_v57, 1  ;;  %v6666_v13 = vrot.slane %v6665_v3, 4 }
 0x779   :  { %v6662_v47 = vadd.f32 %v6661_v40, %v6660_v57  ;;  %v6667_v6 = vadd.f32 %v6666_v13, %v6665_v3  ;;  %v6403_v24 = vpop.f32.mrb[8].mxu1 }
 0x77a   :  { %v6405_v50 = vpop.f32.mrb[9].mxu1  ;;  %v6672_v60 = vsel %vm6554_vm6, %v6403_v24, 0.0 }
 0x77b   :  { %v6854_v34 = vmul.f32 0.0625, %v6662_v47  ;;  %v6668_v15 = vrot.slane %v6667_v6, 2  ;;  %v6406_v9 = vpop.f32.mrb[10].mxu1 }
 0x77c   :  { %v6673_v8 = vsel %vm6554_vm6, %v6406_v9, 0.0  ;;  %v6408_v16 = vpop.f32.mrb[11].mxu1 }
 0x77d   :  { %v6893_v37 = vadd.f32 %v13075_v20, %v6854_v34  ;;  %v6669_v48 = vadd.f32 %v6668_v15, %v6667_v6  ;;  %v6674_v23 = vadd.f32 %v6673_v8, %v6672_v60 }
 0x77f   :  { %v6971_v55 = vrot.slane %v6893_v37, 5  ;;  %v6670_v30 = vrot.slane %v6669_v48, 1  ;;  %v6675_v43 = vrot.slane %v6674_v23, 4 }
 0x781   :  { %v6972_v5 = vsel %vm6953_vm5, %v6971_v55, %v6970_v51  ;;  %v6671_v49 = vadd.f32 %v6670_v30, %v6669_v48  ;;  %v6676_v56 = vadd.f32 %v6675_v43, %v6674_v23  ;;  %v6411_v44 = vpop.f32.mrb[12].mxu1 }
 0x782   :  { %v6413_v27 = vpop.f32.mrb[13].mxu1  ;;  %v6681_v32 = vsel %vm6554_vm6, %v6411_v44, 0.0 }
 0x783   :  { %v6855_v25 = vmul.f32 0.0625, %v6671_v49  ;;  %v6677_v59 = vrot.slane %v6676_v56, 2  ;;  %v6414_v14 = vpop.f32.mrb[14].mxu1 }
 0x784   :  { %v6682_v22 = vsel %vm6554_vm6, %v6414_v14, 0.0  ;;  %v6416_v11 = vpop.f32.mrb[15].mxu1 }
 0x785   :  { %v6894_v54 = vadd.f32 %v13075_v20, %v6855_v25  ;;  %v6678_v35 = vadd.f32 %v6677_v59, %v6676_v56  ;;  %v6683_v61 = vadd.f32 %v6682_v22, %v6681_v32 }
 0x787   :  { %v6973_v36 = vrot.slane %v6894_v54, 4  ;;  %v6679_v28 = vrot.slane %v6678_v35, 1  ;;  %v6684_v10 = vrot.slane %v6683_v61, 4 }
 0x789   :  { %v6974_v29 = vsel %vm6956_vm10, %v6973_v36, %v6972_v5  ;;  %v6680_v46 = vadd.f32 %v6679_v28, %v6678_v35  ;;  %v6685_v41 = vadd.f32 %v6684_v10, %v6683_v61  ;;  %v6419_v31 = vpop.f32.mrb[16].mxu1 }
 0x78a   :  { %v6421_v7 = vpop.f32.mrb[17].mxu1  ;;  %v6690_v2 = vsel %vm6554_vm6, %v6419_v31, 0.0 }
 0x78b   :  { %v6856_v19 = vmul.f32 0.0625, %v6680_v46  ;;  %v6686_v62 = vrot.slane %v6685_v41, 2  ;;  %v6422_v58 = vpop.f32.mrb[18].mxu1 }
 0x78c   :  { %v6691_v0 = vsel %vm6554_vm6, %v6422_v58, 0.0  ;;  %v6424_v45 = vpop.f32.mrb[19].mxu1 }
 0x78d   :  { %v6895_v52 = vadd.f32 %v13075_v20, %v6856_v19  ;;  %v6687_v26 = vadd.f32 %v6686_v62, %v6685_v41  ;;  %v6692_v1 = vadd.f32 %v6691_v0, %v6690_v2 }
 0x78f   :  { %v6975_v63 = vrot.slane %v6895_v52, 3  ;;  %v6688_v12 = vrot.slane %v6687_v26, 1  ;;  %v6693_v4 = vrot.slane %v6692_v1, 4 }
 0x791   :  { %v6976_v18 = vsel %vm6959_vm0, %v6975_v63, %v6974_v29  ;;  %v6689_v33 = vadd.f32 %v6688_v12, %v6687_v26  ;;  %v6694_v17 = vadd.f32 %v6693_v4, %v6692_v1  ;;  %v6427_v21 = vpop.f32.mrb[20].mxu1 }
 0x792   :  { %v6429_v42 = vpop.f32.mrb[21].mxu1  ;;  %v6699_v57 = vsel %vm6554_vm6, %v6427_v21, 0.0 }
 0x793   :  { %v6857_v38 = vmul.f32 0.0625, %v6689_v33  ;;  %v6695_v53 = vrot.slane %v6694_v17, 2  ;;  %v6430_v39 = vpop.f32.mrb[22].mxu1 }
 0x794   :  { %v6700_v3 = vsel %vm6554_vm6, %v6430_v39, 0.0  ;;  %v6432_v51 = vpop.f32.mrb[23].mxu1 }
 0x795   :  { %v6896_v40 = vadd.f32 %v13075_v20, %v6857_v38  ;;  %v6696_v13 = vadd.f32 %v6695_v53, %v6694_v17  ;;  %v6701_v47 = vadd.f32 %v6700_v3, %v6699_v57 }
 0x797   :  { %v6977_v6 = vrot.slane %v6896_v40, 2  ;;  %v6697_v24 = vrot.slane %v6696_v13, 1  ;;  %v6702_v50 = vrot.slane %v6701_v47, 4 }
 0x799   :  { %v6978_v34 = vsel %vm6962_vm1, %v6977_v6, %v6976_v18  ;;  %v6698_v15 = vadd.f32 %v6697_v24, %v6696_v13  ;;  %v6703_v9 = vadd.f32 %v6702_v50, %v6701_v47  ;;  %v6435_v60 = vpop.f32.mrb[24].mxu1 }
 0x79a   :  { %v6437_v8 = vpop.f32.mrb[25].mxu1  ;;  %v6708_v23 = vsel %vm6554_vm6, %v6435_v60, 0.0 }
 0x79b   :  { %v6858_v16 = vmul.f32 0.0625, %v6698_v15  ;;  %v6704_v37 = vrot.slane %v6703_v9, 2  ;;  %v6438_v48 = vpop.f32.mrb[26].mxu1 }
 0x79c   :  { %v6709_v55 = vsel %vm6554_vm6, %v6438_v48, 0.0  ;;  %v6440_v30 = vpop.f32.mrb[27].mxu1 }
 0x79d   :  { %v6897_v43 = vadd.f32 %v13075_v20, %v6858_v16  ;;  %v6710_v5 = vadd.f32 %v6709_v55, %v6708_v23  ;;  %v6705_v56 = vadd.f32 %v6704_v37, %v6703_v9 }
 0x79f   :  { %v6979_v49 = vrot.slane %v6897_v43, 1  ;;  %v6711_v44 = vrot.slane %v6710_v5, 4  ;;  %v6706_v32 = vrot.slane %v6705_v56, 1 }
 0x7a1   :  { %v6980_v27 = vsel %vm6965_vm4, %v6979_v49, %v6978_v34  ;;  %v6712_v25 = vadd.f32 %v6711_v44, %v6710_v5  ;;  %v6443_v59 = vpop.f32.mrb[28].mxu1  ;;  %v6707_v10 = vadd.f32 %v6706_v32, %v6705_v56 }
 0x7a2   :  { %7014 = vst.msk [vmem:[%s13229_s9 + $0x8] sm:$0xff] %vm6554_vm6, %v6980_v27  ;;  %v6445_v14 = vpop.f32.mrb[29].mxu1  ;;  %v6717_v54 = vsel %vm6554_vm6, %v6443_v59, 0.0 }
 0x7a3   :  { %v6713_v22 = vrot.slane %v6712_v25, 2  ;;  %v6446_v11 = vpop.f32.mrb[30].mxu1  ;;  %v6859_v62 = vmul.f32 0.0625, %v6707_v10 }
 0x7a4   :  { %v6718_v35 = vsel %vm6554_vm6, %v6446_v11, 0.0  ;;  %v6448_v61 = vpop.f32.mrb[31].mxu1 }
 0x7a5   :  { %v6714_v36 = vadd.f32 %v6713_v22, %v6712_v25  ;;  %v6719_v28 = vadd.f32 %v6718_v35, %v6717_v54  ;;  %v6898_v4 = vadd.f32 %v13075_v20, %v6859_v62 }
 0x7a7   :  { %v6715_v29 = vrot.slane %v6714_v36, 1  ;;  %v6720_v46 = vrot.slane %v6719_v28, 4 }
 0x7a9   :  { %v6716_v41 = vadd.f32 %v6715_v29, %v6714_v36  ;;  %v6721_v31 = vadd.f32 %v6720_v46, %v6719_v28  ;;  %v6451_v7 = vpop.f32.mrb[32].mxu1 }
 0x7aa   :  { %v6453_v19 = vpop.f32.mrb[33].mxu1  ;;  %v6726_v45 = vsel %vm6554_vm6, %v6451_v7, 0.0 }
 0x7ab   :  { %v6860_v58 = vmul.f32 0.0625, %v6716_v41  ;;  %v6722_v2 = vrot.slane %v6721_v31, 2  ;;  %v6454_v0 = vpop.f32.mrb[34].mxu1 }
 0x7ac   :  { %v6727_v52 = vsel %vm6554_vm6, %v6454_v0, 0.0  ;;  %v6456_v26 = vpop.f32.mrb[35].mxu1 }
 0x7ad   :  { %v6899_v1 = vadd.f32 %v13075_v20, %v6860_v58  ;;  %v6723_v63 = vadd.f32 %v6722_v2, %v6721_v31  ;;  %v6728_v12 = vadd.f32 %v6727_v52, %v6726_v45 }
 0x7af   :  { %v6981_v18 = vrot.slane %v6899_v1, 7  ;;  %v6724_v33 = vrot.slane %v6723_v63, 1  ;;  %v6729_v17 = vrot.slane %v6728_v12, 4 }
 0x7b1   :  { %v6982_v21 = vsel %vm6947_vm7, %v6981_v18, %v6898_v4  ;;  %v6725_v42 = vadd.f32 %v6724_v33, %v6723_v63  ;;  %v6730_v38 = vadd.f32 %v6729_v17, %v6728_v12  ;;  %v6459_v53 = vpop.f32.mrb[36].mxu1 }
 0x7b2   :  { %v6461_v39 = vpop.f32.mrb[37].mxu1  ;;  %v6735_v40 = vsel %vm6554_vm6, %v6459_v53, 0.0 }
 0x7b3   :  { %v6861_v57 = vmul.f32 0.0625, %v6725_v42  ;;  %v6731_v3 = vrot.slane %v6730_v38, 2  ;;  %v6462_v51 = vpop.f32.mrb[38].mxu1 }
 0x7b4   :  { %v6736_v13 = vsel %vm6554_vm6, %v6462_v51, 0.0  ;;  %v6464_v47 = vpop.f32.mrb[39].mxu1 }
 0x7b5   :  { %v6900_v6 = vadd.f32 %v13075_v20, %v6861_v57  ;;  %v6732_v24 = vadd.f32 %v6731_v3, %v6730_v38  ;;  %v6737_v50 = vadd.f32 %v6736_v13, %v6735_v40 }
 0x7b7   :  { %v6983_v34 = vrot.slane %v6900_v6, 6  ;;  %v6733_v15 = vrot.slane %v6732_v24, 1  ;;  %v6738_v9 = vrot.slane %v6737_v50, 4 }
 0x7b9   :  { %v6984_v60 = vsel %vm6950_vm9, %v6983_v34, %v6982_v21  ;;  %v6734_v8 = vadd.f32 %v6733_v15, %v6732_v24  ;;  %v6739_v16 = vadd.f32 %v6738_v9, %v6737_v50  ;;  %v6467_v37 = vpop.f32.mrb[40].mxu1 }
 0x7ba   :  { %v6469_v48 = vpop.f32.mrb[41].mxu1  ;;  %v6744_v43 = vsel %vm6554_vm6, %v6467_v37, 0.0 }
 0x7bb   :  { %v6862_v23 = vmul.f32 0.0625, %v6734_v8  ;;  %v6740_v55 = vrot.slane %v6739_v16, 2  ;;  %v6470_v30 = vpop.f32.mrb[42].mxu1 }
 0x7bc   :  { %v6745_v5 = vsel %vm6554_vm6, %v6470_v30, 0.0  ;;  %v6472_v49 = vpop.f32.mrb[43].mxu1 }
 0x7bd   :  { %v6901_v56 = vadd.f32 %v13075_v20, %v6862_v23  ;;  %v6741_v44 = vadd.f32 %v6740_v55, %v6739_v16  ;;  %v6746_v27 = vadd.f32 %v6745_v5, %v6744_v43 }
 0x7bf   :  { %v6985_v25 = vrot.slane %v6901_v56, 5  ;;  %v6742_v59 = vrot.slane %v6741_v44, 1  ;;  %v6747_v14 = vrot.slane %v6746_v27, 4 }
 0x7c1   :  { %v6986_v32 = vsel %vm6953_vm5, %v6985_v25, %v6984_v60  ;;  %v6743_v22 = vadd.f32 %v6742_v59, %v6741_v44  ;;  %v6748_v11 = vadd.f32 %v6747_v14, %v6746_v27  ;;  %v6475_v54 = vpop.f32.mrb[44].mxu1 }
 0x7c2   :  { %v6477_v35 = vpop.f32.mrb[45].mxu1  ;;  %v6753_v10 = vsel %vm6554_vm6, %v6475_v54, 0.0 }
 0x7c3   :  { %v6863_v61 = vmul.f32 0.0625, %v6743_v22  ;;  %v6749_v36 = vrot.slane %v6748_v11, 2  ;;  %v6478_v28 = vpop.f32.mrb[46].mxu1 }
 0x7c4   :  { %v6754_v29 = vsel %vm6554_vm6, %v6478_v28, 0.0  ;;  %v6480_v46 = vpop.f32.mrb[47].mxu1 }
 0x7c5   :  { %v6902_v41 = vadd.f32 %v13075_v20, %v6863_v61  ;;  %v6750_v31 = vadd.f32 %v6749_v36, %v6748_v11  ;;  %v6755_v7 = vadd.f32 %v6754_v29, %v6753_v10 }
 0x7c7   :  { %v6987_v19 = vrot.slane %v6902_v41, 4  ;;  %v6751_v62 = vrot.slane %v6750_v31, 1  ;;  %v6756_v58 = vrot.slane %v6755_v7, 4 }
 0x7c9   :  { %v6988_v2 = vsel %vm6956_vm10, %v6987_v19, %v6986_v32  ;;  %v6752_v0 = vadd.f32 %v6751_v62, %v6750_v31  ;;  %v6757_v45 = vadd.f32 %v6756_v58, %v6755_v7  ;;  %v6483_v52 = vpop.f32.mrb[48].mxu1 }
 0x7ca   :  { %v6485_v26 = vpop.f32.mrb[49].mxu1  ;;  %v6762_v4 = vsel %vm6554_vm6, %v6483_v52, 0.0 }
 0x7cb   :  { %v6864_v1 = vmul.f32 0.0625, %v6752_v0  ;;  %v6758_v63 = vrot.slane %v6757_v45, 2  ;;  %v6486_v12 = vpop.f32.mrb[50].mxu1 }
 0x7cc   :  { %v6763_v18 = vsel %vm6554_vm6, %v6486_v12, 0.0  ;;  %v6488_v33 = vpop.f32.mrb[51].mxu1 }
 0x7cd   :  { %v6903_v17 = vadd.f32 %v13075_v20, %v6864_v1  ;;  %v6759_v21 = vadd.f32 %v6758_v63, %v6757_v45  ;;  %v6764_v42 = vadd.f32 %v6763_v18, %v6762_v4 }
 0x7cf   :  { %v6989_v38 = vrot.slane %v6903_v17, 3  ;;  %v6760_v53 = vrot.slane %v6759_v21, 1  ;;  %v6765_v39 = vrot.slane %v6764_v42, 4 }
 0x7d1   :  { %v6990_v57 = vsel %vm6959_vm0, %v6989_v38, %v6988_v2  ;;  %v6761_v3 = vadd.f32 %v6760_v53, %v6759_v21  ;;  %v6766_v51 = vadd.f32 %v6765_v39, %v6764_v42  ;;  %v6491_v40 = vpop.f32.mrb[52].mxu1 }
 0x7d2   :  { %v6493_v13 = vpop.f32.mrb[53].mxu1  ;;  %v6771_v50 = vsel %vm6554_vm6, %v6491_v40, 0.0 }
 0x7d3   :  { %v6865_v47 = vmul.f32 0.0625, %v6761_v3  ;;  %v6767_v6 = vrot.slane %v6766_v51, 2  ;;  %v6494_v24 = vpop.f32.mrb[54].mxu1 }
 0x7d4   :  { %v6772_v34 = vsel %vm6554_vm6, %v6494_v24, 0.0  ;;  %v6496_v15 = vpop.f32.mrb[55].mxu1 }
 0x7d5   :  { %v6904_v9 = vadd.f32 %v13075_v20, %v6865_v47  ;;  %v6768_v60 = vadd.f32 %v6767_v6, %v6766_v51  ;;  %v6773_v8 = vadd.f32 %v6772_v34, %v6771_v50 }
 0x7d7   :  { %v6991_v16 = vrot.slane %v6904_v9, 2  ;;  %v6769_v37 = vrot.slane %v6768_v60, 1  ;;  %v6774_v48 = vrot.slane %v6773_v8, 4 }
 0x7d9   :  { %v6992_v23 = vsel %vm6962_vm1, %v6991_v16, %v6990_v57  ;;  %v6770_v55 = vadd.f32 %v6769_v37, %v6768_v60  ;;  %v6775_v30 = vadd.f32 %v6774_v48, %v6773_v8  ;;  %v6499_v43 = vpop.f32.mrb[56].mxu1 }
 0x7da   :  { %v6501_v5 = vpop.f32.mrb[57].mxu1  ;;  %v6780_v27 = vsel %vm6554_vm6, %v6499_v43, 0.0 }
 0x7db   :  { %v6866_v49 = vmul.f32 0.0625, %v6770_v55  ;;  %v6776_v56 = vrot.slane %v6775_v30, 2  ;;  %v6502_v44 = vpop.f32.mrb[58].mxu1 }
 0x7dc   :  { %v6781_v25 = vsel %vm6554_vm6, %v6502_v44, 0.0  ;;  %v6504_v59 = vpop.f32.mrb[59].mxu1 }
 0x7dd   :  { %v6905_v14 = vadd.f32 %v13075_v20, %v6866_v49  ;;  %v6782_v32 = vadd.f32 %v6781_v25, %v6780_v27  ;;  %v6777_v11 = vadd.f32 %v6776_v56, %v6775_v30 }
 0x7df   :  { %v6993_v22 = vrot.slane %v6905_v14, 1  ;;  %v6783_v54 = vrot.slane %v6782_v32, 4  ;;  %v6778_v10 = vrot.slane %v6777_v11, 1 }
 0x7e1   :  { %v6994_v35 = vsel %vm6965_vm4, %v6993_v22, %v6992_v23  ;;  %v6784_v61 = vadd.f32 %v6783_v54, %v6782_v32  ;;  %v6507_v36 = vpop.f32.mrb[60].mxu1  ;;  %v6779_v58 = vadd.f32 %v6778_v10, %v6777_v11 }
 0x7e2   :  { %7015 = vst.msk [vmem:[%s13229_s9 + $0x10] sm:$0xff] %vm6554_vm6, %v6994_v35  ;;  %v6509_v28 = vpop.f32.mrb[61].mxu1  ;;  %v6789_v41 = vsel %vm6554_vm6, %v6507_v36, 0.0 }
 0x7e3   :  { %v6785_v29 = vrot.slane %v6784_v61, 2  ;;  %v6510_v46 = vpop.f32.mrb[62].mxu1  ;;  %v6867_v63 = vmul.f32 0.0625, %v6779_v58 }
 0x7e4   :  { %v6790_v31 = vsel %vm6554_vm6, %v6510_v46, 0.0  ;;  %v6512_v7 = vpop.f32.mrb[63].mxu1 }
 0x7e5   :  { %v6786_v19 = vadd.f32 %v6785_v29, %v6784_v61  ;;  %v6791_v62 = vadd.f32 %v6790_v31, %v6789_v41  ;;  %v6906_v39 = vadd.f32 %v13075_v20, %v6867_v63 }
 0x7e7   :  { %v6787_v2 = vrot.slane %v6786_v19, 1  ;;  %v6792_v0 = vrot.slane %v6791_v62, 4 }
 0x7e9   :  { %v6788_v45 = vadd.f32 %v6787_v2, %v6786_v19  ;;  %v6793_v52 = vadd.f32 %v6792_v0, %v6791_v62  ;;  %v6515_v26 = vpop.f32.mrb[64].mxu1 }
 0x7ea   :  { %v6517_v1 = vpop.f32.mrb[65].mxu1  ;;  %v6798_v33 = vsel %vm6554_vm6, %v6515_v26, 0.0 }
 0x7eb   :  { %v6868_v12 = vmul.f32 0.0625, %v6788_v45  ;;  %v6794_v4 = vrot.slane %v6793_v52, 2  ;;  %v6518_v18 = vpop.f32.mrb[66].mxu1 }
 0x7ec   :  { %v6799_v17 = vsel %vm6554_vm6, %v6518_v18, 0.0  ;;  %v6520_v21 = vpop.f32.mrb[67].mxu1 }
 0x7ed   :  { %v6907_v42 = vadd.f32 %v13075_v20, %v6868_v12  ;;  %v6795_v38 = vadd.f32 %v6794_v4, %v6793_v52  ;;  %v6800_v53 = vadd.f32 %v6799_v17, %v6798_v33 }
 0x7ef   :  { %v6995_v57 = vrot.slane %v6907_v42, 7  ;;  %v6796_v3 = vrot.slane %v6795_v38, 1  ;;  %v6801_v51 = vrot.slane %v6800_v53, 4 }
 0x7f1   :  { %v6996_v40 = vsel %vm6947_vm7, %v6995_v57, %v6906_v39  ;;  %v6797_v13 = vadd.f32 %v6796_v3, %v6795_v38  ;;  %v6802_v47 = vadd.f32 %v6801_v51, %v6800_v53  ;;  %v6523_v6 = vpop.f32.mrb[68].mxu1  ;;  %v7938_v3 = vld [vmem:[%s13228_s8] ss:$0 sm:$0xff] }
 0x7f2   :  { %v6525_v24 = vpop.f32.mrb[69].mxu1  ;;  %v6807_v9 = vsel %vm6554_vm6, %v6523_v6, 0.0 }
 0x7f3   :  { %v6869_v50 = vmul.f32 0.0625, %v6797_v13  ;;  %v6803_v34 = vrot.slane %v6802_v47, 2  ;;  %v6526_v15 = vpop.f32.mrb[70].mxu1 }
 0x7f4   :  { %v6808_v60 = vsel %vm6554_vm6, %v6526_v15, 0.0  ;;  %v6528_v8 = vpop.f32.mrb[71].mxu1 }
 0x7f5   :  { %v6908_v16 = vadd.f32 %v13075_v20, %v6869_v50  ;;  %v6804_v37 = vadd.f32 %v6803_v34, %v6802_v47  ;;  %v6809_v48 = vadd.f32 %v6808_v60, %v6807_v9 }
 0x7f7   :  { %v6997_v23 = vrot.slane %v6908_v16, 6  ;;  %v6805_v55 = vrot.slane %v6804_v37, 1  ;;  %v6810_v30 = vrot.slane %v6809_v48, 4 }
 0x7f9   :  { %v6998_v43 = vsel %vm6950_vm9, %v6997_v23, %v6996_v40  ;;  %v6806_v5 = vadd.f32 %v6805_v55, %v6804_v37  ;;  %v6811_v49 = vadd.f32 %v6810_v30, %v6809_v48  ;;  %v6531_v56 = vpop.f32.mrb[72].mxu1 }
 0x7fa   :  { %v6533_v25 = vpop.f32.mrb[73].mxu1  ;;  %v6816_v22 = vsel %vm6554_vm6, %v6531_v56, 0.0 }
 0x7fb   :  { %v6870_v44 = vmul.f32 0.0625, %v6806_v5  ;;  %v6812_v27 = vrot.slane %v6811_v49, 2  ;;  %v6534_v59 = vpop.f32.mrb[74].mxu1 }
 0x7fc   :  { %v6817_v11 = vsel %vm6554_vm6, %v6534_v59, 0.0  ;;  %v6536_v54 = vpop.f32.mrb[75].mxu1 }
 0x7fd   :  { %v6909_v14 = vadd.f32 %v13075_v20, %v6870_v44  ;;  %v6813_v32 = vadd.f32 %v6812_v27, %v6811_v49  ;;  %v6818_v35 = vadd.f32 %v6817_v11, %v6816_v22 }
 0x7ff   :  { %v6999_v61 = vrot.slane %v6909_v14, 5  ;;  %v6814_v36 = vrot.slane %v6813_v32, 1  ;;  %v6819_v28 = vrot.slane %v6818_v35, 4 }
 0x801   :  { %v7000_v10 = vsel %vm6953_vm5, %v6999_v61, %v6998_v43  ;;  %v6815_v29 = vadd.f32 %v6814_v36, %v6813_v32  ;;  %v6820_v46 = vadd.f32 %v6819_v28, %v6818_v35 }
 0x802   :  { %v6539_v41 = vpop.f32.mrb[76].mxu1 }
 0x803   :  { %v6871_v31 = vmul.f32 0.0625, %v6815_v29  ;;  %v6541_v7 = vpop.f32.mrb[77].mxu1  ;;  %v6821_v19 = vrot.slane %v6820_v46, 2  ;;  %v6825_v2 = vsel %vm6554_vm6, %v6539_v41, 0.0 }
 0x804   :  { %v6542_v62 = vpop.f32.mrb[78].mxu1 }
 0x805   :  { %v6910_v58 = vadd.f32 %v13075_v20, %v6871_v31  ;;  %v6826_v0 = vsel %vm6554_vm6, %v6542_v62, 0.0  ;;  %v6544_v45 = vpop.f32.mrb[79].mxu1  ;;  %v6822_v52 = vadd.f32 %v6821_v19, %v6820_v46 }
 0x806   :  { %v6827_v26 = vadd.f32 %v6826_v0, %v6825_v2 }
 0x807   :  { %v7001_v1 = vrot.slane %v6910_v58, 4  ;;  %v6823_v63 = vrot.slane %v6822_v52, 1 }
 0x808   :  { %v6828_v12 = vrot.slane %v6827_v26, 4 }
 0x809   :  { %v7002_v4 = vsel %vm6956_vm10, %v7001_v1, %v7000_v10  ;;  %v6824_v18 = vadd.f32 %v6823_v63, %v6822_v52 }
 0x80a   :  { %v6829_v33 = vadd.f32 %v6828_v12, %v6827_v26  ;;  %v6547_v17 = vpop.f32.mrb[80].mxu1 }
 0x80b   :  { %v6549_v21 = vpop.f32.mrb[81].mxu1  ;;  %v6872_v42 = vmul.f32 0.0625, %v6824_v18  ;;  %v6834_v20 = vsel %vm6554_vm6, %v6547_v17, 0.0 }
 0x80c   :  { %v6830_v38 = vrot.slane %v6829_v33, 2  ;;  %v6550_v53 = vpop.f32.mrb[82].mxu1 }
 0x80d   :  { %v6835_v39 = vsel %vm6554_vm6, %v6550_v53, 0.0  ;;  %v6552_v57 = vpop.f32.mrb[83].mxu1  ;;  %v6911_v51 = vadd.f32 %v7938_v3, %v6872_v42 }
 0x80e   :  { %v6831_v40 = vadd.f32 %v6830_v38, %v6829_v33  ;;  %v6836_v13 = vadd.f32 %v6835_v39, %v6834_v20 }
 0x80f   :  { %v7003_v47 = vrot.slane %v6911_v51, 3 }
 0x810   :  { %v6832_v6 = vrot.slane %v6831_v40, 1  ;;  %v6837_v24 = vrot.slane %v6836_v13, 4 }
 0x811   :  { %v7004_v50 = vsel %vm6959_vm0, %v7003_v47, %v7002_v4 }
 0x812   :  { %v6833_v34 = vadd.f32 %v6832_v6, %v6831_v40  ;;  %v6838_v15 = vadd.f32 %v6837_v24, %v6836_v13 }
 0x814   :  { %v6873_v9 = vmul.f32 0.0625, %v6833_v34  ;;  %v6839_v60 = vrot.slane %v6838_v15, 2 }
 0x816   :  { %v6912_v8 = vadd.f32 %v7938_v3, %v6873_v9  ;;  %v6840_v16 = vadd.f32 %v6839_v60, %v6838_v15 }
 0x818   :  { %v7005_v37 = vrot.slane %v6912_v8, 2  ;;  %v6841_v48 = vrot.slane %v6840_v16, 1 }
 0x81a   :  { %v7006_v23 = vsel %vm6962_vm1, %v7005_v37, %v7004_v50  ;;  %v6842_v55 = vadd.f32 %v6841_v48, %v6840_v16 }
 0x81c   :  { %v6874_v30 = vmul.f32 0.0625, %v6842_v55 }
 0x81e   :  { %v6913_v43 = vadd.f32 %v7938_v3, %v6874_v30 }
 0x820   :  { %v7007_v5 = vrot.slane %v6913_v43, 1 }
 0x822   :  { %v7008_v49 = vsel %vm6965_vm4, %v7007_v5, %v7006_v23 }
 0x823   :  { %7016 = vst.msk [vmem:[%s13229_s9 + $0x18] sm:$0xff] %vm6554_vm6, %v7008_v49 }

</bundles_post_ra>
